<compile_context>
chip_gen: v7x
topology: tpu7x:2x2x1
jax: 0.10.0
libtpu: 0.0.40
codegen_flags: <defaults>
</compile_context>

<pallas_src>
import functools
import numpy as np
import jax
import jax.numpy as jnp
from jax import lax
from jax.experimental import pallas as pl
from jax.experimental.pallas import tpu as pltpu


def _pair(v):
    return (v, v) if isinstance(v, int) else (int(v[0]), int(v[1]))


# ----------------------------------------------------------------------------
# Single fused Pallas kernel: the entire Block8 on one (H*W, C) image tile
# ----------------------------------------------------------------------------
def _block8_kernel(x_ref, w_in_ref, b_in_ref, w13_ref, b13_ref, w31_ref, b31_ref,
                   wo0_ref, wo1_ref, bo_ref, o_ref, *, H, W, scale, relu):
    HW = H * W
    x_f32 = x_ref[0]                                   # (HW, 2080) f32 residual path
    x_bf = x_f32.astype(jnp.bfloat16)                  # bf16 matmul operand

    # ---- fused branch0 1x1 + branch1[0] 1x1 : one (2080 -> 384) matmul ----------
    y = jnp.dot(x_bf, w_in_ref[...], preferred_element_type=jnp.float32)
    y = jnp.maximum(y + b_in_ref[...], 0.0)            # (HW, 384) f32, VMEM resident
    x0 = y[:, :192].astype(jnp.bfloat16)                # branch0 output
    z = y[:, 192:]                                       # branch1 stage-0 output (f32)

    # pixel row/col indices (one grid block == one image, rows ordered (h, w))
    def _hw_idx(shape):
        r = lax.broadcasted_iota(jnp.int32, shape, 0)
        if (W & (W - 1)) == 0:                           # power-of-two fast path (bit ops)
            return r >> int(np.log2(W)), r & (W - 1)
        return r // W, r % W

    # ---- branch1 (1,3) conv, pad (0,1): tap-summed matmuls on shifted views -----
    _, w_i = _hw_idx(z.shape)
    z_l = jnp.where(w_i >= 1, pltpu.roll(z, shift=1, axis=0), 0.0)           # z[r-1]
    z_r = jnp.where(w_i <= W - 2, pltpu.roll(z, shift=HW - 1, axis=0), 0.0)  # z[r+1]
    t = (jnp.dot(z_l.astype(jnp.bfloat16), w13_ref[0], preferred_element_type=jnp.float32)
         + jnp.dot(z.astype(jnp.bfloat16), w13_ref[1], preferred_element_type=jnp.float32)
         + jnp.dot(z_r.astype(jnp.bfloat16), w13_ref[2], preferred_element_type=jnp.float32))
    t = jnp.maximum(t + b13_ref[...], 0.0)               # (HW, 256) f32 (224 padded to 256)

    # ---- branch1 (3,1) conv, pad (1,0) -------------------------------------------
    h_i, _ = _hw_idx(t.shape)
    t_u = jnp.where(h_i >= 1, pltpu.roll(t, shift=W, axis=0), 0.0)           # t[r-W]
    t_d = jnp.where(h_i <= H - 2, pltpu.roll(t, shift=HW - W, axis=0), 0.0)  # t[r+W]
    u = (jnp.dot(t_u.astype(jnp.bfloat16), w31_ref[0], preferred_element_type=jnp.float32)
         + jnp.dot(t.astype(jnp.bfloat16), w31_ref[1], preferred_element_type=jnp.float32)
         + jnp.dot(t_d.astype(jnp.bfloat16), w31_ref[2], preferred_element_type=jnp.float32))
    u = jnp.maximum(u + b31_ref[...], 0.0).astype(jnp.bfloat16)              # (HW, 256)

    # ---- final 1x1 conv 448->2080 as two accumulating dots (no concat) -----------
    out = (jnp.dot(x0, wo0_ref[...], preferred_element_type=jnp.float32)
           + jnp.dot(u, wo1_ref[...], preferred_element_type=jnp.float32)
           + bo_ref[...])
    out = out * scale + x_f32                            # residual kept in f32
    if relu:
        out = jnp.maximum(out, 0.0)
    o_ref[0] = out.astype(o_ref.dtype)


# ----------------------------------------------------------------------------
# Parameters (synthetic, deterministic) + one-time BN folding / branch fusion
# ----------------------------------------------------------------------------
class KeyGen:
    def __init__(self, seed=0):
        self.base = jax.random.PRNGKey(seed)
        self.i = 0

    def __call__(self):
        self.i += 1
        return jax.random.fold_in(self.base, self.i)


def _bn_p(kg, n):
    return {'gamma': 1.0 + 0.1 * jax.random.normal(kg(), (n,), jnp.float32),
            'beta': 0.05 * jax.random.normal(kg(), (n,), jnp.float32),
            'mean': 0.05 * jax.random.normal(kg(), (n,), jnp.float32),
            'var': 1.0 + 0.1 * jnp.abs(jax.random.normal(kg(), (n,), jnp.float32))}


def _bconv_p(kg, cin, cout, k):
    kh, kw = _pair(k)
    w = jax.random.normal(kg(), (kh, kw, cin, cout), jnp.float32) * np.sqrt(2.0 / (cin * kh * kw))
    d = {'w': w}
    d.update(_bn_p(kg, cout))
    return d


def build_block8_params(seed=0):
    kg = KeyGen(seed)
    return {
        'b0':   _bconv_p(kg, 2080, 192, 1),
        'b1_0': _bconv_p(kg, 2080, 192, 1),
        'b1_1': _bconv_p(kg, 192, 224, (1, 3)),
        'b1_2': _bconv_p(kg, 224, 256, (3, 1)),
        'conv': {'w': jax.random.normal(kg(), (1, 1, 448, 2080), jnp.float32) * np.sqrt(1.0 / 448),
                 'b': 0.05 * jax.random.normal(kg(), (2080,), jnp.float32)},
    }


def _fold_bn(p, eps=1e-3):
    """Conv(no bias)+BN(eval) -> scaled HWIO weight + bias vector."""
    s = p['gamma'] / jnp.sqrt(p['var'] + eps)
    return p['w'] * s, p['beta'] - p['mean'] * s


def prepare_block8(p):
    """One-time weight prep: fold BN, fuse 1x1 branches, pad 224->256, split w_out, cast bf16."""
    w0, b0 = _fold_bn(p['b0'])         # (1,1,2080,192)
    w10, b10 = _fold_bn(p['b1_0'])     # (1,1,2080,192)
    w11, b11 = _fold_bn(p['b1_1'])     # (1,3,192,224)
    w12, b12 = _fold_bn(p['b1_2'])     # (3,1,224,256)

    w_in = jnp.concatenate([w0.reshape(2080, 192), w10.reshape(2080, 192)], axis=1)
    b_in = jnp.concatenate([b0, b10]).reshape(1, 384)

    # (1,3) conv taps with output channels zero-padded 224 -> 256 (lane-dense tiles);
    # matching zero input rows inserted into the (3,1) conv taps -> identical math.
    w13 = jnp.pad(w11[0], ((0, 0), (0, 0), (0, 32)))        # (3, 192, 256)
    b13 = jnp.pad(b11, (0, 32)).reshape(1, 256)
    w31 = jnp.pad(w12[:, 0], ((0, 0), (0, 32), (0, 0)))     # (3, 256, 256)
    b31 = b12.reshape(1, 256)

    w_out = p['conv']['w'].reshape(448, 2080)
    return {
        'w_in': w_in.astype(jnp.bfloat16), 'b_in': b_in.astype(jnp.float32),
        'w13': w13.astype(jnp.bfloat16), 'b13': b13.astype(jnp.float32),
        'w31': w31.astype(jnp.bfloat16), 'b31': b31.astype(jnp.float32),
        'wo0': w_out[:192].astype(jnp.bfloat16),             # multiplies branch0 (192)
        'wo1': w_out[192:].astype(jnp.bfloat16),             # multiplies branch1 (256)
        'bo': p['conv']['b'].reshape(1, 2080).astype(jnp.float32),
    }


# ----------------------------------------------------------------------------
# Block8 forward: one pallas_call, grid over batch images
# ----------------------------------------------------------------------------
def block8_forward(prep, x_nchw, *, scale=1.0, noReLU=False):
    B, C, H, W = x_nchw.shape
    HW = H * W
    # TODO(synk): NCHW<->NHWC permutes stay in plain XLA here; in a full
    # InceptionResNetV2 stack activations would be kept NHWC end-to-end.
    x = jnp.transpose(x_nchw, (0, 2, 3, 1)).reshape(B, HW, C).astype(jnp.float32)

    kern = functools.partial(_block8_kernel, H=H, W=W,
                             scale=float(scale), relu=not noReLU)

    in_specs = [
        pl.BlockSpec((1, HW, C), lambda b: (b, 0, 0)),        # x (f32)
        pl.BlockSpec((C, 384), lambda b: (0, 0)),             # fused 1x1 weights
        pl.BlockSpec((1, 384), lambda b: (0, 0)),
        pl.BlockSpec((3, 192, 256), lambda b: (0, 0, 0)),     # (1,3) conv taps
        pl.BlockSpec((1, 256), lambda b: (0, 0)),
        pl.BlockSpec((3, 256, 256), lambda b: (0, 0, 0)),     # (3,1) conv taps
        pl.BlockSpec((1, 256), lambda b: (0, 0)),
        pl.BlockSpec((192, 2080), lambda b: (0, 0)),          # w_out (branch0 half)
        pl.BlockSpec((256, 2080), lambda b: (0, 0)),          # w_out (branch1 half)
        pl.BlockSpec((1, 2080), lambda b: (0, 0)),
    ]
    out_spec = pl.BlockSpec((1, HW, 2080), lambda b: (b, 0, 0))

    flops = 2 * B * HW * (C * 384 + 3 * 192 * 256 + 3 * 256 * 256
                          + 192 * 2080 + 256 * 2080)
    weight_bytes = sum(int(np.prod(v.shape)) * v.dtype.itemsize for v in prep.values())
    bytes_accessed = int(x.size * 4 + B * HW * 2080 * 4 + weight_bytes)

    out = pl.pallas_call(
        kern,
        out_shape=jax.ShapeDtypeStruct((B, HW, 2080), jnp.float32),
        grid_spec=pltpu.PrefetchScalarGridSpec(
            num_scalar_prefetch=0, grid=(B,),
            in_specs=in_specs, out_specs=out_spec),
        compiler_params=pltpu.CompilerParams(
            dimension_semantics=("parallel",),
            vmem_limit_bytes=32 * 1024 * 1024),
        cost_estimate=pl.CostEstimate(flops=flops, transcendentals=0,
                                      bytes_accessed=bytes_accessed),
    )(x, prep['w_in'], prep['b_in'], prep['w13'], prep['b13'],
      prep['w31'], prep['b31'], prep['wo0'], prep['wo1'], prep['bo'])

    return jnp.transpose(out.reshape(B, H, W, 2080), (0, 3, 1, 2))   # back to NCHW


# ----------------------------------------------------------------------------
# Pure-JAX f32 reference (for numerical sanity check)
# ----------------------------------------------------------------------------
def _basic_conv_ref(x, p, padding=0, eps=1e-3):
    ph, pw = _pair(padding)
    y = lax.conv_general_dilated(x, p['w'], (1, 1), ((ph, ph), (pw, pw)),
                                 dimension_numbers=('NHWC', 'HWIO', 'NHWC'))
    s = p['gamma'] / jnp.sqrt(p['var'] + eps)
    return jnp.maximum(y * s + (p['beta'] - p['mean'] * s), 0.0)


def block8_reference(p, x_nchw, *, scale=1.0, noReLU=False):
    x = jnp.transpose(x_nchw, (0, 2, 3, 1)).astype(jnp.float32)
    x0 = _basic_conv_ref(x, p['b0'])
    x1 = _basic_conv_ref(x, p['b1_0'])
    x1 = _basic_conv_ref(x1, p['b1_1'], padding=(0, 1))
    x1 = _basic_conv_ref(x1, p['b1_2'], padding=(1, 0))
    cat = jnp.concatenate([x0, x1], axis=-1)
    out = lax.conv_general_dilated(cat, p['conv']['w'], (1, 1), 'VALID',
                                   dimension_numbers=('NHWC', 'HWIO', 'NHWC'))
    out = (out + p['conv']['b']) * scale + x
    if not noReLU:
        out = jnp.maximum(out, 0.0)
    return jnp.transpose(out, (0, 3, 1, 2))


if __name__ == "__main__":
    # Block8 lives on the 8x8 feature map of InceptionResNetV2; channels fixed at 2080.
    key = jax.random.PRNGKey(0)
    x = jax.random.uniform(key, (2, 2080, 8, 8), dtype=jnp.float32)   # NCHW input
    params = build_block8_params(seed=0)
    prep = prepare_block8(params)

    fwd = jax.jit(functools.partial(block8_forward, scale=1.0, noReLU=False))
    out = jax.block_until_ready(fwd(prep, x))

    assert out.shape == (2, 2080, 8, 8), out.shape
    assert bool(jnp.all(jnp.isfinite(out)))

    ref = jax.block_until_ready(block8_reference(params, x, scale=1.0, noReLU=False))
    err = float(jnp.max(jnp.abs(out - ref)) / (jnp.max(jnp.abs(ref)) + 1e-6))
    assert err < 0.08, f"bf16 vs f32 reference mismatch: rel-to-max err = {err:.4f}"

    print("KERNEL_OK")
</pallas_src>

<mosaic_0001>
module attributes {stable_mosaic.version = 11 : i64} {
  func.func @_block8_kernel(%arg0: i32, %arg1: memref<1x64x2080xf32, #tpu.memory_space<vmem>>, %arg2: memref<2080x384xbf16, #tpu.memory_space<vmem>>, %arg3: memref<1x384xf32, #tpu.memory_space<vmem>>, %arg4: memref<3x192x256xbf16, #tpu.memory_space<vmem>>, %arg5: memref<1x256xf32, #tpu.memory_space<vmem>>, %arg6: memref<3x256x256xbf16, #tpu.memory_space<vmem>>, %arg7: memref<1x256xf32, #tpu.memory_space<vmem>>, %arg8: memref<192x2080xbf16, #tpu.memory_space<vmem>>, %arg9: memref<256x2080xbf16, #tpu.memory_space<vmem>>, %arg10: memref<1x2080xf32, #tpu.memory_space<vmem>>, %arg11: memref<1x64x2080xf32, #tpu.memory_space<vmem>>) attributes {dimension_semantics = [#tpu.dimension_semantics<parallel>], iteration_bounds = array<i64: 2>, scalar_prefetch = 0 : i64, scratch_operands = 0 : i64, tpu.core_type = #tpu.core_type<tc>, window_params = [{transform_indices = @transform_0, window_bounds = array<i64: 1, 64, 2080>}, {pipeline_mode = #tpu.pipeline_mode<synchronous>, transform_indices = @transform_1, window_bounds = array<i64: 2080, 384>}, {pipeline_mode = #tpu.pipeline_mode<synchronous>, transform_indices = @transform_2, window_bounds = array<i64: 1, 384>}, {pipeline_mode = #tpu.pipeline_mode<synchronous>, transform_indices = @transform_3, window_bounds = array<i64: 3, 192, 256>}, {pipeline_mode = #tpu.pipeline_mode<synchronous>, transform_indices = @transform_4, window_bounds = array<i64: 1, 256>}, {pipeline_mode = #tpu.pipeline_mode<synchronous>, transform_indices = @transform_5, window_bounds = array<i64: 3, 256, 256>}, {pipeline_mode = #tpu.pipeline_mode<synchronous>, transform_indices = @transform_6, window_bounds = array<i64: 1, 256>}, {pipeline_mode = #tpu.pipeline_mode<synchronous>, transform_indices = @transform_7, window_bounds = array<i64: 192, 2080>}, {pipeline_mode = #tpu.pipeline_mode<synchronous>, transform_indices = @transform_8, window_bounds = array<i64: 256, 2080>}, {pipeline_mode = #tpu.pipeline_mode<synchronous>, transform_indices = @transform_9, window_bounds = array<i64: 1, 2080>}, {transform_indices = @transform_10, window_bounds = array<i64: 1, 64, 2080>}]} {
    %c0 = arith.constant 0 : index
    %c0_0 = arith.constant 0 : index
    %c0_1 = arith.constant 0 : index
    %0 = vector.load %arg1[%c0, %c0_0, %c0_1] : memref<1x64x2080xf32, #tpu.memory_space<vmem>>, vector<1x64x2080xf32>
    %1 = vector.shape_cast %0 : vector<1x64x2080xf32> to vector<64x2080xf32>
    %2 = arith.truncf %1 : vector<64x2080xf32> to vector<64x2080xbf16>
    %c0_2 = arith.constant 0 : index
    %c0_3 = arith.constant 0 : index
    %3 = vector.load %arg2[%c0_2, %c0_3] : memref<2080x384xbf16, #tpu.memory_space<vmem>>, vector<2080x384xbf16>
    %cst = arith.constant dense<0.000000e+00> : vector<64x384xf32>
    %4 = tpu.matmul %2, %3, %cst {dimension_numbers = #tpu.dot_dimension_numbers<[1], [0], [0], [1], [0, 0, 1, 1], [], []>} : vector<64x2080xbf16>, vector<2080x384xbf16>, vector<64x384xf32> -> vector<64x384xf32>
    %c0_4 = arith.constant 0 : index
    %c0_5 = arith.constant 0 : index
    %5 = vector.load %arg3[%c0_4, %c0_5] : memref<1x384xf32, #tpu.memory_space<vmem>>, vector<1x384xf32>
    %6 = vector.broadcast %5 : vector<1x384xf32> to vector<64x384xf32>
    %7 = arith.addf %4, %6 : vector<64x384xf32>
    %cst_6 = arith.constant 0.000000e+00 : f32
    %8 = vector.broadcast %cst_6 : f32 to vector<64x384xf32>
    %9 = arith.maximumf %7, %8 : vector<64x384xf32>
    %10 = vector.extract_strided_slice %9 {offsets = [0, 0], sizes = [64, 192], strides = [1, 1]} : vector<64x384xf32> to vector<64x192xf32>
    %11 = arith.truncf %10 : vector<64x192xf32> to vector<64x192xbf16>
    %12 = vector.extract_strided_slice %9 {offsets = [0, 192], sizes = [64, 192], strides = [1, 1]} : vector<64x384xf32> to vector<64x192xf32>
    %13 = tpu.iota {dimensions = array<i32: 0>} : vector<64x192xi32>
    %c7_i32 = arith.constant 7 : i32
    %14 = vector.broadcast %c7_i32 : i32 to vector<64x192xi32>
    %15 = arith.andi %13, %14 : vector<64x192xi32>
    %c1_i32 = arith.constant 1 : i32
    %16 = vector.broadcast %c1_i32 : i32 to vector<64x192xi32>
    %17 = arith.cmpi sge, %15, %16 : vector<64x192xi32>
    %c1_i32_7 = arith.constant 1 : i32
    %18 = tpu.dynamic_rotate %12 by %c1_i32_7 dim 0 : vector<64x192xf32>, i32 -> vector<64x192xf32>
    %cst_8 = arith.constant 0.000000e+00 : f32
    %19 = vector.broadcast %cst_8 : f32 to vector<64x192xf32>
    %20 = arith.select %17, %18, %19 : vector<64x192xi1>, vector<64x192xf32>
    %c6_i32 = arith.constant 6 : i32
    %21 = vector.broadcast %c6_i32 : i32 to vector<64x192xi32>
    %22 = arith.cmpi sle, %15, %21 : vector<64x192xi32>
    %c63_i32 = arith.constant 63 : i32
    %23 = tpu.dynamic_rotate %12 by %c63_i32 dim 0 : vector<64x192xf32>, i32 -> vector<64x192xf32>
    %cst_9 = arith.constant 0.000000e+00 : f32
    %24 = vector.broadcast %cst_9 : f32 to vector<64x192xf32>
    %25 = arith.select %22, %23, %24 : vector<64x192xi1>, vector<64x192xf32>
    %26 = arith.truncf %20 : vector<64x192xf32> to vector<64x192xbf16>
    %c0_10 = arith.constant 0 : index
    %c0_11 = arith.constant 0 : index
    %c0_12 = arith.constant 0 : index
    %27 = vector.load %arg4[%c0_10, %c0_11, %c0_12] : memref<3x192x256xbf16, #tpu.memory_space<vmem>>, vector<1x192x256xbf16>
    %28 = vector.shape_cast %27 : vector<1x192x256xbf16> to vector<192x256xbf16>
    %cst_13 = arith.constant dense<0.000000e+00> : vector<64x256xf32>
    %29 = tpu.matmul %26, %28, %cst_13 {dimension_numbers = #tpu.dot_dimension_numbers<[1], [0], [0], [1], [0, 0, 1, 1], [], []>} : vector<64x192xbf16>, vector<192x256xbf16>, vector<64x256xf32> -> vector<64x256xf32>
    %30 = arith.truncf %12 : vector<64x192xf32> to vector<64x192xbf16>
    %c1 = arith.constant 1 : index
    %c0_14 = arith.constant 0 : index
    %c0_15 = arith.constant 0 : index
    %31 = vector.load %arg4[%c1, %c0_14, %c0_15] : memref<3x192x256xbf16, #tpu.memory_space<vmem>>, vector<1x192x256xbf16>
    %32 = vector.shape_cast %31 : vector<1x192x256xbf16> to vector<192x256xbf16>
    %cst_16 = arith.constant dense<0.000000e+00> : vector<64x256xf32>
    %33 = tpu.matmul %30, %32, %cst_16 {dimension_numbers = #tpu.dot_dimension_numbers<[1], [0], [0], [1], [0, 0, 1, 1], [], []>} : vector<64x192xbf16>, vector<192x256xbf16>, vector<64x256xf32> -> vector<64x256xf32>
    %34 = arith.addf %29, %33 : vector<64x256xf32>
    %35 = arith.truncf %25 : vector<64x192xf32> to vector<64x192xbf16>
    %c2 = arith.constant 2 : index
    %c0_17 = arith.constant 0 : index
    %c0_18 = arith.constant 0 : index
    %36 = vector.load %arg4[%c2, %c0_17, %c0_18] : memref<3x192x256xbf16, #tpu.memory_space<vmem>>, vector<1x192x256xbf16>
    %37 = vector.shape_cast %36 : vector<1x192x256xbf16> to vector<192x256xbf16>
    %cst_19 = arith.constant dense<0.000000e+00> : vector<64x256xf32>
    %38 = tpu.matmul %35, %37, %cst_19 {dimension_numbers = #tpu.dot_dimension_numbers<[1], [0], [0], [1], [0, 0, 1, 1], [], []>} : vector<64x192xbf16>, vector<192x256xbf16>, vector<64x256xf32> -> vector<64x256xf32>
    %39 = arith.addf %34, %38 : vector<64x256xf32>
    %c0_20 = arith.constant 0 : index
    %c0_21 = arith.constant 0 : index
    %40 = vector.load %arg5[%c0_20, %c0_21] : memref<1x256xf32, #tpu.memory_space<vmem>>, vector<1x256xf32>
    %41 = vector.broadcast %40 : vector<1x256xf32> to vector<64x256xf32>
    %42 = arith.addf %39, %41 : vector<64x256xf32>
    %cst_22 = arith.constant 0.000000e+00 : f32
    %43 = vector.broadcast %cst_22 : f32 to vector<64x256xf32>
    %44 = arith.maximumf %42, %43 : vector<64x256xf32>
    %45 = tpu.iota {dimensions = array<i32: 0>} : vector<64x256xi32>
    %c3_i32 = arith.constant 3 : i32
    %46 = vector.broadcast %c3_i32 : i32 to vector<64x256xi32>
    %47 = arith.shrsi %45, %46 : vector<64x256xi32>
    %c1_i32_23 = arith.constant 1 : i32
    %48 = vector.broadcast %c1_i32_23 : i32 to vector<64x256xi32>
    %49 = arith.cmpi sge, %47, %48 : vector<64x256xi32>
    %c8_i32 = arith.constant 8 : i32
    %50 = tpu.dynamic_rotate %44 by %c8_i32 dim 0 : vector<64x256xf32>, i32 -> vector<64x256xf32>
    %cst_24 = arith.constant 0.000000e+00 : f32
    %51 = vector.broadcast %cst_24 : f32 to vector<64x256xf32>
    %52 = arith.select %49, %50, %51 : vector<64x256xi1>, vector<64x256xf32>
    %c6_i32_25 = arith.constant 6 : i32
    %53 = vector.broadcast %c6_i32_25 : i32 to vector<64x256xi32>
    %54 = arith.cmpi sle, %47, %53 : vector<64x256xi32>
    %c56_i32 = arith.constant 56 : i32
    %55 = tpu.dynamic_rotate %44 by %c56_i32 dim 0 : vector<64x256xf32>, i32 -> vector<64x256xf32>
    %cst_26 = arith.constant 0.000000e+00 : f32
    %56 = vector.broadcast %cst_26 : f32 to vector<64x256xf32>
    %57 = arith.select %54, %55, %56 : vector<64x256xi1>, vector<64x256xf32>
    %58 = arith.truncf %52 : vector<64x256xf32> to vector<64x256xbf16>
    %c0_27 = arith.constant 0 : index
    %c0_28 = arith.constant 0 : index
    %c0_29 = arith.constant 0 : index
    %59 = vector.load %arg6[%c0_27, %c0_28, %c0_29] : memref<3x256x256xbf16, #tpu.memory_space<vmem>>, vector<1x256x256xbf16>
    %60 = vector.shape_cast %59 : vector<1x256x256xbf16> to vector<256x256xbf16>
    %cst_30 = arith.constant dense<0.000000e+00> : vector<64x256xf32>
    %61 = tpu.matmul %58, %60, %cst_30 {dimension_numbers = #tpu.dot_dimension_numbers<[1], [0], [0], [1], [0, 0, 1, 1], [], []>} : vector<64x256xbf16>, vector<256x256xbf16>, vector<64x256xf32> -> vector<64x256xf32>
    %62 = arith.truncf %44 : vector<64x256xf32> to vector<64x256xbf16>
    %c1_31 = arith.constant 1 : index
    %c0_32 = arith.constant 0 : index
    %c0_33 = arith.constant 0 : index
    %63 = vector.load %arg6[%c1_31, %c0_32, %c0_33] : memref<3x256x256xbf16, #tpu.memory_space<vmem>>, vector<1x256x256xbf16>
    %64 = vector.shape_cast %63 : vector<1x256x256xbf16> to vector<256x256xbf16>
    %cst_34 = arith.constant dense<0.000000e+00> : vector<64x256xf32>
    %65 = tpu.matmul %62, %64, %cst_34 {dimension_numbers = #tpu.dot_dimension_numbers<[1], [0], [0], [1], [0, 0, 1, 1], [], []>} : vector<64x256xbf16>, vector<256x256xbf16>, vector<64x256xf32> -> vector<64x256xf32>
    %66 = arith.addf %61, %65 : vector<64x256xf32>
    %67 = arith.truncf %57 : vector<64x256xf32> to vector<64x256xbf16>
    %c2_35 = arith.constant 2 : index
    %c0_36 = arith.constant 0 : index
    %c0_37 = arith.constant 0 : index
    %68 = vector.load %arg6[%c2_35, %c0_36, %c0_37] : memref<3x256x256xbf16, #tpu.memory_space<vmem>>, vector<1x256x256xbf16>
    %69 = vector.shape_cast %68 : vector<1x256x256xbf16> to vector<256x256xbf16>
    %cst_38 = arith.constant dense<0.000000e+00> : vector<64x256xf32>
    %70 = tpu.matmul %67, %69, %cst_38 {dimension_numbers = #tpu.dot_dimension_numbers<[1], [0], [0], [1], [0, 0, 1, 1], [], []>} : vector<64x256xbf16>, vector<256x256xbf16>, vector<64x256xf32> -> vector<64x256xf32>
    %71 = arith.addf %66, %70 : vector<64x256xf32>
    %c0_39 = arith.constant 0 : index
    %c0_40 = arith.constant 0 : index
    %72 = vector.load %arg7[%c0_39, %c0_40] : memref<1x256xf32, #tpu.memory_space<vmem>>, vector<1x256xf32>
    %73 = vector.broadcast %72 : vector<1x256xf32> to vector<64x256xf32>
    %74 = arith.addf %71, %73 : vector<64x256xf32>
    %cst_41 = arith.constant 0.000000e+00 : f32
    %75 = vector.broadcast %cst_41 : f32 to vector<64x256xf32>
    %76 = arith.maximumf %74, %75 : vector<64x256xf32>
    %77 = arith.truncf %76 : vector<64x256xf32> to vector<64x256xbf16>
    %c0_42 = arith.constant 0 : index
    %c0_43 = arith.constant 0 : index
    %78 = vector.load %arg8[%c0_42, %c0_43] : memref<192x2080xbf16, #tpu.memory_space<vmem>>, vector<192x2080xbf16>
    %cst_44 = arith.constant dense<0.000000e+00> : vector<64x2080xf32>
    %79 = tpu.matmul %11, %78, %cst_44 {dimension_numbers = #tpu.dot_dimension_numbers<[1], [0], [0], [1], [0, 0, 1, 1], [], []>} : vector<64x192xbf16>, vector<192x2080xbf16>, vector<64x2080xf32> -> vector<64x2080xf32>
    %c0_45 = arith.constant 0 : index
    %c0_46 = arith.constant 0 : index
    %80 = vector.load %arg9[%c0_45, %c0_46] : memref<256x2080xbf16, #tpu.memory_space<vmem>>, vector<256x2080xbf16>
    %cst_47 = arith.constant dense<0.000000e+00> : vector<64x2080xf32>
    %81 = tpu.matmul %77, %80, %cst_47 {dimension_numbers = #tpu.dot_dimension_numbers<[1], [0], [0], [1], [0, 0, 1, 1], [], []>} : vector<64x256xbf16>, vector<256x2080xbf16>, vector<64x2080xf32> -> vector<64x2080xf32>
    %82 = arith.addf %79, %81 : vector<64x2080xf32>
    %c0_48 = arith.constant 0 : index
    %c0_49 = arith.constant 0 : index
    %83 = vector.load %arg10[%c0_48, %c0_49] : memref<1x2080xf32, #tpu.memory_space<vmem>>, vector<1x2080xf32>
    %84 = vector.broadcast %83 : vector<1x2080xf32> to vector<64x2080xf32>
    %85 = arith.addf %82, %84 : vector<64x2080xf32>
    %cst_50 = arith.constant 1.000000e+00 : f32
    %86 = vector.broadcast %cst_50 : f32 to vector<64x2080xf32>
    %87 = arith.mulf %85, %86 : vector<64x2080xf32>
    %88 = arith.addf %87, %1 : vector<64x2080xf32>
    %cst_51 = arith.constant 0.000000e+00 : f32
    %89 = vector.broadcast %cst_51 : f32 to vector<64x2080xf32>
    %90 = arith.maximumf %88, %89 : vector<64x2080xf32>
    %c0_52 = arith.constant 0 : index
    %c0_53 = arith.constant 0 : index
    %c0_54 = arith.constant 0 : index
    %91 = vector.load %arg11[%c0_52, %c0_53, %c0_54] : memref<1x64x2080xf32, #tpu.memory_space<vmem>>, vector<1x64x2080xf32>
    %92 = vector.shape_cast %91 : vector<1x64x2080xf32> to vector<64x2080xf32>
    %93 = vector.shape_cast %90 : vector<64x2080xf32> to vector<1x64x2080xf32>
    tpu.vector_store %arg11[%c0_52, %c0_53, %c0_54], %93 {strides = array<i32>} : memref<1x64x2080xf32, #tpu.memory_space<vmem>>, vector<1x64x2080xf32>,
    return
  }
  func.func @transform_0(%arg0: i32) -> (i32, i32, i32) {
    %c0_i32 = arith.constant 0 : i32
    %c0_i32_0 = arith.constant 0 : i32
    %c0_i32_1 = arith.constant 0 : i32
    return %arg0, %c0_i32, %c0_i32_0 : i32, i32, i32
  }
  func.func @transform_1(%arg0: i32) -> (i32, i32) {
    %c0_i32 = arith.constant 0 : i32
    %c0_i32_0 = arith.constant 0 : i32
    %c0_i32_1 = arith.constant 0 : i32
    return %c0_i32, %c0_i32_0 : i32, i32
  }
  func.func @transform_2(%arg0: i32) -> (i32, i32) {
    %c0_i32 = arith.constant 0 : i32
    %c0_i32_0 = arith.constant 0 : i32
    %c0_i32_1 = arith.constant 0 : i32
    return %c0_i32, %c0_i32_0 : i32, i32
  }
  func.func @transform_3(%arg0: i32) -> (i32, i32, i32) {
    %c0_i32 = arith.constant 0 : i32
    %c0_i32_0 = arith.constant 0 : i32
    %c0_i32_1 = arith.constant 0 : i32
    %c0_i32_2 = arith.constant 0 : i32
    return %c0_i32, %c0_i32_0, %c0_i32_1 : i32, i32, i32
  }
  func.func @transform_4(%arg0: i32) -> (i32, i32) {
    %c0_i32 = arith.constant 0 : i32
    %c0_i32_0 = arith.constant 0 : i32
    %c0_i32_1 = arith.constant 0 : i32
    return %c0_i32, %c0_i32_0 : i32, i32
  }
  func.func @transform_5(%arg0: i32) -> (i32, i32, i32) {
    %c0_i32 = arith.constant 0 : i32
    %c0_i32_0 = arith.constant 0 : i32
    %c0_i32_1 = arith.constant 0 : i32
    %c0_i32_2 = arith.constant 0 : i32
    return %c0_i32, %c0_i32_0, %c0_i32_1 : i32, i32, i32
  }
  func.func @transform_6(%arg0: i32) -> (i32, i32) {
    %c0_i32 = arith.constant 0 : i32
    %c0_i32_0 = arith.constant 0 : i32
    %c0_i32_1 = arith.constant 0 : i32
    return %c0_i32, %c0_i32_0 : i32, i32
  }
  func.func @transform_7(%arg0: i32) -> (i32, i32) {
    %c0_i32 = arith.constant 0 : i32
    %c0_i32_0 = arith.constant 0 : i32
    %c0_i32_1 = arith.constant 0 : i32
    return %c0_i32, %c0_i32_0 : i32, i32
  }
  func.func @transform_8(%arg0: i32) -> (i32, i32) {
    %c0_i32 = arith.constant 0 : i32
    %c0_i32_0 = arith.constant 0 : i32
    %c0_i32_1 = arith.constant 0 : i32
    return %c0_i32, %c0_i32_0 : i32, i32
  }
  func.func @transform_9(%arg0: i32) -> (i32, i32) {
    %c0_i32 = arith.constant 0 : i32
    %c0_i32_0 = arith.constant 0 : i32
    %c0_i32_1 = arith.constant 0 : i32
    return %c0_i32, %c0_i32_0 : i32, i32
  }
  func.func @transform_10(%arg0: i32) -> (i32, i32, i32) {
    %c0_i32 = arith.constant 0 : i32
    %c0_i32_0 = arith.constant 0 : i32
    %c0_i32_1 = arith.constant 0 : i32
    return %arg0, %c0_i32, %c0_i32_0 : i32, i32, i32
  }
}

</mosaic_0001>

<bundles_post_ra>
// kernel: block8_forward.1
= control target key start
LH: loop header
LB: loop body
LE: loop exit
PB: predicated region body
PF: predicated region fallthrough
CT: control target
= control target key end

     0   :  { %s20025_s0 = inlined_call_operand.hbm [shape: f32[2,64,2080], index: 0, kind: input, shape index: {}]   ;;  %s20026_s1 = inlined_call_operand.vmem [shape: bf16[2080,384], index: 1, kind: input, shape index: {}]   ;;  %s20027_s2 = inlined_call_operand.vmem [shape: f32[1,384], index: 2, kind: input, shape index: {}]   ;;  %s20028_s3 = inlined_call_operand.hbm [shape: bf16[3,192,256], index: 3, kind: input, shape index: {}]   ;;  %s20029_s4 = inlined_call_operand.vmem [shape: f32[1,256], index: 4, kind: input, shape index: {}]   ;;  %s20030_s5 = inlined_call_operand.vmem [shape: bf16[3,256,256], index: 5, kind: input, shape index: {}]   ;;  %s20031_s6 = inlined_call_operand.vmem [shape: f32[1,256], index: 6, kind: input, shape index: {}]   ;;  %s20032_s7 = inlined_call_operand.hbm [shape: bf16[192,2080], index: 7, kind: input, shape index: {}]   ;;  %s20033_s8 = inlined_call_operand.vmem [shape: bf16[256,2080], index: 8, kind: input, shape index: {}]   ;;  %s20034_s9 = inlined_call_operand.vmem [shape: f32[1,2080], index: 9, kind: input, shape index: {}]   ;;  %s20035_s10 = inlined_call_operand.hbm [shape: f32[2,64,2080], index: 10, kind: output, shape index: {}]  }
   0x1   :  { %20047 = sst [smem:[#allocation28_spill]] %s20028_s3 }
   0x2   :  { %20048 = sst [smem:[#allocation29_spill]] %s20032_s7 }
   0x3   :  { %15 = vsyncpa [#allocation3], 0 }
   0x4   :  { %17 = vsyncpa [#allocation3 + $0x1], 0 }
   0x5   :  { %18 = vsyncpa [#allocation6], 0 }
   0x6   :  { %19 = vsyncpa [#allocation4], 0 }
   0x7   :  { %21 = vsyncpa [#allocation4 + $0x1], 0  ;;  %s15342_s13 = smov 0   ;;  %s15344_s14 = smov 0  }
   0x8   :  { %s15346_s15 = smov 0   ;;  %s15348_s16 = smov 0  }
   0x9 LB: > { %20049 = sst [smem:[#allocation12_spill]] %s15259_s13  ;;  %s15363_s17 = sadd.s32 4294967295, %s15271_s16   ;;  %s15271_s16 = sphi %s15348_s16, %s20211_s16   ;;  %s15267_s15 = sphi %s15346_s15, %s20210_s15   ;;  %s15263_s14 = sphi %s15344_s14, %s20209_s14   ;;  %s15259_s13 = sphi %s15342_s13, %s20208_s13  }
   0xa   : > { %s11430_s18 = sadd.s32 4294967294, %s15271_s16   ;;  %p47_p0 = scmp.ne.s32.totalorder %s15263_s14, %s15259_s13 }
   0xb   : > { %p20036_p1 = scmp.eq.s32.totalorder %s15363_s17, 0  ;;  %p266_p3 = scmp.eq.s32.totalorder %s11430_s18, 1 }
   0xc   : > { %p11431_p5 = scmp.ge.s32.totalorder %s15271_s16, 1  ;;  %p273_p7 = scmp.lt.s32.totalorder %s15271_s16, 3 }
   0xd   : > { %p15372_p4 = por %p20036_p1, %p47_p0  ;;  %p15377_p6 = por %p266_p3, %p47_p0 }
   0xe   : > { %p15382_p8 = pnand %p11431_p5, %p273_p7  ;;  %s15273_s22 = smov [#allocation5]  }
   0xf   : > { %s20050_s19 = scalar_select %p15372_p4, 1, 0 }
  0x10   : > { %s20051_s20 = scalar_select %p15377_p6, 1, 0 }
  0x11   : > { %s291_s23 = sshll.u32 %s15273_s22, 4  ;;  %p13399_p9 = pneg %p15382_p8  ;;  %s15386_s23 = int_to_ptr.vmem [resolvable:$true] %s291_s23 }
  0x12   : > { %20052 = sst [smem:[#allocation13_spill]] %s20051_s20  ;;  %s15274_s25 = smov [#allocation7]  }
  0x13   : > { %p15393_p11 = pnand %p13399_p9, %p20036_p1  ;;  %s313_s26 = sshll.u32 %s15274_s25, 4  ;;  %s15397_s26 = int_to_ptr.vmem [resolvable:$true] %s313_s26 }
  0x14   : > { %s20055_s3 = sld [smem:[#allocation28_spill]] }
  0x15   : > { %p15117_p13 = pneg %p15393_p11 }
  0x1a   : > { %s15115_s29 = scalar_lea.hbm %s20055_s3, 9216 }
  0x1b   : > { %p15116_p12 = scmp.ne.s32.totalorder %s20055_s3, %s15115_s29  ;;  %p15122_p5 = scmp.lt.u32.totalorder %s15115_s29, %s20055_s3 }
  0x1d   : > { %p15118_p0 = pnand %p15117_p13, %p15116_p12 }
  0x1f   : > { %p15119_p3 = pneg %p15118_p0 }
  0x21   : > { %p15124_p7 = pnand %p15122_p5, %p15119_p3 }
  0x23   : > { %15127 = shalt.err (!%p15124_p7)
}
  0x24   : > { %s15128_s22 = scalar_lea.vmem %s15386_s23, 9216  ;;  %p15136_p2 = scmp.lt.s32.totalorder %s15386_s23, %s15386_s23 }
  0x25   : > { %p15129_p9 = scmp.ne.s32.totalorder %s15386_s23, %s15128_s22  ;;  %p15137_p12 = scmp.lt.s32.totalorder %s15128_s22, %s15128_s22 }
  0x27   : > { %p15131_p10 = pnand %p15129_p9, %p15117_p13  ;;  %p15138_p0 = por %p15137_p12, %p15136_p2 }
  0x29   : > { %p15132_p1 = pneg %p15131_p10 }
  0x2b   : > { %p15139_p6 = pnand %p15138_p0, %p15132_p1 }
  0x2d   : > { %15142 = shalt.err (!%p15139_p6)
}
  0x2e   : > { %s15275_s25 = smov 128   ;;  %s15276_s27 = smov 8  }
  0x2f   : > { %13402 = dma.hbm_to_vmem [thread:$0]  (!%p15393_p11), %s20055_s3, 9216, %s15386_s23, [#allocation6], %s15275_s25, %s15275_s25, %s15276_s27  }
  0x30   : > { %s20056_s7 = sld [smem:[#allocation29_spill]] }
  0x36   : > { %s15143_s12 = scalar_lea.hbm %s20056_s7, 26112 }
  0x37   : > { %p15144_p2 = scmp.ne.s32.totalorder %s20056_s7, %s15143_s12  ;;  %p15150_p10 = scmp.lt.u32.totalorder %s15143_s12, %s20056_s7 }
  0x39   : > { %p15146_p1 = pnand %p15144_p2, %p15117_p13 }
  0x3b   : > { %p15147_p6 = pneg %p15146_p1 }
  0x3d   : > { %p15152_p3 = pnand %p15150_p10, %p15147_p6 }
  0x3f   : > { %15155 = shalt.err (!%p15152_p3)
}
  0x40   : > { %s15156_s23 = scalar_lea.vmem %s15397_s26, 26112  ;;  %p15164_p12 = scmp.lt.s32.totalorder %s15397_s26, %s15397_s26 }
  0x41   : > { %p15157_p5 = scmp.ne.s32.totalorder %s15397_s26, %s15156_s23  ;;  %p15165_p0 = scmp.lt.s32.totalorder %s15156_s23, %s15156_s23 }
  0x43   : > { %p15159_p7 = pnand %p15157_p5, %p15117_p13  ;;  %p15166_p2 = por %p15165_p0, %p15164_p12 }
  0x45   : > { %p15160_p9 = pneg %p15159_p7 }
  0x47   : > { %p15167_p1 = pnand %p15166_p2, %p15160_p9 }
  0x49   : > { %15170 = shalt.err (!%p15167_p1)
}
  0x4a   : > { %s15277_s13 = smov 1088   ;;  %s15278_s20 = smov 68  }
  0x4b   : > { %13405 = dma.hbm_to_vmem [thread:$0]  (!%p15393_p11), %s20056_s7, 26112, %s15397_s26, [#allocation6], %s15277_s13, %s15277_s13, %s15278_s20  }
  0x4c   : > { %s15452_s28 = sadd.s32 1, %s15271_s16   ;;  %s34_s30 = sadd.s32 1, %s15267_s15 }
  0x4d   : > { %s31_s29 = ssub.s32 %s15271_s16, %s15452_s28  ;;  %p41_p6 = scmp.ne.s32.totalorder %s15267_s15, %s15263_s14 }
  0x4e   : > { %p32_p13 = scmp.eq.s32.totalorder %s31_s29, 0  ;;  %p42_p10 = scmp.eq.s32.totalorder %s15271_s16, 0 }
  0x4f   : > { %p20057_p5 = scmp.eq.s32.totalorder %s15363_s17, 1  ;;  %p13416_p9 = scmp.lt.s32.totalorder %s15271_s16, 2 }
  0x50   : > { %s15461_s11 = scalar_select %p32_p13, %s15267_s15, %s34_s30  }
  0x51   : > { %p43_p3 = por %p42_p10, %p41_p6  ;;  %p15465_p7 = por %p20057_p5, %p41_p6 }
  0x52   : > { %s333_s24 = sand.u32 1, %s15267_s15   ;;  %s13384_s26 = smul.u32 17408, %s15271_s16 }
  0x53   : > { %s20058_s12 = scalar_select %p15465_p7, 1, 0 }
  0x54   : > { %s13383_s18 = smul.u32 1088, %s333_s24  ;;  %p15472_p11 = pnand %p13416_p9, %p43_p3 }
  0x55   : > { %s15479_s20 = scalar_lea.hbm %s20025_s0, %s13384_s26  ;;  %s15483_s29 = scalar_lea.sflag [#allocation3], %s333_s24 }
  0x56   : > { %s337_s25 = scalar_lea.vmem [#allocation2], %s13383_s18  ;;  %s15171_s30 = scalar_lea.hbm %s15479_s20, 17408 }
  0x57   : > { %s344_s27 = sshll.u32 %s337_s25, 4  ;;  %p15172_p12 = scmp.ne.s32.totalorder %s15479_s20, %s15171_s30  ;;  %s15481_s27 = int_to_ptr.vmem [resolvable:$true] %s344_s27 }
  0x58   : > { %p15173_p0 = pneg %p15472_p11  ;;  %s15176_s13 = scalar_lea.hbm %s20025_s0, 34816 }
  0x59   : > { %p15177_p13 = scmp.lt.u32.totalorder %s15479_s20, %s20025_s0  ;;  %p15178_p6 = scmp.lt.u32.totalorder %s15176_s13, %s15171_s30 }
  0x5a   : > { %p15174_p2 = pnand %p15173_p0, %p15172_p12  ;;  %p15180_p3 = scmp.lt.u32.totalorder %s15171_s30, %s15479_s20 }
  0x5b   : > { %p15179_p10 = por %p15178_p6, %p15177_p13 }
  0x5c   : > { %p15175_p1 = pneg %p15174_p2 }
  0x5d   : > { %p15181_p5 = por %p15180_p3, %p15179_p10 }
  0x5f   : > { %p15182_p9 = pnand %p15181_p5, %p15175_p1 }
  0x61   : > { %15185 = shalt.err (!%p15182_p9)
}
  0x62   : > { %s15186_s24 = scalar_lea.vmem %s15481_s27, 17408  ;;  %s15279_s18 = smov [#allocation2]  }
  0x63   : > { %p15187_p12 = scmp.ne.s32.totalorder %s15481_s27, %s15186_s24  ;;  %s15191_s25 = sshll.u32 %s15279_s18, 4  ;;  %s15192_s25 = int_to_ptr.vmem [resolvable:$false] %s15191_s25 }
  0x64   : > { %s15193_s3 = scalar_lea.vmem %s15192_s25, 34816  ;;  %p15194_p4 = scmp.lt.s32.totalorder %s15481_s27, %s15192_s25 }
  0x65   : > { %p15189_p2 = pnand %p15187_p12, %p15173_p0  ;;  %p15195_p13 = scmp.lt.s32.totalorder %s15193_s3, %s15186_s24 }
  0x67   : > { %p15190_p7 = pneg %p15189_p2  ;;  %p15196_p6 = por %p15195_p13, %p15194_p4 }
  0x69   : > { %p15197_p10 = pnand %p15196_p6, %p15190_p7 }
  0x6b   : > { %15200 = shalt.err (!%p15197_p10)
}
  0x6c   : > { %s15280_s7 = smov 2176   ;;  %s15281_s30 = smov 136  }
  0x6d   : > { %13409 = dma.hbm_to_vmem [thread:$0]  (!%p15472_p11), %s15479_s20, 17408, %s15481_s27, %s15483_s29, %s15280_s7, %s15280_s7, %s15281_s30  }
  0x6e   : > { %356 = sbr.rel (%p15382_p8) target bundleno = 2410 (0x96a), region = 60 }
  0x75   : > { %s15514_s26 = sand.u32 1, %s15263_s14   ;;  %p20060_p4 = scmp.ne.s32.totalorder %s20050_s19, 0 }
  0x76   : > { %s13385_s23 = smul.u32 1088, %s15514_s26  ;;  %s359_s13 = scalar_lea.sflag [#allocation3], %s15514_s26 }
  0x78   : > { %s15520_s24 = scalar_lea.vmem [#allocation2], %s13385_s23 }
  0x79   : > { %15246 = dma.done.wait (%p20060_p4), %s359_s13, 17408  }
  0x7a   : > { %15248 = vsyncadd (%p20060_p4), %s359_s13, 4294949888  ;;  %p20061_p7 = scmp.eq.s32.totalorder %s15363_s17, 0 }
  0x7c   : > { %15250 = dma.done.wait (%p20061_p7), [#allocation6], 35328   ;;  %p20062_p8 = pmov %p20061_p7 }
  0x7d   : > { %v20041_v0 = vmov 0   ;;  %v13504_v1 = vld [vmem:[%s20026_s1 + $0x4] ss:$12 sps:$4 sm:$0xff]   ;;  %v13508_v3 = vld [vmem:[%s20026_s1] ss:$12 sps:$4 sm:$0xff]   ;;  %vm20045_vm0 = vcmask 261120  }
  0x7e   : > { %15252 = vsyncadd (%p20062_p8), [#allocation6], 4294931968  ;;  %3858 = vmatprep.mubr.bf16.mxu1 %v20041_v0  ;;  %v13506_v2 = vld [vmem:[%s20026_s1 + $0xc04] ss:$12 sps:$4 sm:$0xff]   ;;  %3242 = vmatprep.subr.bf16.mxu0 %v13504_v1  ;;  %v13509_v4 = vld [vmem:[%s20026_s1 + $0xc00] ss:$12 sps:$4 sm:$0xff]  }
  0x7f   : > { %3826 = vmatprep.subr.bf16.mxu1 %v13506_v2  ;;  %v13510_v5 = vld [vmem:[%s20026_s1 + $0x1c] ss:$12 sps:$4 sm:$0xff]   ;;  %3243 = vmatpush1.bf16.msra.mxu0 %v13508_v3  ;;  %v13514_v7 = vld [vmem:[%s20026_s1 + $0x18] ss:$12 sps:$4 sm:$0xff]   ;;  %v13516_v9 = vld [vmem:[%s20026_s1 + $0x34] ss:$12 sps:$4 sm:$0xff]  }
  0x80   : > { %3827 = vmatpush1.bf16.msra.mxu1 %v13509_v4  ;;  %v13512_v6 = vld [vmem:[%s20026_s1 + $0xc1c] ss:$12 sps:$4 sm:$0xff]   ;;  %3244 = vmatprep.subr.bf16.mxu0 %v13510_v5  ;;  %v13515_v8 = vld [vmem:[%s20026_s1 + $0xc18] ss:$12 sps:$4 sm:$0xff]   ;;  %v13523_v17 = vld [vmem:[%s20026_s1 + $0xe0] ss:$12 sps:$4 sm:$0xff]  }
  0x81   : > { %3828 = vmatprep.subr.bf16.mxu1 %v13512_v6  ;;  %v424_v10 = vld [vmem:[%s15520_s24 + $0x80] sm:$0xff]  ;;  %v441_v11 = vld [vmem:[%s15520_s24 + $0x108] sm:$0xff]  ;;  %v13519_v14 = vld [vmem:[%s20026_s1 + $0x30] ss:$12 sps:$4 sm:$0xff]   ;;  %s15283_s19 = smov 64   ;;  %vm20046_vm1 = vcmask 523264  }
  0x82   : > { %v15560_v12 = vpack.c.bf16 %v441_v11, %v424_v10  ;;  %v13518_v13 = vld [vmem:[%s20026_s1 + $0xc8] ss:$12 sps:$4 sm:$0xff]   ;;  %v13521_v16 = vld [vmem:[%s20026_s1 + $0x4c] ss:$12 sps:$4 sm:$0xff]   ;;  %v13526_v20 = vld [vmem:[%s20026_s1 + $0x64] ss:$12 sps:$4 sm:$0xff]  }
  0x83   : > { %3245 = vmatpush1.bf16.msra.mxu0 %v13514_v7  ;;  %v13520_v15 = vld [vmem:[%s20026_s1 + $0x8] ss:$12 sps:$4 sm:$0xff]   ;;  %v13525_v19 = vld [vmem:[%s20026_s1 + $0x20] ss:$12 sps:$4 sm:$0xff]   ;;  %v475_v22 = vld [vmem:[%s15520_s24 + $0x218] sm:$0xff]  ;;  %s19448_s27 = scalar_lea.vmem [#allocation8], %s13385_s23 }
  0x84   : > { %3829 = vmatpush1.bf16.msra.mxu1 %v13515_v8  ;;  %3246 = vmatprep.subr.bf16.mxu0 %v13516_v9  ;;  %v13524_v18 = vld [vmem:[%s20026_s1 + $0x48] ss:$12 sps:$4 sm:$0xff]   ;;  %v13528_v24 = vld [vmem:[%s20026_s1 + $0xf8] ss:$12 sps:$4 sm:$0xff]   ;;  %v13529_v25 = vld [vmem:[%s20026_s1 + $0x60] ss:$12 sps:$4 sm:$0xff]  }
  0x85   : > { %12669 = vmatprep.subr.bf16.mxu1 %v13518_v13  ;;  %v458_v21 = vld [vmem:[%s15520_s24 + $0x190] sm:$0xff]  ;;  %v13530_v26 = vld [vmem:[%s20026_s1 + $0x38] ss:$12 sps:$4 sm:$0xff]   ;;  %v13531_v27 = vld [vmem:[%s20026_s1 + $0x7c] ss:$12 sps:$4 sm:$0xff]   ;;  %s13386_s13 = smul.u32 17408, %s15363_s17 }
  0x86   : > { %v15591_v23 = vpack.c.bf16 %v475_v22, %v458_v21  ;;  %v13533_v28 = vld [vmem:[%s20026_s1 + $0x110] ss:$12 sps:$4 sm:$0xff]   ;;  %v13534_v29 = vld [vmem:[%s20026_s1 + $0x78] ss:$12 sps:$4 sm:$0xff]   ;;  %v13536_v31 = vld [vmem:[%s20026_s1 + $0x94] ss:$12 sps:$4 sm:$0xff]  }
  0x87   : > { %11829 = vmatmul.mubr.msk.bf16.vlgmr.msra.gmra.mrb[0].mxu1 %vm20045_vm0, %v15560_v12  ;;  %3247 = vmatpush1.bf16.msra.mxu0 %v13519_v14  ;;  %v13535_v30 = vld [vmem:[%s20026_s1 + $0x50] ss:$12 sps:$4 sm:$0xff]   ;;  %v492_v32 = vld [vmem:[%s15520_s24 + $0x2a0] sm:$0xff]  ;;  %v509_v33 = vld [vmem:[%s15520_s24 + $0x328] sm:$0xff]  ;;  %s11338_s21 = sshll.u32 %s19448_s27, 4  ;;  %s19976_s17 = scalar_lea.hbm %s20035_s10, %s13386_s13  ;;  %s19979_s21 = int_to_ptr.vmem [resolvable:$true] %s11338_s21 }
  0x88   : > { %12670 = vmatpush3.bf16.msra.mxu1 %v13520_v15  ;;  %3248 = vmatprep.subr.bf16.mxu0 %v13521_v16  ;;  %v13538_v34 = vld [vmem:[%s20026_s1 + $0x128] ss:$12 sps:$4 sm:$0xff]   ;;  %v13539_v35 = vld [vmem:[%s20026_s1 + $0x90] ss:$12 sps:$4 sm:$0xff]   ;;  %v15628_v36 = vpack.c.bf16 %v509_v33, %v492_v32  ;;  %v13541_v38 = vld [vmem:[%s20026_s1 + $0xac] ss:$12 sps:$4 sm:$0xff]  }
  0x89   : > { %12671 = vmatprep.subr.bf16.mxu1 %v13523_v17  ;;  %3868 = vmatprep.mubr.bf16.mxu1 %v20041_v0  ;;  %v13540_v37 = vld [vmem:[%s20026_s1 + $0x68] ss:$12 sps:$4 sm:$0xff]   ;;  %v13543_v39 = vld [vmem:[%s20026_s1 + $0x140] ss:$12 sps:$4 sm:$0xff]   ;;  %v13546_v42 = vld [vmem:[%s20026_s1 + $0xc4] ss:$12 sps:$4 sm:$0xff]  }
  0x8a   : > { %v13544_v40 = vld [vmem:[%s20026_s1 + $0xa8] ss:$12 sps:$4 sm:$0xff]   ;;  %v13545_v41 = vld [vmem:[%s20026_s1 + $0x80] ss:$12 sps:$4 sm:$0xff]   ;;  %v543_v44 = vld [vmem:[%s15520_s24 + $0x438] sm:$0xff]  ;;  %s11325_s23 = scalar_lea.sflag [#allocation4], %s15514_s26 }
  0x8b   : > { %3249 = vmatpush1.bf16.msra.mxu0 %v13524_v18  ;;  %v526_v43 = vld [vmem:[%s15520_s24 + $0x3b0] sm:$0xff]  ;;  %v13548_v45 = vld [vmem:[%s20026_s1 + $0x158] ss:$12 sps:$4 sm:$0xff]   ;;  %v13549_v47 = vld [vmem:[%s20026_s1 + $0xc0] ss:$12 sps:$4 sm:$0xff]   ;;  %p20203_p0 = scmp.ne.s32.totalorder %s20058_s12, 0 }
  0x8c   : > { %12672 = vmatpush3.bf16.msra.mxu1 %v13525_v19  ;;  %3250 = vmatprep.subr.bf16.mxu0 %v13526_v20  ;;  %v15656_v46 = vpack.c.bf16 %v543_v44, %v526_v43  ;;  %v13550_v48 = vld [vmem:[%s20026_s1 + $0x98] ss:$12 sps:$4 sm:$0xff]   ;;  %v13551_v49 = vld [vmem:[%s20026_s1 + $0xdc] ss:$12 sps:$4 sm:$0xff]   ;;  %v426_v54 = vld [vmem:[%s15520_s24 + $0x90] sm:$0xff] }
  0x8d   : > { %12673 = vmatprep.subr.bf16.mxu1 %v13528_v24  ;;  %v13553_v50 = vld [vmem:[%s20026_s1 + $0x170] ss:$12 sps:$4 sm:$0xff]   ;;  %v13554_v51 = vld [vmem:[%s20026_s1 + $0xd8] ss:$12 sps:$4 sm:$0xff]   ;;  %v409_v53 = vld [vmem:[%s15520_s24 + $0x8] sm:$0xff] }
  0x8e   : > { %v13555_v52 = vld [vmem:[%s20026_s1 + $0xb0] ss:$12 sps:$4 sm:$0xff]   ;;  %v545_v55 = vpack.c.bf16 %v426_v54, %v409_v53  ;;  %v13556_v56 = vld [vmem:[%s20026_s1 + $0xf4] ss:$12 sps:$4 sm:$0xff]   ;;  %v425_v58 = vld [vmem:[%s15520_s24 + $0x88] sm:$0xff] }
  0x8f   : > { %11830 = vmatmul.mubr.msk.bf16.gmra.mrb[4].mxu1 %vm20045_vm0, %v15591_v23  ;;  %3251 = vmatpush1.bf16.msra.mxu0 %v13529_v25  ;;  %v408_v57 = vld [vmem:[%s15520_s24] sm:$0xff]  ;;  %v13558_v59 = vld [vmem:[%s20026_s1 + $0x248] ss:$12 sps:$4 sm:$0xff]   ;;  %v13559_v61 = vld [vmem:[%s20026_s1 + $0xf0] ss:$12 sps:$4 sm:$0xff]  }
  0x90   : > { %12674 = vmatpush3.bf16.msra.mxu1 %v13530_v26  ;;  %3252 = vmatprep.subr.bf16.mxu0 %v13531_v27  ;;  %v15688_v60 = vpack.c.bf16 %v425_v58, %v408_v57  ;;  %v13560_v62 = vld [vmem:[%s20026_s1 + $0x188] ss:$12 sps:$4 sm:$0xff]   ;;  %v13561_v63 = vld [vmem:[%s20026_s1 + $0x10c] ss:$12 sps:$4 sm:$0xff]   ;;  %v460_v5 = vld [vmem:[%s15520_s24 + $0x1a0] sm:$0xff] }
  0x91   : > { %12675 = vmatprep.subr.bf16.mxu1 %v13533_v28  ;;  %3878 = vmatprep.mubr.bf16.mxu1 %v20041_v0  ;;  %v13563_v1 = vld [vmem:[%s20026_s1 + $0x260] ss:$12 sps:$4 sm:$0xff]   ;;  %v13564_v2 = vld [vmem:[%s20026_s1 + $0x108] ss:$12 sps:$4 sm:$0xff]   ;;  %v443_v4 = vld [vmem:[%s15520_s24 + $0x118] sm:$0xff] }
  0x92   : > { %3274 = vmatprep.mubr.bf16.mxu0 %v545_v55  ;;  %v13565_v3 = vld [vmem:[%s20026_s1 + $0x1a0] ss:$12 sps:$4 sm:$0xff]   ;;  %v15711_v6 = vpack.c.bf16 %v460_v5, %v443_v4  ;;  %v13566_v7 = vld [vmem:[%s20026_s1 + $0x124] ss:$12 sps:$4 sm:$0xff]   ;;  %v459_v9 = vld [vmem:[%s15520_s24 + $0x198] sm:$0xff] }
  0x93   : > { %3253 = vmatpush1.bf16.msra.mxu0 %v13534_v29  ;;  %v442_v8 = vld [vmem:[%s15520_s24 + $0x110] sm:$0xff]  ;;  %v13568_v10 = vld [vmem:[%s20026_s1 + $0x278] ss:$12 sps:$4 sm:$0xff]   ;;  %v13569_v13 = vld [vmem:[%s20026_s1 + $0x120] ss:$12 sps:$4 sm:$0xff]  }
  0x94   : > { %12676 = vmatpush3.bf16.msra.mxu1 %v13535_v30  ;;  %3254 = vmatprep.subr.bf16.mxu0 %v13536_v31  ;;  %v15722_v11 = vpack.c.bf16 %v459_v9, %v442_v8  ;;  %v13570_v14 = vld [vmem:[%s20026_s1 + $0x1b8] ss:$12 sps:$4 sm:$0xff]   ;;  %v13571_v15 = vld [vmem:[%s20026_s1 + $0x13c] ss:$12 sps:$4 sm:$0xff]   ;;  %v494_v20 = vld [vmem:[%s15520_s24 + $0x2b0] sm:$0xff] }
  0x95   : > { %12677 = vmatprep.subr.bf16.mxu1 %v13538_v34  ;;  %v13573_v16 = vld [vmem:[%s20026_s1 + $0x290] ss:$12 sps:$4 sm:$0xff]   ;;  %v13574_v17 = vld [vmem:[%s20026_s1 + $0x138] ss:$12 sps:$4 sm:$0xff]   ;;  %v477_v19 = vld [vmem:[%s15520_s24 + $0x228] sm:$0xff] }
  0x96   : > { %v13575_v18 = vld [vmem:[%s20026_s1 + $0x1d0] ss:$12 sps:$4 sm:$0xff]   ;;  %v15745_v21 = vpack.c.bf16 %v494_v20, %v477_v19  ;;  %v13576_v22 = vld [vmem:[%s20026_s1 + $0x154] ss:$12 sps:$4 sm:$0xff]   ;;  %v493_v25 = vld [vmem:[%s15520_s24 + $0x2a8] sm:$0xff] }
  0x97   : > { %11831 = vmatmul.mubr.msk.bf16.gmra.mrb[8].mxu1 %vm20045_vm0, %v15628_v36  ;;  %3255 = vmatpush1.bf16.msra.mxu0 %v13539_v35  ;;  %v476_v24 = vld [vmem:[%s15520_s24 + $0x220] sm:$0xff]  ;;  %v13578_v26 = vld [vmem:[%s20026_s1 + $0x2a8] ss:$12 sps:$4 sm:$0xff]   ;;  %v13579_v28 = vld [vmem:[%s20026_s1 + $0x150] ss:$12 sps:$4 sm:$0xff]  }
  0x98   : > { %12678 = vmatpush3.bf16.msra.mxu1 %v13540_v37  ;;  %3256 = vmatprep.subr.bf16.mxu0 %v13541_v38  ;;  %v15756_v27 = vpack.c.bf16 %v493_v25, %v476_v24  ;;  %v13580_v29 = vld [vmem:[%s20026_s1 + $0x1e8] ss:$12 sps:$4 sm:$0xff]   ;;  %v13581_v30 = vld [vmem:[%s20026_s1 + $0x16c] ss:$12 sps:$4 sm:$0xff]   ;;  %v528_v34 = vld [vmem:[%s15520_s24 + $0x3c0] sm:$0xff] }
  0x99   : > { %12679 = vmatprep.subr.bf16.mxu1 %v13543_v39  ;;  %3888 = vmatprep.mubr.bf16.mxu1 %v20041_v0  ;;  %v13583_v31 = vld [vmem:[%s20026_s1 + $0x2c0] ss:$12 sps:$4 sm:$0xff]   ;;  %v13584_v32 = vld [vmem:[%s20026_s1 + $0x168] ss:$12 sps:$4 sm:$0xff]   ;;  %v511_v33 = vld [vmem:[%s15520_s24 + $0x338] sm:$0xff] }
  0x9a   : > { %v13585_v35 = vld [vmem:[%s20026_s1 + $0x200] ss:$12 sps:$4 sm:$0xff]   ;;  %v15779_v37 = vpack.c.bf16 %v528_v34, %v511_v33  ;;  %v13588_v38 = vld [vmem:[%s20026_s1 + $0x184] ss:$12 sps:$4 sm:$0xff]  }
  0x9b   : > { %3257 = vmatpush1.bf16.msra.mxu0 %v13544_v40  ;;  %v510_v39 = vld [vmem:[%s15520_s24 + $0x330] sm:$0xff]  ;;  %v527_v40 = vld [vmem:[%s15520_s24 + $0x3b8] sm:$0xff]  ;;  %v444_v5 = vld [vmem:[%s15520_s24 + $0x120] sm:$0xff] }
  0x9c   : > { %12680 = vmatpush3.bf16.msra.mxu1 %v13545_v41  ;;  %3258 = vmatprep.subr.bf16.mxu0 %v13546_v42  ;;  %v13589_v41 = vld [vmem:[%s20026_s1 + $0x2d8] ss:$12 sps:$4 sm:$0xff]   ;;  %v13586_v42 = vld [vmem:[%s20026_s1 + $0x180] ss:$12 sps:$4 sm:$0xff]   ;;  %v15793_v43 = vpack.c.bf16 %v527_v40, %v510_v39  ;;  %v410_v54 = vld [vmem:[%s15520_s24 + $0x10] sm:$0xff] }
  0x9d   : > { %12681 = vmatprep.subr.bf16.mxu1 %v13548_v45  ;;  %v13590_v44 = vld [vmem:[%s20026_s1 + $0x218] ss:$12 sps:$4 sm:$0xff]   ;;  %v13593_v45 = vld [vmem:[%s20026_s1 + $0x19c] ss:$12 sps:$4 sm:$0xff]   ;;  %v13598_v53 = vld [vmem:[%s20026_s1 + $0x1b4] ss:$12 sps:$4 sm:$0xff]  }
  0x9e   : > { %v13596_v57 = vld [vmem:[%s20026_s1 + $0x1b0] ss:$12 sps:$4 sm:$0xff]   ;;  %v13606_v8 = vld [vmem:[%s20026_s1 + $0x1e0] ss:$12 sps:$4 sm:$0xff]  }
  0x9f   : > { %11832 = vmatmul.mubr.msk.bf16.gmra.mrb[12].mxu1 %vm20045_vm0, %v15656_v46  ;;  %3259 = vmatpush1.bf16.msra.mxu0 %v13549_v47  ;;  %v13594_v47 = vld [vmem:[%s20026_s1 + $0x2f0] ss:$12 sps:$4 sm:$0xff]   ;;  %v13618_v19 = vld [vmem:[%s20026_s1 + $0x214] ss:$12 sps:$4 sm:$0xff]  }
  0xa0   : > { %12682 = vmatpush3.bf16.msra.mxu1 %v13550_v48  ;;  %3260 = vmatprep.subr.bf16.mxu0 %v13551_v49  ;;  %v13591_v48 = vld [vmem:[%s20026_s1 + $0x198] ss:$12 sps:$4 sm:$0xff]   ;;  %v478_v20 = vld [vmem:[%s15520_s24 + $0x230] sm:$0xff]  ;;  %v13626_v39 = vld [vmem:[%s20026_s1 + $0x240] ss:$12 sps:$4 sm:$0xff]  }
  0xa1   : > { %12683 = vmatprep.subr.bf16.mxu1 %v13553_v50  ;;  %3931 = vmatprep.mubr.bf16.mxu1 %v545_v55  ;;  %v411_v49 = vld [vmem:[%s15520_s24 + $0x18] sm:$0xff]  ;;  %v428_v50 = vld [vmem:[%s15520_s24 + $0xa0] sm:$0xff]  ;;  %v422_v0 = vld [vmem:[%s15520_s24 + $0x70] sm:$0xff] }
  0xa2   : > { %v427_v55 = vld [vmem:[%s15520_s24 + $0x98] sm:$0xff]  ;;  %v13608_v4 = vld [vmem:[%s20026_s1 + $0x1e4] ss:$12 sps:$4 sm:$0xff]  }
  0xa3   : > { %3261 = vmatpush1.bf16.msra.mxu0 %v13554_v51  ;;  %v13595_v51 = vld [vmem:[%s20026_s1 + $0x230] ss:$12 sps:$4 sm:$0xff]   ;;  %v15829_v58 = vpack.c.bf16 %v427_v55, %v410_v54 }
  0xa4   : > { %12684 = vmatpush3.bf16.msra.mxu1 %v13555_v52  ;;  %3262 = vmatprep.subr.bf16.mxu0 %v13556_v56  ;;  %v15814_v52 = vpack.c.bf16 %v428_v50, %v411_v49  ;;  %v13599_v56 = vld [vmem:[%s20026_s1 + $0x3c8] ss:$12 sps:$4 sm:$0xff]   ;;  %v13616_v24 = vld [vmem:[%s20026_s1 + $0x210] ss:$12 sps:$4 sm:$0xff]  }
  0xa5   : > { %12709 = vmatprep.subr.bf16.mxu1 %v13558_v59  ;;  %v13600_v59 = vld [vmem:[%s20026_s1 + $0x308] ss:$12 sps:$4 sm:$0xff]   ;;  %v13628_v34 = vld [vmem:[%s20026_s1 + $0x244] ss:$12 sps:$4 sm:$0xff]  }
  0xa6   : > { %v13638_v50 = vld [vmem:[%s20026_s1 + $0x274] ss:$12 sps:$4 sm:$0xff]   ;;  %v13636_v54 = vld [vmem:[%s20026_s1 + $0x270] ss:$12 sps:$4 sm:$0xff]  }
  0xa7   : > { %3932 = vmatmul.mubr.bf16.vlgmr.msra.gmra.mrb[16].mxu1 %v15688_v60  ;;  %3263 = vmatpush1.bf16.msra.mxu0 %v13559_v61  ;;  %v13604_v61 = vld [vmem:[%s20026_s1 + $0x3e0] ss:$12 sps:$4 sm:$0xff]  }
  0xa8   : > { %12710 = vmatpush3.bf16.msra.mxu1 %v13560_v62  ;;  %3264 = vmatprep.subr.bf16.mxu0 %v13561_v63  ;;  %v13601_v62 = vld [vmem:[%s20026_s1 + $0x1c8] ss:$12 sps:$4 sm:$0xff]  }
  0xa9   : > { %12711 = vmatprep.subr.bf16.mxu1 %v13563_v1  ;;  %3939 = vmatprep.mubr.bf16.mxu1 %v15711_v6  ;;  %v445_v63 = vld [vmem:[%s15520_s24 + $0x128] sm:$0xff]  ;;  %v462_v1 = vld [vmem:[%s15520_s24 + $0x1b0] sm:$0xff] }
  0xab   : > { %3265 = vmatpush1.bf16.msra.mxu0 %v13564_v2  ;;  %v13605_v2 = vld [vmem:[%s20026_s1 + $0x320] ss:$12 sps:$4 sm:$0xff]  }
  0xac   : > { %12712 = vmatpush3.bf16.msra.mxu1 %v13565_v3  ;;  %3266 = vmatprep.subr.bf16.mxu0 %v13566_v7  ;;  %v15850_v3 = vpack.c.bf16 %v462_v1, %v445_v63  ;;  %v13609_v7 = vld [vmem:[%s20026_s1 + $0x3f8] ss:$12 sps:$4 sm:$0xff]   ;;  %v13645_v63 = vld [vmem:[%s20026_s1 + $0x4a0] ss:$12 sps:$4 sm:$0xff]  }
  0xad   : > { %12713 = vmatprep.subr.bf16.mxu1 %v13568_v10  ;;  %v13610_v10 = vld [vmem:[%s20026_s1 + $0x338] ss:$12 sps:$4 sm:$0xff]  }
  0xaf   : > { %3940 = vmatmul.mubr.bf16.gmra.mrb[20].mxu1 %v15722_v11  ;;  %3267 = vmatpush1.bf16.msra.mxu0 %v13569_v13  ;;  %v13614_v13 = vld [vmem:[%s20026_s1 + $0x410] ss:$12 sps:$4 sm:$0xff]  }
  0xb0   : > { %12714 = vmatpush3.bf16.msra.mxu1 %v13570_v14  ;;  %3268 = vmatprep.subr.bf16.mxu0 %v13571_v15  ;;  %v13611_v14 = vld [vmem:[%s20026_s1 + $0x1f8] ss:$12 sps:$4 sm:$0xff]  }
  0xb1   : > { %12715 = vmatprep.subr.bf16.mxu1 %v13573_v16  ;;  %3947 = vmatprep.mubr.bf16.mxu1 %v15745_v21  ;;  %v479_v15 = vld [vmem:[%s15520_s24 + $0x238] sm:$0xff]  ;;  %v496_v16 = vld [vmem:[%s15520_s24 + $0x2c0] sm:$0xff] }
  0xb3   : > { %3269 = vmatpush1.bf16.msra.mxu0 %v13574_v17  ;;  %v13615_v17 = vld [vmem:[%s20026_s1 + $0x350] ss:$12 sps:$4 sm:$0xff]  }
  0xb4   : > { %12716 = vmatpush3.bf16.msra.mxu1 %v13575_v18  ;;  %3270 = vmatprep.subr.bf16.mxu0 %v13576_v22  ;;  %v15886_v18 = vpack.c.bf16 %v496_v16, %v479_v15  ;;  %v13619_v22 = vld [vmem:[%s20026_s1 + $0x428] ss:$12 sps:$4 sm:$0xff]  }
  0xb5   : > { %12717 = vmatprep.subr.bf16.mxu1 %v13578_v26  ;;  %v13620_v26 = vld [vmem:[%s20026_s1 + $0x368] ss:$12 sps:$4 sm:$0xff]  }
  0xb6   : > { %v481_v15 = vld [vmem:[%s15520_s24 + $0x248] sm:$0xff]  ;;  %v498_v16 = vld [vmem:[%s15520_s24 + $0x2d0] sm:$0xff] }
  0xb7   : > { %3948 = vmatmul.mubr.bf16.gmra.mrb[24].mxu1 %v15756_v27  ;;  %3271 = vmatpush1.bf16.msra.mxu0 %v13579_v28  ;;  %v13624_v28 = vld [vmem:[%s20026_s1 + $0x440] ss:$12 sps:$4 sm:$0xff]  }
  0xb8   : > { %12718 = vmatpush3.bf16.msra.mxu1 %v13580_v29  ;;  %3272 = vmatprep.subr.bf16.mxu0 %v13581_v30  ;;  %v13621_v29 = vld [vmem:[%s20026_s1 + $0x228] ss:$12 sps:$4 sm:$0xff]  }
  0xb9   : > { %12719 = vmatprep.subr.bf16.mxu1 %v13583_v31  ;;  %3955 = vmatprep.mubr.bf16.mxu1 %v15779_v37  ;;  %v513_v30 = vld [vmem:[%s15520_s24 + $0x348] sm:$0xff]  ;;  %v530_v31 = vld [vmem:[%s15520_s24 + $0x3d0] sm:$0xff] }
  0xba   : > { %v15922_v33 = vpack.c.bf16 %v530_v31, %v513_v30  ;;  %v13664_v30 = vld [vmem:[%s20026_s1 + $0x5c0] ss:$12 sps:$4 sm:$0xff]   ;;  %v13661_v31 = vld [vmem:[%s20026_s1 + $0x2e8] ss:$12 sps:$4 sm:$0xff]  }
  0xbb   : > { %3273 = vmatpush1.bf16.msra.mxu0 %v13584_v32  ;;  %v13625_v32 = vld [vmem:[%s20026_s1 + $0x380] ss:$12 sps:$4 sm:$0xff]  }
  0xbc   : > { %12720 = vmatpush3.bf16.msra.mxu1 %v13585_v35  ;;  %3315 = vmatprep.subr.bf16.mxu0 %v13588_v38  ;;  %v512_v35 = vld [vmem:[%s15520_s24 + $0x340] sm:$0xff] }
  0xbd   : > { %12721 = vmatprep.subr.bf16.mxu1 %v13589_v41  ;;  %v13629_v38 = vld [vmem:[%s20026_s1 + $0x458] ss:$12 sps:$4 sm:$0xff]  }
  0xbe   : > { %3275 = vmatmul.mubr.bf16.vlgmr.msra.gmra.mrb[0].mxu0 %v15688_v60  ;;  %v13603_v60 = vld [vmem:[%s20026_s1 + $0x1cc] ss:$12 sps:$4 sm:$0xff]  }
  0xbf   : > { %3956 = vmatmul.mubr.bf16.gmra.mrb[28].mxu1 %v15793_v43  ;;  %3316 = vmatpush1.bf16.msra.mxu0 %v13586_v42  ;;  %v13630_v41 = vld [vmem:[%s20026_s1 + $0x398] ss:$12 sps:$4 sm:$0xff]   ;;  %v13633_v42 = vld [vmem:[%s20026_s1 + $0x25c] ss:$12 sps:$4 sm:$0xff]  }
  0xc0   : > { %12722 = vmatpush3.bf16.msra.mxu1 %v13590_v44  ;;  %3317 = vmatprep.subr.bf16.mxu0 %v13593_v45  ;;  %v13631_v44 = vld [vmem:[%s20026_s1 + $0x258] ss:$12 sps:$4 sm:$0xff]   ;;  %v413_v45 = vld [vmem:[%s15520_s24 + $0x28] sm:$0xff] }
  0xc1   : > { %12723 = vmatprep.subr.bf16.mxu1 %v13594_v47  ;;  %3996 = vmatprep.mubr.bf16.mxu1 %v15814_v52  ;;  %v430_v47 = vld [vmem:[%s15520_s24 + $0xb0] sm:$0xff] }
  0xc2   : > { %3284 = vmatprep.mubr.bf16.mxu0 %v15711_v6  ;;  %v461_v6 = vld [vmem:[%s15520_s24 + $0x1a8] sm:$0xff]  ;;  %v15957_v49 = vpack.c.bf16 %v430_v47, %v413_v45  ;;  %v13670_v45 = vld [vmem:[%s20026_s1 + $0x518] ss:$12 sps:$4 sm:$0xff]  }
  0xc3   : > { %3318 = vmatpush1.bf16.msra.mxu0 %v13591_v48  ;;  %v15865_v9 = vpack.c.bf16 %v461_v6, %v444_v5  ;;  %v13635_v48 = vld [vmem:[%s20026_s1 + $0x3b0] ss:$12 sps:$4 sm:$0xff]   ;;  %v13649_v6 = vld [vmem:[%s20026_s1 + $0x578] ss:$12 sps:$4 sm:$0xff]  }
  0xc4   : > { %12724 = vmatpush3.bf16.msra.mxu1 %v13595_v51  ;;  %3319 = vmatprep.subr.bf16.mxu0 %v13598_v53  ;;  %v412_v51 = vld [vmem:[%s15520_s24 + $0x20] sm:$0xff]  ;;  %v13639_v53 = vld [vmem:[%s20026_s1 + $0x548] ss:$12 sps:$4 sm:$0xff]   ;;  %v463_v5 = vld [vmem:[%s15520_s24 + $0x1b8] sm:$0xff] }
  0xc5   : > { %12749 = vmatprep.subr.bf16.mxu1 %v13599_v56  ;;  %v13640_v56 = vld [vmem:[%s20026_s1 + $0x488] ss:$12 sps:$4 sm:$0xff]  }
  0xc6   : > { %3285 = vmatmul.mubr.bf16.gmra.mrb[4].mxu0 %v15722_v11  ;;  %v13613_v11 = vld [vmem:[%s20026_s1 + $0x1fc] ss:$12 sps:$4 sm:$0xff]  }
  0xc7   : > { %3997 = vmatmul.mubr.bf16.vlgmr.msra.gmra.mrb[32].mxu1 %v15829_v58  ;;  %3320 = vmatpush1.bf16.msra.mxu0 %v13596_v57  ;;  %v13643_v57 = vld [vmem:[%s20026_s1 + $0x28c] ss:$12 sps:$4 sm:$0xff]   ;;  %v13673_v47 = vld [vmem:[%s20026_s1 + $0x31c] ss:$12 sps:$4 sm:$0xff]  }
  0xc8   : > { %12750 = vmatpush3.bf16.msra.mxu1 %v13600_v59  ;;  %3321 = vmatprep.subr.bf16.mxu0 %v13603_v60  ;;  %v13644_v59 = vld [vmem:[%s20026_s1 + $0x560] ss:$12 sps:$4 sm:$0xff]   ;;  %v13641_v60 = vld [vmem:[%s20026_s1 + $0x288] ss:$12 sps:$4 sm:$0xff]  }
  0xc9   : > { %12751 = vmatprep.subr.bf16.mxu1 %v13604_v61  ;;  %4004 = vmatprep.mubr.bf16.mxu1 %v15850_v3  ;;  %v447_v61 = vld [vmem:[%s15520_s24 + $0x138] sm:$0xff] }
  0xca   : > { %3294 = vmatprep.mubr.bf16.mxu0 %v15745_v21  ;;  %v495_v21 = vld [vmem:[%s15520_s24 + $0x2b8] sm:$0xff] }
  0xcb   : > { %3322 = vmatpush1.bf16.msra.mxu0 %v13601_v62  ;;  %v15901_v25 = vpack.c.bf16 %v495_v21, %v478_v20  ;;  %v464_v62 = vld [vmem:[%s15520_s24 + $0x1c0] sm:$0xff] }
  0xcc   : > { %12752 = vmatpush3.bf16.msra.mxu1 %v13605_v2  ;;  %3323 = vmatprep.subr.bf16.mxu0 %v13608_v4  ;;  %v15991_v1 = vpack.c.bf16 %v464_v62, %v447_v61  ;;  %v13648_v2 = vld [vmem:[%s20026_s1 + $0x2a4] ss:$12 sps:$4 sm:$0xff]   ;;  %v13658_v20 = vld [vmem:[%s20026_s1 + $0x2d4] ss:$12 sps:$4 sm:$0xff]  }
  0xcd   : > { %12753 = vmatprep.subr.bf16.mxu1 %v13609_v7  ;;  %v446_v4 = vld [vmem:[%s15520_s24 + $0x130] sm:$0xff]  ;;  %v13646_v7 = vld [vmem:[%s20026_s1 + $0x2a0] ss:$12 sps:$4 sm:$0xff]  }
  0xce   : > { %3295 = vmatmul.mubr.bf16.gmra.mrb[8].mxu0 %v15756_v27  ;;  %v13623_v27 = vld [vmem:[%s20026_s1 + $0x22c] ss:$12 sps:$4 sm:$0xff]   ;;  %v480_v21 = vld [vmem:[%s15520_s24 + $0x240] sm:$0xff]  ;;  %v13680_v62 = vld [vmem:[%s20026_s1 + $0x608] ss:$12 sps:$4 sm:$0xff]  }
  0xcf   : > { %4005 = vmatmul.mubr.bf16.gmra.mrb[36].mxu1 %v15865_v9  ;;  %3324 = vmatpush1.bf16.msra.mxu0 %v13606_v8  ;;  %v16005_v8 = vpack.c.bf16 %v463_v5, %v446_v4  ;;  %v449_v4 = vld [vmem:[%s15520_s24 + $0x148] sm:$0xff]  ;;  %v466_v5 = vld [vmem:[%s15520_s24 + $0x1d0] sm:$0xff] }
  0xd0   : > { %12754 = vmatpush3.bf16.msra.mxu1 %v13610_v10  ;;  %3325 = vmatprep.subr.bf16.mxu0 %v13613_v11  ;;  %v13650_v10 = vld [vmem:[%s20026_s1 + $0x4b8] ss:$12 sps:$4 sm:$0xff]   ;;  %v13653_v11 = vld [vmem:[%s20026_s1 + $0x2bc] ss:$12 sps:$4 sm:$0xff]  }
  0xd1   : > { %12755 = vmatprep.subr.bf16.mxu1 %v13614_v13  ;;  %4012 = vmatprep.mubr.bf16.mxu1 %v15886_v18  ;;  %v13654_v13 = vld [vmem:[%s20026_s1 + $0x590] ss:$12 sps:$4 sm:$0xff]  }
  0xd2   : > { %3304 = vmatprep.mubr.bf16.mxu0 %v15779_v37  ;;  %v529_v37 = vld [vmem:[%s15520_s24 + $0x3c8] sm:$0xff] }
  0xd3   : > { %3326 = vmatpush1.bf16.msra.mxu0 %v13611_v14  ;;  %v15937_v40 = vpack.c.bf16 %v529_v37, %v512_v35  ;;  %v13651_v14 = vld [vmem:[%s20026_s1 + $0x2b8] ss:$12 sps:$4 sm:$0xff]   ;;  %v13665_v35 = vld [vmem:[%s20026_s1 + $0x500] ss:$12 sps:$4 sm:$0xff]  }
  0xd4   : > { %12756 = vmatpush3.bf16.msra.mxu1 %v13615_v17  ;;  %3327 = vmatprep.subr.bf16.mxu0 %v13618_v19  ;;  %v13655_v17 = vld [vmem:[%s20026_s1 + $0x4d0] ss:$12 sps:$4 sm:$0xff]   ;;  %v16025_v19 = vpack.c.bf16 %v498_v16, %v481_v15  ;;  %v13690_v16 = vld [vmem:[%s20026_s1 + $0x638] ss:$12 sps:$4 sm:$0xff]  }
  0xd5   : > { %12757 = vmatprep.subr.bf16.mxu1 %v13619_v22  ;;  %v497_v22 = vld [vmem:[%s15520_s24 + $0x2c8] sm:$0xff] }
  0xd6   : > { %3305 = vmatmul.mubr.bf16.gmra.mrb[12].mxu0 %v15793_v43  ;;  %v13634_v43 = vld [vmem:[%s20026_s1 + $0x470] ss:$12 sps:$4 sm:$0xff]  }
  0xd7   : > { %4013 = vmatmul.mubr.bf16.gmra.mrb[40].mxu1 %v15901_v25  ;;  %3328 = vmatpush1.bf16.msra.mxu0 %v13616_v24  ;;  %v13659_v24 = vld [vmem:[%s20026_s1 + $0x5a8] ss:$12 sps:$4 sm:$0xff]  }
  0xd8   : > { %12758 = vmatpush3.bf16.msra.mxu1 %v13620_v26  ;;  %3329 = vmatprep.subr.bf16.mxu0 %v13623_v27  ;;  %v13656_v26 = vld [vmem:[%s20026_s1 + $0x2d0] ss:$12 sps:$4 sm:$0xff]   ;;  %v16039_v27 = vpack.c.bf16 %v497_v22, %v480_v21  ;;  %v500_v22 = vld [vmem:[%s15520_s24 + $0x2e0] sm:$0xff] }
  0xd9   : > { %12759 = vmatprep.subr.bf16.mxu1 %v13624_v28  ;;  %4020 = vmatprep.mubr.bf16.mxu1 %v15922_v33  ;;  %v13660_v28 = vld [vmem:[%s20026_s1 + $0x4e8] ss:$12 sps:$4 sm:$0xff]   ;;  %v483_v21 = vld [vmem:[%s15520_s24 + $0x258] sm:$0xff] }
  0xda   : > { %3347 = vmatprep.mubr.bf16.mxu0 %v15814_v52  ;;  %v429_v52 = vld [vmem:[%s15520_s24 + $0xa8] sm:$0xff] }
  0xdb   : > { %3330 = vmatpush1.bf16.msra.mxu0 %v13621_v29  ;;  %v15971_v55 = vpack.c.bf16 %v429_v52, %v412_v51  ;;  %v13663_v29 = vld [vmem:[%s20026_s1 + $0x2ec] ss:$12 sps:$4 sm:$0xff]   ;;  %v432_v52 = vld [vmem:[%s15520_s24 + $0xc0] sm:$0xff] }
  0xdc   : > { %12760 = vmatpush3.bf16.msra.mxu1 %v13625_v32  ;;  %3331 = vmatprep.subr.bf16.mxu0 %v13628_v34  ;;  %v515_v32 = vld [vmem:[%s15520_s24 + $0x358] sm:$0xff]  ;;  %v532_v34 = vld [vmem:[%s15520_s24 + $0x3e0] sm:$0xff] }
  0xdd   : > { %12761 = vmatprep.subr.bf16.mxu1 %v13629_v38  ;;  %v16059_v37 = vpack.c.bf16 %v532_v34, %v515_v32  ;;  %v13668_v38 = vld [vmem:[%s20026_s1 + $0x304] ss:$12 sps:$4 sm:$0xff]   ;;  %v415_v51 = vld [vmem:[%s15520_s24 + $0x38] sm:$0xff]  ;;  %v13700_v34 = vld [vmem:[%s20026_s1 + $0x668] ss:$12 sps:$4 sm:$0xff]  }
  0xdf   : > { %4021 = vmatmul.mubr.bf16.gmra.mrb[44].mxu1 %v15937_v40  ;;  %3332 = vmatpush1.bf16.msra.mxu0 %v13626_v39  ;;  %v514_v39 = vld [vmem:[%s15520_s24 + $0x350] sm:$0xff] }
  0xe0   : > { %12762 = vmatpush3.bf16.msra.mxu1 %v13630_v41  ;;  %3333 = vmatprep.subr.bf16.mxu0 %v13633_v42  ;;  %v531_v41 = vld [vmem:[%s15520_s24 + $0x3d8] sm:$0xff] }
  0xe1   : > { %12763 = vmatprep.subr.bf16.mxu1 %v13634_v43  ;;  %4061 = vmatprep.mubr.bf16.mxu1 %v15957_v49  ;;  %v13669_v42 = vld [vmem:[%s20026_s1 + $0x5d8] ss:$12 sps:$4 sm:$0xff]   ;;  %v13666_v43 = vld [vmem:[%s20026_s1 + $0x300] ss:$12 sps:$4 sm:$0xff]  }
  0xe3   : > { %3334 = vmatpush1.bf16.msra.mxu0 %v13631_v44  ;;  %v16073_v44 = vpack.c.bf16 %v531_v41, %v514_v39  ;;  %v517_v39 = vld [vmem:[%s15520_s24 + $0x368] sm:$0xff]  ;;  %v534_v41 = vld [vmem:[%s15520_s24 + $0x3f0] sm:$0xff] }
  0xe4   : > { %12764 = vmatpush3.bf16.msra.mxu1 %v13635_v48  ;;  %3335 = vmatprep.subr.bf16.mxu0 %v13638_v50  ;;  %v13674_v48 = vld [vmem:[%s20026_s1 + $0x5f0] ss:$12 sps:$4 sm:$0xff]   ;;  %v13671_v50 = vld [vmem:[%s20026_s1 + $0x318] ss:$12 sps:$4 sm:$0xff]  }
  0xe5   : > { %12789 = vmatprep.subr.bf16.mxu1 %v13639_v53  ;;  %v13675_v53 = vld [vmem:[%s20026_s1 + $0x530] ss:$12 sps:$4 sm:$0xff]  }
  0xe7   : > { %4062 = vmatmul.mubr.bf16.vlgmr.msra.gmra.mrb[48].mxu1 %v15971_v55  ;;  %3336 = vmatpush1.bf16.msra.mxu0 %v13636_v54  ;;  %v16094_v54 = vpack.c.bf16 %v432_v52, %v415_v51  ;;  %v13710_v52 = vld [vmem:[%s20026_s1 + $0x698] ss:$12 sps:$4 sm:$0xff]  }
  0xe8   : > { %12790 = vmatpush3.bf16.msra.mxu1 %v13640_v56  ;;  %3337 = vmatprep.subr.bf16.mxu0 %v13643_v57  ;;  %v13678_v56 = vld [vmem:[%s20026_s1 + $0x334] ss:$12 sps:$4 sm:$0xff]  }
  0xe9   : > { %12791 = vmatprep.subr.bf16.mxu1 %v13644_v59  ;;  %4069 = vmatprep.mubr.bf16.mxu1 %v15991_v1  ;;  %v414_v57 = vld [vmem:[%s15520_s24 + $0x30] sm:$0xff]  ;;  %v431_v59 = vld [vmem:[%s15520_s24 + $0xb8] sm:$0xff] }
  0xea   : > { %v16109_v61 = vpack.c.bf16 %v431_v59, %v414_v57  ;;  %v417_v57 = vld [vmem:[%s15520_s24 + $0x48] sm:$0xff]  ;;  %v434_v59 = vld [vmem:[%s15520_s24 + $0xd0] sm:$0xff] }
  0xeb   : > { %3338 = vmatpush1.bf16.msra.mxu0 %v13641_v60  ;;  %v13676_v60 = vld [vmem:[%s20026_s1 + $0x330] ss:$12 sps:$4 sm:$0xff]  }
  0xec   : > { %12792 = vmatpush3.bf16.msra.mxu1 %v13645_v63  ;;  %3339 = vmatprep.subr.bf16.mxu0 %v13648_v2  ;;  %v13683_v63 = vld [vmem:[%s20026_s1 + $0x34c] ss:$12 sps:$4 sm:$0xff]   ;;  %v13681_v2 = vld [vmem:[%s20026_s1 + $0x348] ss:$12 sps:$4 sm:$0xff]  }
  0xed   : > { %12793 = vmatprep.subr.bf16.mxu1 %v13649_v6  ;;  %v13685_v6 = vld [vmem:[%s20026_s1 + $0x620] ss:$12 sps:$4 sm:$0xff]  }
  0xef   : > { %4070 = vmatmul.mubr.bf16.gmra.mrb[52].mxu1 %v16005_v8  ;;  %3340 = vmatpush1.bf16.msra.mxu0 %v13646_v7  ;;  %v16130_v7 = vpack.c.bf16 %v466_v5, %v449_v4  ;;  %v13716_v4 = vld [vmem:[%s20026_s1 + $0x3f0] ss:$12 sps:$4 sm:$0xff]  }
  0xf0   : > { %12794 = vmatpush3.bf16.msra.mxu1 %v13650_v10  ;;  %3341 = vmatprep.subr.bf16.mxu0 %v13653_v11  ;;  %v13688_v10 = vld [vmem:[%s20026_s1 + $0x364] ss:$12 sps:$4 sm:$0xff]  }
  0xf1   : > { %12795 = vmatprep.subr.bf16.mxu1 %v13654_v13  ;;  %4077 = vmatprep.mubr.bf16.mxu1 %v16025_v19  ;;  %v448_v11 = vld [vmem:[%s15520_s24 + $0x140] sm:$0xff]  ;;  %v465_v13 = vld [vmem:[%s15520_s24 + $0x1c8] sm:$0xff] }
  0xf2   : > { %v16145_v15 = vpack.c.bf16 %v465_v13, %v448_v11  ;;  %v13724_v11 = vld [vmem:[%s20026_s1 + $0x860] ss:$12 sps:$4 sm:$0xff]   ;;  %v13721_v13 = vld [vmem:[%s20026_s1 + $0x408] ss:$12 sps:$4 sm:$0xff]  }
  0xf3   : > { %3342 = vmatpush1.bf16.msra.mxu0 %v13651_v14  ;;  %v13686_v14 = vld [vmem:[%s20026_s1 + $0x360] ss:$12 sps:$4 sm:$0xff]  }
  0xf4   : > { %12796 = vmatpush3.bf16.msra.mxu1 %v13655_v17  ;;  %3343 = vmatprep.subr.bf16.mxu0 %v13658_v20  ;;  %v13693_v17 = vld [vmem:[%s20026_s1 + $0x37c] ss:$12 sps:$4 sm:$0xff]   ;;  %v13691_v20 = vld [vmem:[%s20026_s1 + $0x378] ss:$12 sps:$4 sm:$0xff]  }
  0xf5   : > { %12797 = vmatprep.subr.bf16.mxu1 %v13659_v24  ;;  %v13695_v24 = vld [vmem:[%s20026_s1 + $0x650] ss:$12 sps:$4 sm:$0xff]  }
  0xf7   : > { %4078 = vmatmul.mubr.bf16.gmra.mrb[56].mxu1 %v16039_v27  ;;  %3344 = vmatpush1.bf16.msra.mxu0 %v13656_v26  ;;  %v16166_v26 = vpack.c.bf16 %v500_v22, %v483_v21  ;;  %v467_v21 = vld [vmem:[%s15520_s24 + $0x1d8] sm:$0xff] }
  0xf8   : > { %12798 = vmatpush3.bf16.msra.mxu1 %v13660_v28  ;;  %3345 = vmatprep.subr.bf16.mxu0 %v13663_v29  ;;  %v13698_v28 = vld [vmem:[%s20026_s1 + $0x394] ss:$12 sps:$4 sm:$0xff]   ;;  %v13729_v22 = vld [vmem:[%s20026_s1 + $0x878] ss:$12 sps:$4 sm:$0xff]  }
  0xf9   : > { %12799 = vmatprep.subr.bf16.mxu1 %v13664_v30  ;;  %4085 = vmatprep.mubr.bf16.mxu1 %v16059_v37  ;;  %v482_v29 = vld [vmem:[%s15520_s24 + $0x250] sm:$0xff]  ;;  %v499_v30 = vld [vmem:[%s15520_s24 + $0x2d8] sm:$0xff] }
  0xfa   : > { %v16181_v32 = vpack.c.bf16 %v499_v30, %v482_v29  ;;  %v13730_v29 = vld [vmem:[%s20026_s1 + $0x7b8] ss:$12 sps:$4 sm:$0xff]   ;;  %v13733_v30 = vld [vmem:[%s20026_s1 + $0x43c] ss:$12 sps:$4 sm:$0xff]  }
  0xfb   : > { %3346 = vmatpush1.bf16.msra.mxu0 %v13661_v31  ;;  %v13696_v31 = vld [vmem:[%s20026_s1 + $0x390] ss:$12 sps:$4 sm:$0xff]  }
  0xfc   : > { %12800 = vmatpush3.bf16.msra.mxu1 %v13665_v35  ;;  %3388 = vmatprep.subr.bf16.mxu0 %v13668_v38  ;;  %v13703_v35 = vld [vmem:[%s20026_s1 + $0x3ac] ss:$12 sps:$4 sm:$0xff]   ;;  %v13701_v38 = vld [vmem:[%s20026_s1 + $0x3a8] ss:$12 sps:$4 sm:$0xff]  }
  0xfd   : > { %12801 = vmatprep.subr.bf16.mxu1 %v13669_v42  ;;  %v13705_v42 = vld [vmem:[%s20026_s1 + $0x680] ss:$12 sps:$4 sm:$0xff]  }
  0xfe   : > { %3348 = vmatmul.mubr.bf16.vlgmr.msra.gmra.mrb[0].mxu0 %v15829_v58  ;;  %v13679_v58 = vld [vmem:[%s20026_s1 + $0x6c8] ss:$12 sps:$4 sm:$0xff]  }
  0xff   : > { %4086 = vmatmul.mubr.bf16.gmra.mrb[60].mxu1 %v16073_v44  ;;  %3389 = vmatpush1.bf16.msra.mxu0 %v13666_v43  ;;  %v16202_v43 = vpack.c.bf16 %v534_v41, %v517_v39  ;;  %v13738_v39 = vld [vmem:[%s20026_s1 + $0x454] ss:$12 sps:$4 sm:$0xff]  }
 0x100   : > { %12802 = vmatpush3.bf16.msra.mxu1 %v13670_v45  ;;  %3390 = vmatprep.subr.bf16.mxu0 %v13673_v47  ;;  %v13708_v45 = vld [vmem:[%s20026_s1 + $0x3c4] ss:$12 sps:$4 sm:$0xff]  }
 0x101   : > { %12803 = vmatprep.subr.bf16.mxu1 %v13674_v48  ;;  %4126 = vmatprep.mubr.bf16.mxu1 %v16094_v54  ;;  %v516_v47 = vld [vmem:[%s15520_s24 + $0x360] sm:$0xff]  ;;  %v533_v48 = vld [vmem:[%s15520_s24 + $0x3e8] sm:$0xff] }
 0x102   : > { %3357 = vmatprep.mubr.bf16.mxu0 %v15850_v3  ;;  %v13684_v3 = vld [vmem:[%s20026_s1 + $0x6e0] ss:$12 sps:$4 sm:$0xff]   ;;  %v16217_v51 = vpack.c.bf16 %v533_v48, %v516_v47  ;;  %v13736_v47 = vld [vmem:[%s20026_s1 + $0x450] ss:$12 sps:$4 sm:$0xff]  }
 0x103   : > { %3391 = vmatpush1.bf16.msra.mxu0 %v13671_v50  ;;  %v13706_v50 = vld [vmem:[%s20026_s1 + $0x3c0] ss:$12 sps:$4 sm:$0xff]  }
 0x104   : > { %12804 = vmatpush3.bf16.msra.mxu1 %v13675_v53  ;;  %3392 = vmatprep.subr.bf16.mxu0 %v13678_v56  ;;  %v13713_v53 = vld [vmem:[%s20026_s1 + $0x3dc] ss:$12 sps:$4 sm:$0xff]   ;;  %v13711_v56 = vld [vmem:[%s20026_s1 + $0x3d8] ss:$12 sps:$4 sm:$0xff]  }
 0x105   : > { %12829 = vmatprep.subr.bf16.mxu1 %v13679_v58  ;;  %v13715_v58 = vld [vmem:[%s20026_s1 + $0x6b0] ss:$12 sps:$4 sm:$0xff]   ;;  %v484_v41 = vld [vmem:[%s15520_s24 + $0x260] sm:$0xff] }
 0x106   : > { %3358 = vmatmul.mubr.bf16.gmra.mrb[4].mxu0 %v15865_v9  ;;  %v13689_v9 = vld [vmem:[%s20026_s1 + $0x6f8] ss:$12 sps:$4 sm:$0xff]  }
 0x107   : > { %4127 = vmatmul.mubr.bf16.vlgmr.msra.gmra.mrb[64].mxu1 %v16109_v61  ;;  %3393 = vmatpush1.bf16.msra.mxu0 %v13676_v60  ;;  %v16237_v60 = vpack.c.bf16 %v434_v59, %v417_v57  ;;  %v13745_v57 = vld [vmem:[%s20026_s1 + $0x800] ss:$12 sps:$4 sm:$0xff]  }
 0x108   : > { %12830 = vmatpush3.bf16.msra.mxu1 %v13680_v62  ;;  %3394 = vmatprep.subr.bf16.mxu0 %v13683_v63  ;;  %v13718_v62 = vld [vmem:[%s20026_s1 + $0x3f4] ss:$12 sps:$4 sm:$0xff]  }
 0x109   : > { %12831 = vmatprep.subr.bf16.mxu1 %v13684_v3  ;;  %4134 = vmatprep.mubr.bf16.mxu1 %v16130_v7  ;;  %v416_v63 = vld [vmem:[%s15520_s24 + $0x40] sm:$0xff]  ;;  %v433_v3 = vld [vmem:[%s15520_s24 + $0xc8] sm:$0xff] }
 0x10a   : > { %3367 = vmatprep.mubr.bf16.mxu0 %v15886_v18  ;;  %v13694_v18 = vld [vmem:[%s20026_s1 + $0x710] ss:$12 sps:$4 sm:$0xff]   ;;  %v16251_v5 = vpack.c.bf16 %v433_v3, %v416_v63  ;;  %v13749_v3 = vld [vmem:[%s20026_s1 + $0x8d8] ss:$12 sps:$4 sm:$0xff]  }
 0x10b   : > { %3395 = vmatpush1.bf16.msra.mxu0 %v13681_v2  ;;  %v13719_v2 = vld [vmem:[%s20026_s1 + $0x848] ss:$12 sps:$4 sm:$0xff]   ;;  %v535_v63 = vld [vmem:[%s15520_s24 + $0x3f8] sm:$0xff] }
 0x10c   : > { %12832 = vmatpush3.bf16.msra.mxu1 %v13685_v6  ;;  %3396 = vmatprep.subr.bf16.mxu0 %v13688_v10  ;;  %v13720_v6 = vld [vmem:[%s20026_s1 + $0x788] ss:$12 sps:$4 sm:$0xff]   ;;  %v13723_v10 = vld [vmem:[%s20026_s1 + $0x40c] ss:$12 sps:$4 sm:$0xff]  }
 0x10d   : > { %12833 = vmatprep.subr.bf16.mxu1 %v13689_v9  ;;  %v451_v9 = vld [vmem:[%s15520_s24 + $0x158] sm:$0xff] }
 0x10e   : > { %3368 = vmatmul.mubr.bf16.gmra.mrb[8].mxu0 %v15901_v25  ;;  %v13699_v25 = vld [vmem:[%s20026_s1 + $0x728] ss:$12 sps:$4 sm:$0xff]  }
 0x10f   : > { %4135 = vmatmul.mubr.bf16.gmra.mrb[68].mxu1 %v16145_v15  ;;  %3397 = vmatpush1.bf16.msra.mxu0 %v13686_v14  ;;  %v468_v14 = vld [vmem:[%s15520_s24 + $0x1e0] sm:$0xff] }
 0x110   : > { %12834 = vmatpush3.bf16.msra.mxu1 %v13690_v16  ;;  %3398 = vmatprep.subr.bf16.mxu0 %v13693_v17  ;;  %v13725_v16 = vld [vmem:[%s20026_s1 + $0x7a0] ss:$12 sps:$4 sm:$0xff]   ;;  %v16271_v17 = vpack.c.bf16 %v468_v14, %v451_v9  ;;  %v419_v9 = vld [vmem:[%s15520_s24 + $0x58] sm:$0xff] }
 0x111   : > { %12835 = vmatprep.subr.bf16.mxu1 %v13694_v18  ;;  %4142 = vmatprep.mubr.bf16.mxu1 %v16166_v26  ;;  %v13728_v18 = vld [vmem:[%s20026_s1 + $0x424] ss:$12 sps:$4 sm:$0xff]  }
 0x112   : > { %3377 = vmatprep.mubr.bf16.mxu0 %v15922_v33  ;;  %v13704_v33 = vld [vmem:[%s20026_s1 + $0x740] ss:$12 sps:$4 sm:$0xff]  }
 0x113   : > { %3399 = vmatpush1.bf16.msra.mxu0 %v13691_v20  ;;  %v450_v20 = vld [vmem:[%s15520_s24 + $0x150] sm:$0xff]  ;;  %v436_v14 = vld [vmem:[%s15520_s24 + $0xe0] sm:$0xff] }
 0x114   : > { %12836 = vmatpush3.bf16.msra.mxu1 %v13695_v24  ;;  %3400 = vmatprep.subr.bf16.mxu0 %v13698_v28  ;;  %v13726_v24 = vld [vmem:[%s20026_s1 + $0x420] ss:$12 sps:$4 sm:$0xff]   ;;  %v16285_v28 = vpack.c.bf16 %v467_v21, %v450_v20  ;;  %v418_v21 = vld [vmem:[%s15520_s24 + $0x50] sm:$0xff] }
 0x115   : > { %12837 = vmatprep.subr.bf16.mxu1 %v13699_v25  ;;  %v13734_v25 = vld [vmem:[%s20026_s1 + $0x890] ss:$12 sps:$4 sm:$0xff]   ;;  %v13758_v20 = vld [vmem:[%s20026_s1 + $0x4b4] ss:$12 sps:$4 sm:$0xff]  }
 0x116   : > { %3378 = vmatmul.mubr.bf16.gmra.mrb[12].mxu0 %v15937_v40  ;;  %v13709_v40 = vld [vmem:[%s20026_s1 + $0x758] ss:$12 sps:$4 sm:$0xff]  }
 0x117   : > { %4143 = vmatmul.mubr.bf16.gmra.mrb[72].mxu1 %v16181_v32  ;;  %3401 = vmatpush1.bf16.msra.mxu0 %v13696_v31  ;;  %v13731_v31 = vld [vmem:[%s20026_s1 + $0x438] ss:$12 sps:$4 sm:$0xff]  }
 0x118   : > { %12838 = vmatpush3.bf16.msra.mxu1 %v13700_v34  ;;  %3402 = vmatprep.subr.bf16.mxu0 %v13703_v35  ;;  %v485_v34 = vld [vmem:[%s15520_s24 + $0x268] sm:$0xff]  ;;  %v502_v35 = vld [vmem:[%s15520_s24 + $0x2f0] sm:$0xff] }
 0x119   : > { %12839 = vmatprep.subr.bf16.mxu1 %v13704_v33  ;;  %4150 = vmatprep.mubr.bf16.mxu1 %v16202_v43  ;;  %v13735_v33 = vld [vmem:[%s20026_s1 + $0x7d0] ss:$12 sps:$4 sm:$0xff]  }
 0x11a   : > { %3420 = vmatprep.mubr.bf16.mxu0 %v15957_v49  ;;  %v13714_v49 = vld [vmem:[%s20026_s1 + $0x770] ss:$12 sps:$4 sm:$0xff]  }
 0x11b   : > { %3403 = vmatpush1.bf16.msra.mxu0 %v13701_v38  ;;  %v16305_v38 = vpack.c.bf16 %v502_v35, %v485_v34  ;;  %v453_v34 = vld [vmem:[%s15520_s24 + $0x168] sm:$0xff]  ;;  %v470_v35 = vld [vmem:[%s15520_s24 + $0x1f0] sm:$0xff] }
 0x11c   : > { %12840 = vmatpush3.bf16.msra.mxu1 %v13705_v42  ;;  %3404 = vmatprep.subr.bf16.mxu0 %v13708_v45  ;;  %v501_v42 = vld [vmem:[%s15520_s24 + $0x2e8] sm:$0xff] }
 0x11d   : > { %12841 = vmatprep.subr.bf16.mxu1 %v13709_v40  ;;  %v13739_v45 = vld [vmem:[%s20026_s1 + $0x8a8] ss:$12 sps:$4 sm:$0xff]   ;;  %v16319_v48 = vpack.c.bf16 %v501_v42, %v484_v41  ;;  %v13768_v41 = vld [vmem:[%s20026_s1 + $0x4e4] ss:$12 sps:$4 sm:$0xff]  }
 0x11e   : > { %v13740_v40 = vld [vmem:[%s20026_s1 + $0x7e8] ss:$12 sps:$4 sm:$0xff]   ;;  %v452_v42 = vld [vmem:[%s15520_s24 + $0x160] sm:$0xff] }
 0x11f   : > { %4151 = vmatmul.mubr.bf16.gmra.mrb[76].mxu1 %v16217_v51  ;;  %3405 = vmatpush1.bf16.msra.mxu0 %v13706_v50  ;;  %v13743_v50 = vld [vmem:[%s20026_s1 + $0x46c] ss:$12 sps:$4 sm:$0xff]  }
 0x120   : > { %12842 = vmatpush3.bf16.msra.mxu1 %v13710_v52  ;;  %3406 = vmatprep.subr.bf16.mxu0 %v13713_v53  ;;  %v13744_v52 = vld [vmem:[%s20026_s1 + $0x8c0] ss:$12 sps:$4 sm:$0xff]   ;;  %v13741_v53 = vld [vmem:[%s20026_s1 + $0x468] ss:$12 sps:$4 sm:$0xff]  }
 0x121   : > { %12843 = vmatprep.subr.bf16.mxu1 %v13714_v49  ;;  %4191 = vmatprep.mubr.bf16.mxu1 %v16237_v60  ;;  %v519_v49 = vld [vmem:[%s15520_s24 + $0x378] sm:$0xff] }
 0x123   : > { %3407 = vmatpush1.bf16.msra.mxu0 %v13711_v56  ;;  %v536_v56 = vld [vmem:[%s15520_s24 + $0x400] sm:$0xff] }
 0x124   : > { %12844 = vmatpush3.bf16.msra.mxu1 %v13715_v58  ;;  %3408 = vmatprep.subr.bf16.mxu0 %v13718_v62  ;;  %v16339_v59 = vpack.c.bf16 %v536_v56, %v519_v49  ;;  %v13748_v58 = vld [vmem:[%s20026_s1 + $0x484] ss:$12 sps:$4 sm:$0xff]   ;;  %v487_v49 = vld [vmem:[%s15520_s24 + $0x278] sm:$0xff] }
 0x125   : > { %12869 = vmatprep.subr.bf16.mxu1 %v13719_v2  ;;  %v518_v62 = vld [vmem:[%s15520_s24 + $0x370] sm:$0xff]  ;;  %v13746_v2 = vld [vmem:[%s20026_s1 + $0x480] ss:$12 sps:$4 sm:$0xff]  }
 0x126   : > { %v504_v56 = vld [vmem:[%s15520_s24 + $0x300] sm:$0xff] }
 0x127   : > { %4192 = vmatmul.mubr.bf16.vlgmr.msra.gmra.mrb[80].mxu1 %v16251_v5  ;;  %3409 = vmatpush1.bf16.msra.mxu0 %v13716_v4  ;;  %v16353_v4 = vpack.c.bf16 %v535_v63, %v518_v62  ;;  %v13778_v62 = vld [vmem:[%s20026_s1 + $0x514] ss:$12 sps:$4 sm:$0xff]  }
 0x128   : > { %12870 = vmatpush3.bf16.msra.mxu1 %v13720_v6  ;;  %3410 = vmatprep.subr.bf16.mxu0 %v13723_v10  ;;  %v13750_v6 = vld [vmem:[%s20026_s1 + $0x818] ss:$12 sps:$4 sm:$0xff]   ;;  %v13753_v10 = vld [vmem:[%s20026_s1 + $0x49c] ss:$12 sps:$4 sm:$0xff]   ;;  %v486_v63 = vld [vmem:[%s15520_s24 + $0x270] sm:$0xff] }
 0x129   : > { %12871 = vmatprep.subr.bf16.mxu1 %v13724_v11  ;;  %4199 = vmatprep.mubr.bf16.mxu1 %v16271_v17  ;;  %v13754_v11 = vld [vmem:[%s20026_s1 + $0x8f0] ss:$12 sps:$4 sm:$0xff]  }
 0x12b   : > { %3411 = vmatpush1.bf16.msra.mxu0 %v13721_v13  ;;  %v13751_v13 = vld [vmem:[%s20026_s1 + $0x498] ss:$12 sps:$4 sm:$0xff]  }
 0x12c   : > { %12872 = vmatpush3.bf16.msra.mxu1 %v13725_v16  ;;  %3412 = vmatprep.subr.bf16.mxu0 %v13728_v18  ;;  %v13755_v16 = vld [vmem:[%s20026_s1 + $0x830] ss:$12 sps:$4 sm:$0xff]   ;;  %v16374_v18 = vpack.c.bf16 %v436_v14, %v419_v9  ;;  %v521_v9 = vld [vmem:[%s15520_s24 + $0x388] sm:$0xff] }
 0x12d   : > { %12873 = vmatprep.subr.bf16.mxu1 %v13729_v22  ;;  %v435_v22 = vld [vmem:[%s15520_s24 + $0xd8] sm:$0xff]  ;;  %v538_v14 = vld [vmem:[%s15520_s24 + $0x410] sm:$0xff] }
 0x12f   : > { %4200 = vmatmul.mubr.bf16.gmra.mrb[84].mxu1 %v16285_v28  ;;  %3413 = vmatpush1.bf16.msra.mxu0 %v13726_v24  ;;  %v13756_v24 = vld [vmem:[%s20026_s1 + $0x4b0] ss:$12 sps:$4 sm:$0xff]  }
 0x130   : > { %12874 = vmatpush3.bf16.msra.mxu1 %v13730_v29  ;;  %3414 = vmatprep.subr.bf16.mxu0 %v13733_v30  ;;  %v16389_v29 = vpack.c.bf16 %v435_v22, %v418_v21  ;;  %v13760_v30 = vld [vmem:[%s20026_s1 + $0x908] ss:$12 sps:$4 sm:$0xff]   ;;  %v13788_v21 = vld [vmem:[%s20026_s1 + $0x544] ss:$12 sps:$4 sm:$0xff]  }
 0x131   : > { %12875 = vmatprep.subr.bf16.mxu1 %v13734_v25  ;;  %4207 = vmatprep.mubr.bf16.mxu1 %v16305_v38  ;;  %v13763_v25 = vld [vmem:[%s20026_s1 + $0x4cc] ss:$12 sps:$4 sm:$0xff]   ;;  %v520_v22 = vld [vmem:[%s15520_s24 + $0x380] sm:$0xff] }
 0x133   : > { %3415 = vmatpush1.bf16.msra.mxu0 %v13731_v31  ;;  %v13761_v31 = vld [vmem:[%s20026_s1 + $0x4c8] ss:$12 sps:$4 sm:$0xff]  }
 0x134   : > { %12876 = vmatpush3.bf16.msra.mxu1 %v13735_v33  ;;  %3416 = vmatprep.subr.bf16.mxu0 %v13738_v39  ;;  %v13765_v33 = vld [vmem:[%s20026_s1 + $0x920] ss:$12 sps:$4 sm:$0xff]   ;;  %v16410_v39 = vpack.c.bf16 %v470_v35, %v453_v34  ;;  %v438_v35 = vld [vmem:[%s15520_s24 + $0xf0] sm:$0xff] }
 0x135   : > { %12877 = vmatprep.subr.bf16.mxu1 %v13739_v45  ;;  %v469_v45 = vld [vmem:[%s15520_s24 + $0x1e8] sm:$0xff] }
 0x136   : > { %v421_v34 = vld [vmem:[%s15520_s24 + $0x68] sm:$0xff] }
 0x137   : > { %4208 = vmatmul.mubr.bf16.gmra.mrb[88].mxu1 %v16319_v48  ;;  %3417 = vmatpush1.bf16.msra.mxu0 %v13736_v47  ;;  %v13766_v47 = vld [vmem:[%s20026_s1 + $0x4e0] ss:$12 sps:$4 sm:$0xff]  }
 0x138   : > { %12878 = vmatpush3.bf16.msra.mxu1 %v13740_v40  ;;  %3418 = vmatprep.subr.bf16.mxu0 %v13743_v50  ;;  %v16425_v40 = vpack.c.bf16 %v469_v45, %v452_v42  ;;  %v13770_v50 = vld [vmem:[%s20026_s1 + $0x938] ss:$12 sps:$4 sm:$0xff]   ;;  %v13798_v42 = vld [vmem:[%s20026_s1 + $0x574] ss:$12 sps:$4 sm:$0xff]  }
 0x139   : > { %12879 = vmatprep.subr.bf16.mxu1 %v13744_v52  ;;  %4215 = vmatprep.mubr.bf16.mxu1 %v16339_v59  ;;  %v13773_v52 = vld [vmem:[%s20026_s1 + $0x4fc] ss:$12 sps:$4 sm:$0xff]   ;;  %v420_v45 = vld [vmem:[%s15520_s24 + $0x60] sm:$0xff] }
 0x13b   : > { %3419 = vmatpush1.bf16.msra.mxu0 %v13741_v53  ;;  %v13771_v53 = vld [vmem:[%s20026_s1 + $0x4f8] ss:$12 sps:$4 sm:$0xff]  }
 0x13c   : > { %12880 = vmatpush3.bf16.msra.mxu1 %v13745_v57  ;;  %3461 = vmatprep.subr.bf16.mxu0 %v13748_v58  ;;  %v13775_v57 = vld [vmem:[%s20026_s1 + $0x950] ss:$12 sps:$4 sm:$0xff]   ;;  %v16446_v58 = vpack.c.bf16 %v504_v56, %v487_v49  ;;  %v13803_v49 = vld [vmem:[%s20026_s1 + $0x58c] ss:$12 sps:$4 sm:$0xff]  }
 0x13d   : > { %12881 = vmatprep.subr.bf16.mxu1 %v13749_v3  ;;  %v503_v3 = vld [vmem:[%s15520_s24 + $0x2f8] sm:$0xff]  ;;  %v13804_v56 = vld [vmem:[%s20026_s1 + $0xb60] ss:$12 sps:$4 sm:$0xff]  }
 0x13e   : > { %3421 = vmatmul.mubr.bf16.vlgmr.msra.gmra.mrb[0].mxu0 %v15971_v55  ;;  %v13759_v55 = vld [vmem:[%s20026_s1 + $0x9c8] ss:$12 sps:$4 sm:$0xff]  }
 0x13f   : > { %4216 = vmatmul.mubr.bf16.gmra.mrb[92].mxu1 %v16353_v4  ;;  %3462 = vmatpush1.bf16.msra.mxu0 %v13746_v2  ;;  %v13776_v2 = vld [vmem:[%s20026_s1 + $0x510] ss:$12 sps:$4 sm:$0xff]  }
 0x140   : > { %12882 = vmatpush3.bf16.msra.mxu1 %v13750_v6  ;;  %3463 = vmatprep.subr.bf16.mxu0 %v13753_v10  ;;  %v16461_v6 = vpack.c.bf16 %v503_v3, %v486_v63  ;;  %v13780_v10 = vld [vmem:[%s20026_s1 + $0x968] ss:$12 sps:$4 sm:$0xff]   ;;  %v472_v3 = vld [vmem:[%s15520_s24 + $0x200] sm:$0xff] }
 0x141   : > { %12883 = vmatprep.subr.bf16.mxu1 %v13754_v11  ;;  %4256 = vmatprep.mubr.bf16.mxu1 %v16374_v18  ;;  %v13783_v11 = vld [vmem:[%s20026_s1 + $0x52c] ss:$12 sps:$4 sm:$0xff]  }
 0x142   : > { %3430 = vmatprep.mubr.bf16.mxu0 %v15991_v1  ;;  %v13764_v1 = vld [vmem:[%s20026_s1 + $0x9e0] ss:$12 sps:$4 sm:$0xff]  }
 0x143   : > { %3464 = vmatpush1.bf16.msra.mxu0 %v13751_v13  ;;  %v13781_v13 = vld [vmem:[%s20026_s1 + $0x528] ss:$12 sps:$4 sm:$0xff]  }
 0x144   : > { %12884 = vmatpush3.bf16.msra.mxu1 %v13755_v16  ;;  %3465 = vmatprep.subr.bf16.mxu0 %v13758_v20  ;;  %v13785_v16 = vld [vmem:[%s20026_s1 + $0x980] ss:$12 sps:$4 sm:$0xff]   ;;  %v16482_v20 = vpack.c.bf16 %v538_v14, %v521_v9  ;;  %v471_v9 = vld [vmem:[%s15520_s24 + $0x1f8] sm:$0xff] }
 0x145   : > { %12909 = vmatprep.subr.bf16.mxu1 %v13759_v55  ;;  %v537_v55 = vld [vmem:[%s15520_s24 + $0x408] sm:$0xff] }
 0x146   : > { %3431 = vmatmul.mubr.bf16.gmra.mrb[4].mxu0 %v16005_v8  ;;  %v13769_v8 = vld [vmem:[%s20026_s1 + $0x9f8] ss:$12 sps:$4 sm:$0xff]  }
 0x147   : > { %4257 = vmatmul.mubr.bf16.vlgmr.msra.gmra.mrb[96].mxu1 %v16389_v29  ;;  %3466 = vmatpush1.bf16.msra.mxu0 %v13756_v24  ;;  %v13786_v24 = vld [vmem:[%s20026_s1 + $0x540] ss:$12 sps:$4 sm:$0xff]  }
 0x148   : > { %12910 = vmatpush3.bf16.msra.mxu1 %v13760_v30  ;;  %3467 = vmatprep.subr.bf16.mxu0 %v13763_v25  ;;  %v16497_v30 = vpack.c.bf16 %v537_v55, %v520_v22  ;;  %v13790_v25 = vld [vmem:[%s20026_s1 + $0x998] ss:$12 sps:$4 sm:$0xff]  }
 0x149   : > { %12911 = vmatprep.subr.bf16.mxu1 %v13764_v1  ;;  %4264 = vmatprep.mubr.bf16.mxu1 %v16410_v39  ;;  %v13793_v1 = vld [vmem:[%s20026_s1 + $0x55c] ss:$12 sps:$4 sm:$0xff]  }
 0x14a   : > { %3440 = vmatprep.mubr.bf16.mxu0 %v16025_v19  ;;  %v13774_v19 = vld [vmem:[%s20026_s1 + $0xa10] ss:$12 sps:$4 sm:$0xff]  }
 0x14b   : > { %3468 = vmatpush1.bf16.msra.mxu0 %v13761_v31  ;;  %v13791_v31 = vld [vmem:[%s20026_s1 + $0x558] ss:$12 sps:$4 sm:$0xff]  }
 0x14c   : > { %12912 = vmatpush3.bf16.msra.mxu1 %v13765_v33  ;;  %3469 = vmatprep.subr.bf16.mxu0 %v13768_v41  ;;  %v13795_v33 = vld [vmem:[%s20026_s1 + $0x9b0] ss:$12 sps:$4 sm:$0xff]   ;;  %v16517_v41 = vpack.c.bf16 %v438_v35, %v421_v34 }
 0x14d   : > { %12913 = vmatprep.subr.bf16.mxu1 %v13769_v8  ;;  %v437_v8 = vld [vmem:[%s15520_s24 + $0xe8] sm:$0xff]  ;;  %v506_v34 = vld [vmem:[%s15520_s24 + $0x310] sm:$0xff] }
 0x14e   : > { %3441 = vmatmul.mubr.bf16.gmra.mrb[8].mxu0 %v16039_v27  ;;  %v13779_v27 = vld [vmem:[%s20026_s1 + $0xa28] ss:$12 sps:$4 sm:$0xff]  }
 0x14f   : > { %4265 = vmatmul.mubr.bf16.gmra.mrb[100].mxu1 %v16425_v40  ;;  %3470 = vmatpush1.bf16.msra.mxu0 %v13766_v47 }
 0x150   : > { %12914 = vmatpush3.bf16.msra.mxu1 %v13770_v50  ;;  %3471 = vmatprep.subr.bf16.mxu0 %v13773_v52  ;;  %v13799_v50 = vld [vmem:[%s20026_s1 + $0xb48] ss:$12 sps:$4 sm:$0xff]   ;;  %v13796_v52 = vld [vmem:[%s20026_s1 + $0x570] ss:$12 sps:$4 sm:$0xff]  }
 0x151   : > { %12915 = vmatprep.subr.bf16.mxu1 %v13774_v19  ;;  %4272 = vmatprep.mubr.bf16.mxu1 %v16446_v58  ;;  %v16533_v19 = vpack.c.bf16 %v437_v8, %v420_v45  ;;  %v13818_v45 = vld [vmem:[%s20026_s1 + $0x5d4] ss:$12 sps:$4 sm:$0xff]  }
 0x152   : > { %3450 = vmatprep.mubr.bf16.mxu0 %v16059_v37  ;;  %v13784_v37 = vld [vmem:[%s20026_s1 + $0xa40] ss:$12 sps:$4 sm:$0xff]  }
 0x153   : > { %3472 = vmatpush1.bf16.msra.mxu0 %v13771_v53  ;;  %v13800_v53 = vld [vmem:[%s20026_s1 + $0xa88] ss:$12 sps:$4 sm:$0xff]   ;;  %v488_v8 = vld [vmem:[%s15520_s24 + $0x280] sm:$0xff] }
 0x154   : > { %12916 = vmatpush3.bf16.msra.mxu1 %v13775_v57  ;;  %3473 = vmatprep.subr.bf16.mxu0 %v13778_v62  ;;  %v13801_v57 = vld [vmem:[%s20026_s1 + $0x588] ss:$12 sps:$4 sm:$0xff]   ;;  %v455_v62 = vld [vmem:[%s15520_s24 + $0x178] sm:$0xff] }
 0x155   : > { %12917 = vmatprep.subr.bf16.mxu1 %v13779_v27 }
 0x156   : > { %3451 = vmatmul.mubr.bf16.gmra.mrb[12].mxu0 %v16073_v44  ;;  %v13789_v44 = vld [vmem:[%s20026_s1 + $0xa58] ss:$12 sps:$4 sm:$0xff]  }
 0x157   : > { %4273 = vmatmul.mubr.bf16.gmra.mrb[104].mxu1 %v16461_v6  ;;  %3474 = vmatpush1.bf16.msra.mxu0 %v13776_v2  ;;  %v13805_v2 = vld [vmem:[%s20026_s1 + $0xaa0] ss:$12 sps:$4 sm:$0xff]  }
 0x158   : > { %12918 = vmatpush3.bf16.msra.mxu1 %v13780_v10  ;;  %3475 = vmatprep.subr.bf16.mxu0 %v13783_v11  ;;  %v16557_v10 = vpack.c.bf16 %v472_v3, %v455_v62  ;;  %v13808_v11 = vld [vmem:[%s20026_s1 + $0x5a4] ss:$12 sps:$4 sm:$0xff]   ;;  %v13820_v3 = vld [vmem:[%s20026_s1 + $0xae8] ss:$12 sps:$4 sm:$0xff]  }
 0x159   : > { %12919 = vmatprep.subr.bf16.mxu1 %v13784_v37  ;;  %4280 = vmatprep.mubr.bf16.mxu1 %v16482_v20  ;;  %v454_v37 = vld [vmem:[%s15520_s24 + $0x170] sm:$0xff] }
 0x15a   : > { %3493 = vmatprep.mubr.bf16.mxu0 %v16094_v54  ;;  %v13794_v54 = vld [vmem:[%s20026_s1 + $0xa70] ss:$12 sps:$4 sm:$0xff]   ;;  %v16524_v47 = vpop.f32.mrb[0].mxu1  ;;  %v16575_v22 = vpack.c.bf16 %v471_v9, %v454_v37  ;;  %v13821_v37 = vld [vmem:[%s20026_s1 + $0x5e8] ss:$12 sps:$4 sm:$0xff]  }
 0x15b   : > { %3476 = vmatpush1.bf16.msra.mxu0 %v13781_v13  ;;  %v16548_v63 = vpop.f32.mrb[1].mxu1  ;;  %v523_v9 = vld [vmem:[%s15520_s24 + $0x398] sm:$0xff] }
 0x15c   : > { %12920 = vmatpush3.bf16.msra.mxu1 %v13785_v16  ;;  %3477 = vmatprep.subr.bf16.mxu0 %v13788_v21  ;;  %v16552_v27 = vpop.f32.mrb[2].mxu1  ;;  %v13809_v16 = vld [vmem:[%s20026_s1 + $0xb78] ss:$12 sps:$4 sm:$0xff]   ;;  %v13806_v21 = vld [vmem:[%s20026_s1 + $0x5a0] ss:$12 sps:$4 sm:$0xff]  }
 0x15d   : > { %12921 = vmatprep.subr.bf16.mxu1 %v13789_v44  ;;  %v16563_v13 = vpop.f32.mrb[3].mxu1  ;;  %v13810_v44 = vld [vmem:[%s20026_s1 + $0xab8] ss:$12 sps:$4 sm:$0xff]  }
 0x15e   : > { %20063 = vst [vmem:[#allocation14_spill] sm:$0xff] %v16563_v13 }
 0x15f   : > { %4281 = vmatmul.mubr.bf16.gmra.mrb[108].mxu1 %v16497_v30  ;;  %3478 = vmatpush1.bf16.msra.mxu0 %v13786_v24  ;;  %v13813_v24 = vld [vmem:[%s20026_s1 + $0x5bc] ss:$12 sps:$4 sm:$0xff]  }
 0x160   : > { %12922 = vmatpush3.bf16.msra.mxu1 %v13790_v25  ;;  %3479 = vmatprep.subr.bf16.mxu0 %v13793_v1  ;;  %v13814_v25 = vld [vmem:[%s20026_s1 + $0xb90] ss:$12 sps:$4 sm:$0xff]   ;;  %v13811_v1 = vld [vmem:[%s20026_s1 + $0x5b8] ss:$12 sps:$4 sm:$0xff]  }
 0x161   : > { %12923 = vmatprep.subr.bf16.mxu1 %v13794_v54  ;;  %4321 = vmatprep.mubr.bf16.mxu1 %v16517_v41  ;;  %v489_v54 = vld [vmem:[%s15520_s24 + $0x288] sm:$0xff] }
 0x162   : > { %v16566_v14 = vpop.f32.mrb[4].mxu1 }
 0x163   : > { %3480 = vmatpush1.bf16.msra.mxu0 %v13791_v31  ;;  %20064 = vst [vmem:[#allocation15_spill] sm:$0xff] %v16566_v14  ;;  %v16577_v55 = vpop.f32.mrb[5].mxu1 }
 0x164   : > { %12924 = vmatpush3.bf16.msra.mxu1 %v13795_v33  ;;  %3481 = vmatprep.subr.bf16.mxu0 %v13798_v42  ;;  %20065 = vst [vmem:[#allocation16_spill] sm:$0xff] %v16577_v55  ;;  %v16592_v31 = vpop.f32.mrb[6].mxu1  ;;  %v13815_v33 = vld [vmem:[%s20026_s1 + $0xad0] ss:$12 sps:$4 sm:$0xff]   ;;  %v16601_v42 = vpack.c.bf16 %v506_v34, %v489_v54 }
 0x165   : > { %12949 = vmatprep.subr.bf16.mxu1 %v13799_v50  ;;  %20066 = vst [vmem:[#allocation17_spill] sm:$0xff] %v16592_v31  ;;  %v16596_v35 = vpop.f32.mrb[7].mxu1  ;;  %v522_v54 = vld [vmem:[%s15520_s24 + $0x390] sm:$0xff] }
 0x166   : > { %20067 = vst [vmem:[#allocation18_spill] sm:$0xff] %v16596_v35 }
 0x167   : > { %4322 = vmatmul.mubr.bf16.vlgmr.msra.gmra.mrb[112].mxu1 %v16533_v19  ;;  %3482 = vmatpush1.bf16.msra.mxu0 %v13796_v52  ;;  %v505_v52 = vld [vmem:[%s15520_s24 + $0x308] sm:$0xff] }
 0x168   : > { %12950 = vmatpush3.bf16.msra.mxu1 %v13800_v53  ;;  %3483 = vmatprep.subr.bf16.mxu0 %v13803_v49  ;;  %v13819_v49 = vld [vmem:[%s20026_s1 + $0xba8] ss:$12 sps:$4 sm:$0xff]  }
 0x169   : > { %12951 = vmatprep.subr.bf16.mxu1 %v13804_v56  ;;  %4329 = vmatprep.mubr.bf16.mxu1 %v16557_v10  ;;  %v13816_v56 = vld [vmem:[%s20026_s1 + $0x5d0] ss:$12 sps:$4 sm:$0xff]  }
 0x16a   : > { %v16607_v50 = vpop.f32.mrb[8].mxu1 }
 0x16b   : > { %3484 = vmatpush1.bf16.msra.mxu0 %v13801_v57  ;;  %20068 = vst [vmem:[#allocation19_spill] sm:$0xff] %v16607_v50  ;;  %v16610_v53 = vpop.f32.mrb[9].mxu1  ;;  %v16619_v57 = vpack.c.bf16 %v505_v52, %v488_v8  ;;  %v13829_v8 = vld [vmem:[%s20026_s1 + $0xbd8] ss:$12 sps:$4 sm:$0xff]   ;;  %v13826_v52 = vld [vmem:[%s20026_s1 + $0x600] ss:$12 sps:$4 sm:$0xff]  }
 0x16c   : > { %12952 = vmatpush3.bf16.msra.mxu1 %v13805_v2  ;;  %3485 = vmatprep.subr.bf16.mxu0 %v13808_v11  ;;  %20069 = vst [vmem:[#allocation20_spill] sm:$0xff] %v16610_v53  ;;  %v16621_v62 = vpop.f32.mrb[10].mxu1  ;;  %v13823_v2 = vld [vmem:[%s20026_s1 + $0x5ec] ss:$12 sps:$4 sm:$0xff]  }
 0x16d   : > { %12953 = vmatprep.subr.bf16.mxu1 %v13809_v16  ;;  %20070 = vst [vmem:[#allocation21_spill] sm:$0xff] %v16621_v62  ;;  %v13824_v11 = vld [vmem:[%s20026_s1 + $0xbc0] ss:$12 sps:$4 sm:$0xff]   ;;  %v16636_v16 = vpop.f32.mrb[11].mxu1 }
 0x16e   : > { %20071 = vst [vmem:[#allocation22_spill] sm:$0xff] %v16636_v16 }
 0x16f   : > { %4330 = vmatmul.mubr.bf16.gmra.mrb[116].mxu1 %v16575_v22  ;;  %3486 = vmatpush1.bf16.msra.mxu0 %v13806_v21  ;;  %v540_v21 = vld [vmem:[%s15520_s24 + $0x420] sm:$0xff] }
 0x170   : > { %12954 = vmatpush3.bf16.msra.mxu1 %v13810_v44  ;;  %3487 = vmatprep.subr.bf16.mxu0 %v13813_v24  ;;  %v13825_v24 = vld [vmem:[%s20026_s1 + $0xb00] ss:$12 sps:$4 sm:$0xff]  }
 0x171   : > { %12955 = vmatprep.subr.bf16.mxu1 %v13814_v25  ;;  %4337 = vmatprep.mubr.bf16.mxu1 %v16601_v42  ;;  %v16645_v25 = vpack.c.bf16 %v540_v21, %v523_v9  ;;  %v423_v9 = vld [vmem:[%s15520_s24 + $0x78] sm:$0xff] }
 0x172   : > { %v16640_v44 = vpop.f32.mrb[12].mxu1 }
 0x173   : > { %3488 = vmatpush1.bf16.msra.mxu0 %v13811_v1  ;;  %20072 = vst [vmem:[#allocation23_spill] sm:$0xff] %v16640_v44  ;;  %v13828_v1 = vld [vmem:[%s20026_s1 + $0x604] ss:$12 sps:$4 sm:$0xff]   ;;  %v16651_v34 = vpop.f32.mrb[13].mxu1 }
 0x174   : > { %12956 = vmatpush3.bf16.msra.mxu1 %v13815_v33  ;;  %3489 = vmatprep.subr.bf16.mxu0 %v13818_v45  ;;  %20073 = vst [vmem:[#allocation24_spill] sm:$0xff] %v16651_v34  ;;  %v539_v33 = vld [vmem:[%s15520_s24 + $0x418] sm:$0xff]  ;;  %v16654_v45 = vpop.f32.mrb[14].mxu1  ;;  %v474_v44 = vld [vmem:[%s15520_s24 + $0x210] sm:$0xff] }
 0x175   : > { %12957 = vmatprep.subr.bf16.mxu1 %v13819_v49  ;;  %20074 = vst [vmem:[#allocation25_spill] sm:$0xff] %v16654_v45  ;;  %v16663_v49 = vpack.c.bf16 %v539_v33, %v522_v54  ;;  %v439_v45 = vld [vmem:[%s15520_s24 + $0xf8] sm:$0xff] }
 0x177   : > { %4338 = vmatmul.mubr.bf16.gmra.mrb[120].mxu1 %v16619_v57  ;;  %3490 = vmatpush1.bf16.msra.mxu0 %v13816_v56  ;;  %v16665_v56 = vpop.f32.mrb[15].mxu1 }
 0x178   : > { %12958 = vmatpush3.bf16.msra.mxu1 %v13820_v3  ;;  %3491 = vmatprep.subr.bf16.mxu0 %v13823_v2  ;;  %20075 = vst [vmem:[#allocation26_spill] sm:$0xff] %v16665_v56  ;;  %v13830_v3 = vld [vmem:[%s20026_s1 + $0xb18] ss:$12 sps:$4 sm:$0xff]   ;;  %v13833_v2 = vld [vmem:[%s20026_s1 + $0x61c] ss:$12 sps:$4 sm:$0xff]  }
 0x179   : > { %12959 = vmatprep.subr.bf16.mxu1 %v13824_v11  ;;  %4345 = vmatprep.mubr.bf16.mxu1 %v16645_v25  ;;  %v13834_v11 = vld [vmem:[%s20026_s1 + $0xbf0] ss:$12 sps:$4 sm:$0xff]  }
 0x17a   : > { %v12685_v21 = vpop.f32.mrb[16].mxu1 }
 0x17b   : > { %3492 = vmatpush1.bf16.msra.mxu0 %v13821_v37  ;;  %v13831_v37 = vld [vmem:[%s20026_s1 + $0x618] ss:$12 sps:$4 sm:$0xff]   ;;  %v12686_v54 = vpop.f32.mrb[17].mxu1 }
 0x17c   : > { %12960 = vmatpush3.bf16.msra.mxu1 %v13825_v24  ;;  %3534 = vmatprep.subr.bf16.mxu0 %v13828_v1  ;;  %v440_v24 = vld [vmem:[%s15520_s24 + $0x100] sm:$0xff]  ;;  %v13835_v1 = vld [vmem:[%s20026_s1 + $0xb30] ss:$12 sps:$4 sm:$0xff]   ;;  %v16692_v56 = vadd.f32 %v12686_v54, %v12685_v21 }
 0x17d   : > { %12961 = vmatprep.subr.bf16.mxu1 %v13829_v8  ;;  %v16686_v33 = vpack.c.bf16 %v440_v24, %v423_v9  ;;  %v13838_v8 = vld [vmem:[%s20026_s1 + $0x634] ss:$12 sps:$4 sm:$0xff]   ;;  %v16700_v24 = vpack.c.bf16 %v439_v45, %v422_v0  ;;  %v13841_v0 = vld [vmem:[%s20026_s1 + $0x64c] ss:$12 sps:$4 sm:$0xff]  }
 0x17e   : > { %3494 = vmatmul.mubr.bf16.vlgmr.msra.gmra.mrb[0].mxu0 %v16109_v61  ;;  %v12688_v61 = vpop.f32.mrb[18].mxu1 }
 0x17f   : > { %4346 = vmatmul.mubr.bf16.gmra.mrb[124].mxu1 %v16663_v49  ;;  %3535 = vmatpush1.bf16.msra.mxu0 %v13826_v52  ;;  %v12689_v52 = vpop.f32.mrb[19].mxu1 }
 0x180   : > { %12962 = vmatpush3.bf16.msra.mxu1 %v13830_v3  ;;  %3536 = vmatprep.subr.bf16.mxu0 %v13833_v2  ;;  %v457_v3 = vld [vmem:[%s15520_s24 + $0x188] sm:$0xff]  ;;  %v16698_v34 = vadd.f32 %v12689_v52, %v12688_v61  ;;  %v13836_v2 = vld [vmem:[%s20026_s1 + $0x630] ss:$12 sps:$4 sm:$0xff]   ;;  %v508_v61 = vld [vmem:[%s15520_s24 + $0x320] sm:$0xff] }
 0x181   : > { %12963 = vmatprep.subr.bf16.mxu1 %v13834_v11  ;;  %4386 = vmatprep.mubr.bf16.mxu1 %v16686_v33  ;;  %v16706_v11 = vpack.c.bf16 %v474_v44, %v457_v3  ;;  %v456_v44 = vld [vmem:[%s15520_s24 + $0x180] sm:$0xff] }
 0x182   : > { %3503 = vmatprep.mubr.bf16.mxu0 %v16130_v7  ;;  %v12691_v9 = vpop.f32.mrb[20].mxu1 }
 0x183   : > { %v12692_v16 = vpop.f32.mrb[21].mxu1  ;;  %3537 = vmatpush1.bf16.msra.mxu0 %v13831_v37  ;;  %v13839_v37 = vld [vmem:[%s20026_s1 + $0x648] ss:$12 sps:$4 sm:$0xff]  }
 0x184   : > { %12964 = vmatpush3.bf16.msra.mxu1 %v13835_v1  ;;  %v16708_v21 = vadd.f32 %v12692_v16, %v12691_v9  ;;  %v12694_v7 = vpop.f32.mrb[22].mxu1  ;;  %3538 = vmatprep.subr.bf16.mxu0 %v13838_v8  ;;  %v13844_v16 = vld [vmem:[%s20026_s1 + $0x664] ss:$12 sps:$4 sm:$0xff]   ;;  %v473_v1 = vld [vmem:[%s15520_s24 + $0x208] sm:$0xff]  ;;  %v491_v8 = vld [vmem:[%s15520_s24 + $0x298] sm:$0xff] }
 0x185   : > { %v12695_v45 = vpop.f32.mrb[23].mxu1  ;;  %v16729_v3 = vpack.c.bf16 %v473_v1, %v456_v44  ;;  %v13857_v44 = vld [vmem:[%s20026_s1 + $0xc08] ss:$12 sps:$4 sm:$0xff]  }
 0x186   : > { %v16716_v54 = vadd.f32 %v12695_v45, %v12694_v7  ;;  %3504 = vmatmul.mubr.bf16.gmra.mrb[4].mxu0 %v16145_v15  ;;  %v13842_v15 = vld [vmem:[%s20026_s1 + $0x660] ss:$12 sps:$4 sm:$0xff]   ;;  %v16737_v7 = vpack.c.bf16 %v508_v61, %v491_v8  ;;  %v490_v61 = vld [vmem:[%s15520_s24 + $0x290] sm:$0xff]  ;;  %13035 = vmatprep.subr.bf16.mxu1 %v13857_v44 }
 0x187   : > { %4387 = vmatmul.mubr.bf16.vlgmr.msra.gmra.mrb[128].mxu1 %v16700_v24  ;;  %3539 = vmatpush1.bf16.msra.mxu0 %v13836_v2  ;;  %v13847_v2 = vld [vmem:[%s20026_s1 + $0x67c] ss:$12 sps:$4 sm:$0xff]   ;;  %v13850_v8 = vld [vmem:[%s20026_s1 + $0x694] ss:$12 sps:$4 sm:$0xff]  }
 0x188   : > { %4394 = vmatprep.mubr.bf16.mxu1 %v16706_v11  ;;  %3540 = vmatprep.subr.bf16.mxu0 %v13841_v0 }
 0x189   : > { %3513 = vmatprep.mubr.bf16.mxu0 %v16166_v26  ;;  %13036 = vmatpush3.bf16.msra.mxu1 %v13857_v44 }
 0x18a   : > { %v12697_v52 = vpop.f32.mrb[24].mxu1 }
 0x18b   : > { %v12698_v9 = vpop.f32.mrb[25].mxu1  ;;  %3541 = vmatpush1.bf16.msra.mxu0 %v13839_v37  ;;  %v13845_v37 = vld [vmem:[%s20026_s1 + $0x678] ss:$12 sps:$4 sm:$0xff]  }
 0x18c   : > { %v16739_v0 = vadd.f32 %v12698_v9, %v12697_v52  ;;  %v12700_v26 = vpop.f32.mrb[26].mxu1  ;;  %3542 = vmatprep.subr.bf16.mxu0 %v13844_v16  ;;  %v507_v52 = vld [vmem:[%s15520_s24 + $0x318] sm:$0xff]  ;;  %v13861_v16 = vld [vmem:[%s20026_s1 + $0xc20] ss:$12 sps:$4 sm:$0xff]  }
 0x18d   : > { %v12701_v45 = vpop.f32.mrb[27].mxu1  ;;  %v525_v9 = vld [vmem:[%s15520_s24 + $0x3a8] sm:$0xff]  ;;  %v16763_v62 = vpack.c.bf16 %v507_v52, %v490_v61  ;;  %13037 = vmatprep.subr.bf16.mxu1 %v13861_v16  ;;  %v13856_v52 = vld [vmem:[%s20026_s1 + $0x6c4] ss:$12 sps:$4 sm:$0xff]  }
 0x18e   : > { %v16747_v1 = vadd.f32 %v12701_v45, %v12700_v26  ;;  %3514 = vmatmul.mubr.bf16.gmra.mrb[8].mxu0 %v16181_v32  ;;  %v542_v26 = vld [vmem:[%s15520_s24 + $0x430] sm:$0xff]  ;;  %13038 = vmatpush3.bf16.msra.mxu1 %v13861_v16 }
 0x18f   : > { %4395 = vmatmul.mubr.bf16.gmra.mrb[132].mxu1 %v16729_v3  ;;  %3543 = vmatpush1.bf16.msra.mxu0 %v13842_v15  ;;  %v13848_v32 = vld [vmem:[%s20026_s1 + $0x690] ss:$12 sps:$4 sm:$0xff]   ;;  %v16768_v15 = vpack.c.bf16 %v542_v26, %v525_v9 }
 0x190   : > { %4402 = vmatprep.mubr.bf16.mxu1 %v16737_v7  ;;  %3544 = vmatprep.subr.bf16.mxu0 %v13847_v2 }
 0x191   : > { %3523 = vmatprep.mubr.bf16.mxu0 %v16202_v43  ;;  %v13853_v43 = vld [vmem:[%s20026_s1 + $0x6ac] ss:$12 sps:$4 sm:$0xff]  }
 0x192   : > { %v12703_v45 = vpop.f32.mrb[28].mxu1 }
 0x193   : > { %v12704_v53 = vpop.f32.mrb[29].mxu1  ;;  %3545 = vmatpush1.bf16.msra.mxu0 %v13845_v37  ;;  %v13851_v37 = vld [vmem:[%s20026_s1 + $0x6a8] ss:$12 sps:$4 sm:$0xff]  }
 0x194   : > { %v16770_v2 = vadd.f32 %v12704_v53, %v12703_v45  ;;  %v12706_v50 = vpop.f32.mrb[30].mxu1  ;;  %3546 = vmatprep.subr.bf16.mxu0 %v13850_v8  ;;  %v524_v53 = vld [vmem:[%s15520_s24 + $0x3a0] sm:$0xff]  ;;  %v541_v8 = vld [vmem:[%s15520_s24 + $0x428] sm:$0xff] }
 0x195   : > { %v12707_v44 = vpop.f32.mrb[31].mxu1  ;;  %v16789_v16 = vpack.c.bf16 %v541_v8, %v524_v53  ;;  %v13864_v53 = vld [vmem:[%s20026_s1 + $0x6f4] ss:$12 sps:$4 sm:$0xff]  }
 0x196   : > { %v16775_v61 = vadd.f32 %v12707_v44, %v12706_v50  ;;  %3524 = vmatmul.mubr.bf16.gmra.mrb[12].mxu0 %v16217_v51  ;;  %v13854_v51 = vld [vmem:[%s20026_s1 + $0x6c0] ss:$12 sps:$4 sm:$0xff]  }
 0x197   : > { %4403 = vmatmul.mubr.bf16.gmra.mrb[136].mxu1 %v16763_v62  ;;  %3547 = vmatpush1.bf16.msra.mxu0 %v13848_v32  ;;  %v13860_v32 = vld [vmem:[%s20026_s1 + $0x6dc] ss:$12 sps:$4 sm:$0xff]  }
 0x198   : > { %4410 = vmatprep.mubr.bf16.mxu1 %v16768_v15  ;;  %3548 = vmatprep.subr.bf16.mxu0 %v13853_v43 }
 0x199   : > { %3566 = vmatprep.mubr.bf16.mxu0 %v16237_v60  ;;  %v13858_v60 = vld [vmem:[%s20026_s1 + $0x6d8] ss:$12 sps:$4 sm:$0xff]  }
 0x19a   : > { %v12725_v50 = vpop.f32.mrb[32].mxu1 }
 0x19b   : > { %v12726_v9 = vpop.f32.mrb[33].mxu1  ;;  %3549 = vmatpush1.bf16.msra.mxu0 %v13851_v37  ;;  %v1134_v37 = vlaneseq }
 0x19c   : > { %v12727_v26 = vadd.f32 %v12726_v9, %v12725_v50  ;;  %v12728_v45 = vpop.f32.mrb[34].mxu1  ;;  %3550 = vmatprep.subr.bf16.mxu0 %v13856_v52  ;;  %v13862_v50 = vld [vmem:[%s20026_s1 + $0x6f0] ss:$12 sps:$4 sm:$0xff]  }
 0x19d   : > { %v12729_v43 = vpop.f32.mrb[35].mxu1  ;;  %v16809_v9 = vshrl.u32 %v1134_v37, 7 }
 0x19e   : > { %v12730_v44 = vadd.f32 %v12729_v43, %v12728_v45 }
 0x19f   : > { %4411 = vmatmul.mubr.bf16.gmra.mrb[140].mxu1 %v16789_v16  ;;  %3551 = vmatpush1.bf16.msra.mxu0 %v13854_v51  ;;  %v16822_v37 = vsub.s32 2, %v16809_v9  ;;  %vm4630_vm2 = vcmp.lt.s32.totalorder %v16809_v9, 1  ;;  %vm4687_vm14 = vcmp.lt.s32.totalorder %v16809_v9, 7 }
 0x1a0   : > { %13039 = vmatprep.mubr.msk.bf16.mxu1 %vm20045_vm0, %v15560_v12  ;;  %3552 = vmatprep.subr.bf16.mxu0 %v13860_v32  ;;  %v13867_v12 = vld [vmem:[%s20026_s1 + $0x70c] ss:$12 sps:$4 sm:$0xff]  }
 0x1a1   : > { %20076 = vst [vmem:[#allocation27_spill] sm:$0xff] %v16822_v37 }
 0x1a2   : > { %v12731_v8 = vpop.f32.mrb[36].mxu1 }
 0x1a3   : > { %v12732_v52 = vpop.f32.mrb[37].mxu1  ;;  %3553 = vmatpush1.bf16.msra.mxu0 %v13858_v60  ;;  %v13865_v60 = vld [vmem:[%s20026_s1 + $0x708] ss:$12 sps:$4 sm:$0xff]  }
 0x1a4   : > { %v12733_v51 = vadd.f32 %v12732_v52, %v12731_v8  ;;  %v12734_v45 = vpop.f32.mrb[38].mxu1  ;;  %3554 = vmatprep.subr.bf16.mxu0 %v13864_v53  ;;  %v13870_v53 = vld [vmem:[%s20026_s1 + $0x724] ss:$12 sps:$4 sm:$0xff]  }
 0x1a5   : > { %v12735_v32 = vpop.f32.mrb[39].mxu1 }
 0x1a6   : > { %v12736_v43 = vadd.f32 %v12735_v32, %v12734_v45 }
 0x1a7   : > { %13040 = vmatmul.mubr.msk.bf16.vlgmr.msra.gmra.mrb[144].mxu1 %vm20045_vm0, %v15591_v23  ;;  %3555 = vmatpush1.bf16.msra.mxu0 %v13862_v50  ;;  %v1132_v23 = vld [vmem:[%s20027_s2] sm:$0x7] }
 0x1a8   : > { %13043 = vmatprep.mubr.msk.bf16.mxu1 %vm20045_vm0, %v15628_v36  ;;  %3556 = vmatprep.subr.bf16.mxu0 %v13867_v12  ;;  %v13868_v50 = vld [vmem:[%s20026_s1 + $0x720] ss:$12 sps:$4 sm:$0xff]   ;;  %v1145_v36 = vrot.slane %v1132_v23, %v16822_v37  ;;  %v13873_v12 = vld [vmem:[%s20026_s1 + $0x73c] ss:$12 sps:$4 sm:$0xff]   ;;  %v13871_v23 = vld [vmem:[%s20026_s1 + $0x738] ss:$12 sps:$4 sm:$0xff]  }
 0x1aa   : > { %v12737_v8 = vpop.f32.mrb[40].mxu1  ;;  %v3934_v31 = vadd.f32 %v16692_v56, %v1145_v36  ;;  %v3937_v55 = vadd.f32 %v16698_v34, %v1145_v36  ;;  %v3945_v14 = vadd.f32 %v16716_v54, %v1145_v36 }
 0x1ab   : > { %v12738_v52 = vpop.f32.mrb[41].mxu1  ;;  %3557 = vmatpush1.bf16.msra.mxu0 %v13865_v60  ;;  %v3942_v60 = vadd.f32 %v16708_v21, %v1145_v36  ;;  %v13876_v21 = vld [vmem:[%s20026_s1 + $0x754] ss:$12 sps:$4 sm:$0xff]  }
 0x1ac   : > { %v12739_v45 = vadd.f32 %v12738_v52, %v12737_v8  ;;  %v12740_v32 = vpop.f32.mrb[42].mxu1  ;;  %3558 = vmatprep.subr.bf16.mxu0 %v13870_v53  ;;  %v3950_v8 = vadd.f32 %v16739_v0, %v1145_v36  ;;  %v3953_v53 = vadd.f32 %v16747_v1, %v1145_v36  ;;  %v3999_v52 = vadd.f32 %v12727_v26, %v3934_v31 }
 0x1ad   : > { %v12741_v35 = vpop.f32.mrb[43].mxu1  ;;  %v4002_v56 = vadd.f32 %v12730_v44, %v3937_v55  ;;  %v4007_v37 = vadd.f32 %v12733_v51, %v3942_v60  ;;  %v4010_v34 = vadd.f32 %v12736_v43, %v3945_v14  ;;  %v3958_v0 = vadd.f32 %v16770_v2, %v1145_v36  ;;  %v13874_v55 = vld [vmem:[%s20026_s1 + $0x750] ss:$12 sps:$4 sm:$0xff]   ;;  %v13877_v43 = vld [vmem:[%s20026_s1 + $0x768] ss:$12 sps:$4 sm:$0xff]  }
 0x1ae   : > { %v16851_v54 = vadd.f32 %v12739_v45, %v3950_v8  ;;  %v3961_v14 = vadd.f32 %v16775_v61, %v1145_v36  ;;  %v13885_v8 = vld [vmem:[%s20026_s1 + $0x79c] ss:$12 sps:$4 sm:$0xff]  }
 0x1af   : > { %13044 = vmatmul.mubr.msk.bf16.gmra.mrb[148].mxu1 %vm20045_vm0, %v15656_v46  ;;  %3559 = vmatpush1.bf16.msra.mxu0 %v13868_v50  ;;  %v12742_v46 = vadd.f32 %v12741_v35, %v12740_v32  ;;  %v13879_v35 = vld [vmem:[%s20026_s1 + $0x76c] ss:$12 sps:$4 sm:$0xff]  }
 0x1b0   : > { %3560 = vmatprep.subr.bf16.mxu0 %v13873_v12  ;;  %v13880_v32 = vld [vmem:[%s20026_s1 + $0x780] ss:$12 sps:$4 sm:$0xff]  }
 0x1b1   : > { %v16854_v50 = vadd.f32 %v12742_v46, %v3953_v53  ;;  %v13883_v46 = vld [vmem:[%s20026_s1 + $0x798] ss:$12 sps:$4 sm:$0xff]  }
 0x1b2   : > { %v12743_v1 = vpop.f32.mrb[44].mxu1 }
 0x1b3   : > { %v12744_v13 = vpop.f32.mrb[45].mxu1  ;;  %3561 = vmatpush1.bf16.msra.mxu0 %v13871_v23 }
 0x1b4   : > { %v12745_v31 = vadd.f32 %v12744_v13, %v12743_v1  ;;  %v12746_v26 = vpop.f32.mrb[46].mxu1  ;;  %3562 = vmatprep.subr.bf16.mxu0 %v13876_v21  ;;  %v13882_v13 = vld [vmem:[%s20026_s1 + $0x784] ss:$12 sps:$4 sm:$0xff]   ;;  %v13888_v1 = vld [vmem:[%s20026_s1 + $0x7b4] ss:$12 sps:$4 sm:$0xff]  }
 0x1b5   : > { %v12747_v44 = vpop.f32.mrb[47].mxu1 }
 0x1b6   : > { %v16863_v2 = vadd.f32 %v12745_v31, %v3958_v0  ;;  %v12748_v51 = vadd.f32 %v12747_v44, %v12746_v26  ;;  %v13889_v44 = vld [vmem:[%s20026_s1 + $0x7c8] ss:$12 sps:$4 sm:$0xff]  }
 0x1b7   : > { %3563 = vmatpush1.bf16.msra.mxu0 %v13874_v55 }
 0x1b8   : > { %v16868_v45 = vadd.f32 %v12748_v51, %v3961_v14  ;;  %3564 = vmatprep.subr.bf16.mxu0 %v13879_v35  ;;  %v13894_v51 = vld [vmem:[%s20026_s1 + $0x7e4] ss:$12 sps:$4 sm:$0xff]  }
 0x1ba   : > { %v12765_v61 = vpop.f32.mrb[48].mxu1 }
 0x1bb   : > { %v12766_v36 = vpop.f32.mrb[49].mxu1  ;;  %3565 = vmatpush1.bf16.msra.mxu0 %v13877_v43 }
 0x1bc   : > { %v12767_v12 = vadd.f32 %v12766_v36, %v12765_v61  ;;  %v12768_v60 = vpop.f32.mrb[50].mxu1  ;;  %3607 = vmatprep.subr.bf16.mxu0 %v13882_v13  ;;  %v13897_v61 = vld [vmem:[%s20026_s1 + $0x7fc] ss:$12 sps:$4 sm:$0xff]  }
 0x1bd   : > { %v12769_v53 = vpop.f32.mrb[51].mxu1 }
 0x1be   : > { %v16879_v23 = vadd.f32 %v12767_v12, %v3999_v52  ;;  %v12770_v21 = vadd.f32 %v12769_v53, %v12768_v60  ;;  %3567 = vmatmul.mubr.bf16.vlgmr.msra.gmra.mrb[0].mxu0 %v16251_v5  ;;  %v13886_v5 = vld [vmem:[%s20026_s1 + $0x7b0] ss:$12 sps:$4 sm:$0xff]   ;;  %v13895_v60 = vld [vmem:[%s20026_s1 + $0x7f8] ss:$12 sps:$4 sm:$0xff]  }
 0x1bf   : > { %3608 = vmatpush1.bf16.msra.mxu0 %v13880_v32  ;;  %3576 = vmatprep.mubr.bf16.mxu0 %v16271_v17  ;;  %v13891_v17 = vld [vmem:[%s20026_s1 + $0x7cc] ss:$12 sps:$4 sm:$0xff]  }
 0x1c0   : > { %v16886_v0 = vadd.f32 %v12770_v21, %v4002_v56  ;;  %3609 = vmatprep.subr.bf16.mxu0 %v13885_v8  ;;  %v13900_v8 = vld [vmem:[%s20026_s1 + $0x814] ss:$12 sps:$4 sm:$0xff]  }
 0x1c2   : > { %v12771_v55 = vpop.f32.mrb[52].mxu1 }
 0x1c3   : > { %v12772_v52 = vpop.f32.mrb[53].mxu1  ;;  %3610 = vmatpush1.bf16.msra.mxu0 %v13883_v46  ;;  %v13903_v46 = vld [vmem:[%s20026_s1 + $0x82c] ss:$12 sps:$4 sm:$0xff]  }
 0x1c4   : > { %v12773_v14 = vadd.f32 %v12772_v52, %v12771_v55  ;;  %v12774_v31 = vpop.f32.mrb[54].mxu1  ;;  %3611 = vmatprep.subr.bf16.mxu0 %v13888_v1 }
 0x1c5   : > { %v12775_v56 = vpop.f32.mrb[55].mxu1 }
 0x1c6   : > { %v16897_v26 = vadd.f32 %v12773_v14, %v4007_v37  ;;  %v12776_v35 = vadd.f32 %v12775_v56, %v12774_v31  ;;  %3577 = vmatmul.mubr.bf16.gmra.mrb[4].mxu0 %v16285_v28  ;;  %v13892_v28 = vld [vmem:[%s20026_s1 + $0x7e0] ss:$12 sps:$4 sm:$0xff]   ;;  %v13906_v14 = vld [vmem:[%s20026_s1 + $0x844] ss:$12 sps:$4 sm:$0xff]   ;;  %v13909_v56 = vld [vmem:[%s20026_s1 + $0x85c] ss:$12 sps:$4 sm:$0xff]  }
 0x1c7   : > { %3612 = vmatpush1.bf16.msra.mxu0 %v13886_v5  ;;  %3586 = vmatprep.mubr.bf16.mxu0 %v16305_v38  ;;  %v13901_v5 = vld [vmem:[%s20026_s1 + $0x828] ss:$12 sps:$4 sm:$0xff]  }
 0x1c8   : > { %v16907_v43 = vadd.f32 %v12776_v35, %v4010_v34  ;;  %3613 = vmatprep.subr.bf16.mxu0 %v13891_v17 }
 0x1ca   : > { %v12777_v13 = vpop.f32.mrb[56].mxu1 }
 0x1cb   : > { %v12778_v37 = vpop.f32.mrb[57].mxu1  ;;  %3614 = vmatpush1.bf16.msra.mxu0 %v13889_v44 }
 0x1cc   : > { %v12779_v36 = vadd.f32 %v12778_v37, %v12777_v13  ;;  %v12780_v32 = vpop.f32.mrb[58].mxu1  ;;  %3615 = vmatprep.subr.bf16.mxu0 %v13894_v51  ;;  %v13907_v13 = vld [vmem:[%s20026_s1 + $0x858] ss:$12 sps:$4 sm:$0xff]   ;;  %v13912_v37 = vld [vmem:[%s20026_s1 + $0x874] ss:$12 sps:$4 sm:$0xff]  }
 0x1cd   : > { %v12781_v12 = vpop.f32.mrb[59].mxu1 }
 0x1ce   : > { %v16916_v38 = vadd.f32 %v12779_v36, %v16851_v54  ;;  %v12782_v34 = vadd.f32 %v12781_v12, %v12780_v32  ;;  %3587 = vmatmul.mubr.bf16.gmra.mrb[8].mxu0 %v16319_v48  ;;  %v13898_v48 = vld [vmem:[%s20026_s1 + $0x810] ss:$12 sps:$4 sm:$0xff]   ;;  %v13915_v32 = vld [vmem:[%s20026_s1 + $0x88c] ss:$12 sps:$4 sm:$0xff]  }
 0x1cf   : > { %3616 = vmatpush1.bf16.msra.mxu0 %v13892_v28  ;;  %3596 = vmatprep.mubr.bf16.mxu0 %v16339_v59 }
 0x1d0   : > { %v16927_v53 = vadd.f32 %v12782_v34, %v16854_v50  ;;  %3617 = vmatprep.subr.bf16.mxu0 %v13897_v61 }
 0x1d2   : > { %v12783_v54 = vpop.f32.mrb[60].mxu1 }
 0x1d3   : > { %v12784_v21 = vpop.f32.mrb[61].mxu1  ;;  %3618 = vmatpush1.bf16.msra.mxu0 %v13895_v60 }
 0x1d4   : > { %v12785_v1 = vadd.f32 %v12784_v21, %v12783_v54  ;;  %v12786_v55 = vpop.f32.mrb[62].mxu1  ;;  %3619 = vmatprep.subr.bf16.mxu0 %v13900_v8  ;;  %v13913_v54 = vld [vmem:[%s20026_s1 + $0x888] ss:$12 sps:$4 sm:$0xff]   ;;  %v13918_v21 = vld [vmem:[%s20026_s1 + $0x8a4] ss:$12 sps:$4 sm:$0xff]  }
 0x1d5   : > { %v12787_v52 = vpop.f32.mrb[63].mxu1 }
 0x1d6   : > { %v16936_v59 = vadd.f32 %v12785_v1, %v16863_v2  ;;  %v12788_v50 = vadd.f32 %v12787_v52, %v12786_v55  ;;  %3597 = vmatmul.mubr.bf16.gmra.mrb[12].mxu0 %v16353_v4  ;;  %v13904_v4 = vld [vmem:[%s20026_s1 + $0x840] ss:$12 sps:$4 sm:$0xff]   ;;  %v13921_v55 = vld [vmem:[%s20026_s1 + $0x8bc] ss:$12 sps:$4 sm:$0xff]  }
 0x1d7   : > { %3620 = vmatpush1.bf16.msra.mxu0 %v13898_v48  ;;  %3639 = vmatprep.mubr.bf16.mxu0 %v16374_v18 }
 0x1d8   : > { %v16947_v31 = vadd.f32 %v12788_v50, %v16868_v45  ;;  %3621 = vmatprep.subr.bf16.mxu0 %v13903_v46 }
 0x1da   : > { %v12805_v2 = vpop.f32.mrb[64].mxu1 }
 0x1db   : > { %v12806_v17 = vpop.f32.mrb[65].mxu1  ;;  %3622 = vmatpush1.bf16.msra.mxu0 %v13901_v5 }
 0x1dc   : > { %v12807_v35 = vadd.f32 %v12806_v17, %v12805_v2  ;;  %v12808_v44 = vpop.f32.mrb[66].mxu1  ;;  %3623 = vmatprep.subr.bf16.mxu0 %v13906_v14  ;;  %v13919_v2 = vld [vmem:[%s20026_s1 + $0x8b8] ss:$12 sps:$4 sm:$0xff]   ;;  %v13924_v17 = vld [vmem:[%s20026_s1 + $0x8d4] ss:$12 sps:$4 sm:$0xff]  }
 0x1dd   : > { %v12809_v51 = vpop.f32.mrb[67].mxu1 }
 0x1de   : > { %v16956_v18 = vadd.f32 %v12807_v35, %v16879_v23  ;;  %v12810_v45 = vadd.f32 %v12809_v51, %v12808_v44  ;;  %v13910_v23 = vld [vmem:[%s20026_s1 + $0x870] ss:$12 sps:$4 sm:$0xff]   ;;  %v13927_v44 = vld [vmem:[%s20026_s1 + $0x8ec] ss:$12 sps:$4 sm:$0xff]  }
 0x1df   : > { %3624 = vmatpush1.bf16.msra.mxu0 %v13904_v4 }
 0x1e0   : > { %v16965_v28 = vadd.f32 %v12810_v45, %v16886_v0  ;;  %3625 = vmatprep.subr.bf16.mxu0 %v13909_v56 }
 0x1e2   : > { %v12811_v61 = vpop.f32.mrb[68].mxu1 }
 0x1e3   : > { %v12812_v36 = vpop.f32.mrb[69].mxu1  ;;  %3626 = vmatpush1.bf16.msra.mxu0 %v13907_v13 }
 0x1e4   : > { %v12813_v12 = vadd.f32 %v12812_v36, %v12811_v61  ;;  %v12814_v34 = vpop.f32.mrb[70].mxu1  ;;  %3627 = vmatprep.subr.bf16.mxu0 %v13912_v37 }
 0x1e5   : > { %v12815_v60 = vpop.f32.mrb[71].mxu1 }
 0x1e6   : > { %v16974_v8 = vadd.f32 %v12813_v12, %v16897_v26  ;;  %v12816_v0 = vadd.f32 %v12815_v60, %v12814_v34  ;;  %v13916_v26 = vld [vmem:[%s20026_s1 + $0x8a0] ss:$12 sps:$4 sm:$0xff]  }
 0x1e7   : > { %3628 = vmatpush1.bf16.msra.mxu0 %v13910_v23  ;;  %v13930_v23 = vld [vmem:[%s20026_s1 + $0x904] ss:$12 sps:$4 sm:$0xff]  }
 0x1e8   : > { %v16983_v48 = vadd.f32 %v12816_v0, %v16907_v43  ;;  %3629 = vmatprep.subr.bf16.mxu0 %v13915_v32  ;;  %v13928_v32 = vld [vmem:[%s20026_s1 + $0x900] ss:$12 sps:$4 sm:$0xff]  }
 0x1ea   : > { %v12817_v46 = vpop.f32.mrb[72].mxu1 }
 0x1eb   : > { %v12818_v1 = vpop.f32.mrb[73].mxu1  ;;  %3630 = vmatpush1.bf16.msra.mxu0 %v13913_v54  ;;  %v13931_v54 = vld [vmem:[%s20026_s1 + $0x918] ss:$12 sps:$4 sm:$0xff]  }
 0x1ec   : > { %v12819_v52 = vadd.f32 %v12818_v1, %v12817_v46  ;;  %v12820_v50 = vpop.f32.mrb[74].mxu1  ;;  %3631 = vmatprep.subr.bf16.mxu0 %v13918_v21  ;;  %v13936_v1 = vld [vmem:[%s20026_s1 + $0x934] ss:$12 sps:$4 sm:$0xff]  }
 0x1ed   : > { %v12821_v5 = vpop.f32.mrb[75].mxu1 }
 0x1ee   : > { %v16992_v14 = vadd.f32 %v12819_v52, %v16916_v38  ;;  %v12822_v43 = vadd.f32 %v12821_v5, %v12820_v50  ;;  %v13922_v38 = vld [vmem:[%s20026_s1 + $0x8d0] ss:$12 sps:$4 sm:$0xff]  }
 0x1ef   : > { %3632 = vmatpush1.bf16.msra.mxu0 %v13916_v26 }
 0x1f0   : > { %v17001_v4 = vadd.f32 %v12822_v43, %v16927_v53  ;;  %3633 = vmatprep.subr.bf16.mxu0 %v13921_v55  ;;  %v13925_v53 = vld [vmem:[%s20026_s1 + $0x8e8] ss:$12 sps:$4 sm:$0xff]   ;;  %v13934_v55 = vld [vmem:[%s20026_s1 + $0x930] ss:$12 sps:$4 sm:$0xff]  }
 0x1f2   : > { %v12823_v56 = vpop.f32.mrb[76].mxu1 }
 0x1f3   : > { %v12824_v35 = vpop.f32.mrb[77].mxu1  ;;  %3634 = vmatpush1.bf16.msra.mxu0 %v13919_v2 }
 0x1f4   : > { %v12825_v51 = vadd.f32 %v12824_v35, %v12823_v56  ;;  %v12826_v45 = vpop.f32.mrb[78].mxu1  ;;  %3635 = vmatprep.subr.bf16.mxu0 %v13924_v17  ;;  %v13942_v17 = vld [vmem:[%s20026_s1 + $0x964] ss:$12 sps:$4 sm:$0xff]   ;;  %v13940_v35 = vld [vmem:[%s20026_s1 + $0x960] ss:$12 sps:$4 sm:$0xff]  }
 0x1f5   : > { %v12827_v13 = vpop.f32.mrb[79].mxu1 }
 0x1f6   : > { %v17013_v37 = vadd.f32 %v12825_v51, %v16936_v59  ;;  %v12828_v61 = vadd.f32 %v12827_v13, %v12826_v45  ;;  %v13933_v59 = vld [vmem:[%s20026_s1 + $0x91c] ss:$12 sps:$4 sm:$0xff]  }
 0x1f7   : > { %3636 = vmatpush1.bf16.msra.mxu0 %v13922_v38  ;;  %v13945_v38 = vld [vmem:[%s20026_s1 + $0x97c] ss:$12 sps:$4 sm:$0xff]  }
 0x1f8   : > { %v17016_v36 = vadd.f32 %v12828_v61, %v16947_v31  ;;  %3637 = vmatprep.subr.bf16.mxu0 %v13927_v44 }
 0x1fa   : > { %v12845_v12 = vpop.f32.mrb[80].mxu1 }
 0x1fb   : > { %v12846_v34 = vpop.f32.mrb[81].mxu1  ;;  %3638 = vmatpush1.bf16.msra.mxu0 %v13925_v53  ;;  %v13948_v53 = vld [vmem:[%s20026_s1 + $0x994] ss:$12 sps:$4 sm:$0xff]  }
 0x1fc   : > { %v12847_v60 = vadd.f32 %v12846_v34, %v12845_v12  ;;  %v12848_v0 = vpop.f32.mrb[82].mxu1  ;;  %3680 = vmatprep.subr.bf16.mxu0 %v13930_v23  ;;  %v13946_v23 = vld [vmem:[%s20026_s1 + $0x990] ss:$12 sps:$4 sm:$0xff]  }
 0x1fd   : > { %v12849_v31 = vpop.f32.mrb[83].mxu1 }
 0x1fe   : > { %v17031_v21 = vadd.f32 %v12847_v60, %v16956_v18  ;;  %v12850_v46 = vadd.f32 %v12849_v31, %v12848_v0  ;;  %3640 = vmatmul.mubr.bf16.vlgmr.msra.gmra.mrb[0].mxu0 %v16389_v29  ;;  %v13939_v29 = vld [vmem:[%s20026_s1 + $0x94c] ss:$12 sps:$4 sm:$0xff]   ;;  %v13954_v0 = vld [vmem:[%s20026_s1 + $0x9c4] ss:$12 sps:$4 sm:$0xff]  }
 0x1ff   : > { %3681 = vmatpush1.bf16.msra.mxu0 %v13928_v32  ;;  %3649 = vmatprep.mubr.bf16.mxu0 %v16410_v39  ;;  %v13937_v39 = vld [vmem:[%s20026_s1 + $0x948] ss:$12 sps:$4 sm:$0xff]   ;;  %v13951_v32 = vld [vmem:[%s20026_s1 + $0x9ac] ss:$12 sps:$4 sm:$0xff]  }
 0x200   : > { %v17039_v26 = vadd.f32 %v12850_v46, %v16965_v28  ;;  %3682 = vmatprep.subr.bf16.mxu0 %v13933_v59  ;;  %v13957_v46 = vld [vmem:[%s20026_s1 + $0x9dc] ss:$12 sps:$4 sm:$0xff]  }
 0x202   : > { %v12851_v18 = vpop.f32.mrb[84].mxu1 }
 0x203   : > { %v12852_v52 = vpop.f32.mrb[85].mxu1  ;;  %3683 = vmatpush1.bf16.msra.mxu0 %v13931_v54  ;;  %v13952_v54 = vld [vmem:[%s20026_s1 + $0x9c0] ss:$12 sps:$4 sm:$0xff]  }
 0x204   : > { %v12853_v50 = vadd.f32 %v12852_v52, %v12851_v18  ;;  %v12854_v5 = vpop.f32.mrb[86].mxu1  ;;  %3684 = vmatprep.subr.bf16.mxu0 %v13936_v1  ;;  %v13960_v52 = vld [vmem:[%s20026_s1 + $0x9f4] ss:$12 sps:$4 sm:$0xff]  }
 0x205   : > { %v12855_v43 = vpop.f32.mrb[87].mxu1 }
 0x206   : > { %v17051_v28 = vadd.f32 %v12853_v50, %v16974_v8  ;;  %v12856_v2 = vadd.f32 %v12855_v43, %v12854_v5  ;;  %3650 = vmatmul.mubr.bf16.gmra.mrb[4].mxu0 %v16425_v40  ;;  %v13958_v5 = vld [vmem:[%s20026_s1 + $0x9f0] ss:$12 sps:$4 sm:$0xff]  }
 0x207   : > { %3685 = vmatpush1.bf16.msra.mxu0 %v13934_v55  ;;  %3659 = vmatprep.mubr.bf16.mxu0 %v16446_v58  ;;  %v13943_v58 = vld [vmem:[%s20026_s1 + $0x978] ss:$12 sps:$4 sm:$0xff]  }
 0x208   : > { %v17059_v56 = vadd.f32 %v12856_v2, %v16983_v48  ;;  %3686 = vmatprep.subr.bf16.mxu0 %v13939_v29 }
 0x20a   : > { %v12857_v8 = vpop.f32.mrb[88].mxu1 }
 0x20b   : > { %v12858_v44 = vpop.f32.mrb[89].mxu1  ;;  %3687 = vmatpush1.bf16.msra.mxu0 %v13937_v39 }
 0x20c   : > { %v12859_v51 = vadd.f32 %v12858_v44, %v12857_v8  ;;  %v12860_v40 = vpop.f32.mrb[90].mxu1  ;;  %3688 = vmatprep.subr.bf16.mxu0 %v13942_v17  ;;  %v13966_v44 = vld [vmem:[%s20026_s1 + $0xa24] ss:$12 sps:$4 sm:$0xff]  }
 0x20d   : > { %v12861_v45 = vpop.f32.mrb[91].mxu1 }
 0x20e   : > { %v17071_v48 = vadd.f32 %v12859_v51, %v16992_v14  ;;  %v12862_v13 = vadd.f32 %v12861_v45, %v12860_v40  ;;  %3660 = vmatmul.mubr.bf16.gmra.mrb[8].mxu0 %v16461_v6  ;;  %v13964_v40 = vld [vmem:[%s20026_s1 + $0xa20] ss:$12 sps:$4 sm:$0xff]  }
 0x20f   : > { %3689 = vmatpush1.bf16.msra.mxu0 %v13940_v35  ;;  %3669 = vmatprep.mubr.bf16.mxu0 %v16482_v20  ;;  %v13949_v20 = vld [vmem:[%s20026_s1 + $0x9a8] ss:$12 sps:$4 sm:$0xff]  }
 0x210   : > { %v17079_v61 = vadd.f32 %v12862_v13, %v17001_v4  ;;  %3690 = vmatprep.subr.bf16.mxu0 %v13945_v38 }
 0x212   : > { %v12863_v14 = vpop.f32.mrb[92].mxu1 }
 0x213   : > { %v12864_v12 = vpop.f32.mrb[93].mxu1  ;;  %3691 = vmatpush1.bf16.msra.mxu0 %v13943_v58 }
 0x214   : > { %v12865_v59 = vadd.f32 %v12864_v12, %v12863_v14  ;;  %v12866_v6 = vpop.f32.mrb[94].mxu1  ;;  %3692 = vmatprep.subr.bf16.mxu0 %v13948_v53  ;;  %v13972_v12 = vld [vmem:[%s20026_s1 + $0xa54] ss:$12 sps:$4 sm:$0xff]  }
 0x215   : > { %v12867_v34 = vpop.f32.mrb[95].mxu1 }
 0x216   : > { %v17091_v4 = vadd.f32 %v12865_v59, %v17013_v37  ;;  %v12868_v60 = vadd.f32 %v12867_v34, %v12866_v6  ;;  %3670 = vmatmul.mubr.bf16.gmra.mrb[12].mxu0 %v16497_v30  ;;  %v13970_v6 = vld [vmem:[%s20026_s1 + $0xa50] ss:$12 sps:$4 sm:$0xff]  }
 0x217   : > { %3693 = vmatpush1.bf16.msra.mxu0 %v13946_v23  ;;  %3712 = vmatprep.mubr.bf16.mxu0 %v16517_v41  ;;  %v13955_v41 = vld [vmem:[%s20026_s1 + $0x9d8] ss:$12 sps:$4 sm:$0xff]  }
 0x218   : > { %v17099_v31 = vadd.f32 %v12868_v60, %v17016_v36  ;;  %3694 = vmatprep.subr.bf16.mxu0 %v13951_v32 }
 0x21a   : > { %v12885_v37 = vpop.f32.mrb[96].mxu1 }
 0x21b   : > { %v12886_v1 = vpop.f32.mrb[97].mxu1  ;;  %3695 = vmatpush1.bf16.msra.mxu0 %v13949_v20 }
 0x21c   : > { %v12887_v55 = vadd.f32 %v12886_v1, %v12885_v37  ;;  %v12888_v30 = vpop.f32.mrb[98].mxu1  ;;  %3696 = vmatprep.subr.bf16.mxu0 %v13954_v0  ;;  %v13978_v1 = vld [vmem:[%s20026_s1 + $0xa84] ss:$12 sps:$4 sm:$0xff]  }
 0x21d   : > { %v12889_v18 = vpop.f32.mrb[99].mxu1 }
 0x21e   : > { %v17111_v36 = vadd.f32 %v12887_v55, %v17031_v21  ;;  %v12890_v29 = vadd.f32 %v12889_v18, %v12888_v30  ;;  %v13963_v21 = vld [vmem:[%s20026_s1 + $0xa0c] ss:$12 sps:$4 sm:$0xff]  }
 0x21f   : > { %3697 = vmatpush1.bf16.msra.mxu0 %v13952_v54  ;;  %v13976_v30 = vld [vmem:[%s20026_s1 + $0xa80] ss:$12 sps:$4 sm:$0xff]  }
 0x220   : > { %v17117_v50 = vadd.f32 %v12890_v29, %v17039_v26  ;;  %3698 = vmatprep.subr.bf16.mxu0 %v13957_v46  ;;  %v13961_v26 = vld [vmem:[%s20026_s1 + $0xa08] ss:$12 sps:$4 sm:$0xff]  }
 0x222   : > { %v12891_v43 = vpop.f32.mrb[100].mxu1 }
 0x223   : > { %v12892_v39 = vpop.f32.mrb[101].mxu1  ;;  %3699 = vmatpush1.bf16.msra.mxu0 %v13955_v41 }
 0x224   : > { %v12893_v2 = vadd.f32 %v12892_v39, %v12891_v43  ;;  %v12894_v17 = vpop.f32.mrb[102].mxu1  ;;  %3700 = vmatprep.subr.bf16.mxu0 %v13960_v52  ;;  %v13984_v39 = vld [vmem:[%s20026_s1 + $0xab4] ss:$12 sps:$4 sm:$0xff]  }
 0x225   : > { %v12895_v35 = vpop.f32.mrb[103].mxu1 }
 0x226   : > { %v17129_v8 = vadd.f32 %v12893_v2, %v17051_v28  ;;  %v12896_v38 = vadd.f32 %v12895_v35, %v12894_v17  ;;  %v13969_v28 = vld [vmem:[%s20026_s1 + $0xa3c] ss:$12 sps:$4 sm:$0xff]  }
 0x227   : > { %3701 = vmatpush1.bf16.msra.mxu0 %v13958_v5  ;;  %v13982_v17 = vld [vmem:[%s20026_s1 + $0xab0] ss:$12 sps:$4 sm:$0xff]  }
 0x228   : > { %v17135_v51 = vadd.f32 %v12896_v38, %v17059_v56  ;;  %3702 = vmatprep.subr.bf16.mxu0 %v13963_v21  ;;  %v13967_v56 = vld [vmem:[%s20026_s1 + $0xa38] ss:$12 sps:$4 sm:$0xff]  }
 0x22a   : > { %v12897_v45 = vpop.f32.mrb[104].mxu1 }
 0x22b   : > { %v12898_v58 = vpop.f32.mrb[105].mxu1  ;;  %3703 = vmatpush1.bf16.msra.mxu0 %v13961_v26 }
 0x22c   : > { %v12899_v13 = vadd.f32 %v12898_v58, %v12897_v45  ;;  %v12900_v53 = vpop.f32.mrb[106].mxu1  ;;  %3704 = vmatprep.subr.bf16.mxu0 %v13966_v44  ;;  %v13990_v45 = vld [vmem:[%s20026_s1 + $0xae4] ss:$12 sps:$4 sm:$0xff]   ;;  %v13988_v58 = vld [vmem:[%s20026_s1 + $0xae0] ss:$12 sps:$4 sm:$0xff]  }
 0x22d   : > { %v12901_v23 = vpop.f32.mrb[107].mxu1 }
 0x22e   : > { %v17147_v14 = vadd.f32 %v12899_v13, %v17071_v48  ;;  %v12902_v32 = vadd.f32 %v12901_v23, %v12900_v53  ;;  %v13975_v48 = vld [vmem:[%s20026_s1 + $0xa6c] ss:$12 sps:$4 sm:$0xff]   ;;  %v13993_v13 = vld [vmem:[%s20026_s1 + $0xafc] ss:$12 sps:$4 sm:$0xff]  }
 0x22f   : > { %3705 = vmatpush1.bf16.msra.mxu0 %v13964_v40 }
 0x230   : > { %v17153_v59 = vadd.f32 %v12902_v32, %v17079_v61  ;;  %3706 = vmatprep.subr.bf16.mxu0 %v13969_v28  ;;  %v13973_v61 = vld [vmem:[%s20026_s1 + $0xa68] ss:$12 sps:$4 sm:$0xff]  }
 0x232   : > { %v12903_v34 = vpop.f32.mrb[108].mxu1 }
 0x233   : > { %v12904_v20 = vpop.f32.mrb[109].mxu1  ;;  %3707 = vmatpush1.bf16.msra.mxu0 %v13967_v56 }
 0x234   : > { %v12905_v60 = vadd.f32 %v12904_v20, %v12903_v34  ;;  %v12906_v0 = vpop.f32.mrb[110].mxu1  ;;  %3708 = vmatprep.subr.bf16.mxu0 %v13972_v12  ;;  %v13996_v12 = vld [vmem:[%s20026_s1 + $0xb14] ss:$12 sps:$4 sm:$0xff]   ;;  %v13994_v34 = vld [vmem:[%s20026_s1 + $0xb10] ss:$12 sps:$4 sm:$0xff]  }
 0x235   : > { %v12907_v54 = vpop.f32.mrb[111].mxu1 }
 0x236   : > { %v17165_v37 = vadd.f32 %v12905_v60, %v17091_v4  ;;  %v12908_v46 = vadd.f32 %v12907_v54, %v12906_v0  ;;  %v13981_v4 = vld [vmem:[%s20026_s1 + $0xa9c] ss:$12 sps:$4 sm:$0xff]  }
 0x237   : > { %3709 = vmatpush1.bf16.msra.mxu0 %v13970_v6 }
 0x238   : > { %v17171_v55 = vadd.f32 %v12908_v46, %v17099_v31  ;;  %3710 = vmatprep.subr.bf16.mxu0 %v13975_v48  ;;  %v13979_v31 = vld [vmem:[%s20026_s1 + $0xa98] ss:$12 sps:$4 sm:$0xff]  }
 0x239   : > { %v13999_v48 = vld [vmem:[%s20026_s1 + $0xb2c] ss:$12 sps:$4 sm:$0xff]  }
 0x23a   : > { %v12925_v18 = vpop.f32.mrb[112].mxu1 }
 0x23b   : > { %v12926_v41 = vpop.f32.mrb[113].mxu1  ;;  %3711 = vmatpush1.bf16.msra.mxu0 %v13973_v61  ;;  %v14002_v61 = vld [vmem:[%s20026_s1 + $0xb44] ss:$12 sps:$4 sm:$0xff]  }
 0x23c   : > { %v12927_v29 = vadd.f32 %v12926_v41, %v12925_v18  ;;  %v12928_v52 = vpop.f32.mrb[114].mxu1  ;;  %3753 = vmatprep.subr.bf16.mxu0 %v13978_v1  ;;  %v14000_v1 = vld [vmem:[%s20026_s1 + $0xb40] ss:$12 sps:$4 sm:$0xff]  }
 0x23d   : > { %v12929_v5 = vpop.f32.mrb[115].mxu1 }
 0x23e   : > { %v17183_v43 = vadd.f32 %v12927_v29, %v17111_v36  ;;  %v12930_v21 = vadd.f32 %v12929_v5, %v12928_v52  ;;  %3713 = vmatmul.mubr.bf16.vlgmr.msra.gmra.mrb[0].mxu0 %v16533_v19  ;;  %v13987_v19 = vld [vmem:[%s20026_s1 + $0xacc] ss:$12 sps:$4 sm:$0xff]   ;;  %v14008_v52 = vld [vmem:[%s20026_s1 + $0xb74] ss:$12 sps:$4 sm:$0xff]  }
 0x23f   : > { %3754 = vmatpush1.bf16.msra.mxu0 %v13976_v30  ;;  %3722 = vmatprep.mubr.bf16.mxu0 %v16557_v10  ;;  %v13985_v10 = vld [vmem:[%s20026_s1 + $0xac8] ss:$12 sps:$4 sm:$0xff]  }
 0x240   : > { %v17190_v2 = vadd.f32 %v12930_v21, %v17117_v50  ;;  %3755 = vmatprep.subr.bf16.mxu0 %v13981_v4  ;;  %v14005_v30 = vld [vmem:[%s20026_s1 + $0xb5c] ss:$12 sps:$4 sm:$0xff]  }
 0x242   : > { %v12931_v36 = vpop.f32.mrb[116].mxu1 }
 0x243   : > { %v12932_v35 = vpop.f32.mrb[117].mxu1  ;;  %3756 = vmatpush1.bf16.msra.mxu0 %v13979_v31  ;;  %v14006_v31 = vld [vmem:[%s20026_s1 + $0xb70] ss:$12 sps:$4 sm:$0xff]  }
 0x244   : > { %v12933_v26 = vadd.f32 %v12932_v35, %v12931_v36  ;;  %v12934_v38 = vpop.f32.mrb[118].mxu1  ;;  %3757 = vmatprep.subr.bf16.mxu0 %v13984_v39  ;;  %v14011_v39 = vld [vmem:[%s20026_s1 + $0xb8c] ss:$12 sps:$4 sm:$0xff]  }
 0x245   : > { %v12935_v44 = vpop.f32.mrb[119].mxu1 }
 0x246   : > { %v17203_v50 = vadd.f32 %v12933_v26, %v17129_v8  ;;  %v12936_v40 = vadd.f32 %v12935_v44, %v12934_v38  ;;  %3723 = vmatmul.mubr.bf16.gmra.mrb[4].mxu0 %v16575_v22  ;;  %v14014_v38 = vld [vmem:[%s20026_s1 + $0xba4] ss:$12 sps:$4 sm:$0xff]  }
 0x247   : > { %3758 = vmatpush1.bf16.msra.mxu0 %v13982_v17  ;;  %3732 = vmatprep.mubr.bf16.mxu0 %v16601_v42  ;;  %v13991_v42 = vld [vmem:[%s20026_s1 + $0xaf8] ss:$12 sps:$4 sm:$0xff]  }
 0x248   : > { %v17210_v28 = vadd.f32 %v12936_v40, %v17135_v51  ;;  %3759 = vmatprep.subr.bf16.mxu0 %v13987_v19 }
 0x24a   : > { %v12937_v8 = vpop.f32.mrb[120].mxu1 }
 0x24b   : > { %v12938_v53 = vpop.f32.mrb[121].mxu1  ;;  %3760 = vmatpush1.bf16.msra.mxu0 %v13985_v10  ;;  %v14012_v10 = vld [vmem:[%s20026_s1 + $0xba0] ss:$12 sps:$4 sm:$0xff]  }
 0x24c   : > { %v12939_v23 = vadd.f32 %v12938_v53, %v12937_v8  ;;  %v12940_v22 = vpop.f32.mrb[122].mxu1  ;;  %3761 = vmatprep.subr.bf16.mxu0 %v13990_v45  ;;  %v14017_v45 = vld [vmem:[%s20026_s1 + $0xbbc] ss:$12 sps:$4 sm:$0xff]  }
 0x24d   : > { %v12941_v56 = vpop.f32.mrb[123].mxu1 }
 0x24e   : > { %v17223_v51 = vadd.f32 %v12939_v23, %v17147_v14  ;;  %v12942_v32 = vadd.f32 %v12941_v56, %v12940_v22  ;;  %3733 = vmatmul.mubr.bf16.gmra.mrb[8].mxu0 %v16619_v57  ;;  %v14020_v22 = vld [vmem:[%s20026_s1 + $0xbd4] ss:$12 sps:$4 sm:$0xff]  }
 0x24f   : > { %3762 = vmatpush1.bf16.msra.mxu0 %v13988_v58  ;;  %3742 = vmatprep.mubr.bf16.mxu0 %v16645_v25  ;;  %v13997_v25 = vld [vmem:[%s20026_s1 + $0xb28] ss:$12 sps:$4 sm:$0xff]  }
 0x250   : > { %v17230_v6 = vadd.f32 %v12942_v32, %v17153_v59  ;;  %3763 = vmatprep.subr.bf16.mxu0 %v13993_v13  ;;  %v14018_v32 = vld [vmem:[%s20026_s1 + $0xbd0] ss:$12 sps:$4 sm:$0xff]  }
 0x252   : > { %v12943_v14 = vpop.f32.mrb[124].mxu1 }
 0x253   : > { %v12944_v20 = vpop.f32.mrb[125].mxu1  ;;  %3764 = vmatpush1.bf16.msra.mxu0 %v13991_v42 }
 0x254   : > { %v12945_v60 = vadd.f32 %v12944_v20, %v12943_v14  ;;  %v12946_v57 = vpop.f32.mrb[126].mxu1  ;;  %3765 = vmatprep.subr.bf16.mxu0 %v13996_v12 }
 0x255   : > { %v12947_v0 = vpop.f32.mrb[127].mxu1 }
 0x256   : > { %v17243_v59 = vadd.f32 %v12945_v60, %v17165_v37  ;;  %v12948_v54 = vadd.f32 %v12947_v0, %v12946_v57  ;;  %3743 = vmatmul.mubr.bf16.gmra.mrb[12].mxu0 %v16663_v49 }
 0x257   : > { %3766 = vmatpush1.bf16.msra.mxu0 %v13994_v34  ;;  %3785 = vmatprep.mubr.bf16.mxu0 %v16686_v33  ;;  %v14003_v33 = vld [vmem:[%s20026_s1 + $0xb58] ss:$12 sps:$4 sm:$0xff]  }
 0x258   : > { %v17250_v46 = vadd.f32 %v12948_v54, %v17171_v55  ;;  %3767 = vmatprep.subr.bf16.mxu0 %v13999_v48  ;;  %v14023_v34 = vld [vmem:[%s20026_s1 + $0xbec] ss:$12 sps:$4 sm:$0xff]  }
 0x25a   : > { %v12965_v37 = vpop.f32.mrb[128].mxu1 }
 0x25b   : > { %v12966_v18 = vpop.f32.mrb[129].mxu1  ;;  %3768 = vmatpush1.bf16.msra.mxu0 %v13997_v25 }
 0x25c   : > { %v12967_v4 = vadd.f32 %v12966_v18, %v12965_v37  ;;  %v12968_v49 = vpop.f32.mrb[130].mxu1  ;;  %3769 = vmatprep.subr.bf16.mxu0 %v14002_v61 }
 0x25d   : > { %v12969_v41 = vpop.f32.mrb[131].mxu1 }
 0x25e   : > { %v12970_v55 = vadd.f32 %v12969_v41, %v12968_v49  ;;  %v4389_v29 = vadd.f32 %v12967_v4, %v17183_v43 }
 0x25f   : > { %3770 = vmatpush1.bf16.msra.mxu0 %v14000_v1 }
 0x260   : > { %v4392_v5 = vadd.f32 %v12970_v55, %v17190_v2  ;;  %3771 = vmatprep.subr.bf16.mxu0 %v14005_v30  ;;  %v14009_v2 = vld [vmem:[%s20026_s1 + $0xb88] ss:$12 sps:$4 sm:$0xff]  }
 0x262   : > { %v12971_v21 = vpop.f32.mrb[132].mxu1 }
 0x263   : > { %v12972_v17 = vpop.f32.mrb[133].mxu1  ;;  %3772 = vmatpush1.bf16.msra.mxu0 %v14003_v33 }
 0x264   : > { %v12973_v43 = vadd.f32 %v12972_v17, %v12971_v21  ;;  %v12974_v36 = vpop.f32.mrb[134].mxu1  ;;  %3773 = vmatprep.subr.bf16.mxu0 %v14008_v52 }
 0x265   : > { %v12975_v19 = vpop.f32.mrb[135].mxu1 }
 0x266   : > { %v12976_v35 = vadd.f32 %v12975_v19, %v12974_v36  ;;  %v4397_v26 = vadd.f32 %v12973_v43, %v17203_v50 }
 0x267   : > { %3774 = vmatpush1.bf16.msra.mxu0 %v14006_v31 }
 0x268   : > { %v4400_v44 = vadd.f32 %v12976_v35, %v17210_v28  ;;  %3775 = vmatprep.subr.bf16.mxu0 %v14011_v39  ;;  %v14015_v28 = vld [vmem:[%s20026_s1 + $0xbb8] ss:$12 sps:$4 sm:$0xff]  }
 0x26a   : > { %v12977_v40 = vpop.f32.mrb[136].mxu1 }
 0x26b   : > { %v12978_v58 = vpop.f32.mrb[137].mxu1  ;;  %3776 = vmatpush1.bf16.msra.mxu0 %v14009_v2 }
 0x26c   : > { %v12979_v50 = vadd.f32 %v12978_v58, %v12977_v40  ;;  %v12980_v8 = vpop.f32.mrb[138].mxu1  ;;  %3777 = vmatprep.subr.bf16.mxu0 %v14014_v38  ;;  %v14032_v40 = vld [vmem:[#allocation5 + $0xe4] ss:$8 sps:$4 sm:$0xff]   ;;  %v14035_v58 = vld [vmem:[#allocation5 + $0xf4] ss:$8 sps:$4 sm:$0xff]  }
 0x26d   : > { %v12981_v13 = vpop.f32.mrb[139].mxu1 }
 0x26e   : > { %v12982_v53 = vadd.f32 %v12981_v13, %v12980_v8  ;;  %v4405_v23 = vadd.f32 %v12979_v50, %v17223_v51  ;;  %v14033_v50 = vld [vmem:[#allocation5 + $0xf0] ss:$8 sps:$4 sm:$0xff]   ;;  %v14044_v13 = vld [vmem:[#allocation5 + $0x124] ss:$8 sps:$4 sm:$0xff]  }
 0x26f   : > { %3778 = vmatpush1.bf16.msra.mxu0 %v14012_v10  ;;  %v14029_v10 = vld [vmem:[#allocation5 + $0xd4] ss:$8 sps:$4 sm:$0xff]   ;;  %v14039_v8 = vld [vmem:[#allocation5 + $0x110] ss:$8 sps:$4 sm:$0xff]  }
 0x270   : > { %v4408_v56 = vadd.f32 %v12982_v53, %v17230_v6  ;;  %3779 = vmatprep.subr.bf16.mxu0 %v14017_v45  ;;  %v14021_v6 = vld [vmem:[%s20026_s1 + $0xbe8] ss:$12 sps:$4 sm:$0xff]  }
 0x271   : > { %v14030_v45 = vld [vmem:[#allocation5 + $0xe0] ss:$8 sps:$4 sm:$0xff]   ;;  %v14047_v53 = vld [vmem:[#allocation5 + $0x134] ss:$8 sps:$4 sm:$0xff]  }
 0x272   : > { %v12983_v42 = vpop.f32.mrb[140].mxu1 }
 0x273   : > { %v12984_v12 = vpop.f32.mrb[141].mxu1  ;;  %3780 = vmatpush1.bf16.msra.mxu0 %v14015_v28  ;;  %v14042_v28 = vld [vmem:[#allocation5 + $0x120] ss:$8 sps:$4 sm:$0xff]  }
 0x274   : > { %v12985_v51 = vadd.f32 %v12984_v12, %v12983_v42  ;;  %v12986_v14 = vpop.f32.mrb[142].mxu1  ;;  %3781 = vmatprep.subr.bf16.mxu0 %v14020_v22  ;;  %v14050_v22 = vld [vmem:[#allocation5 + $0x144] ss:$8 sps:$4 sm:$0xff]   ;;  %v14053_v42 = vld [vmem:[#allocation5 + $0x154] ss:$8 sps:$4 sm:$0xff]  }
 0x275   : > { %v12987_v48 = vpop.f32.mrb[143].mxu1  ;;  %v14056_v12 = vld [vmem:[#allocation5 + $0x164] ss:$8 sps:$4 sm:$0xff]  }
 0x276   : > { %v12988_v20 = vadd.f32 %v12987_v48, %v12986_v14  ;;  %v4413_v60 = vadd.f32 %v12985_v51, %v17243_v59  ;;  %v17338_v51 = vsub.s32 0, %v16809_v9  ;;  %v17341_v14 = vsub.s32 1, %v16809_v9  ;;  %v14976_v48 = vld [vmem:[%s20027_s2] sm:$0x7] }
 0x277   : > { %3782 = vmatpush1.bf16.msra.mxu0 %v14018_v32  ;;  %v14051_v32 = vld [vmem:[#allocation5 + $0x150] ss:$8 sps:$4 sm:$0xff]  }
 0x278   : > { %v4416_v57 = vadd.f32 %v12988_v20, %v17250_v46  ;;  %3783 = vmatprep.subr.bf16.mxu0 %v14023_v34  ;;  %v14054_v34 = vld [vmem:[#allocation5 + $0x160] ss:$8 sps:$4 sm:$0xff]   ;;  %v17347_v20 = vrot.slane %v14976_v48, %v17338_v51 }
 0x27a   : > { %v13041_v0 = vpop.f32.mrb[144].mxu1 }
 0x27b   : > { %v4462_v25 = vadd.f32 %v13041_v0, %v4397_v26  ;;  %v4453_v54 = vpop.f32.mrb[145].mxu1  ;;  %3784 = vmatpush1.bf16.msra.mxu0 %v14021_v6  ;;  %v14059_v6 = vld [vmem:[#allocation5 + $0x174] ss:$8 sps:$4 sm:$0xff]  }
 0x27c   : > { %v4454_v61 = vadd.f32 %v4453_v54, %v4389_v29  ;;  %v13042_v1 = vpop.f32.mrb[146].mxu1 }
 0x27d   : > { %v4465_v37 = vadd.f32 %v13042_v1, %v4400_v44  ;;  %v4456_v30 = vpop.f32.mrb[147].mxu1  ;;  %v4492_v4 = vmax.f32 %v4462_v25, 0.0  ;;  %v14026_v44 = vld [vmem:[#allocation5 + $0xc4] ss:$8 sps:$4 sm:$0xff]  }
 0x27e   : > { %v4457_v18 = vadd.f32 %v4456_v30, %v4392_v5  ;;  %3786 = vmatmul.mubr.bf16.vlgmr.msra.gmra.mrb[0].mxu0 %v16700_v24  ;;  %v4486_v41 = vmax.f32 %v4454_v61, 0.0  ;;  %4946 = vmatprep.subr.bf16.mxu1 %v14026_v44  ;;  %v14062_v61 = vld [vmem:[#allocation5 + $0x4] ss:$8 sps:$4 sm:$0xff]  }
 0x27f   : > { %v4495_v49 = vmax.f32 %v4465_v37, 0.0  ;;  %3795 = vmatprep.mubr.bf16.mxu0 %v16706_v11 }
 0x280   : > { %v4489_v33 = vmax.f32 %v4457_v18, 0.0 }
 0x281   : > { %v17308_v59 = vpack.i.bf16 %v4495_v49, %v4492_v4  ;;  %v17310_v46 = vpack.c.bf16 %v4495_v49, %v4492_v4 }
 0x282   : > { %v17312_v55 = vpack.i.bf16 %v4489_v33, %v4486_v41  ;;  %v17314_v29 = vpack.c.bf16 %v4489_v33, %v4486_v41  ;;  %v13045_v52 = vpop.f32.mrb[148].mxu1 }
 0x283   : > { %v17316_v31 = vadd.f32 %v13045_v52, %v4413_v60  ;;  %v4469_v5 = vpop.f32.mrb[149].mxu1  ;;  %v17350_v60 = vrot.slane %v14976_v48, %v17341_v14 }
 0x284   : > { %v4470_v21 = vadd.f32 %v4469_v5, %v4405_v23  ;;  %v13046_v39 = vpop.f32.mrb[150].mxu1  ;;  %v14045_v23 = vld [vmem:[#allocation5 + $0x130] ss:$8 sps:$4 sm:$0xff]   ;;  %v20077_v5 = vld [vmem:[#allocation14_spill] sm:$0xff] }
 0x285   : > { %v17318_v17 = vadd.f32 %v13046_v39, %v4416_v57  ;;  %v4472_v24 = vpop.f32.mrb[151].mxu1  ;;  %v4504_v11 = vmax.f32 %v17316_v31, 0.0  ;;  %v14057_v57 = vld [vmem:[#allocation5 + $0x170] ss:$8 sps:$4 sm:$0xff]   ;;  %v14060_v31 = vld [vmem:[#allocation5] ss:$8 sps:$4 sm:$0xff]  }
 0x286   : > { %v4473_v43 = vadd.f32 %v4472_v24, %v4408_v56  ;;  %3796 = vmatmul.mubr.bf16.gmra.mrb[4].mxu0 %v16729_v3  ;;  %v4498_v19 = vmax.f32 %v4470_v21, 0.0  ;;  %v14024_v3 = vld [vmem:[#allocation5 + $0xc0] ss:$8 sps:$4 sm:$0xff]  }
 0x287   : > { %v4507_v36 = vmax.f32 %v17318_v17, 0.0  ;;  %3805 = vmatprep.mubr.bf16.mxu0 %v16737_v7  ;;  %4947 = vmatpush1.bf16.msra.mxu1 %v14024_v3  ;;  %v14027_v7 = vld [vmem:[#allocation5 + $0xd0] ss:$8 sps:$4 sm:$0xff]   ;;  %v14048_v56 = vld [vmem:[#allocation5 + $0x140] ss:$8 sps:$4 sm:$0xff]  }
 0x288   : > { %v4501_v2 = vmax.f32 %v4473_v43, 0.0  ;;  %4948 = vmatprep.subr.bf16.mxu1 %v14029_v10  ;;  %v20079_v17 = vld [vmem:[#allocation16_spill] sm:$0xff] }
 0x289   : > { %v17328_v35 = vpack.c.bf16 %v4507_v36, %v4504_v11 }
 0x28a   : > { %v17330_v26 = vpack.i.bf16 %v4501_v2, %v4498_v19  ;;  %v17332_v38 = vpack.c.bf16 %v4501_v2, %v4498_v19 }
 0x28b   : > { %4949 = vmatpush1.bf16.msra.mxu1 %v14027_v7  ;;  %v20078_v7 = vld [vmem:[#allocation15_spill] sm:$0xff] }
 0x28c   : > { %4950 = vmatprep.subr.bf16.mxu1 %v14032_v40 }
 0x28e   : > { %3806 = vmatmul.mubr.bf16.gmra.mrb[8].mxu0 %v16763_v62  ;;  %v14038_v62 = vld [vmem:[#allocation5 + $0x104] ss:$8 sps:$4 sm:$0xff]  }
 0x28f   : > { %3815 = vmatprep.mubr.bf16.mxu0 %v16768_v15  ;;  %4951 = vmatpush1.bf16.msra.mxu1 %v14030_v45  ;;  %v14036_v15 = vld [vmem:[#allocation5 + $0x100] ss:$8 sps:$4 sm:$0xff]  }
 0x290   : > { %4952 = vmatprep.subr.bf16.mxu1 %v14035_v58 }
 0x293   : > { %4953 = vmatpush1.bf16.msra.mxu1 %v14033_v50 }
 0x294   : > { %4954 = vmatprep.subr.bf16.mxu1 %v14038_v62  ;;  %v20080_v62 = vld [vmem:[#allocation17_spill] sm:$0xff] }
 0x296   : > { %3816 = vmatmul.mubr.bf16.gmra.mrb[12].mxu0 %v16789_v16  ;;  %v14041_v16 = vld [vmem:[#allocation5 + $0x114] ss:$8 sps:$4 sm:$0xff]  }
 0x297   : > { %4955 = vmatpush1.bf16.msra.mxu1 %v14036_v15 }
 0x298   : > { %4956 = vmatprep.subr.bf16.mxu1 %v14041_v16  ;;  %v20081_v16 = vld [vmem:[#allocation18_spill] sm:$0xff] }
 0x29b   : > { %4957 = vmatpush1.bf16.msra.mxu1 %v14039_v8 }
 0x29c   : > { %4958 = vmatprep.subr.bf16.mxu1 %v14044_v13 }
 0x29f   : > { %4959 = vmatpush1.bf16.msra.mxu1 %v14042_v28 }
 0x2a0   : > { %4960 = vmatprep.subr.bf16.mxu1 %v14047_v53 }
 0x2a3   : > { %4961 = vmatpush1.bf16.msra.mxu1 %v14045_v23 }
 0x2a4   : > { %4962 = vmatprep.subr.bf16.mxu1 %v14050_v22 }
 0x2a7   : > { %4963 = vmatpush1.bf16.msra.mxu1 %v14048_v56 }
 0x2a8   : > { %4964 = vmatprep.subr.bf16.mxu1 %v14053_v42 }
 0x2ab   : > { %4965 = vmatpush1.bf16.msra.mxu1 %v14051_v32 }
 0x2ac   : > { %4966 = vmatprep.subr.bf16.mxu1 %v14056_v12 }
 0x2af   : > { %4967 = vmatpush1.bf16.msra.mxu1 %v14054_v34 }
 0x2b0   : > { %4968 = vmatprep.subr.bf16.mxu1 %v14059_v6 }
 0x2b3   : > { %4969 = vmatpush1.bf16.msra.mxu1 %v14057_v57  ;;  %v20082_v57 = vld [vmem:[#allocation19_spill] sm:$0xff] }
 0x2b4   : > { %5151 = vmatprep.subr.bf16.mxu1 %v14062_v61  ;;  %v20083_v61 = vld [vmem:[#allocation20_spill] sm:$0xff] }
 0x351   : > { %v3787_v0 = vpop.f32.mrb[0].mxu0 }
 0x352   : > { %v13047_v25 = vadd.f32 %v3787_v0, %v17347_v20  ;;  %v3789_v54 = vpop.f32.mrb[1].mxu0 }
 0x353   : > { %v13049_v1 = vadd.f32 %v3789_v54, %v17350_v60  ;;  %v3791_v37 = vpop.f32.mrb[2].mxu0 }
 0x354   : > { %v13048_v30 = vadd.f32 %v13047_v25, %v16524_v47  ;;  %v13051_v18 = vadd.f32 %v3791_v37, %v17347_v20  ;;  %v3793_v4 = vpop.f32.mrb[3].mxu0  ;;  %v20084_v37 = vld [vmem:[#allocation21_spill] sm:$0xff] }
 0x355   : > { %v13050_v49 = vadd.f32 %v13049_v1, %v16548_v63  ;;  %v13053_v41 = vadd.f32 %v3793_v4, %v17350_v60 }
 0x356   : > { %v13052_v33 = vadd.f32 %v13051_v18, %v16552_v27  ;;  %v4484_v39 = vmax.f32 %v13048_v30, 0.0  ;;  %v20085_v18 = vld [vmem:[#allocation22_spill] sm:$0xff] }
 0x357   : > { %v4485_v52 = vmax.f32 %v13050_v49, 0.0  ;;  %v17360_v21 = vadd.f32 %v13053_v41, %v20077_v5 }
 0x358   : > { %v4487_v24 = vmax.f32 %v13052_v33, 0.0 }
 0x359   : > { %v4488_v43 = vmax.f32 %v17360_v21, 0.0  ;;  %v3797_v19 = vpop.f32.mrb[4].mxu0  ;;  %v17365_v47 = vpack.i.bf16 %v4485_v52, %v4507_v36 }
 0x35a   : > { %v17367_v2 = vpack.c.bf16 %v4487_v24, %v4484_v39  ;;  %v13055_v63 = vadd.f32 %v3797_v19, %v17347_v20  ;;  %v3799_v3 = vpop.f32.mrb[5].mxu0 }
 0x35b   : > { %v17372_v27 = vpack.c.bf16 %v4488_v43, %v4485_v52  ;;  %v13057_v44 = vadd.f32 %v3799_v3, %v17350_v60  ;;  %v3801_v10 = vpop.f32.mrb[6].mxu0 }
 0x35c   : > { %v13056_v40 = vadd.f32 %v13055_v63, %v20078_v7  ;;  %v13059_v45 = vadd.f32 %v3801_v10, %v17347_v20  ;;  %v3803_v58 = vpop.f32.mrb[7].mxu0  ;;  %v20086_v7 = vld [vmem:[#allocation23_spill] sm:$0xff] }
 0x35d   : > { %v13058_v36 = vadd.f32 %v13057_v44, %v20079_v17  ;;  %v13061_v50 = vadd.f32 %v3803_v58, %v17350_v60  ;;  %4789 = vrot.lane.b32.xlu0 %v17372_v27, %s15283_s19  ;;  %v20087_v17 = vld [vmem:[#allocation24_spill] sm:$0xff] }
 0x35e   : > { %v13060_v15 = vadd.f32 %v13059_v45, %v20080_v62  ;;  %v4490_v13 = vmax.f32 %v13056_v40, 0.0 }
 0x35f   : > { %v13062_v8 = vadd.f32 %v13061_v50, %v20081_v16  ;;  %v4491_v53 = vmax.f32 %v13058_v36, 0.0  ;;  %v20088_v50 = vld [vmem:[#allocation25_spill] sm:$0xff]  ;;  %v20089_v16 = vld [vmem:[#allocation26_spill] sm:$0xff] }
 0x360   : > { %v4493_v28 = vmax.f32 %v13060_v15, 0.0 }
 0x361   : > { %v4494_v23 = vmax.f32 %v13062_v8, 0.0  ;;  %4791 = vrot.lane.b32.xlu0 %v17314_v29, %s15283_s19  ;;  %v3807_v22 = vpop.f32.mrb[8].mxu0 }
 0x362   : > { %v17385_v56 = vpack.c.bf16 %v4493_v28, %v4490_v13  ;;  %v13063_v42 = vadd.f32 %v3807_v22, %v17347_v20  ;;  %v3809_v32 = vpop.f32.mrb[9].mxu0 }
 0x363   : > { %v17388_v12 = vpack.c.bf16 %v4494_v23, %v4491_v53  ;;  %v13065_v34 = vadd.f32 %v3809_v32, %v17350_v60  ;;  %v3811_v48 = vpop.f32.mrb[10].mxu0  ;;  %v13484_v6 = vpack.i.bf16 %v4494_v23, %v4491_v53 }
 0x364   : > { %v13064_v0 = vadd.f32 %v13063_v42, %v20082_v57  ;;  %v13067_v25 = vadd.f32 %v3811_v48, %v17347_v20  ;;  %v3813_v54 = vpop.f32.mrb[11].mxu0  ;;  %v14071_v42 = vld [vmem:[#allocation5 + $0x34] ss:$8 sps:$4 sm:$0xff]   ;;  %v14074_v57 = vld [vmem:[#allocation5 + $0x44] ss:$8 sps:$4 sm:$0xff]  }
 0x365   : > { %v13066_v1 = vadd.f32 %v13065_v34, %v20083_v61  ;;  %v13069_v29 = vadd.f32 %v3813_v54, %v17350_v60  ;;  %4793 = vrot.lane.b32.xlu1 %v17388_v12, %s15283_s19  ;;  %v14069_v34 = vld [vmem:[#allocation5 + $0x30] ss:$8 sps:$4 sm:$0xff]   ;;  %v14077_v61 = vld [vmem:[#allocation5 + $0x54] ss:$8 sps:$4 sm:$0xff]  }
 0x366   : > { %v13068_v30 = vadd.f32 %v13067_v25, %v20084_v37  ;;  %v4496_v49 = vmax.f32 %v13064_v0, 0.0  ;;  %v14072_v0 = vld [vmem:[#allocation5 + $0x40] ss:$8 sps:$4 sm:$0xff]  }
 0x367   : > { %v13070_v4 = vadd.f32 %v13069_v29, %v20085_v18  ;;  %v4497_v33 = vmax.f32 %v13066_v1, 0.0  ;;  %v17453_v18 = vadd.s32 8, %v16809_v9 }
 0x368   : > { %v4499_v41 = vmax.f32 %v13068_v30, 0.0  ;;  %v14075_v30 = vld [vmem:[#allocation5 + $0x50] ss:$8 sps:$4 sm:$0xff]  }
 0x369   : > { %v4500_v52 = vmax.f32 %v13070_v4, 0.0  ;;  %4795 = vrot.lane.b32.xlu1 %v17310_v46, %s15283_s19  ;;  %v3817_v5 = vpop.f32.mrb[12].mxu0 }
 0x36a   : > { %v17401_v39 = vpack.c.bf16 %v4499_v41, %v4496_v49  ;;  %v13071_v24 = vadd.f32 %v3817_v5, %v17347_v20  ;;  %v3819_v19 = vpop.f32.mrb[13].mxu0  ;;  %v14080_v49 = vld [vmem:[#allocation5 + $0x64] ss:$8 sps:$4 sm:$0xff]  }
 0x36b   : > { %v17404_v63 = vpack.c.bf16 %v4500_v52, %v4497_v33  ;;  %v13073_v3 = vadd.f32 %v3819_v19, %v17350_v60  ;;  %v3821_v44 = vpop.f32.mrb[14].mxu0  ;;  %v13494_v10 = vpack.i.bf16 %v4500_v52, %v4497_v33  ;;  %v4525_v52 = vand.u32 7, %v16809_v9 }
 0x36c   : > { %v13072_v40 = vadd.f32 %v13071_v24, %v20086_v7  ;;  %v13075_v45 = vadd.f32 %v3821_v44, %v17347_v20  ;;  %v3823_v58 = vpop.f32.mrb[15].mxu0  ;;  %v4526_v44 = vand.u32 7, %v17453_v18 }
 0x36d   : > { %v13074_v36 = vadd.f32 %v13073_v3, %v20087_v17  ;;  %v13077_v46 = vadd.f32 %v3823_v58, %v17350_v60  ;;  %4799 = vrot.lane.b32.xlu1 %v17332_v38, %s15283_s19  ;;  %4797 = vrot.lane.b32.xlu0 %v17404_v63, %s15283_s19  ;;  %v14078_v3 = vld [vmem:[#allocation5 + $0x60] ss:$8 sps:$4 sm:$0xff]   ;;  %vm17466_vm3 = vcmp.ge.s32.totalorder %v4525_v52, 1  ;;  %v14081_v58 = vld [vmem:[#allocation5 + $0x70] ss:$8 sps:$4 sm:$0xff]   ;;  %v17581_v17 = vadd.s32 48, %v16809_v9 }
 0x36e   : > { %v13076_v62 = vadd.f32 %v13075_v45, %v20088_v50  ;;  %v4502_v13 = vmax.f32 %v13072_v40, 0.0  ;;  %vm17476_vm4 = vcmp.ge.s32.totalorder %v4526_v44, 1  ;;  %v14086_v50 = vld [vmem:[#allocation5 + $0x84] ss:$8 sps:$4 sm:$0xff]   ;;  %v14111_v40 = vld [vmem:[#allocation5 + $0x1d0] ss:$8 sps:$4 sm:$0xff]  }
 0x36f   : > { %v4503_v15 = vmax.f32 %v13074_v36, 0.0  ;;  %v13078_v8 = vadd.f32 %v13077_v46, %v20089_v16  ;;  %vm11890_vm7 = vmpackc.low %vm17476_vm4, %vm17466_vm3  ;;  %vm17667_vm15 = vcmp.le.s32.totalorder %v4526_v44, 6 }
 0x370   : > { %v4505_v28 = vmax.f32 %v13076_v62, 0.0 }
 0x371   : > { %v4506_v53 = vmax.f32 %v13078_v8, 0.0  ;;  %4803 = vrot.lane.b32.xlu1 %v17328_v35, %s15283_s19  ;;  %13465 = vrot.lane.b32.xlu0 %v17312_v55, %s15283_s19  ;;  %v13499_v38 = vpack.i.bf16 %v4503_v15, %v4504_v11  ;;  %v14065_v35 = vld [vmem:[#allocation5 + $0x14] ss:$8 sps:$4 sm:$0xff]   ;;  %v14084_v8 = vld [vmem:[#allocation5 + $0x80] ss:$8 sps:$4 sm:$0xff]  }
 0x372   : > { %v17423_v20 = vpack.c.bf16 %v4505_v28, %v4502_v13  ;;  %v14089_v28 = vld [vmem:[#allocation5 + $0x94] ss:$8 sps:$4 sm:$0xff]  }
 0x373   : > { %v17425_v60 = vpack.c.bf16 %v4506_v53, %v4503_v15  ;;  %v13474_v23 = vpack.i.bf16 %v4506_v53, %v4488_v43  ;;  %v17489_v53 = vadd.s32 16, %v16809_v9 }
 0x375   : > { %13470 = vrot.lane.b32.xlu1 %v17365_v47, %s15283_s19  ;;  %4801 = vrot.lane.b32.xlu0 %v17425_v60, %s15283_s19  ;;  %v14066_v47 = vld [vmem:[#allocation5 + $0x20] ss:$8 sps:$4 sm:$0xff]  }
 0x379   : > { %13480 = vrot.lane.b32.xlu1 %v17308_v59, %s15283_s19  ;;  %13475 = vrot.lane.b32.xlu0 %v13474_v23, %s15283_s19  ;;  %v14063_v59 = vld [vmem:[#allocation5 + $0x10] ss:$8 sps:$4 sm:$0xff]  }
 0x37d   : > { %13490 = vrot.lane.b32.xlu1 %v17330_v26, %s15283_s19  ;;  %13485 = vrot.lane.b32.xlu0 %v13484_v6, %s15283_s19  ;;  %v14068_v26 = vld [vmem:[#allocation5 + $0x24] ss:$8 sps:$4 sm:$0xff]  }
 0x381   : > { %13500 = vrot.lane.b32.xlu1 %v13499_v38, %s15283_s19  ;;  %13495 = vrot.lane.b32.xlu0 %v13494_v10, %s15283_s19  ;;  %v14083_v10 = vld [vmem:[#allocation5 + $0x74] ss:$8 sps:$4 sm:$0xff]   ;;  %v17493_v38 = vadd.s32 24, %v16809_v9  ;;  %s15201_s19 = scalar_lea.vmem %s19979_s21, 17408 }
 0x382   : > { %p15202_p11 = scmp.ne.s32.totalorder %s19979_s21, %s15201_s19 }
 0x384   : > { %p15203_p1 = pnand %p15202_p11, %p20203_p0 }
 0x386   : > { %p15204_p3 = pneg %p15203_p1 }
 0x3cf   : > { %v4790_v55 = vpop.permute.xlu0 %4789 }
 0x3d3   : > { %v4792_v11 = vpop.permute.xlu0 %4791 }
 0x3d4   : > { %v4806_v21 = vsel %vm20046_vm1, %v4790_v55, %v4792_v11  ;;  %11861 = vmatprep.mubr.msk.bf16.mxu1 %vm20046_vm1, %v4792_v11 }
 0x3d5   : > { %4979 = vmatmul.mubr.bf16.vlgmr.msra.gmra.mrb[152].mxu1 %v4806_v21  ;;  %v14087_v21 = vld [vmem:[#allocation5 + $0x90] ss:$8 sps:$4 sm:$0xff]  }
 0x3d6   : > { %5152 = vmatpush1.bf16.msra.mxu1 %v14060_v31 }
 0x3d7   : > { %v4794_v43 = vpop.permute.xlu1 %4793  ;;  %5153 = vmatprep.subr.bf16.mxu1 %v14065_v35 }
 0x3da   : > { %5154 = vmatpush1.bf16.msra.mxu1 %v14063_v59  ;;  %v14092_v59 = vld [vmem:[#allocation5 + $0xa4] ss:$8 sps:$4 sm:$0xff]  }
 0x3db   : > { %v4796_v22 = vpop.permute.xlu1 %4795  ;;  %5155 = vmatprep.subr.bf16.mxu1 %v14068_v26  ;;  %v4528_v26 = vand.u32 7, %v17493_v38 }
 0x3dc   : > { %11862 = vmatprep.mubr.msk.bf16.mxu1 %vm20046_vm1, %v4796_v22  ;;  %v4807_v32 = vsel %vm20046_vm1, %v4794_v43, %v4796_v22  ;;  %v4527_v43 = vand.u32 7, %v17489_v53 }
 0x3dd   : > { %4989 = vmatmul.mubr.bf16.gmra.mrb[156].mxu1 %v4807_v32  ;;  %vm17525_vm6 = vcmp.ge.s32.totalorder %v4528_v26, 1 }
 0x3de   : > { %5156 = vmatpush1.bf16.msra.mxu1 %v14066_v47  ;;  %vm17517_vm5 = vcmp.ge.s32.totalorder %v4527_v43, 1 }
 0x3df   : > { %v4800_v48 = vpop.permute.xlu1 %4799  ;;  %v4798_v6 = vpop.permute.xlu0 %4797  ;;  %5157 = vmatprep.subr.bf16.mxu1 %v14071_v42  ;;  %vm11894_vm10 = vmpackc.low %vm17525_vm6, %vm17517_vm5 }
 0x3e0   : > { %11863 = vmatprep.mubr.msk.bf16.mxu1 %vm20046_vm1, %v4800_v48  ;;  %v4808_v1 = vsel %vm20046_vm1, %v4798_v6, %v4800_v48  ;;  %v14090_v6 = vld [vmem:[#allocation5 + $0xa0] ss:$8 sps:$4 sm:$0xff]  }
 0x3e2   : > { %5158 = vmatpush1.bf16.msra.mxu1 %v14069_v34 }
 0x3e3   : > { %v4804_v25 = vpop.permute.xlu1 %4803  ;;  %v13466_v54 = vpop.permute.xlu0 %13465  ;;  %5159 = vmatprep.subr.bf16.mxu1 %v14074_v57 }
 0x3e4   : > { %v17447_v29 = vunpack.i.h.bf16 %v13466_v54  ;;  %v17449_v37 = vunpack.i.l.bf16 %v13466_v54 }
 0x3e5   : > { %4999 = vmatmul.mubr.bf16.gmra.mrb[160].mxu1 %v4808_v1  ;;  %v14120_v1 = vld [vmem:[#allocation5 + $0x200] ss:$8 sps:$4 sm:$0xff]  }
 0x3e6   : > { %5160 = vmatpush1.bf16.msra.mxu1 %v14072_v0  ;;  %11864 = vmatprep.mubr.msk.bf16.mxu1 %vm20046_vm1, %v4804_v25  ;;  %v4617_v5 = vrot.slane %v17447_v29, 7  ;;  %v4615_v24 = vrot.slane %v17449_v37, 7  ;;  %v14095_v0 = vld [vmem:[#allocation5 + $0xb4] ss:$8 sps:$4 sm:$0xff]  }
 0x3e7   : > { %v13471_v4 = vpop.permute.xlu1 %13470  ;;  %5161 = vmatprep.subr.bf16.mxu1 %v14077_v61  ;;  %v4802_v33 = vpop.permute.xlu0 %4801 }
 0x3e8   : > { %v17455_v41 = vunpack.i.l.bf16 %v13471_v4  ;;  %v4809_v7 = vsel %vm20046_vm1, %v4802_v33, %v4804_v25  ;;  %v4644_v36 = vsel %vm4630_vm2, %v4615_v24, %v4617_v5  ;;  %v13473_v31 = vunpack.i.h.bf16 %v13471_v4  ;;  %v14105_v25 = vld [vmem:[#allocation5 + $0x1b0] ss:$8 sps:$4 sm:$0xff]  }
 0x3e9   : > { %v4650_v62 = vsel %vm17476_vm4, %v4644_v36, 0.0  ;;  %v14098_v36 = vld [vmem:[#allocation5 + $0x184] ss:$8 sps:$4 sm:$0xff]   ;;  %vm17706_vm4 = vcmp.le.s32.totalorder %v4528_v26, 6 }
 0x3ea   : > { %v4629_v19 = vrot.slane %v17455_v41, 7  ;;  %5162 = vmatpush1.bf16.msra.mxu1 %v14075_v30  ;;  %v17511_v42 = vsel %vm20046_vm1, %v13473_v31, %v17449_v37  ;;  %v17530_v30 = vadd.s32 32, %v16809_v9 }
 0x3eb   : > { %5163 = vmatprep.subr.bf16.mxu1 %v14080_v49  ;;  %v13476_v15 = vpop.permute.xlu0 %13475  ;;  %v13481_v13 = vpop.permute.xlu1 %13480  ;;  %v4614_v4 = vrot.slane %v17511_v42, 7 }
 0x3ec   : > { %v4646_v45 = vsel %vm4630_vm2, %v4629_v19, %v4615_v24  ;;  %v13478_v23 = vunpack.i.h.bf16 %v13476_v15  ;;  %v13477_v55 = vunpack.i.l.bf16 %v13476_v15  ;;  %v17495_v11 = vunpack.i.h.bf16 %v13481_v13 }
 0x3ed   : > { %5009 = vmatmul.mubr.bf16.gmra.mrb[164].mxu1 %v4809_v7  ;;  %v4648_v46 = vsel %vm17466_vm3, %v4646_v45, 0.0  ;;  %v17497_v35 = vunpack.i.l.bf16 %v13481_v13  ;;  %v17534_v24 = vadd.s32 40, %v16809_v9  ;;  %v14093_v7 = vld [vmem:[#allocation5 + $0xb0] ss:$8 sps:$4 sm:$0xff]   ;;  %vm17683_vm3 = vcmp.le.s32.totalorder %v4525_v52, 6 }
 0x3ee   : > { %5164 = vmatpush1.bf16.msra.mxu1 %v14078_v3  ;;  %v4721_v16 = vpack.c.bf16 %v4650_v62, %v4648_v46  ;;  %v17503_v47 = vsel %vm20046_vm1, %v13478_v23, %v17455_v41  ;;  %v17507_v22 = vsel %vm20046_vm1, %v13477_v55, %v17447_v29  ;;  %v4621_v32 = vrot.slane %v17495_v11, 7  ;;  %v14096_v55 = vld [vmem:[#allocation5 + $0x180] ss:$8 sps:$4 sm:$0xff]  }
 0x3ef   : > { %5165 = vmatprep.subr.bf16.mxu1 %v14083_v10  ;;  %v4619_v34 = vrot.slane %v17497_v35, 7  ;;  %v13486_v48 = vpop.permute.xlu0 %13485  ;;  %v13491_v57 = vpop.permute.xlu1 %13490  ;;  %v4628_v54 = vrot.slane %v17503_v47, 7  ;;  %v4616_v61 = vrot.slane %v17507_v22, 7  ;;  %v4529_v62 = vand.u32 7, %v17530_v30 }
 0x3f0   : > { %11889 = vmatprep.mubr.msk.bf16.mxu1 %vm20046_vm1, %v4721_v16  ;;  %v13488_v49 = vunpack.i.h.bf16 %v13486_v48  ;;  %v13487_v33 = vunpack.i.l.bf16 %v13486_v48  ;;  %v17536_v3 = vunpack.i.h.bf16 %v13491_v57  ;;  %v17538_v10 = vunpack.i.l.bf16 %v13491_v57 }
 0x3f1   : > { %v4640_v45 = vsel %vm4630_vm2, %v4619_v34, %v4621_v32  ;;  %v4645_v46 = vsel %vm4630_vm2, %v4628_v54, %v4614_v4  ;;  %v4530_v31 = vand.u32 7, %v17534_v24  ;;  %vm17576_vm8 = vcmp.ge.s32.totalorder %v4529_v62, 1 }
 0x3f2   : > { %5166 = vmatpush1.bf16.msra.mxu1 %v14081_v58  ;;  %v4642_v58 = vsel %vm4630_vm2, %v4617_v5, %v4619_v34  ;;  %v17555_v15 = vsel %vm20046_vm1, %v13488_v49, %v17495_v11  ;;  %v17559_v16 = vsel %vm20046_vm1, %v13487_v33, %v17497_v35  ;;  %v4625_v13 = vrot.slane %v17536_v3, 7  ;;  %v14101_v34 = vld [vmem:[#allocation5 + $0x194] ss:$8 sps:$4 sm:$0xff]   ;;  %v14099_v33 = vld [vmem:[#allocation5 + $0x190] ss:$8 sps:$4 sm:$0xff]  }
 0x3f3   : > { %5167 = vmatprep.subr.bf16.mxu1 %v14086_v50  ;;  %v4643_v50 = vsel %vm4630_vm2, %v4614_v4, %v4616_v61  ;;  %v4652_v5 = vsel %vm17517_vm5, %v4642_v58, 0.0  ;;  %v13496_v23 = vpop.permute.xlu0 %13495  ;;  %v4620_v48 = vrot.slane %v17555_v15, 7  ;;  %vm17588_vm9 = vcmp.ge.s32.totalorder %v4530_v31, 1 }
 0x3f4   : > { %v13497_v4 = vunpack.i.l.bf16 %v13496_v23  ;;  %vm11898_vm13 = vmpackc.low %vm17588_vm9, %vm17576_vm8  ;;  %vm17720_vm5 = vcmp.le.s32.totalorder %v4527_v43, 6 }
 0x3f6   : > { %5168 = vmatpush1.bf16.msra.mxu1 %v14084_v8  ;;  %v4654_v8 = vsel %vm17525_vm6, %v4640_v45, 0.0  ;;  %vm11930_vm6 = vmpackc.low %vm17667_vm15, %vm17683_vm3 }
 0x3f7   : > { %5169 = vmatprep.subr.bf16.mxu1 %v14089_v28  ;;  %v4623_v28 = vrot.slane %v17538_v10, 7  ;;  %v4723_v57 = vpack.c.bf16 %v4654_v8, %v4652_v5  ;;  %v17601_v5 = vadd.s32 56, %v16809_v9 }
 0x3f9   : > { %v4636_v45 = vsel %vm4630_vm2, %v4623_v28, %v4625_v13  ;;  %v4638_v58 = vsel %vm4630_vm2, %v4621_v32, %v4623_v28 }
 0x3fa   : > { %5170 = vmatpush1.bf16.msra.mxu1 %v14087_v21  ;;  %v11891_v21 = vpack.c.bf16 %v4643_v50, %v4645_v46  ;;  %v4656_v32 = vsel %vm17576_vm8, %v4638_v58, 0.0  ;;  %v4658_v28 = vsel %vm17588_vm9, %v4636_v45, 0.0  ;;  %v4532_v45 = vand.u32 7, %v17601_v5  ;;  %vm11934_vm9 = vmpackc.low %vm17706_vm4, %vm17720_vm5 }
 0x3fb   : > { %5171 = vmatprep.subr.bf16.mxu1 %v14092_v59  ;;  %v13501_v59 = vpop.permute.xlu1 %13500  ;;  %vm17769_vm8 = vcmp.le.s32.totalorder %v4529_v62, 6  ;;  %v14138_v62 = vld [vmem:[%s20030_s5 + $0x120] ss:$8 sps:$4 sm:$0xff]  }
 0x3fc   : > { %v17583_v49 = vunpack.i.l.bf16 %v13501_v59  ;;  %v13503_v58 = vunpack.i.h.bf16 %v13501_v59  ;;  %vm17633_vm12 = vcmp.ge.s32.totalorder %v4532_v45, 1 }
 0x3fe   : > { %5172 = vmatpush1.bf16.msra.mxu1 %v14090_v6  ;;  %v4618_v6 = vrot.slane %v17559_v16, 7 }
 0x3ff   : > { %5173 = vmatprep.subr.bf16.mxu1 %v14095_v0  ;;  %v13498_v0 = vunpack.i.h.bf16 %v13496_v23  ;;  %v17609_v23 = vsel %vm20046_vm1, %v13497_v4, %v17538_v10  ;;  %v4725_v4 = vpack.c.bf16 %v4658_v28, %v4656_v32  ;;  %v17649_v28 = vsel %vm20046_vm1, %v13503_v58, %v17583_v49 }
 0x400   : > { %v4639_v46 = vsel %vm4630_vm2, %v4618_v6, %v4620_v48  ;;  %v4641_v50 = vsel %vm4630_vm2, %v4616_v61, %v4618_v6  ;;  %v14102_v61 = vld [vmem:[#allocation5 + $0x1a0] ss:$8 sps:$4 sm:$0xff]   ;;  %v14107_v6 = vld [vmem:[#allocation5 + $0x1b4] ss:$8 sps:$4 sm:$0xff]   ;;  %v4679_v44 = vrot.slane %v17609_v23, 1 }
 0x401   : > { %v17605_v8 = vsel %vm20046_vm1, %v13498_v0, %v17536_v3  ;;  %v4622_v0 = vrot.slane %v17609_v23, 7 }
 0x402   : > { %5174 = vmatpush1.bf16.msra.mxu1 %v14093_v7  ;;  %v4677_v7 = vrot.slane %v17555_v15, 1  ;;  %v14140_v15 = vld [vmem:[%s20030_s5 + $0x124] ss:$8 sps:$4 sm:$0xff]  }
 0x403   : > { %5389 = vmatprep.subr.bf16.mxu1 %v14098_v36  ;;  %v14104_v36 = vld [vmem:[#allocation5 + $0x1a4] ss:$8 sps:$4 sm:$0xff]   ;;  %v4637_v32 = vsel %vm4630_vm2, %v4620_v48, %v4622_v0 }
 0x404   : > { %v4694_v23 = vsel %vm4687_vm14, %v4677_v7, %v4679_v44 }
 0x405   : > { %11892 = vmatmul.mubr.msk.bf16.vlgmr.msra.gmra.mrb[152].mxu1 %vm11890_vm7, %v11891_v21  ;;  %v4531_v21 = vand.u32 7, %v17581_v17  ;;  %vm17753_vm7 = vcmp.le.s32.totalorder %v4530_v31, 6  ;;  %v14171_v31 = vld [vmem:[%s20030_s5 + $0x1d0] ss:$8 sps:$4 sm:$0xff]  }
 0x406   : > { %11893 = vmatprep.mubr.msk.bf16.mxu1 %vm20046_vm1, %v4723_v57  ;;  %5390 = vmatpush1.bf16.msra.mxu1 %v14096_v55  ;;  %v4627_v55 = vrot.slane %v17583_v49, 7  ;;  %v4624_v57 = vrot.slane %v17605_v8, 7 }
 0x407   : > { %5391 = vmatprep.subr.bf16.mxu1 %v14101_v34  ;;  %v11895_v34 = vpack.c.bf16 %v4639_v46, %v4641_v50  ;;  %vm17627_vm11 = vcmp.ge.s32.totalorder %v4531_v21, 1  ;;  %v14110_v46 = vld [vmem:[#allocation5 + $0x1c4] ss:$8 sps:$4 sm:$0xff]  }
 0x408   : > { %v4632_v59 = vsel %vm4630_vm2, %v4627_v55, %v4629_v19  ;;  %v4635_v50 = vsel %vm4630_vm2, %v4622_v0, %v4624_v57  ;;  %v4672_v0 = vrot.slane %v17449_v37, 1 }
 0x409   : > { %v4662_v19 = vsel %vm17633_vm12, %v4632_v59, 0.0  ;;  %v11899_v48 = vpack.c.bf16 %v4635_v50, %v4637_v32  ;;  %v14119_v32 = vld [vmem:[#allocation5 + $0x1f4] ss:$8 sps:$4 sm:$0xff]  }
 0x40a   : > { %5392 = vmatpush1.bf16.msra.mxu1 %v14099_v33  ;;  %v14125_v33 = vld [vmem:[#allocation5 + $0x214] ss:$8 sps:$4 sm:$0xff]  }
 0x40b   : > { %5393 = vmatprep.subr.bf16.mxu1 %v14104_v36  ;;  %v4634_v36 = vsel %vm4630_vm2, %v4625_v13, %v4627_v55  ;;  %v4676_v13 = vrot.slane %v17497_v35, 1  ;;  %v14108_v55 = vld [vmem:[#allocation5 + $0x1c0] ss:$8 sps:$4 sm:$0xff]  }
 0x40c   : > { %v14132_v35 = vld [vmem:[%s20030_s5 + $0x100] ss:$8 sps:$4 sm:$0xff]  }
 0x40d   : > { %11896 = vmatmul.mubr.msk.bf16.gmra.mrb[156].mxu1 %vm11894_vm10, %v11895_v34  ;;  %v14113_v34 = vld [vmem:[#allocation5 + $0x1d4] ss:$8 sps:$4 sm:$0xff]   ;;  %vm17797_vm10 = vcmp.le.s32.totalorder %v4531_v21, 6 }
 0x40e   : > { %11897 = vmatprep.mubr.msk.bf16.mxu1 %vm20046_vm1, %v4725_v4  ;;  %5394 = vmatpush1.bf16.msra.mxu1 %v14102_v61  ;;  %v4660_v61 = vsel %vm17627_vm11, %v4634_v36, 0.0  ;;  %v4626_v4 = vrot.slane %v17649_v28, 7 }
 0x40f   : > { %5395 = vmatprep.subr.bf16.mxu1 %v14107_v6  ;;  %v4674_v6 = vrot.slane %v17447_v29, 1  ;;  %v4727_v58 = vpack.c.bf16 %v4662_v19, %v4660_v61  ;;  %v14117_v19 = vld [vmem:[#allocation5 + $0x1f0] ss:$8 sps:$4 sm:$0xff]  }
 0x410   : > { %v4631_v59 = vsel %vm4630_vm2, %v4626_v4, %v4628_v54  ;;  %v4633_v36 = vsel %vm4630_vm2, %v4624_v57, %v4626_v4  ;;  %vm11902_vm2 = vmpackc.low %vm17633_vm12, %vm17627_vm11  ;;  %v14114_v54 = vld [vmem:[#allocation5 + $0x1e0] ss:$8 sps:$4 sm:$0xff]   ;;  %vm17815_vm11 = vcmp.le.s32.totalorder %v4532_v45, 6 }
 0x411   : > { %v4699_v29 = vsel %vm4687_vm14, %v4674_v6, %v4676_v13  ;;  %v11903_v57 = vpack.c.bf16 %v4631_v59, %v4633_v36  ;;  %v14126_v4 = vld [vmem:[#allocation5 + $0x220] ss:$8 sps:$4 sm:$0xff]   ;;  %v14129_v59 = vld [vmem:[#allocation5 + $0x230] ss:$8 sps:$4 sm:$0xff]   ;;  %vm11938_vm12 = vmpackc.low %vm17753_vm7, %vm17769_vm8 }
 0x412   : > { %5396 = vmatpush1.bf16.msra.mxu1 %v14105_v25  ;;  %v14116_v25 = vld [vmem:[#allocation5 + $0x1e4] ss:$8 sps:$4 sm:$0xff]   ;;  %v4707_v50 = vsel %vm17667_vm15, %v4699_v29, 0.0  ;;  %v4675_v29 = vrot.slane %v17559_v16, 1  ;;  %v4671_v16 = vrot.slane %v17511_v42, 1 }
 0x413   : > { %5397 = vmatprep.subr.bf16.mxu1 %v14110_v46  ;;  %v4701_v46 = vsel %vm4687_vm14, %v4672_v0, %v4674_v6  ;;  %v4680_v6 = vrot.slane %v17538_v10, 1  ;;  %v14144_v45 = vld [vmem:[%s20030_s5 + $0x140] ss:$8 sps:$4 sm:$0xff]   ;;  %v14153_v42 = vld [vmem:[%s20030_s5 + $0x170] ss:$8 sps:$4 sm:$0xff]  }
 0x414   : > { %v4705_v52 = vsel %vm17683_vm3, %v4701_v46, 0.0 }
 0x415   : > { %11900 = vmatmul.mubr.msk.bf16.gmra.mrb[160].mxu1 %vm11898_vm13, %v11899_v48  ;;  %v5225_v61 = vpack.c.bf16 %v4707_v50, %v4705_v52  ;;  %v14123_v48 = vld [vmem:[#allocation5 + $0x210] ss:$8 sps:$4 sm:$0xff]   ;;  %v14137_v52 = vld [vmem:[%s20030_s5 + $0x114] ss:$8 sps:$4 sm:$0xff]   ;;  %vm11942_vm13 = vmpackc.low %vm17815_vm11, %vm17797_vm10 }
 0x416   : > { %11901 = vmatprep.mubr.msk.bf16.mxu1 %vm20046_vm1, %v4727_v58  ;;  %5398 = vmatpush1.bf16.msra.mxu1 %v14108_v55  ;;  %v14122_v55 = vld [vmem:[#allocation5 + $0x204] ss:$8 sps:$4 sm:$0xff]   ;;  %v14131_v58 = vld [vmem:[#allocation5 + $0x234] ss:$8 sps:$4 sm:$0xff]  }
 0x417   : > { %5399 = vmatprep.subr.bf16.mxu1 %v14113_v34  ;;  %v14128_v34 = vld [vmem:[#allocation5 + $0x224] ss:$8 sps:$4 sm:$0xff]  }
 0x41a   : > { %5400 = vmatpush1.bf16.msra.mxu1 %v14111_v40  ;;  %v4678_v40 = vrot.slane %v17495_v11, 1  ;;  %v14134_v11 = vld [vmem:[%s20030_s5 + $0x104] ss:$8 sps:$4 sm:$0xff]  }
 0x41b   : > { %5401 = vmatprep.subr.bf16.mxu1 %v14116_v25  ;;  %v4673_v25 = vrot.slane %v17507_v22, 1 }
 0x41c   : > { %v4695_v10 = vsel %vm4687_vm14, %v4678_v40, %v4680_v6  ;;  %v4697_v46 = vsel %vm4687_vm14, %v4676_v13, %v4678_v40  ;;  %v4681_v40 = vrot.slane %v17605_v8, 1  ;;  %v14146_v8 = vld [vmem:[%s20030_s5 + $0x144] ss:$8 sps:$4 sm:$0xff]  }
 0x41d   : > { %11904 = vmatmul.mubr.msk.bf16.gmra.mrb[164].mxu1 %vm11902_vm2, %v11903_v57  ;;  %v4698_v22 = vsel %vm4687_vm14, %v4673_v25, %v4675_v29  ;;  %v4711_v50 = vsel %vm17706_vm4, %v4695_v10, 0.0  ;;  %v4684_v57 = vrot.slane %v17583_v49, 1  ;;  %v4709_v13 = vsel %vm17720_vm5, %v4697_v46, 0.0 }
 0x41e   : > { %5402 = vmatpush1.bf16.msra.mxu1 %v14114_v54  ;;  %11929 = vmatprep.mubr.msk.bf16.mxu1 %vm20046_vm1, %v5225_v61  ;;  %v4700_v54 = vsel %vm4687_vm14, %v4671_v16, %v4673_v25  ;;  %v4682_v49 = vrot.slane %v17536_v3, 1  ;;  %v14135_v3 = vld [vmem:[%s20030_s5 + $0x110] ss:$8 sps:$4 sm:$0xff]   ;;  %v4692_v21 = vsel %vm4687_vm14, %v4679_v44, %v4681_v40  ;;  %v4685_v46 = vrot.slane %v17503_v47, 1  ;;  %v14167_v61 = vld [vmem:[%s20030_s5 + $0x1b4] ss:$8 sps:$4 sm:$0xff]  }
 0x41f   : > { %5403 = vmatprep.subr.bf16.mxu1 %v14119_v32  ;;  %v11931_v43 = vpack.c.bf16 %v4698_v22, %v4700_v54  ;;  %v5227_v32 = vpack.c.bf16 %v4711_v50, %v4709_v13  ;;  %v14147_v50 = vld [vmem:[%s20030_s5 + $0x150] ss:$8 sps:$4 sm:$0xff]   ;;  %v14152_v54 = vld [vmem:[%s20030_s5 + $0x164] ss:$8 sps:$4 sm:$0xff]   ;;  %v14155_v13 = vld [vmem:[%s20030_s5 + $0x174] ss:$8 sps:$4 sm:$0xff]  }
 0x420   : > { %v4702_v47 = vsel %vm4687_vm14, %v4685_v46, %v4671_v16  ;;  %v14158_v16 = vld [vmem:[%s20030_s5 + $0x184] ss:$8 sps:$4 sm:$0xff]   ;;  %v14159_v44 = vld [vmem:[%s20030_s5 + $0x190] ss:$8 sps:$4 sm:$0xff]  }
 0x422   : > { %5404 = vmatpush1.bf16.msra.mxu1 %v14117_v19  ;;  %v4691_v19 = vsel %vm4687_vm14, %v4682_v49, %v4684_v57 }
 0x423   : > { %5405 = vmatprep.subr.bf16.mxu1 %v14122_v55  ;;  %v4693_v55 = vsel %vm4687_vm14, %v4680_v6, %v4682_v49  ;;  %v14143_v6 = vld [vmem:[%s20030_s5 + $0x134] ss:$8 sps:$4 sm:$0xff]  }
 0x424   : > { %v14161_v49 = vld [vmem:[%s20030_s5 + $0x194] ss:$8 sps:$4 sm:$0xff]  }
 0x426   : > { %5406 = vmatpush1.bf16.msra.mxu1 %v14120_v1  ;;  %v4715_v1 = vsel %vm17753_vm7, %v4691_v19, 0.0  ;;  %v14165_v19 = vld [vmem:[%s20030_s5 + $0x1b0] ss:$8 sps:$4 sm:$0xff]  }
 0x427   : > { %5407 = vmatprep.subr.bf16.mxu1 %v14125_v33  ;;  %v4696_v33 = vsel %vm4687_vm14, %v4675_v29, %v4677_v7  ;;  %v14162_v7 = vld [vmem:[%s20030_s5 + $0x1a0] ss:$8 sps:$4 sm:$0xff]  }
 0x42a   : > { %5408 = vmatpush1.bf16.msra.mxu1 %v14123_v48  ;;  %v11935_v48 = vpack.c.bf16 %v4694_v23, %v4696_v33  ;;  %v14173_v23 = vld [vmem:[%s20030_s5 + $0x1d4] ss:$8 sps:$4 sm:$0xff]  }
 0x42b   : > { %5409 = vmatprep.subr.bf16.mxu1 %v14128_v34  ;;  %v4713_v34 = vsel %vm17769_vm8, %v4693_v55, 0.0  ;;  %v14174_v55 = vld [vmem:[%s20030_s5 + $0x1e0] ss:$8 sps:$4 sm:$0xff]   ;;  %v14179_v33 = vld [vmem:[%s20030_s5 + $0x1f4] ss:$8 sps:$4 sm:$0xff]  }
 0x42c   : > { %v5229_v29 = vpack.c.bf16 %v4715_v1, %v4713_v34  ;;  %v14176_v1 = vld [vmem:[%s20030_s5 + $0x1e4] ss:$8 sps:$4 sm:$0xff]   ;;  %v5522_v34 = vshra.s32 %v16809_v9, 3 }
 0x42e   : > { %5410 = vmatpush1.bf16.msra.mxu1 %v14126_v4  ;;  %v4686_v4 = vrot.slane %v17455_v41, 1  ;;  %v14141_v41 = vld [vmem:[%s20030_s5 + $0x130] ss:$8 sps:$4 sm:$0xff]  }
 0x42f   : > { %5411 = vmatprep.subr.bf16.mxu1 %v14131_v58  ;;  %v4683_v58 = vrot.slane %v17649_v28, 1 }
 0x430   : > { %v4703_v10 = vsel %vm4687_vm14, %v4686_v4, %v4672_v0  ;;  %v14149_v0 = vld [vmem:[%s20030_s5 + $0x154] ss:$8 sps:$4 sm:$0xff]  }
 0x431   : > { %v4690_v28 = vsel %vm4687_vm14, %v4681_v40, %v4683_v58  ;;  %v4719_v37 = vsel %vm17815_vm11, %v4703_v10, 0.0  ;;  %v5478_v40 = vld [vmem:[%s20029_s4] sm:$0x3] }
 0x432   : > { %5412 = vmatpush1.bf16.msra.mxu1 %v14129_v59  ;;  %v4689_v59 = vsel %vm4687_vm14, %v4684_v57, %v4686_v4  ;;  %v11939_v22 = vpack.c.bf16 %v4690_v28, %v4692_v21  ;;  %v4688_v57 = vsel %vm4687_vm14, %v4683_v58, %v4685_v46  ;;  %vm17919_vm14 = vcmp.le.s32.totalorder %v5522_v34, 6  ;;  %v14293_v58 = vld [vmem:[%s20033_s8 + $0x124] ss:$68 sps:$4 sm:$0xff]  }
 0x433   : > { %5819 = vmatprep.subr.bf16.mxu1 %v14134_v11  ;;  %v4717_v11 = vsel %vm17797_vm10, %v4689_v59, 0.0  ;;  %v17940_v25 = vrot.slane %v5478_v40, %v17341_v14  ;;  %v14291_v4 = vld [vmem:[%s20033_s8 + $0x120] ss:$68 sps:$4 sm:$0xff]  }
 0x434   : > { %v5231_v26 = vpack.c.bf16 %v4719_v37, %v4717_v11 }
 0x435   : > { %11932 = vmatmul.mubr.msk.bf16.vlgmr.msra.gmra.mrb[152].mxu1 %vm11930_vm6, %v11931_v43  ;;  %v11943_v43 = vpack.c.bf16 %v4702_v47, %v4688_v57 }
 0x436   : > { %11933 = vmatprep.mubr.msk.bf16.mxu1 %vm20046_vm1, %v5227_v32  ;;  %5820 = vmatpush1.bf16.msra.mxu1 %v14132_v35  ;;  %v14150_v35 = vld [vmem:[%s20030_s5 + $0x160] ss:$8 sps:$4 sm:$0xff]   ;;  %v14164_v32 = vld [vmem:[%s20030_s5 + $0x1a4] ss:$8 sps:$4 sm:$0xff]  }
 0x437   : > { %5821 = vmatprep.subr.bf16.mxu1 %v14137_v52  ;;  %v14156_v52 = vld [vmem:[%s20030_s5 + $0x180] ss:$8 sps:$4 sm:$0xff]  }
 0x43a   : > { %5822 = vmatpush1.bf16.msra.mxu1 %v14135_v3  ;;  %v14170_v3 = vld [vmem:[%s20030_s5 + $0x1c4] ss:$8 sps:$4 sm:$0xff]  }
 0x43b   : > { %5823 = vmatprep.subr.bf16.mxu1 %v14140_v15  ;;  %v14168_v15 = vld [vmem:[%s20030_s5 + $0x1c0] ss:$8 sps:$4 sm:$0xff]  }
 0x43d   : > { %11936 = vmatmul.mubr.msk.bf16.gmra.mrb[156].mxu1 %vm11934_vm9, %v11935_v48  ;;  %v14182_v48 = vld [vmem:[%s20030_s5 + $0x4] ss:$8 sps:$4 sm:$0xff]  }
 0x43e   : > { %11937 = vmatprep.mubr.msk.bf16.mxu1 %vm20046_vm1, %v5229_v29  ;;  %5824 = vmatpush1.bf16.msra.mxu1 %v14138_v62  ;;  %v14177_v62 = vld [vmem:[%s20030_s5 + $0x1f0] ss:$8 sps:$4 sm:$0xff]   ;;  %v17937_v29 = vrot.slane %v5478_v40, %v17338_v51  ;;  %v14186_v40 = vld [vmem:[%s20030_s5 + $0x20] ss:$8 sps:$4 sm:$0xff]  }
 0x43f   : > { %5825 = vmatprep.subr.bf16.mxu1 %v14143_v6  ;;  %v5523_v6 = vshra.s32 %v17453_v18, 3  ;;  %v14203_v18 = vld [vmem:[%s20030_s5 + $0x74] ss:$8 sps:$4 sm:$0xff]  }
 0x441   : > { %vm17925_vm15 = vcmp.le.s32.totalorder %v5523_v6, 6 }
 0x442   : > { %5826 = vmatpush1.bf16.msra.mxu1 %v14141_v41  ;;  %vm12129_vm3 = vmpackc.low %vm17925_vm15, %vm17919_vm14 }
 0x443   : > { %5827 = vmatprep.subr.bf16.mxu1 %v14146_v8 }
 0x445   : > { %11940 = vmatmul.mubr.msk.bf16.gmra.mrb[160].mxu1 %vm11938_vm12, %v11939_v22  ;;  %vm18072_vm12 = vcmp.ge.s32.totalorder %v5522_v34, 1  ;;  %v14198_v34 = vld [vmem:[%s20030_s5 + $0x60] ss:$8 sps:$4 sm:$0xff]  }
 0x446   : > { %11941 = vmatprep.mubr.msk.bf16.mxu1 %vm20046_vm1, %v5231_v26  ;;  %5828 = vmatpush1.bf16.msra.mxu1 %v14144_v45 }
 0x447   : > { %5829 = vmatprep.subr.bf16.mxu1 %v14149_v0 }
 0x44a   : > { %5830 = vmatpush1.bf16.msra.mxu1 %v14147_v50 }
 0x44b   : > { %5831 = vmatprep.subr.bf16.mxu1 %v14152_v54  ;;  %v14180_v54 = vld [vmem:[%s20030_s5] ss:$8 sps:$4 sm:$0xff]  }
 0x44d   : > { %11944 = vmatmul.mubr.msk.bf16.gmra.mrb[164].mxu1 %vm11942_vm13, %v11943_v43  ;;  %v5524_v43 = vshra.s32 %v17489_v53, 3  ;;  %vm18078_vm13 = vcmp.ge.s32.totalorder %v5523_v6, 1  ;;  %v14276_v6 = vld [vmem:[%s20033_s8] ss:$68 sps:$4 sm:$0xff]   ;;  %v14338_v53 = vld [vmem:[%s20033_s8 + $0x554] ss:$68 sps:$4 sm:$0xff]  }
 0x44e   : > { %5832 = vmatpush1.bf16.msra.mxu1 %v14150_v35  ;;  %v14185_v35 = vld [vmem:[%s20030_s5 + $0x14] ss:$8 sps:$4 sm:$0xff]   ;;  %vm12041_vm0 = vmpackc.low %vm18078_vm13, %vm18072_vm12 }
 0x44f   : > { %5833 = vmatprep.subr.bf16.mxu1 %v14155_v13  ;;  %v5525_v13 = vshra.s32 %v17493_v38, 3  ;;  %vm17969_vm2 = vcmp.le.s32.totalorder %v5524_v43, 6  ;;  %vm18219_vm1 = vcmp.ge.s32.totalorder %v5524_v43, 1  ;;  %v14228_v43 = vld [vmem:[%s20030_s5 + $0x200] ss:$8 sps:$4 sm:$0xff]  }
 0x450   : > { %v14233_v38 = vld [vmem:[%s20030_s5 + $0x214] ss:$8 sps:$4 sm:$0xff]  }
 0x451   : > { %vm17975_vm4 = vcmp.le.s32.totalorder %v5525_v13, 6  ;;  %vm18225_vm11 = vcmp.ge.s32.totalorder %v5525_v13, 1  ;;  %v14336_v13 = vld [vmem:[%s20033_s8 + $0x550] ss:$68 sps:$4 sm:$0xff]  }
 0x452   : > { %5834 = vmatpush1.bf16.msra.mxu1 %v14153_v42  ;;  %vm12135_vm5 = vmpackc.low %vm17975_vm4, %vm17969_vm2  ;;  %vm20158_vm4 = vcmask 523264  }
 0x453   : > { %5835 = vmatprep.subr.bf16.mxu1 %v14158_v16  ;;  %vm12047_vm8 = vmpackc.low %vm18225_vm11, %vm18219_vm1 }
 0x456   : > { %5836 = vmatpush1.bf16.msra.mxu1 %v14156_v52 }
 0x457   : > { %5837 = vmatprep.subr.bf16.mxu1 %v14161_v49 }
 0x45a   : > { %5838 = vmatpush1.bf16.msra.mxu1 %v14159_v44 }
 0x45b   : > { %5839 = vmatprep.subr.bf16.mxu1 %v14164_v32  ;;  %v14303_v32 = vld [vmem:[%s20033_s8 + $0x230] ss:$68 sps:$4 sm:$0xff]  }
 0x45e   : > { %5840 = vmatpush1.bf16.msra.mxu1 %v14162_v7  ;;  %v14305_v7 = vld [vmem:[%s20033_s8 + $0x234] ss:$68 sps:$4 sm:$0xff]  }
 0x45f   : > { %5841 = vmatprep.subr.bf16.mxu1 %v14167_v61 }
 0x462   : > { %5842 = vmatpush1.bf16.msra.mxu1 %v14165_v19 }
 0x463   : > { %5843 = vmatprep.subr.bf16.mxu1 %v14170_v3  ;;  %v14183_v3 = vld [vmem:[%s20030_s5 + $0x10] ss:$8 sps:$4 sm:$0xff]  }
 0x466   : > { %5844 = vmatpush1.bf16.msra.mxu1 %v14168_v15 }
 0x467   : > { %5845 = vmatprep.subr.bf16.mxu1 %v14173_v23 }
 0x46a   : > { %5846 = vmatpush1.bf16.msra.mxu1 %v14171_v31  ;;  %v14188_v31 = vld [vmem:[%s20030_s5 + $0x24] ss:$8 sps:$4 sm:$0xff]  }
 0x46b   : > { %5847 = vmatprep.subr.bf16.mxu1 %v14176_v1 }
 0x46e   : > { %5848 = vmatpush1.bf16.msra.mxu1 %v14174_v55 }
 0x46f   : > { %5849 = vmatprep.subr.bf16.mxu1 %v14179_v33 }
 0x472   : > { %5850 = vmatpush1.bf16.msra.mxu1 %v14177_v62 }
 0x473   : > { %6052 = vmatprep.subr.bf16.mxu1 %v14182_v48 }
 0x508   : > { %v5423_v59 = vpop.f32.mrb[152].mxu1 }
 0x509   : > { %v17943_v41 = vadd.f32 %v17937_v29, %v5423_v59  ;;  %v5425_v8 = vpop.f32.mrb[153].mxu1 }
 0x50a   : > { %v17946_v28 = vadd.f32 %v17940_v25, %v5425_v8  ;;  %v5427_v21 = vpop.f32.mrb[154].mxu1 }
 0x50b   : > { %v5492_v36 = vadd.f32 %v17937_v29, %v5427_v21  ;;  %v5429_v10 = vpop.f32.mrb[155].mxu1  ;;  %v5506_v45 = vmax.f32 %v17943_v41, 0.0  ;;  %v14191_v21 = vld [vmem:[%s20030_s5 + $0x34] ss:$8 sps:$4 sm:$0xff]   ;;  %v14278_v41 = vld [vmem:[%s20033_s8 + $0x4] ss:$68 sps:$4 sm:$0xff]  }
 0x50c   : > { %v5493_v11 = vadd.f32 %v17940_v25, %v5429_v10  ;;  %v5507_v37 = vmax.f32 %v17946_v28, 0.0  ;;  %v5527_v10 = vshra.s32 %v17534_v24, 3  ;;  %v14201_v28 = vld [vmem:[%s20030_s5 + $0x70] ss:$8 sps:$4 sm:$0xff]   ;;  %8347 = vmatprep.subr.bf16.mxu0 %v14278_v41  ;;  %v14221_v41 = vld [vmem:[%s20030_s5 + $0xd4] ss:$8 sps:$4 sm:$0xff]  }
 0x50d   : > { %v5508_v22 = vmax.f32 %v5492_v36, 0.0  ;;  %v5526_v36 = vshra.s32 %v17530_v30, 3  ;;  %8348 = vmatpush1.bf16.msra.mxu0 %v14276_v6  ;;  %v14216_v6 = vld [vmem:[%s20030_s5 + $0xc0] ss:$8 sps:$4 sm:$0xff]   ;;  %v14239_v24 = vld [vmem:[%s20030_s5 + $0x234] ss:$8 sps:$4 sm:$0xff]  }
 0x50e   : > { %v5509_v0 = vmax.f32 %v5493_v11, 0.0  ;;  %vm18013_vm7 = vcmp.le.s32.totalorder %v5527_v10, 6  ;;  %vm18277_vm12 = vcmp.ge.s32.totalorder %v5527_v10, 1  ;;  %v14350_v30 = vld [vmem:[%s20033_s8 + $0x664] ss:$68 sps:$4 sm:$0xff]  }
 0x50f   : > { %v5618_v26 = vpack.c.bf16 %v5508_v22, %v5506_v45  ;;  %vm18007_vm6 = vcmp.le.s32.totalorder %v5526_v36, 6  ;;  %v14348_v10 = vld [vmem:[%s20033_s8 + $0x660] ss:$68 sps:$4 sm:$0xff]  }
 0x510   : > { %v5619_v46 = vpack.c.bf16 %v5509_v0, %v5507_v37  ;;  %v5433_v50 = vpop.f32.mrb[156].mxu1  ;;  %vm20154_vm14 = vmpackc.low %vm18013_vm7, %vm18007_vm6 }
 0x511   : > { %v5494_v57 = vadd.f32 %v17937_v29, %v5433_v50  ;;  %v5435_v47 = vpop.f32.mrb[157].mxu1  ;;  %vm20155_vm15 = vmmov %vm20154_vm14  ;;  %v14315_v50 = vld [vmem:[%s20033_s8 + $0x340] ss:$68 sps:$4 sm:$0xff]  }
 0x512   : > { %v5495_v42 = vadd.f32 %v17940_v25, %v5435_v47  ;;  %v5437_v16 = vpop.f32.mrb[158].mxu1  ;;  %5851 = vmatprep.mubr.bf16.mxu1 %v5619_v46  ;;  %vm20160_vm6 = vmmov %vm20158_vm4 }
 0x513   : > { %v5510_v52 = vmax.f32 %v5494_v57, 0.0  ;;  %v5496_v49 = vadd.f32 %v17937_v29, %v5437_v16  ;;  %v5439_v44 = vpop.f32.mrb[159].mxu1  ;;  %5852 = vmatmul.mubr.bf16.vlgmr.msra.gmra.mrb[168].mxu1 %v5618_v26  ;;  %vm20161_vm7 = vmmov %vm20158_vm4 }
 0x514   : > { %v5511_v61 = vmax.f32 %v5495_v42, 0.0  ;;  %v5497_v19 = vadd.f32 %v17940_v25, %v5439_v44  ;;  %6053 = vmatpush1.bf16.msra.mxu1 %v14180_v54  ;;  %v14317_v54 = vld [vmem:[%s20033_s8 + $0x344] ss:$68 sps:$4 sm:$0xff]  }
 0x515   : > { %v17987_v15 = vpack.c.bf16 %v5510_v52, %v5508_v22  ;;  %v5512_v23 = vmax.f32 %v5496_v49, 0.0  ;;  %6054 = vmatprep.subr.bf16.mxu1 %v14185_v35  ;;  %v14189_v35 = vld [vmem:[%s20030_s5 + $0x30] ss:$8 sps:$4 sm:$0xff]  }
 0x516   : > { %v17992_v55 = vpack.c.bf16 %v5511_v61, %v5509_v0  ;;  %v5513_v1 = vmax.f32 %v5497_v19, 0.0 }
 0x517   : > { %v5620_v33 = vpack.c.bf16 %v5512_v23, %v5510_v52  ;;  %v14194_v52 = vld [vmem:[%s20030_s5 + $0x44] ss:$8 sps:$4 sm:$0xff]  }
 0x518   : > { %v5621_v62 = vpack.c.bf16 %v5513_v1, %v5511_v61  ;;  %6055 = vmatpush1.bf16.msra.mxu1 %v14183_v3  ;;  %v5443_v48 = vpop.f32.mrb[160].mxu1 }
 0x519   : > { %v5498_v59 = vadd.f32 %v17937_v29, %v5443_v48  ;;  %v5445_v8 = vpop.f32.mrb[161].mxu1  ;;  %6056 = vmatprep.subr.bf16.mxu1 %v14188_v31  ;;  %v14192_v31 = vld [vmem:[%s20030_s5 + $0x40] ss:$8 sps:$4 sm:$0xff]   ;;  %v5529_v48 = vshra.s32 %v17601_v5, 3  ;;  %v14245_v5 = vld [vmem:[%s20030_s5 + $0x254] ss:$8 sps:$4 sm:$0xff]  }
 0x51a   : > { %v5499_v11 = vadd.f32 %v17940_v25, %v5445_v8  ;;  %v5447_v22 = vpop.f32.mrb[162].mxu1  ;;  %5861 = vmatprep.mubr.bf16.mxu1 %v5621_v62  ;;  %v14197_v62 = vld [vmem:[%s20030_s5 + $0x54] ss:$8 sps:$4 sm:$0xff]  }
 0x51b   : > { %v5514_v0 = vmax.f32 %v5498_v59, 0.0  ;;  %v5500_v26 = vadd.f32 %v17937_v29, %v5447_v22  ;;  %v5449_v46 = vpop.f32.mrb[163].mxu1  ;;  %5862 = vmatmul.mubr.bf16.gmra.mrb[172].mxu1 %v5620_v33  ;;  %vm18051_vm10 = vcmp.le.s32.totalorder %v5529_v48, 6  ;;  %v14335_v22 = vld [vmem:[%s20033_s8 + $0x4dc] ss:$68 sps:$4 sm:$0xff]  }
 0x51c   : > { %v5515_v57 = vmax.f32 %v5499_v11, 0.0  ;;  %v5501_v47 = vadd.f32 %v17940_v25, %v5449_v46  ;;  %6057 = vmatpush1.bf16.msra.mxu1 %v14186_v40 }
 0x51d   : > { %v18025_v42 = vpack.c.bf16 %v5514_v0, %v5512_v23  ;;  %v5516_v16 = vmax.f32 %v5500_v26, 0.0  ;;  %6058 = vmatprep.subr.bf16.mxu1 %v14191_v21 }
 0x51e   : > { %v18030_v49 = vpack.c.bf16 %v5515_v57, %v5513_v1  ;;  %v5517_v44 = vmax.f32 %v5501_v47, 0.0  ;;  %v5528_v1 = vshra.s32 %v17581_v17, 3  ;;  %v14240_v17 = vld [vmem:[%s20030_s5 + $0x240] ss:$8 sps:$4 sm:$0xff]  }
 0x51f   : > { %v5622_v61 = vpack.c.bf16 %v5516_v16, %v5514_v0  ;;  %v14333_v0 = vld [vmem:[%s20033_s8 + $0x4d8] ss:$68 sps:$4 sm:$0xff]  }
 0x520   : > { %v5623_v19 = vpack.c.bf16 %v5517_v44, %v5515_v57  ;;  %6059 = vmatpush1.bf16.msra.mxu1 %v14189_v35  ;;  %v5453_v3 = vpop.f32.mrb[164].mxu1  ;;  %vm18045_vm9 = vcmp.le.s32.totalorder %v5528_v1, 6  ;;  %v14200_v35 = vld [vmem:[%s20030_s5 + $0x64] ss:$8 sps:$4 sm:$0xff]   ;;  %vm18323_vm1 = vcmp.ge.s32.totalorder %v5528_v1, 1 }
 0x521   : > { %v5502_v23 = vadd.f32 %v17937_v29, %v5453_v3  ;;  %v5455_v33 = vpop.f32.mrb[165].mxu1  ;;  %6060 = vmatprep.subr.bf16.mxu1 %v14194_v52  ;;  %v14243_v1 = vld [vmem:[%s20030_s5 + $0x250] ss:$8 sps:$4 sm:$0xff]  }
 0x522   : > { %v5503_v40 = vadd.f32 %v17940_v25, %v5455_v33  ;;  %v5457_v59 = vpop.f32.mrb[166].mxu1  ;;  %5871 = vmatprep.mubr.bf16.mxu1 %v5623_v19  ;;  %v14290_v33 = vld [vmem:[%s20033_s8 + $0x114] ss:$68 sps:$4 sm:$0xff]  }
 0x523   : > { %v5518_v8 = vmax.f32 %v5502_v23, 0.0  ;;  %v5504_v21 = vadd.f32 %v17937_v29, %v5457_v59  ;;  %v5459_v11 = vpop.f32.mrb[167].mxu1  ;;  %5872 = vmatmul.mubr.bf16.gmra.mrb[176].mxu1 %v5622_v61  ;;  %v14195_v29 = vld [vmem:[%s20030_s5 + $0x50] ss:$8 sps:$4 sm:$0xff]   ;;  %v14282_v23 = vld [vmem:[%s20033_s8 + $0x88] ss:$68 sps:$4 sm:$0xff]  }
 0x524   : > { %v5519_v26 = vmax.f32 %v5503_v40, 0.0  ;;  %v5505_v46 = vadd.f32 %v17940_v25, %v5459_v11  ;;  %6061 = vmatpush1.bf16.msra.mxu1 %v14192_v31  ;;  %v14209_v40 = vld [vmem:[%s20030_s5 + $0x94] ss:$8 sps:$4 sm:$0xff]   ;;  %v14212_v11 = vld [vmem:[%s20030_s5 + $0xa4] ss:$8 sps:$4 sm:$0xff]  }
 0x525   : > { %v18063_v57 = vpack.c.bf16 %v5518_v8, %v5516_v16  ;;  %v5520_v47 = vmax.f32 %v5504_v21, 0.0  ;;  %6062 = vmatprep.subr.bf16.mxu1 %v14197_v62  ;;  %v14204_v62 = vld [vmem:[%s20030_s5 + $0x80] ss:$8 sps:$4 sm:$0xff]   ;;  %v14288_v59 = vld [vmem:[%s20033_s8 + $0x110] ss:$68 sps:$4 sm:$0xff]  }
 0x526   : > { %v18068_v52 = vpack.c.bf16 %v5519_v26, %v5517_v44  ;;  %v5521_v25 = vmax.f32 %v5505_v46, 0.0  ;;  %v14207_v21 = vld [vmem:[%s20030_s5 + $0x90] ss:$8 sps:$4 sm:$0xff]   ;;  %v14302_v46 = vld [vmem:[%s20033_s8 + $0x224] ss:$68 sps:$4 sm:$0xff]  }
 0x527   : > { %v5624_v19 = vpack.c.bf16 %v5520_v47, %v5518_v8  ;;  %v18084_v3 = vpack.c.bf16 %v5506_v45, %v5520_v47  ;;  %v14284_v45 = vld [vmem:[%s20033_s8 + $0x8c] ss:$68 sps:$4 sm:$0xff]   ;;  %v14296_v8 = vld [vmem:[%s20033_s8 + $0x19c] ss:$68 sps:$4 sm:$0xff]  }
 0x528   : > { %v5625_v44 = vpack.c.bf16 %v5521_v25, %v5519_v26  ;;  %v18088_v31 = vpack.c.bf16 %v5507_v37, %v5521_v25  ;;  %6063 = vmatpush1.bf16.msra.mxu1 %v14195_v29  ;;  %v14206_v37 = vld [vmem:[%s20030_s5 + $0x84] ss:$8 sps:$4 sm:$0xff]   ;;  %8349 = vmatprep.subr.bf16.mxu0 %v14284_v45  ;;  %v14294_v26 = vld [vmem:[%s20033_s8 + $0x198] ss:$68 sps:$4 sm:$0xff]   ;;  %v14210_v29 = vld [vmem:[%s20030_s5 + $0xa0] ss:$8 sps:$4 sm:$0xff]  }
 0x529   : > { %6064 = vmatprep.subr.bf16.mxu1 %v14200_v35  ;;  %8350 = vmatpush1.bf16.msra.mxu0 %v14282_v23  ;;  %v14215_v47 = vld [vmem:[%s20030_s5 + $0xb4] ss:$8 sps:$4 sm:$0xff]   ;;  %v14300_v35 = vld [vmem:[%s20033_s8 + $0x220] ss:$68 sps:$4 sm:$0xff]   ;;  %v14308_v25 = vld [vmem:[%s20033_s8 + $0x2ac] ss:$68 sps:$4 sm:$0xff]  }
 0x52a   : > { %5881 = vmatprep.mubr.bf16.mxu1 %v5625_v44  ;;  %8351 = vmatprep.subr.bf16.mxu0 %v14290_v33  ;;  %v14218_v44 = vld [vmem:[%s20030_s5 + $0xc4] ss:$8 sps:$4 sm:$0xff]   ;;  %v14320_v45 = vld [vmem:[%s20033_s8 + $0x3bc] ss:$68 sps:$4 sm:$0xff]   ;;  %v14231_v16 = vld [vmem:[%s20030_s5 + $0x210] ss:$8 sps:$4 sm:$0xff]  }
 0x52b   : > { %5882 = vmatmul.mubr.bf16.gmra.mrb[180].mxu1 %v5624_v19  ;;  %v14213_v19 = vld [vmem:[%s20030_s5 + $0xb0] ss:$8 sps:$4 sm:$0xff]   ;;  %v14224_v23 = vld [vmem:[%s20030_s5 + $0xe4] ss:$8 sps:$4 sm:$0xff]  }
 0x52c   : > { %6065 = vmatpush1.bf16.msra.mxu1 %v14198_v34  ;;  %12043 = vmatprep.mubr.msk.bf16.mxu1 %vm12041_vm0, %v18088_v31  ;;  %v14306_v34 = vld [vmem:[%s20033_s8 + $0x2a8] ss:$68 sps:$4 sm:$0xff]   ;;  %v14318_v33 = vld [vmem:[%s20033_s8 + $0x3b8] ss:$68 sps:$4 sm:$0xff]  }
 0x52d   : > { %6066 = vmatprep.subr.bf16.mxu1 %v14203_v18  ;;  %8352 = vmatpush1.bf16.msra.mxu0 %v14288_v59  ;;  %v14314_v18 = vld [vmem:[%s20033_s8 + $0x334] ss:$68 sps:$4 sm:$0xff]   ;;  %v14236_v61 = vld [vmem:[%s20030_s5 + $0x224] ss:$8 sps:$4 sm:$0xff]  }
 0x52e   : > { %8353 = vmatprep.subr.bf16.mxu0 %v14296_v8  ;;  %v14227_v59 = vld [vmem:[%s20030_s5 + $0xf4] ss:$8 sps:$4 sm:$0xff]   ;;  %v14324_v8 = vld [vmem:[%s20033_s8 + $0x440] ss:$68 sps:$4 sm:$0xff]  }
 0x530   : > { %6067 = vmatpush1.bf16.msra.mxu1 %v14201_v28  ;;  %v14312_v28 = vld [vmem:[%s20033_s8 + $0x330] ss:$68 sps:$4 sm:$0xff]  }
 0x531   : > { %6068 = vmatprep.subr.bf16.mxu1 %v14206_v37  ;;  %8354 = vmatpush1.bf16.msra.mxu0 %v14294_v26  ;;  %v14219_v37 = vld [vmem:[%s20030_s5 + $0xd0] ss:$8 sps:$4 sm:$0xff]   ;;  %v14230_v26 = vld [vmem:[%s20030_s5 + $0x204] ss:$8 sps:$4 sm:$0xff]  }
 0x532   : > { %8355 = vmatprep.subr.bf16.mxu0 %v14302_v46  ;;  %v14266_v46 = vld [vmem:[%s20030_s5 + $0x2c4] ss:$8 sps:$4 sm:$0xff]  }
 0x534   : > { %6069 = vmatpush1.bf16.msra.mxu1 %v14204_v62  ;;  %v14326_v62 = vld [vmem:[%s20033_s8 + $0x444] ss:$68 sps:$4 sm:$0xff]  }
 0x535   : > { %6070 = vmatprep.subr.bf16.mxu1 %v14209_v40  ;;  %8356 = vmatpush1.bf16.msra.mxu0 %v14300_v35  ;;  %v14222_v40 = vld [vmem:[%s20030_s5 + $0xe0] ss:$8 sps:$4 sm:$0xff]  }
 0x536   : > { %8357 = vmatprep.subr.bf16.mxu0 %v14308_v25  ;;  %v14344_v35 = vld [vmem:[%s20033_s8 + $0x5dc] ss:$68 sps:$4 sm:$0xff]  }
 0x537   : > { %v14287_v25 = vld [vmem:[%s20033_s8 + $0x9c] ss:$68 sps:$4 sm:$0xff]  }
 0x538   : > { %6071 = vmatpush1.bf16.msra.mxu1 %v14207_v21  ;;  %v14332_v21 = vld [vmem:[%s20033_s8 + $0x4cc] ss:$68 sps:$4 sm:$0xff]  }
 0x539   : > { %6072 = vmatprep.subr.bf16.mxu1 %v14212_v11  ;;  %8358 = vmatpush1.bf16.msra.mxu0 %v14306_v34  ;;  %v14225_v11 = vld [vmem:[%s20030_s5 + $0xf0] ss:$8 sps:$4 sm:$0xff]  }
 0x53a   : > { %8359 = vmatprep.subr.bf16.mxu0 %v14314_v18  ;;  %v14356_v34 = vld [vmem:[%s20033_s8 + $0x6ec] ss:$68 sps:$4 sm:$0xff]  }
 0x53b   : > { %v14237_v18 = vld [vmem:[%s20030_s5 + $0x230] ss:$8 sps:$4 sm:$0xff]  }
 0x53c   : > { %6073 = vmatpush1.bf16.msra.mxu1 %v14210_v29  ;;  %v14264_v29 = vld [vmem:[%s20030_s5 + $0x2c0] ss:$8 sps:$4 sm:$0xff]  }
 0x53d   : > { %6074 = vmatprep.subr.bf16.mxu1 %v14215_v47  ;;  %8360 = vmatpush1.bf16.msra.mxu0 %v14312_v28  ;;  %v14330_v47 = vld [vmem:[%s20033_s8 + $0x4c8] ss:$68 sps:$4 sm:$0xff]   ;;  %v14360_v28 = vld [vmem:[%s20033_s8 + $0x770] ss:$68 sps:$4 sm:$0xff]  }
 0x53e   : > { %8361 = vmatprep.subr.bf16.mxu0 %v14320_v45  ;;  %v14354_v45 = vld [vmem:[%s20033_s8 + $0x6e8] ss:$68 sps:$4 sm:$0xff]  }
 0x540   : > { %6075 = vmatpush1.bf16.msra.mxu1 %v14213_v19  ;;  %v14285_v19 = vld [vmem:[%s20033_s8 + $0x98] ss:$68 sps:$4 sm:$0xff]  }
 0x541   : > { %6076 = vmatprep.subr.bf16.mxu1 %v14218_v44  ;;  %8362 = vmatpush1.bf16.msra.mxu0 %v14318_v33  ;;  %v14342_v44 = vld [vmem:[%s20033_s8 + $0x5d8] ss:$68 sps:$4 sm:$0xff]  }
 0x542   : > { %8363 = vmatprep.subr.bf16.mxu0 %v14326_v62  ;;  %v14249_v33 = vld [vmem:[%s20030_s5 + $0x270] ss:$8 sps:$4 sm:$0xff]   ;;  %v14254_v62 = vld [vmem:[%s20030_s5 + $0x284] ss:$8 sps:$4 sm:$0xff]  }
 0x544   : > { %6077 = vmatpush1.bf16.msra.mxu1 %v14216_v6  ;;  %v14242_v6 = vld [vmem:[%s20030_s5 + $0x244] ss:$8 sps:$4 sm:$0xff]  }
 0x545   : > { %6078 = vmatprep.subr.bf16.mxu1 %v14221_v41  ;;  %8364 = vmatpush1.bf16.msra.mxu0 %v14324_v8  ;;  %v14260_v8 = vld [vmem:[%s20030_s5 + $0x2a4] ss:$8 sps:$4 sm:$0xff]   ;;  %v14357_v41 = vld [vmem:[%s20033_s8 + $0x6f8] ss:$68 sps:$4 sm:$0xff]  }
 0x546   : > { %8365 = vmatprep.subr.bf16.mxu0 %v14332_v21  ;;  %v14258_v21 = vld [vmem:[%s20030_s5 + $0x2a0] ss:$8 sps:$4 sm:$0xff]  }
 0x548   : > { %6079 = vmatpush1.bf16.msra.mxu1 %v14219_v37  ;;  %v14246_v37 = vld [vmem:[%s20030_s5 + $0x260] ss:$8 sps:$4 sm:$0xff]  }
 0x549   : > { %6080 = vmatprep.subr.bf16.mxu1 %v14224_v23  ;;  %8366 = vmatpush1.bf16.msra.mxu0 %v14330_v47  ;;  %v14251_v23 = vld [vmem:[%s20030_s5 + $0x274] ss:$8 sps:$4 sm:$0xff]  }
 0x54a   : > { %8367 = vmatprep.subr.bf16.mxu0 %v14338_v53  ;;  %v14269_v47 = vld [vmem:[%s20030_s5 + $0x2d4] ss:$8 sps:$4 sm:$0xff]   ;;  %v14267_v53 = vld [vmem:[%s20030_s5 + $0x2d0] ss:$8 sps:$4 sm:$0xff]  }
 0x54c   : > { %6081 = vmatpush1.bf16.msra.mxu1 %v14222_v40  ;;  %v14252_v40 = vld [vmem:[%s20030_s5 + $0x280] ss:$8 sps:$4 sm:$0xff]  }
 0x54d   : > { %6082 = vmatprep.subr.bf16.mxu1 %v14227_v59  ;;  %8368 = vmatpush1.bf16.msra.mxu0 %v14336_v13  ;;  %v14257_v59 = vld [vmem:[%s20030_s5 + $0x294] ss:$8 sps:$4 sm:$0xff]  }
 0x54e   : > { %8369 = vmatprep.subr.bf16.mxu0 %v14344_v35  ;;  %v14275_v13 = vld [vmem:[%s20030_s5 + $0x2f4] ss:$8 sps:$4 sm:$0xff]   ;;  %v14273_v35 = vld [vmem:[%s20030_s5 + $0x2f0] ss:$8 sps:$4 sm:$0xff]  }
 0x550   : > { %6083 = vmatpush1.bf16.msra.mxu1 %v14225_v11  ;;  %v14263_v11 = vld [vmem:[%s20030_s5 + $0x2b4] ss:$8 sps:$4 sm:$0xff]  }
 0x551   : > { %6326 = vmatprep.subr.bf16.mxu1 %v14230_v26  ;;  %8370 = vmatpush1.bf16.msra.mxu0 %v14342_v44  ;;  %v14261_v26 = vld [vmem:[%s20030_s5 + $0x2b0] ss:$8 sps:$4 sm:$0xff]  }
 0x552   : > { %8371 = vmatprep.subr.bf16.mxu0 %v14350_v30  ;;  %v14329_v44 = vld [vmem:[%s20033_s8 + $0x454] ss:$68 sps:$4 sm:$0xff]  }
 0x553   : > { %12046 = vmatmul.mubr.msk.bf16.vlgmr.msra.gmra.mrb[168].mxu1 %vm12041_vm0, %v18084_v3  ;;  %vm18271_vm0 = vcmp.ge.s32.totalorder %v5526_v36, 1  ;;  %v14234_v36 = vld [vmem:[%s20030_s5 + $0x220] ss:$8 sps:$4 sm:$0xff]   ;;  %v14327_v30 = vld [vmem:[%s20033_s8 + $0x450] ss:$68 sps:$4 sm:$0xff]  }
 0x554   : > { %12049 = vmatprep.mubr.msk.bf16.mxu1 %vm12047_vm8, %v17992_v55  ;;  %6327 = vmatpush1.bf16.msra.mxu1 %v14228_v43  ;;  %vm12053_vm13 = vmpackc.low %vm18277_vm12, %vm18271_vm0  ;;  %v14272_v43 = vld [vmem:[%s20030_s5 + $0x2e4] ss:$8 sps:$4 sm:$0xff]  }
 0x555   : > { %6328 = vmatprep.subr.bf16.mxu1 %v14233_v38  ;;  %8372 = vmatpush1.bf16.msra.mxu0 %v14348_v10  ;;  %v14270_v38 = vld [vmem:[%s20030_s5 + $0x2e0] ss:$8 sps:$4 sm:$0xff]   ;;  %vm20164_vm0 = vmmov %vm20158_vm4 }
 0x556   : > { %8373 = vmatprep.subr.bf16.mxu0 %v14356_v34  ;;  %v14345_v10 = vld [vmem:[%s20033_s8 + $0x5e8] ss:$68 sps:$4 sm:$0xff]   ;;  %v14353_v34 = vld [vmem:[%s20033_s8 + $0x674] ss:$68 sps:$4 sm:$0xff]   ;;  %vm20165_vm12 = vmmov %vm20164_vm0 }
 0x558   : > { %6329 = vmatpush1.bf16.msra.mxu1 %v14231_v16  ;;  %v14281_v16 = vld [vmem:[%s20033_s8 + $0x14] ss:$68 sps:$4 sm:$0xff]  }
 0x559   : > { %6330 = vmatprep.subr.bf16.mxu1 %v14236_v61  ;;  %8374 = vmatpush1.bf16.msra.mxu0 %v14354_v45  ;;  %v14279_v61 = vld [vmem:[%s20033_s8 + $0x10] ss:$68 sps:$4 sm:$0xff]  }
 0x55a   : > { %v14362_v45 = vld [vmem:[%s20033_s8 + $0x774] ss:$68 sps:$4 sm:$0xff]  }
 0x55b   : > { %12052 = vmatmul.mubr.msk.bf16.gmra.mrb[172].mxu1 %vm12047_vm8, %v17987_v15  ;;  %vm18329_vm8 = vcmp.ge.s32.totalorder %v5529_v48, 1  ;;  %v14248_v48 = vld [vmem:[%s20030_s5 + $0x264] ss:$8 sps:$4 sm:$0xff]   ;;  %8375 = vmatprep.subr.bf16.mxu0 %v14362_v45 }
 0x55c   : > { %12055 = vmatprep.mubr.msk.bf16.mxu1 %vm12053_vm13, %v18030_v49  ;;  %6331 = vmatpush1.bf16.msra.mxu1 %v14234_v36  ;;  %vm12059_vm11 = vmpackc.low %vm18329_vm8, %vm18323_vm1  ;;  %v14339_v36 = vld [vmem:[%s20033_s8 + $0x560] ss:$68 sps:$4 sm:$0xff]  }
 0x55d   : > { %6332 = vmatprep.subr.bf16.mxu1 %v14239_v24  ;;  %v14347_v24 = vld [vmem:[%s20033_s8 + $0x5ec] ss:$68 sps:$4 sm:$0xff]   ;;  %8376 = vmatpush1.bf16.msra.mxu0 %v14360_v28  ;;  %v14392_v45 = vld [vmem:[%s20033_s8 + $0x1a4] ss:$68 sps:$4 sm:$0xff]   ;;  %vm20167_vm1 = vmmov %vm20164_vm0 }
 0x55e   : > { %vm20169_vm8 = vmmov %vm20164_vm0 }
 0x560   : > { %6333 = vmatpush1.bf16.msra.mxu1 %v14237_v18  ;;  %v14351_v18 = vld [vmem:[%s20033_s8 + $0x670] ss:$68 sps:$4 sm:$0xff]  }
 0x561   : > { %6334 = vmatprep.subr.bf16.mxu1 %v14242_v6  ;;  %v14359_v6 = vld [vmem:[%s20033_s8 + $0x6fc] ss:$68 sps:$4 sm:$0xff]  }
 0x563   : > { %12058 = vmatmul.mubr.msk.bf16.gmra.mrb[176].mxu1 %vm12053_vm13, %v18025_v42  ;;  %vm20166_vm13 = vmmov %vm20164_vm0 }
 0x564   : > { %12061 = vmatprep.mubr.msk.bf16.mxu1 %vm12059_vm11, %v18068_v52  ;;  %6335 = vmatpush1.bf16.msra.mxu1 %v14240_v17  ;;  %v14363_v17 = vld [vmem:[%s20033_s8 + $0x780] ss:$68 sps:$4 sm:$0xff]  }
 0x565   : > { %6336 = vmatprep.subr.bf16.mxu1 %v14245_v5  ;;  %v14365_v5 = vld [vmem:[%s20033_s8 + $0x784] ss:$68 sps:$4 sm:$0xff]  }
 0x568   : > { %6337 = vmatpush1.bf16.msra.mxu1 %v14243_v1  ;;  %v14368_v1 = vld [vmem:[%s20033_s8 + $0x7fc] ss:$68 sps:$4 sm:$0xff]  }
 0x569   : > { %6338 = vmatprep.subr.bf16.mxu1 %v14248_v48  ;;  %v14371_v48 = vld [vmem:[%s20033_s8 + $0x80c] ss:$68 sps:$4 sm:$0xff]   ;;  %8377 = vmatprep.subr.bf16.mxu0 %v14368_v1 }
 0x56b   : > { %12064 = vmatmul.mubr.msk.bf16.gmra.mrb[180].mxu1 %vm12059_vm11, %v18063_v57  ;;  %vm20170_vm11 = vmmov %vm20164_vm0 }
 0x56c   : > { %6339 = vmatpush1.bf16.msra.mxu1 %v14246_v37  ;;  %12131 = vmatprep.mubr.msk.bf16.mxu1 %vm12129_vm3, %v17992_v55  ;;  %v14255_v55 = vld [vmem:[%s20030_s5 + $0x290] ss:$8 sps:$4 sm:$0xff]  }
 0x56d   : > { %6340 = vmatprep.subr.bf16.mxu1 %v14251_v23  ;;  %v14366_v37 = vld [vmem:[%s20033_s8 + $0x7f8] ss:$68 sps:$4 sm:$0xff]   ;;  %v14369_v23 = vld [vmem:[%s20033_s8 + $0x808] ss:$68 sps:$4 sm:$0xff]  }
 0x56e   : > { %8378 = vmatpush1.bf16.msra.mxu0 %v14366_v37 }
 0x570   : > { %6341 = vmatpush1.bf16.msra.mxu1 %v14249_v33  ;;  %v14374_v33 = vld [vmem:[%s20033_s8 + $0xc] ss:$68 sps:$4 sm:$0xff]  }
 0x571   : > { %6342 = vmatprep.subr.bf16.mxu1 %v14254_v62  ;;  %v14377_v62 = vld [vmem:[%s20033_s8 + $0x24] ss:$68 sps:$4 sm:$0xff]   ;;  %8420 = vmatprep.subr.bf16.mxu0 %v14374_v33 }
 0x572   : > { %v14390_v33 = vld [vmem:[%s20033_s8 + $0x1a0] ss:$68 sps:$4 sm:$0xff]  }
 0x574   : > { %6343 = vmatpush1.bf16.msra.mxu1 %v14252_v40  ;;  %v6415_v40 = vld [vmem:[%s20031_s6] sm:$0x3] }
 0x575   : > { %6344 = vmatprep.subr.bf16.mxu1 %v14257_v59  ;;  %v18583_v59 = vrot.slane %v6415_v40, %v17338_v51 }
 0x578   : > { %6345 = vmatpush1.bf16.msra.mxu1 %v14255_v55  ;;  %v18586_v55 = vrot.slane %v6415_v40, %v17341_v14 }
 0x579   : > { %6346 = vmatprep.subr.bf16.mxu1 %v14260_v8 }
 0x57c   : > { %6347 = vmatpush1.bf16.msra.mxu1 %v14258_v21 }
 0x57d   : > { %6348 = vmatprep.subr.bf16.mxu1 %v14263_v11 }
 0x580   : > { %6349 = vmatpush1.bf16.msra.mxu1 %v14261_v26 }
 0x581   : > { %6350 = vmatprep.subr.bf16.mxu1 %v14266_v46 }
 0x584   : > { %6351 = vmatpush1.bf16.msra.mxu1 %v14264_v29 }
 0x585   : > { %6352 = vmatprep.subr.bf16.mxu1 %v14269_v47 }
 0x588   : > { %6353 = vmatpush1.bf16.msra.mxu1 %v14267_v53 }
 0x589   : > { %6354 = vmatprep.subr.bf16.mxu1 %v14272_v43 }
 0x58c   : > { %6355 = vmatpush1.bf16.msra.mxu1 %v14270_v38 }
 0x58d   : > { %6356 = vmatprep.subr.bf16.mxu1 %v14275_v13 }
 0x590   : > { %6357 = vmatpush1.bf16.msra.mxu1 %v14273_v35 }
 0x591   : > { %8493 = vmatprep.subr.bf16.mxu1 %v14281_v16 }
 0x593   : > { %12134 = vmatmul.mubr.msk.bf16.vlgmr.msra.gmra.mrb[168].mxu1 %vm12129_vm3, %v17987_v15  ;;  %v14299_v15 = vld [vmem:[%s20033_s8 + $0x1ac] ss:$68 sps:$4 sm:$0xff]   ;;  %vm20156_vm3 = vmpackc.low %vm18051_vm10, %vm18045_vm9 }
 0x594   : > { %12137 = vmatprep.mubr.msk.bf16.mxu1 %vm12135_vm5, %v18030_v49  ;;  %8494 = vmatpush1.bf16.msra.mxu1 %v14279_v61  ;;  %v14297_v49 = vld [vmem:[%s20033_s8 + $0x1a8] ss:$68 sps:$4 sm:$0xff]   ;;  %vm20157_vm2 = vmmov %vm20156_vm3 }
 0x595   : > { %8495 = vmatprep.subr.bf16.mxu1 %v14287_v25  ;;  %vm20162_vm9 = vmmov %vm20158_vm4 }
 0x596   : > { %vm20163_vm10 = vmmov %vm20158_vm4 }
 0x598   : > { %8496 = vmatpush1.bf16.msra.mxu1 %v14285_v19  ;;  %v14372_v19 = vld [vmem:[%s20033_s8 + $0x8] ss:$68 sps:$4 sm:$0xff]  }
 0x599   : > { %8497 = vmatprep.subr.bf16.mxu1 %v14293_v58  ;;  %v14375_v58 = vld [vmem:[%s20033_s8 + $0x20] ss:$68 sps:$4 sm:$0xff]  }
 0x59b   : > { %12140 = vmatmul.mubr.msk.bf16.gmra.mrb[172].mxu1 %vm12135_vm5, %v18025_v42  ;;  %v14311_v42 = vld [vmem:[%s20033_s8 + $0x2bc] ss:$68 sps:$4 sm:$0xff]   ;;  %vm20159_vm5 = vmmov %vm20158_vm4 }
 0x59c   : > { %12143 = vmatprep.mubr.msk.bf16.mxu1 %vm20154_vm14, %v18068_v52  ;;  %8498 = vmatpush1.bf16.msra.mxu1 %v14291_v4  ;;  %v14309_v52 = vld [vmem:[%s20033_s8 + $0x2b8] ss:$68 sps:$4 sm:$0xff]   ;;  %vm20171_vm14 = vmmov %vm20164_vm0 }
 0x59d   : > { %8499 = vmatprep.subr.bf16.mxu1 %v14299_v15 }
 0x5a0   : > { %8500 = vmatpush1.bf16.msra.mxu1 %v14297_v49  ;;  %v14380_v49 = vld [vmem:[%s20033_s8 + $0x94] ss:$68 sps:$4 sm:$0xff]  }
 0x5a1   : > { %8501 = vmatprep.subr.bf16.mxu1 %v14305_v7  ;;  %v14383_v7 = vld [vmem:[%s20033_s8 + $0xac] ss:$68 sps:$4 sm:$0xff]  }
 0x5a3   : > { %12146 = vmatmul.mubr.msk.bf16.gmra.mrb[176].mxu1 %vm20155_vm15, %v18063_v57  ;;  %v14323_v57 = vld [vmem:[%s20033_s8 + $0x3cc] ss:$68 sps:$4 sm:$0xff]   ;;  %vm20172_vm15 = vmmov %vm20164_vm0 }
 0x5a4   : > { %12149 = vmatprep.mubr.msk.bf16.mxu1 %vm20156_vm3, %v18088_v31  ;;  %8502 = vmatpush1.bf16.msra.mxu1 %v14303_v32  ;;  %v14321_v31 = vld [vmem:[%s20033_s8 + $0x3c8] ss:$68 sps:$4 sm:$0xff]   ;;  %vm20173_vm3 = vmmov %vm20164_vm0 }
 0x5a5   : > { %8503 = vmatprep.subr.bf16.mxu1 %v14311_v42 }
 0x5a8   : > { %8504 = vmatpush1.bf16.msra.mxu1 %v14309_v52 }
 0x5a9   : > { %8505 = vmatprep.subr.bf16.mxu1 %v14317_v54 }
 0x5ab   : > { %12152 = vmatmul.mubr.msk.bf16.gmra.mrb[180].mxu1 %vm20157_vm2, %v18084_v3  ;;  %v14341_v3 = vld [vmem:[%s20033_s8 + $0x564] ss:$68 sps:$4 sm:$0xff]   ;;  %vm20174_vm2 = vmmov %vm20164_vm0 }
 0x5ac   : > { %8506 = vmatpush1.bf16.msra.mxu1 %v14315_v50 }
 0x5ad   : > { %8507 = vmatprep.subr.bf16.mxu1 %v14323_v57  ;;  %v14378_v57 = vld [vmem:[%s20033_s8 + $0x90] ss:$68 sps:$4 sm:$0xff]  }
 0x5b0   : > { %8508 = vmatpush1.bf16.msra.mxu1 %v14321_v31  ;;  %v14381_v31 = vld [vmem:[%s20033_s8 + $0xa8] ss:$68 sps:$4 sm:$0xff]  }
 0x5b1   : > { %8509 = vmatprep.subr.bf16.mxu1 %v14329_v44 }
 0x5b4   : > { %8510 = vmatpush1.bf16.msra.mxu1 %v14327_v30 }
 0x5b5   : > { %8511 = vmatprep.subr.bf16.mxu1 %v14335_v22  ;;  %v14386_v22 = vld [vmem:[%s20033_s8 + $0x11c] ss:$68 sps:$4 sm:$0xff]  }
 0x5b8   : > { %8512 = vmatpush1.bf16.msra.mxu1 %v14333_v0  ;;  %v14389_v0 = vld [vmem:[%s20033_s8 + $0x134] ss:$68 sps:$4 sm:$0xff]  }
 0x5b9   : > { %8513 = vmatprep.subr.bf16.mxu1 %v14341_v3 }
 0x5bc   : > { %8514 = vmatpush1.bf16.msra.mxu1 %v14339_v36 }
 0x5bd   : > { %8515 = vmatprep.subr.bf16.mxu1 %v14347_v24 }
 0x5c0   : > { %8516 = vmatpush1.bf16.msra.mxu1 %v14345_v10 }
 0x5c1   : > { %8517 = vmatprep.subr.bf16.mxu1 %v14353_v34 }
 0x5c4   : > { %8518 = vmatpush1.bf16.msra.mxu1 %v14351_v18  ;;  %v14384_v18 = vld [vmem:[%s20033_s8 + $0x118] ss:$68 sps:$4 sm:$0xff]  }
 0x5c5   : > { %8519 = vmatprep.subr.bf16.mxu1 %v14359_v6  ;;  %v14387_v6 = vld [vmem:[%s20033_s8 + $0x130] ss:$68 sps:$4 sm:$0xff]  }
 0x5c8   : > { %8520 = vmatpush1.bf16.msra.mxu1 %v14357_v41 }
 0x5c9   : > { %8521 = vmatprep.subr.bf16.mxu1 %v14365_v5 }
 0x5cc   : > { %8522 = vmatpush1.bf16.msra.mxu1 %v14363_v17  ;;  %v14395_v17 = vld [vmem:[%s20033_s8 + $0x1bc] ss:$68 sps:$4 sm:$0xff]  }
 0x5cd   : > { %8523 = vmatprep.subr.bf16.mxu1 %v14371_v48 }
 0x5d0   : > { %8524 = vmatpush1.bf16.msra.mxu1 %v14369_v23 }
 0x5d1   : > { %8639 = vmatprep.subr.bf16.mxu1 %v14377_v62  ;;  %v14393_v62 = vld [vmem:[%s20033_s8 + $0x1b8] ss:$68 sps:$4 sm:$0xff]  }
 0x666   : > { %v6360_v8 = vpop.f32.mrb[168].mxu1 }
 0x667   : > { %v6427_v21 = vadd.f32 %v18583_v59, %v6360_v8  ;;  %v6362_v11 = vpop.f32.mrb[169].mxu1 }
 0x668   : > { %v6428_v26 = vadd.f32 %v18586_v55, %v6362_v11  ;;  %v6364_v46 = vpop.f32.mrb[170].mxu1  ;;  %v14401_v11 = vld [vmem:[%s20033_s8 + $0x244] ss:$68 sps:$4 sm:$0xff]  }
 0x669   : > { %v6429_v29 = vadd.f32 %v18583_v59, %v6364_v46  ;;  %v6366_v47 = vpop.f32.mrb[171].mxu1  ;;  %v6443_v43 = vmax.f32 %v6427_v21, 0.0  ;;  %v14398_v21 = vld [vmem:[%s20033_s8 + $0x22c] ss:$68 sps:$4 sm:$0xff]  }
 0x66a   : > { %v6430_v53 = vadd.f32 %v18586_v55, %v6366_v47  ;;  %v6444_v13 = vmax.f32 %v6428_v26, 0.0 }
 0x66b   : > { %v6445_v38 = vmax.f32 %v6429_v29, 0.0 }
 0x66c   : > { %v6446_v35 = vmax.f32 %v6430_v53, 0.0 }
 0x66d   : > { %v18592_v16 = vpack.c.bf16 %v6445_v38, %v6443_v43  ;;  %v14396_v43 = vld [vmem:[%s20033_s8 + $0x228] ss:$68 sps:$4 sm:$0xff]   ;;  %v14399_v38 = vld [vmem:[%s20033_s8 + $0x240] ss:$68 sps:$4 sm:$0xff]  }
 0x66e   : > { %v18594_v61 = vpack.c.bf16 %v6446_v35, %v6444_v13  ;;  %v6370_v25 = vpop.f32.mrb[172].mxu1 }
 0x66f   : > { %v6431_v4 = vadd.f32 %v18583_v59, %v6370_v25  ;;  %v6372_v15 = vpop.f32.mrb[173].mxu1  ;;  %v14404_v25 = vld [vmem:[%s20033_s8 + $0x2b4] ss:$68 sps:$4 sm:$0xff]  }
 0x670   : > { %v6432_v32 = vadd.f32 %v18586_v55, %v6372_v15  ;;  %v6374_v42 = vpop.f32.mrb[174].mxu1  ;;  %8379 = vmatprep.mubr.bf16.mxu0 %v18594_v61  ;;  %8525 = vmatprep.mubr.bf16.mxu1 %v18594_v61 }
 0x671   : > { %v6433_v52 = vadd.f32 %v18583_v59, %v6374_v42  ;;  %v6376_v54 = vpop.f32.mrb[175].mxu1  ;;  %8380 = vmatmul.mubr.bf16.vlgmr.msra.gmra.mrb[16].mxu0 %v18592_v16  ;;  %8526 = vmatmul.mubr.bf16.vlgmr.msra.gmra.mrb[184].mxu1 %v18592_v16  ;;  %v6447_v44 = vmax.f32 %v6431_v4, 0.0  ;;  %v14405_v42 = vld [vmem:[%s20033_s8 + $0x2c8] ss:$68 sps:$4 sm:$0xff]  }
 0x672   : > { %v6434_v50 = vadd.f32 %v18586_v55, %v6376_v54  ;;  %8421 = vmatpush1.bf16.msra.mxu0 %v14372_v19  ;;  %8640 = vmatpush1.bf16.msra.mxu1 %v14375_v58  ;;  %v6448_v3 = vmax.f32 %v6432_v32, 0.0  ;;  %v14407_v19 = vld [vmem:[%s20033_s8 + $0x2cc] ss:$68 sps:$4 sm:$0xff]  }
 0x673   : > { %v6449_v30 = vmax.f32 %v6433_v52, 0.0  ;;  %8422 = vmatprep.subr.bf16.mxu0 %v14380_v49  ;;  %8641 = vmatprep.subr.bf16.mxu1 %v14383_v7  ;;  %v14402_v32 = vld [vmem:[%s20033_s8 + $0x2b0] ss:$68 sps:$4 sm:$0xff]  }
 0x674   : > { %v6450_v36 = vmax.f32 %v6434_v50, 0.0 }
 0x675   : > { %v18628_v24 = vpack.c.bf16 %v6449_v30, %v6447_v44  ;;  %v14408_v30 = vld [vmem:[%s20033_s8 + $0x338] ss:$68 sps:$4 sm:$0xff]  }
 0x676   : > { %v18630_v10 = vpack.c.bf16 %v6450_v36, %v6448_v3  ;;  %8423 = vmatpush1.bf16.msra.mxu0 %v14378_v57  ;;  %8642 = vmatpush1.bf16.msra.mxu1 %v14381_v31  ;;  %v6380_v34 = vpop.f32.mrb[176].mxu1  ;;  %v14419_v3 = vld [vmem:[%s20033_s8 + $0x3dc] ss:$68 sps:$4 sm:$0xff]  }
 0x677   : > { %v6435_v41 = vadd.f32 %v18583_v59, %v6380_v34  ;;  %v6382_v28 = vpop.f32.mrb[177].mxu1  ;;  %8424 = vmatprep.subr.bf16.mxu0 %v14386_v22  ;;  %8643 = vmatprep.subr.bf16.mxu1 %v14389_v0  ;;  %v14411_v22 = vld [vmem:[%s20033_s8 + $0x350] ss:$68 sps:$4 sm:$0xff]   ;;  %v14416_v0 = vld [vmem:[%s20033_s8 + $0x3c4] ss:$68 sps:$4 sm:$0xff]  }
 0x678   : > { %v6436_v5 = vadd.f32 %v18586_v55, %v6382_v28  ;;  %v6384_v1 = vpop.f32.mrb[178].mxu1  ;;  %8389 = vmatprep.mubr.bf16.mxu0 %v18630_v10  ;;  %8535 = vmatprep.mubr.bf16.mxu1 %v18630_v10  ;;  %v14414_v36 = vld [vmem:[%s20033_s8 + $0x3c0] ss:$68 sps:$4 sm:$0xff]   ;;  %v14417_v34 = vld [vmem:[%s20033_s8 + $0x3d8] ss:$68 sps:$4 sm:$0xff]  }
 0x679   : > { %v6437_v48 = vadd.f32 %v18583_v59, %v6384_v1  ;;  %v6386_v37 = vpop.f32.mrb[179].mxu1  ;;  %8390 = vmatmul.mubr.bf16.gmra.mrb[20].mxu0 %v18628_v24  ;;  %8536 = vmatmul.mubr.bf16.gmra.mrb[188].mxu1 %v18628_v24  ;;  %v6451_v40 = vmax.f32 %v6435_v41, 0.0  ;;  %v14420_v41 = vld [vmem:[%s20033_s8 + $0x448] ss:$68 sps:$4 sm:$0xff]   ;;  %v14423_v28 = vld [vmem:[%s20033_s8 + $0x460] ss:$68 sps:$4 sm:$0xff]  }
 0x67a   : > { %v6438_v23 = vadd.f32 %v18586_v55, %v6386_v37  ;;  %8425 = vmatpush1.bf16.msra.mxu0 %v14384_v18  ;;  %8644 = vmatpush1.bf16.msra.mxu1 %v14387_v6  ;;  %v6452_v26 = vmax.f32 %v6436_v5, 0.0  ;;  %v14422_v18 = vld [vmem:[%s20033_s8 + $0x44c] ss:$68 sps:$4 sm:$0xff]   ;;  %v14425_v6 = vld [vmem:[%s20033_s8 + $0x464] ss:$68 sps:$4 sm:$0xff]  }
 0x67b   : > { %v6453_v8 = vmax.f32 %v6437_v48, 0.0  ;;  %8426 = vmatprep.subr.bf16.mxu0 %v14392_v45  ;;  %8645 = vmatprep.subr.bf16.mxu1 %v14395_v17  ;;  %v14428_v45 = vld [vmem:[%s20033_s8 + $0x4d4] ss:$68 sps:$4 sm:$0xff]   ;;  %v14431_v17 = vld [vmem:[%s20033_s8 + $0x4ec] ss:$68 sps:$4 sm:$0xff]  }
 0x67c   : > { %v6454_v46 = vmax.f32 %v6438_v23, 0.0  ;;  %v14426_v5 = vld [vmem:[%s20033_s8 + $0x4d0] ss:$68 sps:$4 sm:$0xff]   ;;  %v14429_v1 = vld [vmem:[%s20033_s8 + $0x4e8] ss:$68 sps:$4 sm:$0xff]  }
 0x67d   : > { %v18664_v29 = vpack.c.bf16 %v6453_v8, %v6451_v40  ;;  %v14434_v48 = vld [vmem:[%s20033_s8 + $0x55c] ss:$68 sps:$4 sm:$0xff]   ;;  %v14437_v37 = vld [vmem:[%s20033_s8 + $0x574] ss:$68 sps:$4 sm:$0xff]  }
 0x67e   : > { %v18666_v47 = vpack.c.bf16 %v6454_v46, %v6452_v26  ;;  %8427 = vmatpush1.bf16.msra.mxu0 %v14390_v33  ;;  %8646 = vmatpush1.bf16.msra.mxu1 %v14393_v62  ;;  %v6390_v53 = vpop.f32.mrb[180].mxu1  ;;  %v14432_v23 = vld [vmem:[%s20033_s8 + $0x558] ss:$68 sps:$4 sm:$0xff]   ;;  %v14435_v33 = vld [vmem:[%s20033_s8 + $0x570] ss:$68 sps:$4 sm:$0xff]  }
 0x67f   : > { %v6439_v13 = vadd.f32 %v18583_v59, %v6390_v53  ;;  %v6392_v35 = vpop.f32.mrb[181].mxu1  ;;  %8428 = vmatprep.subr.bf16.mxu0 %v14398_v21  ;;  %8647 = vmatprep.subr.bf16.mxu1 %v14401_v11  ;;  %v14440_v62 = vld [vmem:[%s20033_s8 + $0x5e4] ss:$68 sps:$4 sm:$0xff]   ;;  %v14443_v40 = vld [vmem:[%s20033_s8 + $0x5fc] ss:$68 sps:$4 sm:$0xff]  }
 0x680   : > { %v6440_v58 = vadd.f32 %v18586_v55, %v6392_v35  ;;  %v6394_v4 = vpop.f32.mrb[182].mxu1  ;;  %8399 = vmatprep.mubr.bf16.mxu0 %v18666_v47  ;;  %8545 = vmatprep.mubr.bf16.mxu1 %v18666_v47  ;;  %v14438_v8 = vld [vmem:[%s20033_s8 + $0x5e0] ss:$68 sps:$4 sm:$0xff]   ;;  %v14441_v21 = vld [vmem:[%s20033_s8 + $0x5f8] ss:$68 sps:$4 sm:$0xff]  }
 0x681   : > { %v6441_v15 = vadd.f32 %v18583_v59, %v6394_v4  ;;  %v6396_v49 = vpop.f32.mrb[183].mxu1  ;;  %8400 = vmatmul.mubr.bf16.gmra.mrb[24].mxu0 %v18664_v29  ;;  %8546 = vmatmul.mubr.bf16.gmra.mrb[192].mxu1 %v18664_v29  ;;  %v6455_v52 = vmax.f32 %v6439_v13, 0.0  ;;  %v14410_v59 = vld [vmem:[%s20033_s8 + $0x33c] ss:$68 sps:$4 sm:$0xff]   ;;  %v14446_v11 = vld [vmem:[%s20033_s8 + $0x66c] ss:$68 sps:$4 sm:$0xff]  }
 0x682   : > { %v6442_v7 = vadd.f32 %v18586_v55, %v6396_v49  ;;  %8429 = vmatpush1.bf16.msra.mxu0 %v14396_v43  ;;  %8648 = vmatpush1.bf16.msra.mxu1 %v14399_v38  ;;  %v14413_v55 = vld [vmem:[%s20033_s8 + $0x354] ss:$68 sps:$4 sm:$0xff]   ;;  %v6456_v50 = vmax.f32 %v6440_v58, 0.0  ;;  %v14449_v26 = vld [vmem:[%s20033_s8 + $0x684] ss:$68 sps:$4 sm:$0xff]  }
 0x683   : > { %v6457_v54 = vmax.f32 %v6441_v15, 0.0  ;;  %8430 = vmatprep.subr.bf16.mxu0 %v14404_v25  ;;  %8649 = vmatprep.subr.bf16.mxu1 %v14407_v19  ;;  %v14444_v46 = vld [vmem:[%s20033_s8 + $0x668] ss:$68 sps:$4 sm:$0xff]   ;;  %v14447_v53 = vld [vmem:[%s20033_s8 + $0x680] ss:$68 sps:$4 sm:$0xff]  }
 0x684   : > { %v6458_v57 = vmax.f32 %v6442_v7, 0.0  ;;  %v14452_v43 = vld [vmem:[%s20033_s8 + $0x6f4] ss:$68 sps:$4 sm:$0xff]   ;;  %v14455_v38 = vld [vmem:[%s20033_s8 + $0x70c] ss:$68 sps:$4 sm:$0xff]  }
 0x685   : > { %v18700_v31 = vpack.c.bf16 %v6457_v54, %v6455_v52  ;;  %v14450_v13 = vld [vmem:[%s20033_s8 + $0x6f0] ss:$68 sps:$4 sm:$0xff]   ;;  %v14453_v35 = vld [vmem:[%s20033_s8 + $0x708] ss:$68 sps:$4 sm:$0xff]   ;;  %v14458_v25 = vld [vmem:[%s20033_s8 + $0x77c] ss:$68 sps:$4 sm:$0xff]  }
 0x686   : > { %v18702_v44 = vpack.c.bf16 %v6458_v57, %v6456_v50  ;;  %8431 = vmatpush1.bf16.msra.mxu0 %v14402_v32  ;;  %8650 = vmatpush1.bf16.msra.mxu1 %v14405_v42  ;;  %v14461_v19 = vld [vmem:[%s20033_s8 + $0x794] ss:$68 sps:$4 sm:$0xff]   ;;  %v14464_v15 = vld [vmem:[%s20033_s8 + $0x804] ss:$68 sps:$4 sm:$0xff]   ;;  %v14467_v49 = vld [vmem:[%s20033_s8 + $0x81c] ss:$68 sps:$4 sm:$0xff]  }
 0x687   : > { %8432 = vmatprep.subr.bf16.mxu0 %v14410_v59  ;;  %8651 = vmatprep.subr.bf16.mxu1 %v14413_v55  ;;  %v14456_v58 = vld [vmem:[%s20033_s8 + $0x778] ss:$68 sps:$4 sm:$0xff]   ;;  %v14459_v4 = vld [vmem:[%s20033_s8 + $0x790] ss:$68 sps:$4 sm:$0xff]   ;;  %v14462_v7 = vld [vmem:[%s20033_s8 + $0x800] ss:$68 sps:$4 sm:$0xff]  }
 0x688   : > { %8409 = vmatprep.mubr.bf16.mxu0 %v18702_v44  ;;  %8555 = vmatprep.mubr.bf16.mxu1 %v18702_v44  ;;  %v14465_v32 = vld [vmem:[%s20033_s8 + $0x818] ss:$68 sps:$4 sm:$0xff]   ;;  %v14471_v59 = vld [vmem:[%s20033_s8 + $0x30] ss:$68 sps:$4 sm:$0xff]   ;;  %v14476_v55 = vld [vmem:[%s20033_s8 + $0xa4] ss:$68 sps:$4 sm:$0xff]  }
 0x689   : > { %8410 = vmatmul.mubr.bf16.gmra.mrb[28].mxu0 %v18700_v31  ;;  %8556 = vmatmul.mubr.bf16.gmra.mrb[196].mxu1 %v18700_v31  ;;  %v14470_v42 = vld [vmem:[%s20033_s8 + $0x1c] ss:$68 sps:$4 sm:$0xff]   ;;  %v14473_v52 = vld [vmem:[%s20033_s8 + $0x34] ss:$68 sps:$4 sm:$0xff]  }
 0x68a   : > { %8433 = vmatpush1.bf16.msra.mxu0 %v14408_v30  ;;  %8652 = vmatpush1.bf16.msra.mxu1 %v14411_v22  ;;  %v14468_v54 = vld [vmem:[%s20033_s8 + $0x18] ss:$68 sps:$4 sm:$0xff]   ;;  %v14474_v57 = vld [vmem:[%s20033_s8 + $0xa0] ss:$68 sps:$4 sm:$0xff]   ;;  %v14482_v22 = vld [vmem:[%s20033_s8 + $0x12c] ss:$68 sps:$4 sm:$0xff]  }
 0x68b   : > { %8452 = vmatprep.mubr.bf16.mxu0 %v18594_v61  ;;  %8671 = vmatprep.mubr.bf16.mxu1 %v18594_v61  ;;  %v14479_v50 = vld [vmem:[%s20033_s8 + $0xbc] ss:$68 sps:$4 sm:$0xff]  }
 0x68c   : > { %8434 = vmatprep.subr.bf16.mxu0 %v14416_v0  ;;  %8653 = vmatprep.subr.bf16.mxu1 %v14419_v3  ;;  %v14477_v30 = vld [vmem:[%s20033_s8 + $0xb8] ss:$68 sps:$4 sm:$0xff]   ;;  %v14485_v0 = vld [vmem:[%s20033_s8 + $0x144] ss:$68 sps:$4 sm:$0xff]  }
 0x68d   : > { %v14480_v3 = vld [vmem:[%s20033_s8 + $0x128] ss:$68 sps:$4 sm:$0xff]  }
 0x68e   : > { %8435 = vmatpush1.bf16.msra.mxu0 %v14414_v36  ;;  %8654 = vmatpush1.bf16.msra.mxu1 %v14417_v34  ;;  %v14483_v36 = vld [vmem:[%s20033_s8 + $0x140] ss:$68 sps:$4 sm:$0xff]   ;;  %v14488_v34 = vld [vmem:[%s20033_s8 + $0x1b4] ss:$68 sps:$4 sm:$0xff]  }
 0x68f   : > { %8436 = vmatprep.subr.bf16.mxu0 %v14422_v18  ;;  %8655 = vmatprep.subr.bf16.mxu1 %v14425_v6  ;;  %v14491_v18 = vld [vmem:[%s20033_s8 + $0x1cc] ss:$68 sps:$4 sm:$0xff]  }
 0x690   : > { %v14486_v6 = vld [vmem:[%s20033_s8 + $0x1b0] ss:$68 sps:$4 sm:$0xff]  }
 0x692   : > { %8437 = vmatpush1.bf16.msra.mxu0 %v14420_v41  ;;  %8656 = vmatpush1.bf16.msra.mxu1 %v14423_v28  ;;  %v14489_v41 = vld [vmem:[%s20033_s8 + $0x1c8] ss:$68 sps:$4 sm:$0xff]   ;;  %v14494_v28 = vld [vmem:[%s20033_s8 + $0x23c] ss:$68 sps:$4 sm:$0xff]  }
 0x693   : > { %8438 = vmatprep.subr.bf16.mxu0 %v14428_v45  ;;  %8657 = vmatprep.subr.bf16.mxu1 %v14431_v17  ;;  %v14497_v45 = vld [vmem:[%s20033_s8 + $0x254] ss:$68 sps:$4 sm:$0xff]  }
 0x694   : > { %v14492_v17 = vld [vmem:[%s20033_s8 + $0x238] ss:$68 sps:$4 sm:$0xff]  }
 0x696   : > { %8439 = vmatpush1.bf16.msra.mxu0 %v14426_v5  ;;  %8658 = vmatpush1.bf16.msra.mxu1 %v14429_v1  ;;  %v14495_v5 = vld [vmem:[%s20033_s8 + $0x250] ss:$68 sps:$4 sm:$0xff]   ;;  %v14500_v1 = vld [vmem:[%s20033_s8 + $0x2c4] ss:$68 sps:$4 sm:$0xff]  }
 0x697   : > { %8440 = vmatprep.subr.bf16.mxu0 %v14434_v48  ;;  %8659 = vmatprep.subr.bf16.mxu1 %v14437_v37  ;;  %v14503_v48 = vld [vmem:[%s20033_s8 + $0x2dc] ss:$68 sps:$4 sm:$0xff]  }
 0x698   : > { %v14498_v37 = vld [vmem:[%s20033_s8 + $0x2c0] ss:$68 sps:$4 sm:$0xff]  }
 0x69a   : > { %8441 = vmatpush1.bf16.msra.mxu0 %v14432_v23  ;;  %8660 = vmatpush1.bf16.msra.mxu1 %v14435_v33  ;;  %v14501_v23 = vld [vmem:[%s20033_s8 + $0x2d8] ss:$68 sps:$4 sm:$0xff]   ;;  %v14506_v33 = vld [vmem:[%s20033_s8 + $0x34c] ss:$68 sps:$4 sm:$0xff]  }
 0x69b   : > { %8442 = vmatprep.subr.bf16.mxu0 %v14440_v62  ;;  %8661 = vmatprep.subr.bf16.mxu1 %v14443_v40  ;;  %v14509_v62 = vld [vmem:[%s20033_s8 + $0x364] ss:$68 sps:$4 sm:$0xff]  }
 0x69c   : > { %v14504_v40 = vld [vmem:[%s20033_s8 + $0x348] ss:$68 sps:$4 sm:$0xff]  }
 0x69e   : > { %8443 = vmatpush1.bf16.msra.mxu0 %v14438_v8  ;;  %8662 = vmatpush1.bf16.msra.mxu1 %v14441_v21  ;;  %v14507_v8 = vld [vmem:[%s20033_s8 + $0x360] ss:$68 sps:$4 sm:$0xff]   ;;  %v14512_v21 = vld [vmem:[%s20033_s8 + $0x3d4] ss:$68 sps:$4 sm:$0xff]  }
 0x69f   : > { %8444 = vmatprep.subr.bf16.mxu0 %v14446_v11  ;;  %8663 = vmatprep.subr.bf16.mxu1 %v14449_v26  ;;  %v14515_v11 = vld [vmem:[%s20033_s8 + $0x3ec] ss:$68 sps:$4 sm:$0xff]  }
 0x6a0   : > { %v14510_v26 = vld [vmem:[%s20033_s8 + $0x3d0] ss:$68 sps:$4 sm:$0xff]  }
 0x6a2   : > { %8445 = vmatpush1.bf16.msra.mxu0 %v14444_v46  ;;  %8664 = vmatpush1.bf16.msra.mxu1 %v14447_v53  ;;  %v14513_v46 = vld [vmem:[%s20033_s8 + $0x3e8] ss:$68 sps:$4 sm:$0xff]   ;;  %v14518_v53 = vld [vmem:[%s20033_s8 + $0x45c] ss:$68 sps:$4 sm:$0xff]  }
 0x6a3   : > { %8446 = vmatprep.subr.bf16.mxu0 %v14452_v43  ;;  %8665 = vmatprep.subr.bf16.mxu1 %v14455_v38  ;;  %v14521_v43 = vld [vmem:[%s20033_s8 + $0x474] ss:$68 sps:$4 sm:$0xff]  }
 0x6a4   : > { %v14516_v38 = vld [vmem:[%s20033_s8 + $0x458] ss:$68 sps:$4 sm:$0xff]  }
 0x6a6   : > { %8447 = vmatpush1.bf16.msra.mxu0 %v14450_v13  ;;  %8666 = vmatpush1.bf16.msra.mxu1 %v14453_v35  ;;  %v14519_v13 = vld [vmem:[%s20033_s8 + $0x470] ss:$68 sps:$4 sm:$0xff]   ;;  %v14524_v35 = vld [vmem:[%s20033_s8 + $0x4e4] ss:$68 sps:$4 sm:$0xff]  }
 0x6a7   : > { %8448 = vmatprep.subr.bf16.mxu0 %v14458_v25  ;;  %8667 = vmatprep.subr.bf16.mxu1 %v14461_v19  ;;  %v14527_v25 = vld [vmem:[%s20033_s8 + $0x4fc] ss:$68 sps:$4 sm:$0xff]  }
 0x6a8   : > { %v14522_v19 = vld [vmem:[%s20033_s8 + $0x4e0] ss:$68 sps:$4 sm:$0xff]  }
 0x6aa   : > { %8449 = vmatpush1.bf16.msra.mxu0 %v14456_v58  ;;  %8668 = vmatpush1.bf16.msra.mxu1 %v14459_v4  ;;  %v14525_v58 = vld [vmem:[%s20033_s8 + $0x4f8] ss:$68 sps:$4 sm:$0xff]   ;;  %v14530_v4 = vld [vmem:[%s20033_s8 + $0x56c] ss:$68 sps:$4 sm:$0xff]  }
 0x6ab   : > { %8450 = vmatprep.subr.bf16.mxu0 %v14464_v15  ;;  %8669 = vmatprep.subr.bf16.mxu1 %v14467_v49  ;;  %v14533_v15 = vld [vmem:[%s20033_s8 + $0x584] ss:$68 sps:$4 sm:$0xff]  }
 0x6ac   : > { %v14528_v49 = vld [vmem:[%s20033_s8 + $0x568] ss:$68 sps:$4 sm:$0xff]  }
 0x6ae   : > { %8451 = vmatpush1.bf16.msra.mxu0 %v14462_v7  ;;  %8670 = vmatpush1.bf16.msra.mxu1 %v14465_v32  ;;  %v14531_v7 = vld [vmem:[%s20033_s8 + $0x580] ss:$68 sps:$4 sm:$0xff]   ;;  %v14536_v32 = vld [vmem:[%s20033_s8 + $0x5f4] ss:$68 sps:$4 sm:$0xff]  }
 0x6af   : > { %8566 = vmatprep.subr.bf16.mxu0 %v14470_v42  ;;  %8785 = vmatprep.subr.bf16.mxu1 %v14473_v52  ;;  %v14539_v42 = vld [vmem:[%s20033_s8 + $0x60c] ss:$68 sps:$4 sm:$0xff]  }
 0x6b0   : > { %v14534_v52 = vld [vmem:[%s20033_s8 + $0x5f0] ss:$68 sps:$4 sm:$0xff]  }
 0x6b1   : > { %8453 = vmatmul.mubr.bf16.vlgmr.msra.gmra.mrb[32].mxu0 %v18592_v16  ;;  %8672 = vmatmul.mubr.bf16.vlgmr.msra.gmra.mrb[200].mxu1 %v18592_v16 }
 0x6b2   : > { %8462 = vmatprep.mubr.bf16.mxu0 %v18630_v10  ;;  %8567 = vmatpush1.bf16.msra.mxu0 %v14468_v54  ;;  %v14537_v54 = vld [vmem:[%s20033_s8 + $0x608] ss:$68 sps:$4 sm:$0xff]  }
 0x6b3   : > { %8681 = vmatprep.mubr.bf16.mxu1 %v18630_v10  ;;  %8786 = vmatpush1.bf16.msra.mxu1 %v14471_v59  ;;  %v14542_v59 = vld [vmem:[%s20033_s8 + $0x67c] ss:$68 sps:$4 sm:$0xff]  }
 0x6b4   : > { %8568 = vmatprep.subr.bf16.mxu0 %v14476_v55  ;;  %8787 = vmatprep.subr.bf16.mxu1 %v14479_v50  ;;  %v14545_v55 = vld [vmem:[%s20033_s8 + $0x694] ss:$68 sps:$4 sm:$0xff]  }
 0x6b5   : > { %v14540_v50 = vld [vmem:[%s20033_s8 + $0x678] ss:$68 sps:$4 sm:$0xff]  }
 0x6b6   : > { %8569 = vmatpush1.bf16.msra.mxu0 %v14474_v57  ;;  %v14543_v57 = vld [vmem:[%s20033_s8 + $0x690] ss:$68 sps:$4 sm:$0xff]  }
 0x6b7   : > { %8788 = vmatpush1.bf16.msra.mxu1 %v14477_v30  ;;  %8570 = vmatprep.subr.bf16.mxu0 %v14482_v22  ;;  %v14548_v30 = vld [vmem:[%s20033_s8 + $0x704] ss:$68 sps:$4 sm:$0xff]   ;;  %v14551_v22 = vld [vmem:[%s20033_s8 + $0x71c] ss:$68 sps:$4 sm:$0xff]  }
 0x6b8   : > { %8789 = vmatprep.subr.bf16.mxu1 %v14485_v0  ;;  %v14546_v0 = vld [vmem:[%s20033_s8 + $0x700] ss:$68 sps:$4 sm:$0xff]  }
 0x6b9   : > { %8463 = vmatmul.mubr.bf16.gmra.mrb[36].mxu0 %v18628_v24  ;;  %8682 = vmatmul.mubr.bf16.gmra.mrb[204].mxu1 %v18628_v24 }
 0x6ba   : > { %8472 = vmatprep.mubr.bf16.mxu0 %v18666_v47  ;;  %8571 = vmatpush1.bf16.msra.mxu0 %v14480_v3  ;;  %v14549_v3 = vld [vmem:[%s20033_s8 + $0x718] ss:$68 sps:$4 sm:$0xff]  }
 0x6bb   : > { %8691 = vmatprep.mubr.bf16.mxu1 %v18666_v47  ;;  %8790 = vmatpush1.bf16.msra.mxu1 %v14483_v36  ;;  %v14554_v36 = vld [vmem:[%s20033_s8 + $0x78c] ss:$68 sps:$4 sm:$0xff]  }
 0x6bc   : > { %8572 = vmatprep.subr.bf16.mxu0 %v14488_v34  ;;  %8791 = vmatprep.subr.bf16.mxu1 %v14491_v18  ;;  %v14557_v34 = vld [vmem:[%s20033_s8 + $0x7a4] ss:$68 sps:$4 sm:$0xff]  }
 0x6bd   : > { %v14552_v18 = vld [vmem:[%s20033_s8 + $0x788] ss:$68 sps:$4 sm:$0xff]  }
 0x6be   : > { %8573 = vmatpush1.bf16.msra.mxu0 %v14486_v6  ;;  %v14555_v6 = vld [vmem:[%s20033_s8 + $0x7a0] ss:$68 sps:$4 sm:$0xff]  }
 0x6bf   : > { %8792 = vmatpush1.bf16.msra.mxu1 %v14489_v41  ;;  %8574 = vmatprep.subr.bf16.mxu0 %v14494_v28  ;;  %v14560_v41 = vld [vmem:[%s20033_s8 + $0x814] ss:$68 sps:$4 sm:$0xff]   ;;  %v14563_v28 = vld [vmem:[%s20033_s8 + $0x82c] ss:$68 sps:$4 sm:$0xff]  }
 0x6c0   : > { %8793 = vmatprep.subr.bf16.mxu1 %v14497_v45  ;;  %v14558_v45 = vld [vmem:[%s20033_s8 + $0x810] ss:$68 sps:$4 sm:$0xff]  }
 0x6c1   : > { %8473 = vmatmul.mubr.bf16.gmra.mrb[40].mxu0 %v18664_v29  ;;  %8692 = vmatmul.mubr.bf16.gmra.mrb[208].mxu1 %v18664_v29 }
 0x6c2   : > { %8482 = vmatprep.mubr.bf16.mxu0 %v18702_v44  ;;  %8575 = vmatpush1.bf16.msra.mxu0 %v14492_v17  ;;  %v14561_v17 = vld [vmem:[%s20033_s8 + $0x828] ss:$68 sps:$4 sm:$0xff]  }
 0x6c3   : > { %8701 = vmatprep.mubr.bf16.mxu1 %v18702_v44  ;;  %8794 = vmatpush1.bf16.msra.mxu1 %v14495_v5  ;;  %v14566_v5 = vld [vmem:[%s20033_s8 + $0x2c] ss:$68 sps:$4 sm:$0xff]  }
 0x6c4   : > { %8576 = vmatprep.subr.bf16.mxu0 %v14500_v1  ;;  %8795 = vmatprep.subr.bf16.mxu1 %v14503_v48  ;;  %v14567_v1 = vld [vmem:[%s20033_s8 + $0x480] ss:$68 sps:$4 sm:$0xff]   ;;  %v14564_v48 = vld [vmem:[%s20033_s8 + $0x28] ss:$68 sps:$4 sm:$0xff]  }
 0x6c6   : > { %8577 = vmatpush1.bf16.msra.mxu0 %v14498_v37  ;;  %v14568_v37 = vld [vmem:[%s20033_s8 + $0x40] ss:$68 sps:$4 sm:$0xff]  }
 0x6c7   : > { %8796 = vmatpush1.bf16.msra.mxu1 %v14501_v23  ;;  %8578 = vmatprep.subr.bf16.mxu0 %v14506_v33  ;;  %v14571_v23 = vld [vmem:[%s20033_s8 + $0xb4] ss:$68 sps:$4 sm:$0xff]   ;;  %v14572_v33 = vld [vmem:[%s20033_s8 + $0x508] ss:$68 sps:$4 sm:$0xff]  }
 0x6c8   : > { %8797 = vmatprep.subr.bf16.mxu1 %v14509_v62  ;;  %v14569_v62 = vld [vmem:[%s20033_s8 + $0xb0] ss:$68 sps:$4 sm:$0xff]  }
 0x6c9   : > { %8483 = vmatmul.mubr.bf16.gmra.mrb[44].mxu0 %v18700_v31  ;;  %8702 = vmatmul.mubr.bf16.gmra.mrb[212].mxu1 %v18700_v31 }
 0x6ca   : > { %8579 = vmatpush1.bf16.msra.mxu0 %v14504_v40  ;;  %8598 = vmatprep.mubr.bf16.mxu0 %v18594_v61  ;;  %v14573_v40 = vld [vmem:[%s20033_s8 + $0xc8] ss:$68 sps:$4 sm:$0xff]  }
 0x6cb   : > { %8798 = vmatpush1.bf16.msra.mxu1 %v14507_v8  ;;  %8817 = vmatprep.mubr.bf16.mxu1 %v18594_v61  ;;  %v14576_v8 = vld [vmem:[%s20033_s8 + $0x13c] ss:$68 sps:$4 sm:$0xff]  }
 0x6cc   : > { %8580 = vmatprep.subr.bf16.mxu0 %v14512_v21  ;;  %8799 = vmatprep.subr.bf16.mxu1 %v14515_v11  ;;  %v14577_v21 = vld [vmem:[%s20033_s8 + $0x590] ss:$68 sps:$4 sm:$0xff]   ;;  %v14574_v11 = vld [vmem:[%s20033_s8 + $0x138] ss:$68 sps:$4 sm:$0xff]  }
 0x6ce   : > { %8581 = vmatpush1.bf16.msra.mxu0 %v14510_v26  ;;  %v14578_v26 = vld [vmem:[%s20033_s8 + $0x150] ss:$68 sps:$4 sm:$0xff]  }
 0x6cf   : > { %8800 = vmatpush1.bf16.msra.mxu1 %v14513_v46  ;;  %8582 = vmatprep.subr.bf16.mxu0 %v14518_v53  ;;  %v14581_v46 = vld [vmem:[%s20033_s8 + $0x1c4] ss:$68 sps:$4 sm:$0xff]   ;;  %v14582_v53 = vld [vmem:[%s20033_s8 + $0x618] ss:$68 sps:$4 sm:$0xff]  }
 0x6d0   : > { %8801 = vmatprep.subr.bf16.mxu1 %v14521_v43  ;;  %v14579_v43 = vld [vmem:[%s20033_s8 + $0x1c0] ss:$68 sps:$4 sm:$0xff]  }
 0x6d2   : > { %8583 = vmatpush1.bf16.msra.mxu0 %v14516_v38  ;;  %v14583_v38 = vld [vmem:[%s20033_s8 + $0x1d8] ss:$68 sps:$4 sm:$0xff]  }
 0x6d3   : > { %8802 = vmatpush1.bf16.msra.mxu1 %v14519_v13  ;;  %8584 = vmatprep.subr.bf16.mxu0 %v14524_v35  ;;  %v14586_v13 = vld [vmem:[%s20033_s8 + $0x24c] ss:$68 sps:$4 sm:$0xff]   ;;  %v14587_v35 = vld [vmem:[%s20033_s8 + $0x6a0] ss:$68 sps:$4 sm:$0xff]  }
 0x6d4   : > { %8803 = vmatprep.subr.bf16.mxu1 %v14527_v25  ;;  %v14584_v25 = vld [vmem:[%s20033_s8 + $0x248] ss:$68 sps:$4 sm:$0xff]  }
 0x6d6   : > { %8585 = vmatpush1.bf16.msra.mxu0 %v14522_v19  ;;  %v14588_v19 = vld [vmem:[%s20033_s8 + $0x260] ss:$68 sps:$4 sm:$0xff]  }
 0x6d7   : > { %8804 = vmatpush1.bf16.msra.mxu1 %v14525_v58  ;;  %8586 = vmatprep.subr.bf16.mxu0 %v14530_v4  ;;  %v14591_v58 = vld [vmem:[%s20033_s8 + $0x2d4] ss:$68 sps:$4 sm:$0xff]   ;;  %v14592_v4 = vld [vmem:[%s20033_s8 + $0x728] ss:$68 sps:$4 sm:$0xff]  }
 0x6d8   : > { %8805 = vmatprep.subr.bf16.mxu1 %v14533_v15  ;;  %v14589_v15 = vld [vmem:[%s20033_s8 + $0x2d0] ss:$68 sps:$4 sm:$0xff]  }
 0x6da   : > { %8587 = vmatpush1.bf16.msra.mxu0 %v14528_v49  ;;  %v14593_v49 = vld [vmem:[%s20033_s8 + $0x2e8] ss:$68 sps:$4 sm:$0xff]  }
 0x6db   : > { %8806 = vmatpush1.bf16.msra.mxu1 %v14531_v7  ;;  %8588 = vmatprep.subr.bf16.mxu0 %v14536_v32  ;;  %v14596_v7 = vld [vmem:[%s20033_s8 + $0x35c] ss:$68 sps:$4 sm:$0xff]   ;;  %v14597_v32 = vld [vmem:[%s20033_s8 + $0x7b0] ss:$68 sps:$4 sm:$0xff]  }
 0x6dc   : > { %8807 = vmatprep.subr.bf16.mxu1 %v14539_v42  ;;  %v14594_v42 = vld [vmem:[%s20033_s8 + $0x358] ss:$68 sps:$4 sm:$0xff]  }
 0x6de   : > { %8589 = vmatpush1.bf16.msra.mxu0 %v14534_v52  ;;  %v14598_v52 = vld [vmem:[%s20033_s8 + $0x370] ss:$68 sps:$4 sm:$0xff]  }
 0x6df   : > { %8808 = vmatpush1.bf16.msra.mxu1 %v14537_v54  ;;  %8590 = vmatprep.subr.bf16.mxu0 %v14542_v59  ;;  %v14601_v54 = vld [vmem:[%s20033_s8 + $0x3e4] ss:$68 sps:$4 sm:$0xff]   ;;  %v14602_v59 = vld [vmem:[%s20033_s8 + $0x838] ss:$68 sps:$4 sm:$0xff]  }
 0x6e0   : > { %8809 = vmatprep.subr.bf16.mxu1 %v14545_v55  ;;  %v14599_v55 = vld [vmem:[%s20033_s8 + $0x3e0] ss:$68 sps:$4 sm:$0xff]  }
 0x6e2   : > { %8591 = vmatpush1.bf16.msra.mxu0 %v14540_v50  ;;  %v14603_v50 = vld [vmem:[%s20033_s8 + $0x3f8] ss:$68 sps:$4 sm:$0xff]  }
 0x6e3   : > { %8810 = vmatpush1.bf16.msra.mxu1 %v14543_v57  ;;  %8592 = vmatprep.subr.bf16.mxu0 %v14548_v30  ;;  %v14606_v57 = vld [vmem:[%s20033_s8 + $0x46c] ss:$68 sps:$4 sm:$0xff]   ;;  %v14609_v30 = vld [vmem:[#allocation7 + $0x14] ss:$68 sps:$4 sm:$0xff]  }
 0x6e4   : > { %8811 = vmatprep.subr.bf16.mxu1 %v14551_v22  ;;  %v14604_v22 = vld [vmem:[%s20033_s8 + $0x468] ss:$68 sps:$4 sm:$0xff]  }
 0x6e6   : > { %8593 = vmatpush1.bf16.msra.mxu0 %v14546_v0  ;;  %v14607_v0 = vld [vmem:[#allocation7 + $0x10] ss:$68 sps:$4 sm:$0xff]  }
 0x6e7   : > { %8812 = vmatpush1.bf16.msra.mxu1 %v14549_v3  ;;  %8594 = vmatprep.subr.bf16.mxu0 %v14554_v36  ;;  %v14612_v3 = vld [vmem:[%s20033_s8 + $0x4f4] ss:$68 sps:$4 sm:$0xff]   ;;  %v14615_v36 = vld [vmem:[#allocation7 + $0x9c] ss:$68 sps:$4 sm:$0xff]  }
 0x6e8   : > { %8813 = vmatprep.subr.bf16.mxu1 %v14557_v34  ;;  %v14610_v34 = vld [vmem:[%s20033_s8 + $0x4f0] ss:$68 sps:$4 sm:$0xff]  }
 0x6ea   : > { %8595 = vmatpush1.bf16.msra.mxu0 %v14552_v18  ;;  %v14613_v18 = vld [vmem:[#allocation7 + $0x98] ss:$68 sps:$4 sm:$0xff]  }
 0x6eb   : > { %8814 = vmatpush1.bf16.msra.mxu1 %v14555_v6  ;;  %8596 = vmatprep.subr.bf16.mxu0 %v14560_v41  ;;  %v14618_v6 = vld [vmem:[%s20033_s8 + $0x57c] ss:$68 sps:$4 sm:$0xff]   ;;  %v14621_v41 = vld [vmem:[#allocation7 + $0x124] ss:$68 sps:$4 sm:$0xff]  }
 0x6ec   : > { %8815 = vmatprep.subr.bf16.mxu1 %v14563_v28  ;;  %v14616_v28 = vld [vmem:[%s20033_s8 + $0x578] ss:$68 sps:$4 sm:$0xff]  }
 0x6ee   : > { %8597 = vmatpush1.bf16.msra.mxu0 %v14558_v45  ;;  %v14619_v45 = vld [vmem:[#allocation7 + $0x120] ss:$68 sps:$4 sm:$0xff]  }
 0x6ef   : > { %8816 = vmatpush1.bf16.msra.mxu1 %v14561_v17  ;;  %8712 = vmatprep.subr.bf16.mxu0 %v14566_v5  ;;  %v14624_v17 = vld [vmem:[%s20033_s8 + $0x604] ss:$68 sps:$4 sm:$0xff]   ;;  %v14627_v5 = vld [vmem:[#allocation7 + $0x1ac] ss:$68 sps:$4 sm:$0xff]  }
 0x6f0   : > { %12995 = vmatprep.subr.bf16.mxu1 %v14567_v1  ;;  %v14622_v1 = vld [vmem:[%s20033_s8 + $0x600] ss:$68 sps:$4 sm:$0xff]  }
 0x6f1   : > { %8599 = vmatmul.mubr.bf16.vlgmr.msra.gmra.mrb[48].mxu0 %v18592_v16 }
 0x6f2   : > { %8818 = vmatmul.mubr.bf16.vlgmr.msra.gmra.mrb[216].mxu1 %v18592_v16  ;;  %8608 = vmatprep.mubr.bf16.mxu0 %v18630_v10 }
 0x6f3   : > { %8713 = vmatpush1.bf16.msra.mxu0 %v14564_v48  ;;  %8827 = vmatprep.mubr.bf16.mxu1 %v18630_v10  ;;  %v14625_v48 = vld [vmem:[#allocation7 + $0x1a8] ss:$68 sps:$4 sm:$0xff]  }
 0x6f4   : > { %12996 = vmatpush3.bf16.msra.mxu1 %v14568_v37  ;;  %8714 = vmatprep.subr.bf16.mxu0 %v14571_v23  ;;  %v14630_v37 = vld [vmem:[%s20033_s8 + $0x68c] ss:$68 sps:$4 sm:$0xff]   ;;  %v14633_v23 = vld [vmem:[#allocation7 + $0x234] ss:$68 sps:$4 sm:$0xff]  }
 0x6f5   : > { %12997 = vmatprep.subr.bf16.mxu1 %v14572_v33  ;;  %v14628_v33 = vld [vmem:[%s20033_s8 + $0x688] ss:$68 sps:$4 sm:$0xff]  }
 0x6f7   : > { %8715 = vmatpush1.bf16.msra.mxu0 %v14569_v62  ;;  %v14631_v62 = vld [vmem:[#allocation7 + $0x230] ss:$68 sps:$4 sm:$0xff]  }
 0x6f8   : > { %12998 = vmatpush3.bf16.msra.mxu1 %v14573_v40  ;;  %8716 = vmatprep.subr.bf16.mxu0 %v14576_v8  ;;  %v14636_v40 = vld [vmem:[%s20033_s8 + $0x714] ss:$68 sps:$4 sm:$0xff]   ;;  %v14639_v8 = vld [vmem:[#allocation7 + $0x2bc] ss:$68 sps:$4 sm:$0xff]  }
 0x6f9   : > { %8609 = vmatmul.mubr.bf16.gmra.mrb[52].mxu0 %v18628_v24  ;;  %12999 = vmatprep.subr.bf16.mxu1 %v14577_v21  ;;  %v14634_v21 = vld [vmem:[%s20033_s8 + $0x710] ss:$68 sps:$4 sm:$0xff]  }
 0x6fa   : > { %8828 = vmatmul.mubr.bf16.gmra.mrb[220].mxu1 %v18628_v24  ;;  %8618 = vmatprep.mubr.bf16.mxu0 %v18666_v47 }
 0x6fb   : > { %8717 = vmatpush1.bf16.msra.mxu0 %v14574_v11  ;;  %8837 = vmatprep.mubr.bf16.mxu1 %v18666_v47  ;;  %v14637_v11 = vld [vmem:[#allocation7 + $0x2b8] ss:$68 sps:$4 sm:$0xff]  }
 0x6fc   : > { %13000 = vmatpush3.bf16.msra.mxu1 %v14578_v26  ;;  %8718 = vmatprep.subr.bf16.mxu0 %v14581_v46  ;;  %v14642_v26 = vld [vmem:[%s20033_s8 + $0x79c] ss:$68 sps:$4 sm:$0xff]   ;;  %v14645_v46 = vld [vmem:[#allocation7 + $0x344] ss:$68 sps:$4 sm:$0xff]  }
 0x6fd   : > { %13001 = vmatprep.subr.bf16.mxu1 %v14582_v53  ;;  %v14640_v53 = vld [vmem:[%s20033_s8 + $0x798] ss:$68 sps:$4 sm:$0xff]  }
 0x6ff   : > { %8719 = vmatpush1.bf16.msra.mxu0 %v14579_v43  ;;  %v14643_v43 = vld [vmem:[#allocation7 + $0x340] ss:$68 sps:$4 sm:$0xff]  }
 0x700   : > { %13002 = vmatpush3.bf16.msra.mxu1 %v14583_v38  ;;  %8720 = vmatprep.subr.bf16.mxu0 %v14586_v13  ;;  %v14648_v38 = vld [vmem:[%s20033_s8 + $0x824] ss:$68 sps:$4 sm:$0xff]   ;;  %v14651_v13 = vld [vmem:[#allocation7 + $0x3cc] ss:$68 sps:$4 sm:$0xff]  }
 0x701   : > { %8619 = vmatmul.mubr.bf16.gmra.mrb[56].mxu0 %v18664_v29  ;;  %13003 = vmatprep.subr.bf16.mxu1 %v14587_v35  ;;  %v14646_v35 = vld [vmem:[%s20033_s8 + $0x820] ss:$68 sps:$4 sm:$0xff]  }
 0x702   : > { %8838 = vmatmul.mubr.bf16.gmra.mrb[224].mxu1 %v18664_v29  ;;  %8628 = vmatprep.mubr.bf16.mxu0 %v18702_v44 }
 0x703   : > { %8721 = vmatpush1.bf16.msra.mxu0 %v14584_v25  ;;  %8847 = vmatprep.mubr.bf16.mxu1 %v18702_v44  ;;  %v14649_v25 = vld [vmem:[#allocation7 + $0x3c8] ss:$68 sps:$4 sm:$0xff]  }
 0x704   : > { %13004 = vmatpush3.bf16.msra.mxu1 %v14588_v19  ;;  %8722 = vmatprep.subr.bf16.mxu0 %v14591_v58  ;;  %v14654_v19 = vld [vmem:[%s20033_s8 + $0x3c] ss:$68 sps:$4 sm:$0xff]   ;;  %v14657_v58 = vld [vmem:[#allocation7 + $0x454] ss:$68 sps:$4 sm:$0xff]  }
 0x705   : > { %13005 = vmatprep.subr.bf16.mxu1 %v14592_v4  ;;  %v14652_v4 = vld [vmem:[%s20033_s8 + $0x38] ss:$68 sps:$4 sm:$0xff]  }
 0x707   : > { %8723 = vmatpush1.bf16.msra.mxu0 %v14589_v15  ;;  %v14655_v15 = vld [vmem:[#allocation7 + $0x450] ss:$68 sps:$4 sm:$0xff]  }
 0x708   : > { %13006 = vmatpush3.bf16.msra.mxu1 %v14593_v49  ;;  %8724 = vmatprep.subr.bf16.mxu0 %v14596_v7  ;;  %v14660_v49 = vld [vmem:[%s20033_s8 + $0xc4] ss:$68 sps:$4 sm:$0xff]   ;;  %v14663_v7 = vld [vmem:[#allocation7 + $0x4dc] ss:$68 sps:$4 sm:$0xff]  }
 0x709   : > { %8629 = vmatmul.mubr.bf16.gmra.mrb[60].mxu0 %v18700_v31  ;;  %13007 = vmatprep.subr.bf16.mxu1 %v14597_v32  ;;  %v14658_v32 = vld [vmem:[%s20033_s8 + $0xc0] ss:$68 sps:$4 sm:$0xff]  }
 0x70a   : > { %8848 = vmatmul.mubr.bf16.gmra.mrb[228].mxu1 %v18700_v31  ;;  %8744 = vmatprep.mubr.bf16.mxu0 %v18594_v61 }
 0x70b   : > { %8725 = vmatpush1.bf16.msra.mxu0 %v14594_v42  ;;  %8963 = vmatprep.mubr.bf16.mxu1 %v18594_v61  ;;  %v14661_v42 = vld [vmem:[#allocation7 + $0x4d8] ss:$68 sps:$4 sm:$0xff]  }
 0x70c   : > { %13008 = vmatpush3.bf16.msra.mxu1 %v14598_v52  ;;  %8726 = vmatprep.subr.bf16.mxu0 %v14601_v54  ;;  %v14666_v52 = vld [vmem:[%s20033_s8 + $0x14c] ss:$68 sps:$4 sm:$0xff]   ;;  %v14669_v54 = vld [vmem:[#allocation7 + $0x564] ss:$68 sps:$4 sm:$0xff]  }
 0x70d   : > { %13009 = vmatprep.subr.bf16.mxu1 %v14602_v59  ;;  %v14664_v59 = vld [vmem:[%s20033_s8 + $0x148] ss:$68 sps:$4 sm:$0xff]  }
 0x70f   : > { %8727 = vmatpush1.bf16.msra.mxu0 %v14599_v55  ;;  %v14667_v55 = vld [vmem:[#allocation7 + $0x560] ss:$68 sps:$4 sm:$0xff]  }
 0x710   : > { %13010 = vmatpush3.bf16.msra.mxu1 %v14603_v50  ;;  %8728 = vmatprep.subr.bf16.mxu0 %v14606_v57  ;;  %v14672_v50 = vld [vmem:[%s20033_s8 + $0x1d4] ss:$68 sps:$4 sm:$0xff]   ;;  %v14675_v57 = vld [vmem:[#allocation7 + $0x5ec] ss:$68 sps:$4 sm:$0xff]  }
 0x711   : > { %10186 = vmatprep.subr.bf16.mxu1 %v14609_v30  ;;  %v14670_v30 = vld [vmem:[%s20033_s8 + $0x1d0] ss:$68 sps:$4 sm:$0xff]  }
 0x713   : > { %8964 = vmatmul.mubr.bf16.vlgmr.msra.gmra.mrb[232].mxu1 %v18592_v16  ;;  %8729 = vmatpush1.bf16.msra.mxu0 %v14604_v22  ;;  %v14673_v22 = vld [vmem:[#allocation7 + $0x5e8] ss:$68 sps:$4 sm:$0xff]  }
 0x714   : > { %8971 = vmatprep.mubr.bf16.mxu1 %v18630_v10  ;;  %10187 = vmatpush1.bf16.msra.mxu1 %v14607_v0  ;;  %v14678_v0 = vld [vmem:[%s20033_s8 + $0x25c] ss:$68 sps:$4 sm:$0xff]  }
 0x715   : > { %8730 = vmatprep.subr.bf16.mxu0 %v14612_v3  ;;  %10188 = vmatprep.subr.bf16.mxu1 %v14615_v36  ;;  %v14681_v3 = vld [vmem:[#allocation7 + $0x24] ss:$68 sps:$4 sm:$0xff]   ;;  %v14676_v36 = vld [vmem:[%s20033_s8 + $0x258] ss:$68 sps:$4 sm:$0xff]  }
 0x717   : > { %8731 = vmatpush1.bf16.msra.mxu0 %v14610_v34  ;;  %v14679_v34 = vld [vmem:[#allocation7 + $0x20] ss:$68 sps:$4 sm:$0xff]  }
 0x718   : > { %10189 = vmatpush1.bf16.msra.mxu1 %v14613_v18  ;;  %8732 = vmatprep.subr.bf16.mxu0 %v14618_v6  ;;  %v14684_v18 = vld [vmem:[%s20033_s8 + $0x2e4] ss:$68 sps:$4 sm:$0xff]   ;;  %v14687_v6 = vld [vmem:[#allocation7 + $0xac] ss:$68 sps:$4 sm:$0xff]  }
 0x719   : > { %10190 = vmatprep.subr.bf16.mxu1 %v14621_v41  ;;  %v14682_v41 = vld [vmem:[%s20033_s8 + $0x2e0] ss:$68 sps:$4 sm:$0xff]  }
 0x71b   : > { %8972 = vmatmul.mubr.bf16.gmra.mrb[236].mxu1 %v18628_v24  ;;  %8733 = vmatpush1.bf16.msra.mxu0 %v14616_v28  ;;  %v14685_v28 = vld [vmem:[#allocation7 + $0xa8] ss:$68 sps:$4 sm:$0xff]  }
 0x71c   : > { %8979 = vmatprep.mubr.bf16.mxu1 %v18666_v47  ;;  %10191 = vmatpush1.bf16.msra.mxu1 %v14619_v45  ;;  %v14690_v45 = vld [vmem:[%s20033_s8 + $0x36c] ss:$68 sps:$4 sm:$0xff]  }
 0x71d   : > { %8734 = vmatprep.subr.bf16.mxu0 %v14624_v17  ;;  %10192 = vmatprep.subr.bf16.mxu1 %v14627_v5  ;;  %v14693_v17 = vld [vmem:[#allocation7 + $0x134] ss:$68 sps:$4 sm:$0xff]   ;;  %v14688_v5 = vld [vmem:[%s20033_s8 + $0x368] ss:$68 sps:$4 sm:$0xff]  }
 0x71f   : > { %8735 = vmatpush1.bf16.msra.mxu0 %v14622_v1  ;;  %v14691_v1 = vld [vmem:[#allocation7 + $0x130] ss:$68 sps:$4 sm:$0xff]  }
 0x720   : > { %10193 = vmatpush1.bf16.msra.mxu1 %v14625_v48  ;;  %8736 = vmatprep.subr.bf16.mxu0 %v14630_v37  ;;  %v14696_v48 = vld [vmem:[%s20033_s8 + $0x3f4] ss:$68 sps:$4 sm:$0xff]   ;;  %v14699_v37 = vld [vmem:[#allocation7 + $0x1bc] ss:$68 sps:$4 sm:$0xff]  }
 0x721   : > { %10194 = vmatprep.subr.bf16.mxu1 %v14633_v23  ;;  %v14694_v23 = vld [vmem:[%s20033_s8 + $0x3f0] ss:$68 sps:$4 sm:$0xff]  }
 0x723   : > { %8980 = vmatmul.mubr.bf16.gmra.mrb[240].mxu1 %v18664_v29  ;;  %8737 = vmatpush1.bf16.msra.mxu0 %v14628_v33  ;;  %v14697_v33 = vld [vmem:[#allocation7 + $0x1b8] ss:$68 sps:$4 sm:$0xff]  }
 0x724   : > { %8987 = vmatprep.mubr.bf16.mxu1 %v18702_v44  ;;  %10195 = vmatpush1.bf16.msra.mxu1 %v14631_v62  ;;  %v14702_v62 = vld [vmem:[%s20033_s8 + $0x47c] ss:$68 sps:$4 sm:$0xff]  }
 0x725   : > { %8738 = vmatprep.subr.bf16.mxu0 %v14636_v40  ;;  %10196 = vmatprep.subr.bf16.mxu1 %v14639_v8  ;;  %v14705_v40 = vld [vmem:[#allocation7 + $0x244] ss:$68 sps:$4 sm:$0xff]  }
 0x726   : > { %v14703_v8 = vld [vmem:[#allocation7 + $0x240] ss:$68 sps:$4 sm:$0xff]  }
 0x727   : > { %8739 = vmatpush1.bf16.msra.mxu0 %v14634_v21  ;;  %v14708_v21 = vld [vmem:[%s20033_s8 + $0x504] ss:$68 sps:$4 sm:$0xff]  }
 0x728   : > { %10197 = vmatpush1.bf16.msra.mxu1 %v14637_v11  ;;  %8740 = vmatprep.subr.bf16.mxu0 %v14642_v26  ;;  %v14711_v11 = vld [vmem:[#allocation7 + $0x2cc] ss:$68 sps:$4 sm:$0xff]   ;;  %v14706_v26 = vld [vmem:[%s20033_s8 + $0x500] ss:$68 sps:$4 sm:$0xff]  }
 0x729   : > { %10198 = vmatprep.subr.bf16.mxu1 %v14645_v46  ;;  %v14709_v46 = vld [vmem:[#allocation7 + $0x2c8] ss:$68 sps:$4 sm:$0xff]  }
 0x72b   : > { %8988 = vmatmul.mubr.bf16.gmra.mrb[244].mxu1 %v18700_v31  ;;  %8741 = vmatpush1.bf16.msra.mxu0 %v14640_v53  ;;  %v14714_v53 = vld [vmem:[%s20033_s8 + $0x58c] ss:$68 sps:$4 sm:$0xff]  }
 0x72c   : > { %10199 = vmatpush1.bf16.msra.mxu1 %v14643_v43  ;;  %12637 = vmatprep.mubr.msk.bf16.mxu1 %vm20158_vm4, %v17372_v27  ;;  %v14717_v43 = vld [vmem:[#allocation7 + $0x354] ss:$68 sps:$4 sm:$0xff]   ;;  %vm20175_vm4 = vmmov %vm20164_vm0 }
 0x72d   : > { %8742 = vmatprep.subr.bf16.mxu0 %v14648_v38  ;;  %10200 = vmatprep.subr.bf16.mxu1 %v14651_v13  ;;  %v14712_v38 = vld [vmem:[%s20033_s8 + $0x588] ss:$68 sps:$4 sm:$0xff]   ;;  %v14715_v13 = vld [vmem:[#allocation7 + $0x350] ss:$68 sps:$4 sm:$0xff]  }
 0x72f   : > { %8743 = vmatpush1.bf16.msra.mxu0 %v14646_v35  ;;  %v14720_v35 = vld [vmem:[%s20033_s8 + $0x614] ss:$68 sps:$4 sm:$0xff]  }
 0x730   : > { %10201 = vmatpush1.bf16.msra.mxu1 %v14649_v25  ;;  %8858 = vmatprep.subr.bf16.mxu0 %v14654_v19  ;;  %v14723_v25 = vld [vmem:[#allocation7 + $0x3dc] ss:$68 sps:$4 sm:$0xff]   ;;  %v14718_v19 = vld [vmem:[%s20033_s8 + $0x610] ss:$68 sps:$4 sm:$0xff]  }
 0x731   : > { %10202 = vmatprep.subr.bf16.mxu1 %v14657_v58  ;;  %v14721_v58 = vld [vmem:[#allocation7 + $0x3d8] ss:$68 sps:$4 sm:$0xff]  }
 0x732   : > { %8745 = vmatmul.mubr.bf16.vlgmr.msra.gmra.mrb[64].mxu0 %v18592_v16 }
 0x733   : > { %8754 = vmatprep.mubr.bf16.mxu0 %v18630_v10  ;;  %8859 = vmatpush1.bf16.msra.mxu0 %v14652_v4  ;;  %v14726_v4 = vld [vmem:[%s20033_s8 + $0x69c] ss:$68 sps:$4 sm:$0xff]  }
 0x734   : > { %10203 = vmatpush1.bf16.msra.mxu1 %v14655_v15  ;;  %8860 = vmatprep.subr.bf16.mxu0 %v14660_v49  ;;  %v14729_v15 = vld [vmem:[#allocation7 + $0x464] ss:$68 sps:$4 sm:$0xff]   ;;  %v14724_v49 = vld [vmem:[%s20033_s8 + $0x698] ss:$68 sps:$4 sm:$0xff]  }
 0x735   : > { %10204 = vmatprep.subr.bf16.mxu1 %v14663_v7  ;;  %v14727_v7 = vld [vmem:[#allocation7 + $0x460] ss:$68 sps:$4 sm:$0xff]  }
 0x737   : > { %8861 = vmatpush1.bf16.msra.mxu0 %v14658_v32  ;;  %v14732_v32 = vld [vmem:[%s20033_s8 + $0x724] ss:$68 sps:$4 sm:$0xff]  }
 0x738   : > { %10205 = vmatpush1.bf16.msra.mxu1 %v14661_v42  ;;  %8862 = vmatprep.subr.bf16.mxu0 %v14666_v52  ;;  %v14735_v42 = vld [vmem:[#allocation7 + $0x4ec] ss:$68 sps:$4 sm:$0xff]   ;;  %v14730_v52 = vld [vmem:[%s20033_s8 + $0x720] ss:$68 sps:$4 sm:$0xff]  }
 0x739   : > { %10206 = vmatprep.subr.bf16.mxu1 %v14669_v54  ;;  %v14733_v54 = vld [vmem:[#allocation7 + $0x4e8] ss:$68 sps:$4 sm:$0xff]  }
 0x73a   : > { %8755 = vmatmul.mubr.bf16.gmra.mrb[68].mxu0 %v18628_v24 }
 0x73b   : > { %8764 = vmatprep.mubr.bf16.mxu0 %v18666_v47  ;;  %8863 = vmatpush1.bf16.msra.mxu0 %v14664_v59  ;;  %v14738_v59 = vld [vmem:[%s20033_s8 + $0x7ac] ss:$68 sps:$4 sm:$0xff]  }
 0x73c   : > { %10207 = vmatpush1.bf16.msra.mxu1 %v14667_v55  ;;  %8864 = vmatprep.subr.bf16.mxu0 %v14672_v50  ;;  %v14741_v55 = vld [vmem:[#allocation7 + $0x574] ss:$68 sps:$4 sm:$0xff]   ;;  %v14736_v50 = vld [vmem:[%s20033_s8 + $0x7a8] ss:$68 sps:$4 sm:$0xff]  }
 0x73d   : > { %10208 = vmatprep.subr.bf16.mxu1 %v14675_v57  ;;  %v14739_v57 = vld [vmem:[#allocation7 + $0x570] ss:$68 sps:$4 sm:$0xff]  }
 0x73f   : > { %8865 = vmatpush1.bf16.msra.mxu0 %v14670_v30  ;;  %v14744_v30 = vld [vmem:[%s20033_s8 + $0x834] ss:$68 sps:$4 sm:$0xff]  }
 0x740   : > { %10209 = vmatpush1.bf16.msra.mxu1 %v14673_v22  ;;  %8866 = vmatprep.subr.bf16.mxu0 %v14678_v0  ;;  %v14747_v22 = vld [vmem:[#allocation7 + $0x5fc] ss:$68 sps:$4 sm:$0xff]   ;;  %v14742_v0 = vld [vmem:[%s20033_s8 + $0x830] ss:$68 sps:$4 sm:$0xff]  }
 0x741   : > { %10332 = vmatprep.subr.bf16.mxu1 %v14681_v3  ;;  %v14745_v3 = vld [vmem:[#allocation7 + $0x5f8] ss:$68 sps:$4 sm:$0xff]  }
 0x742   : > { %8765 = vmatmul.mubr.bf16.gmra.mrb[72].mxu0 %v18664_v29 }
 0x743   : > { %10219 = vmatmul.mubr.bf16.vlgmr.msra.gmra.mrb[184].mxu1 %v17367_v2  ;;  %8774 = vmatprep.mubr.bf16.mxu0 %v18702_v44 }
 0x744   : > { %8867 = vmatpush1.bf16.msra.mxu0 %v14676_v36  ;;  %12638 = vmatprep.mubr.msk.bf16.mxu1 %vm20159_vm5, %v17388_v12  ;;  %v14750_v36 = vld [vmem:[#allocation7 + $0x4] ss:$68 sps:$4 sm:$0xff]   ;;  %vm20176_vm5 = vmmov %vm20164_vm0 }
 0x745   : > { %10333 = vmatpush1.bf16.msra.mxu1 %v14679_v34  ;;  %8868 = vmatprep.subr.bf16.mxu0 %v14684_v18  ;;  %v14753_v34 = vld [vmem:[#allocation7 + $0x34] ss:$68 sps:$4 sm:$0xff]   ;;  %v14748_v18 = vld [vmem:[#allocation7] ss:$68 sps:$4 sm:$0xff]  }
 0x746   : > { %10334 = vmatprep.subr.bf16.mxu1 %v14687_v6  ;;  %v14751_v6 = vld [vmem:[#allocation7 + $0x30] ss:$68 sps:$4 sm:$0xff]  }
 0x748   : > { %8869 = vmatpush1.bf16.msra.mxu0 %v14682_v41  ;;  %v14756_v41 = vld [vmem:[#allocation7 + $0x8c] ss:$68 sps:$4 sm:$0xff]  }
 0x749   : > { %10335 = vmatpush1.bf16.msra.mxu1 %v14685_v28  ;;  %8870 = vmatprep.subr.bf16.mxu0 %v14690_v45  ;;  %v14759_v28 = vld [vmem:[#allocation7 + $0xbc] ss:$68 sps:$4 sm:$0xff]   ;;  %v14754_v45 = vld [vmem:[#allocation7 + $0x88] ss:$68 sps:$4 sm:$0xff]  }
 0x74a   : > { %8775 = vmatmul.mubr.bf16.gmra.mrb[76].mxu0 %v18700_v31  ;;  %10336 = vmatprep.subr.bf16.mxu1 %v14693_v17  ;;  %v14757_v17 = vld [vmem:[#allocation7 + $0xb8] ss:$68 sps:$4 sm:$0xff]  }
 0x74b   : > { %10229 = vmatmul.mubr.bf16.gmra.mrb[188].mxu1 %v17385_v56  ;;  %8890 = vmatprep.mubr.bf16.mxu0 %v18594_v61  ;;  %v14700_v61 = vld [vmem:[%s20033_s8 + $0x478] ss:$68 sps:$4 sm:$0xff]  }
 0x74c   : > { %8871 = vmatpush1.bf16.msra.mxu0 %v14688_v5  ;;  %12639 = vmatprep.mubr.msk.bf16.mxu1 %vm20160_vm6, %v17404_v63  ;;  %v14762_v5 = vld [vmem:[#allocation7 + $0x114] ss:$68 sps:$4 sm:$0xff]   ;;  %vm20177_vm6 = vmmov %vm20164_vm0 }
 0x74d   : > { %10337 = vmatpush1.bf16.msra.mxu1 %v14691_v1  ;;  %8872 = vmatprep.subr.bf16.mxu0 %v14696_v48  ;;  %v14765_v1 = vld [vmem:[#allocation7 + $0x144] ss:$68 sps:$4 sm:$0xff]   ;;  %v14760_v48 = vld [vmem:[#allocation7 + $0x110] ss:$68 sps:$4 sm:$0xff]  }
 0x74e   : > { %10338 = vmatprep.subr.bf16.mxu1 %v14699_v37  ;;  %v14768_v37 = vld [vmem:[#allocation7 + $0x19c] ss:$68 sps:$4 sm:$0xff]  }
 0x750   : > { %8873 = vmatpush1.bf16.msra.mxu0 %v14694_v23  ;;  %v14766_v23 = vld [vmem:[#allocation7 + $0x198] ss:$68 sps:$4 sm:$0xff]  }
 0x751   : > { %10339 = vmatpush1.bf16.msra.mxu1 %v14697_v33  ;;  %8874 = vmatprep.subr.bf16.mxu0 %v14702_v62  ;;  %v14769_v33 = vld [vmem:[#allocation7 + $0x1c8] ss:$68 sps:$4 sm:$0xff]  }
 0x752   : > { %10340 = vmatprep.subr.bf16.mxu1 %v14705_v40  ;;  %v14774_v62 = vld [vmem:[#allocation7 + $0x224] ss:$68 sps:$4 sm:$0xff]   ;;  %v14777_v40 = vld [vmem:[#allocation7 + $0x254] ss:$68 sps:$4 sm:$0xff]  }
 0x753   : > { %10239 = vmatmul.mubr.bf16.gmra.mrb[192].mxu1 %v17401_v39 }
 0x754   : > { %8875 = vmatpush1.bf16.msra.mxu0 %v14700_v61  ;;  %12640 = vmatprep.mubr.msk.bf16.mxu1 %vm20161_vm7, %v17425_v60  ;;  %v14772_v61 = vld [vmem:[#allocation7 + $0x220] ss:$68 sps:$4 sm:$0xff]   ;;  %vm20178_vm7 = vmmov %vm20164_vm0 }
 0x755   : > { %10341 = vmatpush1.bf16.msra.mxu1 %v14703_v8  ;;  %8876 = vmatprep.subr.bf16.mxu0 %v14708_v21  ;;  %v14780_v8 = vld [vmem:[#allocation7 + $0x2ac] ss:$68 sps:$4 sm:$0xff]  }
 0x756   : > { %10342 = vmatprep.subr.bf16.mxu1 %v14711_v11  ;;  %v14778_v21 = vld [vmem:[#allocation7 + $0x2a8] ss:$68 sps:$4 sm:$0xff]   ;;  %v14781_v11 = vld [vmem:[#allocation7 + $0x2d8] ss:$68 sps:$4 sm:$0xff]  }
 0x758   : > { %8877 = vmatpush1.bf16.msra.mxu0 %v14706_v26  ;;  %v14786_v26 = vld [vmem:[#allocation7 + $0x334] ss:$68 sps:$4 sm:$0xff]  }
 0x759   : > { %10343 = vmatpush1.bf16.msra.mxu1 %v14709_v46  ;;  %8878 = vmatprep.subr.bf16.mxu0 %v14714_v53  ;;  %v14789_v46 = vld [vmem:[#allocation7 + $0x364] ss:$68 sps:$4 sm:$0xff]   ;;  %v14784_v53 = vld [vmem:[#allocation7 + $0x330] ss:$68 sps:$4 sm:$0xff]  }
 0x75a   : > { %10344 = vmatprep.subr.bf16.mxu1 %v14717_v43  ;;  %v14792_v43 = vld [vmem:[#allocation7 + $0x3bc] ss:$68 sps:$4 sm:$0xff]  }
 0x75b   : > { %10249 = vmatmul.mubr.bf16.gmra.mrb[196].mxu1 %v17423_v20 }
 0x75c   : > { %8879 = vmatpush1.bf16.msra.mxu0 %v14712_v38  ;;  %12645 = vmatprep.mubr.msk.bf16.mxu1 %vm20162_vm9, %v17372_v27  ;;  %v14790_v38 = vld [vmem:[#allocation7 + $0x3b8] ss:$68 sps:$4 sm:$0xff]   ;;  %vm20179_vm9 = vmmov %vm20164_vm0 }
 0x75d   : > { %10345 = vmatpush1.bf16.msra.mxu1 %v14715_v13  ;;  %8880 = vmatprep.subr.bf16.mxu0 %v14720_v35  ;;  %v14793_v13 = vld [vmem:[#allocation7 + $0x3e8] ss:$68 sps:$4 sm:$0xff]  }
 0x75e   : > { %10346 = vmatprep.subr.bf16.mxu1 %v14723_v25  ;;  %v14798_v35 = vld [vmem:[#allocation7 + $0x444] ss:$68 sps:$4 sm:$0xff]   ;;  %v14801_v25 = vld [vmem:[#allocation7 + $0x474] ss:$68 sps:$4 sm:$0xff]  }
 0x760   : > { %8881 = vmatpush1.bf16.msra.mxu0 %v14718_v19  ;;  %v14799_v19 = vld [vmem:[#allocation7 + $0x470] ss:$68 sps:$4 sm:$0xff]  }
 0x761   : > { %10347 = vmatpush1.bf16.msra.mxu1 %v14721_v58  ;;  %8882 = vmatprep.subr.bf16.mxu0 %v14726_v4  ;;  %v14804_v58 = vld [vmem:[#allocation7 + $0x4cc] ss:$68 sps:$4 sm:$0xff]   ;;  %v14807_v4 = vld [vmem:[#allocation7 + $0x4fc] ss:$68 sps:$4 sm:$0xff]  }
 0x762   : > { %10348 = vmatprep.subr.bf16.mxu1 %v14729_v15  ;;  %v14802_v15 = vld [vmem:[#allocation7 + $0x4c8] ss:$68 sps:$4 sm:$0xff]  }
 0x764   : > { %8883 = vmatpush1.bf16.msra.mxu0 %v14724_v49  ;;  %v14805_v49 = vld [vmem:[#allocation7 + $0x4f8] ss:$68 sps:$4 sm:$0xff]  }
 0x765   : > { %10349 = vmatpush1.bf16.msra.mxu1 %v14727_v7  ;;  %8884 = vmatprep.subr.bf16.mxu0 %v14732_v32  ;;  %v14810_v7 = vld [vmem:[#allocation7 + $0x554] ss:$68 sps:$4 sm:$0xff]   ;;  %v14813_v32 = vld [vmem:[#allocation7 + $0x584] ss:$68 sps:$4 sm:$0xff]  }
 0x766   : > { %10350 = vmatprep.subr.bf16.mxu1 %v14735_v42  ;;  %v14808_v42 = vld [vmem:[#allocation7 + $0x550] ss:$68 sps:$4 sm:$0xff]  }
 0x768   : > { %8885 = vmatpush1.bf16.msra.mxu0 %v14730_v52  ;;  %v14811_v52 = vld [vmem:[#allocation7 + $0x580] ss:$68 sps:$4 sm:$0xff]  }
 0x769   : > { %10351 = vmatpush1.bf16.msra.mxu1 %v14733_v54  ;;  %8886 = vmatprep.subr.bf16.mxu0 %v14738_v59  ;;  %v14816_v54 = vld [vmem:[#allocation7 + $0x5dc] ss:$68 sps:$4 sm:$0xff]   ;;  %v14819_v59 = vld [vmem:[#allocation7 + $0x60c] ss:$68 sps:$4 sm:$0xff]  }
 0x76a   : > { %10352 = vmatprep.subr.bf16.mxu1 %v14741_v55  ;;  %v14814_v55 = vld [vmem:[#allocation7 + $0x5d8] ss:$68 sps:$4 sm:$0xff]  }
 0x76c   : > { %8887 = vmatpush1.bf16.msra.mxu0 %v14736_v50  ;;  %v14817_v50 = vld [vmem:[#allocation7 + $0x608] ss:$68 sps:$4 sm:$0xff]  }
 0x76d   : > { %10353 = vmatpush1.bf16.msra.mxu1 %v14739_v57  ;;  %8888 = vmatprep.subr.bf16.mxu0 %v14744_v30  ;;  %v14822_v57 = vld [vmem:[#allocation7 + $0xc] ss:$68 sps:$4 sm:$0xff]  }
 0x76e   : > { %10354 = vmatprep.subr.bf16.mxu1 %v14747_v22  ;;  %v14820_v30 = vld [vmem:[#allocation7 + $0x8] ss:$68 sps:$4 sm:$0xff]   ;;  %v20168_v22 = vmov 0  }
 0x770   : > { %8889 = vmatpush1.bf16.msra.mxu0 %v14742_v0  ;;  %v14823_v0 = vld [vmem:[#allocation7 + $0x40] ss:$68 sps:$4 sm:$0xff]  }
 0x771   : > { %10355 = vmatpush1.bf16.msra.mxu1 %v14745_v3  ;;  %10040 = vmatprep.subr.bf16.mxu0 %v14750_v36  ;;  %v14826_v3 = vld [vmem:[#allocation7 + $0x94] ss:$68 sps:$4 sm:$0xff]  }
 0x772   : > { %10478 = vmatprep.subr.bf16.mxu1 %v14753_v34  ;;  %v14824_v36 = vld [vmem:[#allocation7 + $0x90] ss:$68 sps:$4 sm:$0xff]   ;;  %v14827_v34 = vld [vmem:[#allocation7 + $0xc8] ss:$68 sps:$4 sm:$0xff]  }
 0x773   : > { %8891 = vmatmul.mubr.bf16.vlgmr.msra.gmra.mrb[80].mxu0 %v18592_v16  ;;  %v14763_v16 = vld [vmem:[#allocation7 + $0x140] ss:$68 sps:$4 sm:$0xff]  }
 0x774   : > { %10365 = vmatmul.mubr.bf16.vlgmr.msra.gmra.mrb[200].mxu1 %v17367_v2  ;;  %8900 = vmatprep.mubr.bf16.mxu0 %v18630_v10  ;;  %v14771_v10 = vld [vmem:[#allocation7 + $0x1cc] ss:$68 sps:$4 sm:$0xff]  }
 0x775   : > { %10041 = vmatpush1.bf16.msra.mxu0 %v14748_v18  ;;  %12646 = vmatprep.mubr.msk.bf16.mxu1 %vm20163_vm10, %v17388_v12  ;;  %v14830_v18 = vld [vmem:[#allocation7 + $0x11c] ss:$68 sps:$4 sm:$0xff]   ;;  %vm20180_vm10 = vmmov %vm20164_vm0 }
 0x776   : > { %10479 = vmatpush1.bf16.msra.mxu1 %v14751_v6  ;;  %10042 = vmatprep.subr.bf16.mxu0 %v14756_v41  ;;  %v14828_v6 = vld [vmem:[#allocation7 + $0x118] ss:$68 sps:$4 sm:$0xff]   ;;  %v14831_v41 = vld [vmem:[#allocation7 + $0x150] ss:$68 sps:$4 sm:$0xff]  }
 0x777   : > { %10480 = vmatprep.subr.bf16.mxu1 %v14759_v28  ;;  %v14834_v28 = vld [vmem:[#allocation7 + $0x1a4] ss:$68 sps:$4 sm:$0xff]  }
 0x779   : > { %10043 = vmatpush1.bf16.msra.mxu0 %v14754_v45  ;;  %v14832_v45 = vld [vmem:[#allocation7 + $0x1a0] ss:$68 sps:$4 sm:$0xff]  }
 0x77a   : > { %10481 = vmatpush1.bf16.msra.mxu1 %v14757_v17  ;;  %10044 = vmatprep.subr.bf16.mxu0 %v14762_v5  ;;  %v14835_v17 = vld [vmem:[#allocation7 + $0x1d8] ss:$68 sps:$4 sm:$0xff]   ;;  %v14838_v5 = vld [vmem:[#allocation7 + $0x22c] ss:$68 sps:$4 sm:$0xff]  }
 0x77b   : > { %8901 = vmatmul.mubr.bf16.gmra.mrb[84].mxu0 %v18628_v24  ;;  %10482 = vmatprep.subr.bf16.mxu1 %v14765_v1  ;;  %v14775_v24 = vld [vmem:[#allocation7 + $0x250] ss:$68 sps:$4 sm:$0xff]   ;;  %v14836_v1 = vld [vmem:[#allocation7 + $0x228] ss:$68 sps:$4 sm:$0xff]  }
 0x77c   : > { %10375 = vmatmul.mubr.bf16.gmra.mrb[204].mxu1 %v17385_v56  ;;  %8910 = vmatprep.mubr.bf16.mxu0 %v18666_v47  ;;  %v14783_v47 = vld [vmem:[#allocation7 + $0x2dc] ss:$68 sps:$4 sm:$0xff]  }
 0x77d   : > { %10045 = vmatpush1.bf16.msra.mxu0 %v14760_v48  ;;  %12647 = vmatprep.mubr.msk.bf16.mxu1 %vm20164_vm0, %v17404_v63  ;;  %v14839_v48 = vld [vmem:[#allocation7 + $0x260] ss:$68 sps:$4 sm:$0xff]  }
 0x77e   : > { %10483 = vmatpush1.bf16.msra.mxu1 %v14763_v16  ;;  %10046 = vmatprep.subr.bf16.mxu0 %v14768_v37  ;;  %v14842_v16 = vld [vmem:[#allocation7 + $0x2b4] ss:$68 sps:$4 sm:$0xff]  }
 0x77f   : > { %10484 = vmatprep.subr.bf16.mxu1 %v14771_v10  ;;  %v14840_v37 = vld [vmem:[#allocation7 + $0x2b0] ss:$68 sps:$4 sm:$0xff]   ;;  %v14843_v10 = vld [vmem:[#allocation7 + $0x2e8] ss:$68 sps:$4 sm:$0xff]  }
 0x781   : > { %10047 = vmatpush1.bf16.msra.mxu0 %v14766_v23  ;;  %v14846_v23 = vld [vmem:[#allocation7 + $0x33c] ss:$68 sps:$4 sm:$0xff]  }
 0x782   : > { %10485 = vmatpush1.bf16.msra.mxu1 %v14769_v33  ;;  %10048 = vmatprep.subr.bf16.mxu0 %v14774_v62  ;;  %v14844_v33 = vld [vmem:[#allocation7 + $0x338] ss:$68 sps:$4 sm:$0xff]   ;;  %v14847_v62 = vld [vmem:[#allocation7 + $0x370] ss:$68 sps:$4 sm:$0xff]  }
 0x783   : > { %8911 = vmatmul.mubr.bf16.gmra.mrb[88].mxu0 %v18664_v29  ;;  %10486 = vmatprep.subr.bf16.mxu1 %v14777_v40  ;;  %v14787_v29 = vld [vmem:[#allocation7 + $0x360] ss:$68 sps:$4 sm:$0xff]  }
 0x784   : > { %10385 = vmatmul.mubr.bf16.gmra.mrb[208].mxu1 %v17401_v39  ;;  %8920 = vmatprep.mubr.bf16.mxu0 %v18702_v44  ;;  %v14795_v44 = vld [vmem:[#allocation7 + $0x3ec] ss:$68 sps:$4 sm:$0xff]   ;;  %v14850_v40 = vld [vmem:[#allocation7 + $0x3c4] ss:$68 sps:$4 sm:$0xff]  }
 0x785   : > { %10049 = vmatpush1.bf16.msra.mxu0 %v14772_v61  ;;  %12648 = vmatprep.mubr.msk.bf16.mxu1 %vm20165_vm12, %v17425_v60  ;;  %v14848_v61 = vld [vmem:[#allocation7 + $0x3c0] ss:$68 sps:$4 sm:$0xff]   ;;  %vm20181_vm12 = vmmov %vm20164_vm0 }
 0x786   : > { %10487 = vmatpush1.bf16.msra.mxu1 %v14775_v24  ;;  %10050 = vmatprep.subr.bf16.mxu0 %v14780_v8  ;;  %v14851_v24 = vld [vmem:[#allocation7 + $0x3f8] ss:$68 sps:$4 sm:$0xff]   ;;  %v14854_v8 = vld [vmem:[#allocation7 + $0x44c] ss:$68 sps:$4 sm:$0xff]  }
 0x787   : > { %10488 = vmatprep.subr.bf16.mxu1 %v14783_v47  ;;  %v14852_v47 = vld [vmem:[#allocation7 + $0x448] ss:$68 sps:$4 sm:$0xff]  }
 0x789   : > { %10051 = vmatpush1.bf16.msra.mxu0 %v14778_v21  ;;  %v14855_v21 = vld [vmem:[#allocation7 + $0x480] ss:$68 sps:$4 sm:$0xff]  }
 0x78a   : > { %10489 = vmatpush1.bf16.msra.mxu1 %v14781_v11  ;;  %10052 = vmatprep.subr.bf16.mxu0 %v14786_v26  ;;  %v14858_v11 = vld [vmem:[#allocation7 + $0x4d4] ss:$68 sps:$4 sm:$0xff]  }
 0x78b   : > { %8921 = vmatmul.mubr.bf16.gmra.mrb[92].mxu0 %v18700_v31  ;;  %10490 = vmatprep.subr.bf16.mxu1 %v14789_v46  ;;  %v14796_v31 = vld [vmem:[#allocation7 + $0x440] ss:$68 sps:$4 sm:$0xff]   ;;  %v14856_v26 = vld [vmem:[#allocation7 + $0x4d0] ss:$68 sps:$4 sm:$0xff]   ;;  %v14859_v46 = vld [vmem:[#allocation7 + $0x508] ss:$68 sps:$4 sm:$0xff]  }
 0x78c   : > { %10395 = vmatmul.mubr.bf16.gmra.mrb[212].mxu1 %v17423_v20  ;;  %12629 = vmatprep.mubr.msk.bf16.mxu0 %vm20166_vm13, %v17372_v27  ;;  %vm20182_vm13 = vmmov %vm20164_vm0 }
 0x78d   : > { %10053 = vmatpush1.bf16.msra.mxu0 %v14784_v53  ;;  %12653 = vmatprep.mubr.msk.bf16.mxu1 %vm20167_vm1, %v17372_v27  ;;  %v14862_v53 = vld [vmem:[#allocation7 + $0x55c] ss:$68 sps:$4 sm:$0xff]   ;;  %vm20183_vm1 = vmmov %vm20164_vm0 }
 0x78e   : > { %10491 = vmatpush1.bf16.msra.mxu1 %v14787_v29  ;;  %10054 = vmatprep.subr.bf16.mxu0 %v14792_v43  ;;  %v14860_v29 = vld [vmem:[#allocation7 + $0x558] ss:$68 sps:$4 sm:$0xff]   ;;  %v14863_v43 = vld [vmem:[#allocation7 + $0x590] ss:$68 sps:$4 sm:$0xff]  }
 0x78f   : > { %10492 = vmatprep.subr.bf16.mxu1 %v14795_v44  ;;  %v14866_v44 = vld [vmem:[#allocation7 + $0x5e4] ss:$68 sps:$4 sm:$0xff]  }
 0x791   : > { %10055 = vmatpush1.bf16.msra.mxu0 %v14790_v38  ;;  %v14864_v38 = vld [vmem:[#allocation7 + $0x5e0] ss:$68 sps:$4 sm:$0xff]  }
 0x792   : > { %10493 = vmatpush1.bf16.msra.mxu1 %v14793_v13  ;;  %10056 = vmatprep.subr.bf16.mxu0 %v14798_v35  ;;  %v14867_v13 = vld [vmem:[#allocation7 + $0x618] ss:$68 sps:$4 sm:$0xff]  }
 0x793   : > { %10494 = vmatprep.subr.bf16.mxu1 %v14801_v25  ;;  %v14870_v35 = vld [vmem:[#allocation7 + $0x1c] ss:$68 sps:$4 sm:$0xff]  }
 0x794   : > { %v14868_v25 = vld [vmem:[#allocation7 + $0x18] ss:$68 sps:$4 sm:$0xff]  }
 0x795   : > { %10057 = vmatpush1.bf16.msra.mxu0 %v14796_v31  ;;  %v14873_v31 = vld [vmem:[#allocation7 + $0xa4] ss:$68 sps:$4 sm:$0xff]  }
 0x796   : > { %10495 = vmatpush1.bf16.msra.mxu1 %v14799_v19  ;;  %10058 = vmatprep.subr.bf16.mxu0 %v14804_v58  ;;  %v14871_v19 = vld [vmem:[#allocation7 + $0xa0] ss:$68 sps:$4 sm:$0xff]   ;;  %v14876_v58 = vld [vmem:[#allocation7 + $0x12c] ss:$68 sps:$4 sm:$0xff]  }
 0x797   : > { %10496 = vmatprep.subr.bf16.mxu1 %v14807_v4  ;;  %v14874_v4 = vld [vmem:[#allocation7 + $0x128] ss:$68 sps:$4 sm:$0xff]  }
 0x799   : > { %10059 = vmatpush1.bf16.msra.mxu0 %v14802_v15  ;;  %v14879_v15 = vld [vmem:[#allocation7 + $0x1b4] ss:$68 sps:$4 sm:$0xff]  }
 0x79a   : > { %10497 = vmatpush1.bf16.msra.mxu1 %v14805_v49  ;;  %10060 = vmatprep.subr.bf16.mxu0 %v14810_v7  ;;  %v14877_v49 = vld [vmem:[#allocation7 + $0x1b0] ss:$68 sps:$4 sm:$0xff]   ;;  %v14882_v7 = vld [vmem:[#allocation7 + $0x23c] ss:$68 sps:$4 sm:$0xff]  }
 0x79b   : > { %10498 = vmatprep.subr.bf16.mxu1 %v14813_v32  ;;  %v14880_v32 = vld [vmem:[#allocation7 + $0x238] ss:$68 sps:$4 sm:$0xff]  }
 0x79d   : > { %10061 = vmatpush1.bf16.msra.mxu0 %v14808_v42  ;;  %v14885_v42 = vld [vmem:[#allocation7 + $0x2c4] ss:$68 sps:$4 sm:$0xff]  }
 0x79e   : > { %10499 = vmatpush1.bf16.msra.mxu1 %v14811_v52  ;;  %10062 = vmatprep.subr.bf16.mxu0 %v14816_v54 }
 0x79f   : > { %10500 = vmatprep.subr.bf16.mxu1 %v14819_v59  ;;  %v14883_v59 = vld [vmem:[#allocation7 + $0x2c0] ss:$68 sps:$4 sm:$0xff]  }
 0x7a1   : > { %10063 = vmatpush1.bf16.msra.mxu0 %v14814_v55 }
 0x7a2   : > { %10501 = vmatpush1.bf16.msra.mxu1 %v14817_v50  ;;  %10113 = vmatprep.subr.bf16.mxu0 %v14822_v57  ;;  %v14888_v57 = vld [vmem:[#allocation7 + $0x34c] ss:$68 sps:$4 sm:$0xff]  }
 0x7a3   : > { %10624 = vmatprep.subr.bf16.mxu1 %v20168_v22 }
 0x7a4   : > { %10073 = vmatmul.mubr.bf16.vlgmr.msra.gmra.mrb[16].mxu0 %v17367_v2 }
 0x7a5   : > { %10511 = vmatmul.mubr.bf16.vlgmr.msra.gmra.mrb[216].mxu1 %v17367_v2  ;;  %12630 = vmatprep.mubr.msk.bf16.mxu0 %vm20169_vm8, %v17388_v12  ;;  %vm20184_vm8 = vmmov %vm20164_vm0 }
 0x7a6   : > { %10114 = vmatpush1.bf16.msra.mxu0 %v14820_v30  ;;  %12654 = vmatprep.mubr.msk.bf16.mxu1 %vm20170_vm11, %v17388_v12  ;;  %vm20185_vm11 = vmmov %vm20164_vm0 }
 0x7a7   : > { %10625 = vmatpush1.bf16.msra.mxu1 %v14823_v0  ;;  %10115 = vmatprep.subr.bf16.mxu0 %v14826_v3  ;;  %v14886_v0 = vld [vmem:[#allocation7 + $0x348] ss:$68 sps:$4 sm:$0xff]   ;;  %v14891_v3 = vld [vmem:[#allocation7 + $0x3d4] ss:$68 sps:$4 sm:$0xff]  }
 0x7a8   : > { %10626 = vmatprep.subr.bf16.mxu1 %v20168_v22 }
 0x7aa   : > { %10116 = vmatpush1.bf16.msra.mxu0 %v14824_v36 }
 0x7ab   : > { %10627 = vmatpush1.bf16.msra.mxu1 %v14827_v34  ;;  %10117 = vmatprep.subr.bf16.mxu0 %v14830_v18  ;;  %v14889_v18 = vld [vmem:[#allocation7 + $0x3d0] ss:$68 sps:$4 sm:$0xff]  }
 0x7ac   : > { %10083 = vmatmul.mubr.bf16.gmra.mrb[20].mxu0 %v17385_v56  ;;  %10628 = vmatprep.subr.bf16.mxu1 %v20168_v22 }
 0x7ad   : > { %10521 = vmatmul.mubr.bf16.gmra.mrb[220].mxu1 %v17385_v56  ;;  %12631 = vmatprep.mubr.msk.bf16.mxu0 %vm20171_vm14, %v17404_v63  ;;  %vm20186_vm14 = vmmov %vm20164_vm0 }
 0x7ae   : > { %10118 = vmatpush1.bf16.msra.mxu0 %v14828_v6  ;;  %12655 = vmatprep.mubr.msk.bf16.mxu1 %vm20172_vm15, %v17404_v63  ;;  %vm20187_vm15 = vmmov %vm20164_vm0 }
 0x7af   : > { %10629 = vmatpush1.bf16.msra.mxu1 %v14831_v41  ;;  %10119 = vmatprep.subr.bf16.mxu0 %v14834_v28  ;;  %v14894_v28 = vld [vmem:[#allocation7 + $0x45c] ss:$68 sps:$4 sm:$0xff]  }
 0x7b0   : > { %10630 = vmatprep.subr.bf16.mxu1 %v20168_v22 }
 0x7b2   : > { %10120 = vmatpush1.bf16.msra.mxu0 %v14832_v45 }
 0x7b3   : > { %10631 = vmatpush1.bf16.msra.mxu1 %v14835_v17  ;;  %10121 = vmatprep.subr.bf16.mxu0 %v14838_v5  ;;  %v14892_v5 = vld [vmem:[#allocation7 + $0x458] ss:$68 sps:$4 sm:$0xff]  }
 0x7b4   : > { %10093 = vmatmul.mubr.bf16.gmra.mrb[24].mxu0 %v17401_v39  ;;  %10632 = vmatprep.subr.bf16.mxu1 %v20168_v22 }
 0x7b5   : > { %10531 = vmatmul.mubr.bf16.gmra.mrb[224].mxu1 %v17401_v39  ;;  %12632 = vmatprep.mubr.msk.bf16.mxu0 %vm20173_vm3, %v17425_v60  ;;  %vm20188_vm3 = vmmov %vm20164_vm0 }
 0x7b6   : > { %10122 = vmatpush1.bf16.msra.mxu0 %v14836_v1  ;;  %12656 = vmatprep.mubr.msk.bf16.mxu1 %vm20174_vm2, %v17425_v60  ;;  %v14897_v1 = vld [vmem:[#allocation7 + $0x4e4] ss:$68 sps:$4 sm:$0xff]   ;;  %vm20189_vm2 = vmmov %vm20164_vm0 }
 0x7b7   : > { %10633 = vmatpush1.bf16.msra.mxu1 %v14839_v48  ;;  %10123 = vmatprep.subr.bf16.mxu0 %v14842_v16 }
 0x7b8   : > { %10634 = vmatprep.subr.bf16.mxu1 %v20168_v22 }
 0x7ba   : > { %10124 = vmatpush1.bf16.msra.mxu0 %v14840_v37  ;;  %v14895_v37 = vld [vmem:[#allocation7 + $0x4e0] ss:$68 sps:$4 sm:$0xff]  }
 0x7bb   : > { %10635 = vmatpush1.bf16.msra.mxu1 %v14843_v10  ;;  %10125 = vmatprep.subr.bf16.mxu0 %v14846_v23 }
 0x7bc   : > { %10103 = vmatmul.mubr.bf16.gmra.mrb[28].mxu0 %v17423_v20  ;;  %10636 = vmatprep.subr.bf16.mxu1 %v20168_v22 }
 0x7bd   : > { %10541 = vmatmul.mubr.bf16.gmra.mrb[228].mxu1 %v17423_v20  ;;  %12633 = vmatprep.mubr.msk.bf16.mxu0 %vm20175_vm4, %v17372_v27  ;;  %vm20190_vm4 = vmmov %vm20164_vm0 }
 0x7be   : > { %10126 = vmatpush1.bf16.msra.mxu0 %v14844_v33  ;;  %12661 = vmatprep.mubr.msk.bf16.mxu1 %vm20176_vm5, %v17372_v27  ;;  %v14900_v33 = vld [vmem:[#allocation7 + $0x56c] ss:$68 sps:$4 sm:$0xff]   ;;  %vm20191_vm5 = vmmov %vm20164_vm0 }
 0x7bf   : > { %10637 = vmatpush1.bf16.msra.mxu1 %v14847_v62  ;;  %10127 = vmatprep.subr.bf16.mxu0 %v14850_v40 }
 0x7c0   : > { %10638 = vmatprep.subr.bf16.mxu1 %v20168_v22 }
 0x7c2   : > { %10128 = vmatpush1.bf16.msra.mxu0 %v14848_v61  ;;  %v14898_v61 = vld [vmem:[#allocation7 + $0x568] ss:$68 sps:$4 sm:$0xff]  }
 0x7c3   : > { %10639 = vmatpush1.bf16.msra.mxu1 %v14851_v24  ;;  %10129 = vmatprep.subr.bf16.mxu0 %v14854_v8  ;;  %v14903_v24 = vld [vmem:[#allocation7 + $0x5f4] ss:$68 sps:$4 sm:$0xff]  }
 0x7c4   : > { %10640 = vmatprep.subr.bf16.mxu1 %v20168_v22 }
 0x7c6   : > { %10130 = vmatpush1.bf16.msra.mxu0 %v14852_v47 }
 0x7c7   : > { %10641 = vmatpush1.bf16.msra.mxu1 %v14855_v21  ;;  %10131 = vmatprep.subr.bf16.mxu0 %v14858_v11  ;;  %v14901_v21 = vld [vmem:[#allocation7 + $0x5f0] ss:$68 sps:$4 sm:$0xff]  }
 0x7c8   : > { %10642 = vmatprep.subr.bf16.mxu1 %v20168_v22 }
 0x7ca   : > { %10132 = vmatpush1.bf16.msra.mxu0 %v14856_v26 }
 0x7cb   : > { %10643 = vmatpush1.bf16.msra.mxu1 %v14859_v46  ;;  %10133 = vmatprep.subr.bf16.mxu0 %v14862_v53  ;;  %v14906_v46 = vld [vmem:[#allocation7 + $0x2c] ss:$68 sps:$4 sm:$0xff]  }
 0x7cc   : > { %10644 = vmatprep.subr.bf16.mxu1 %v20168_v22 }
 0x7ce   : > { %10134 = vmatpush1.bf16.msra.mxu0 %v14860_v29 }
 0x7cf   : > { %10645 = vmatpush1.bf16.msra.mxu1 %v14863_v43  ;;  %10135 = vmatprep.subr.bf16.mxu0 %v14866_v44  ;;  %v14904_v43 = vld [vmem:[#allocation7 + $0x28] ss:$68 sps:$4 sm:$0xff]   ;;  %v14909_v44 = vld [vmem:[#allocation7 + $0xb4] ss:$68 sps:$4 sm:$0xff]  }
 0x7d0   : > { %10646 = vmatprep.subr.bf16.mxu1 %v20168_v22 }
 0x7d2   : > { %10136 = vmatpush1.bf16.msra.mxu0 %v14864_v38  ;;  %v14907_v38 = vld [vmem:[#allocation7 + $0xb0] ss:$68 sps:$4 sm:$0xff]  }
 0x7d3   : > { %10647 = vmatpush1.bf16.msra.mxu1 %v14867_v13  ;;  %10259 = vmatprep.subr.bf16.mxu0 %v14870_v35  ;;  %v14912_v13 = vld [vmem:[#allocation7 + $0x13c] ss:$68 sps:$4 sm:$0xff]  }
 0x7d4   : > { %v14910_v35 = vld [vmem:[#allocation7 + $0x138] ss:$68 sps:$4 sm:$0xff]  }
 0x7d5   : > { %10146 = vmatmul.mubr.bf16.vlgmr.msra.gmra.mrb[32].mxu0 %v17367_v2 }
 0x7d6   : > { %10657 = vmatmul.mubr.bf16.vlgmr.msra.gmra.mrb[248].mxu1 %v17367_v2  ;;  %12634 = vmatprep.mubr.msk.bf16.mxu0 %vm20177_vm6, %v17388_v12  ;;  %vm20192_vm6 = vmmov %vm20164_vm0 }
 0x7d7   : > { %10260 = vmatpush1.bf16.msra.mxu0 %v14868_v25  ;;  %12662 = vmatprep.mubr.msk.bf16.mxu1 %vm20178_vm7, %v17388_v12  ;;  %v14915_v25 = vld [vmem:[#allocation7 + $0x1c4] ss:$68 sps:$4 sm:$0xff]   ;;  %vm20193_vm7 = vmmov %vm20164_vm0 }
 0x7d8   : > { %10261 = vmatprep.subr.bf16.mxu0 %v14873_v31  ;;  %v14913_v31 = vld [vmem:[#allocation7 + $0x1c0] ss:$68 sps:$4 sm:$0xff]  }
 0x7db   : > { %10262 = vmatpush1.bf16.msra.mxu0 %v14871_v19  ;;  %v10713_v19 = vsub.s32 4, %v16809_v9 }
 0x7dc   : > { %10263 = vmatprep.subr.bf16.mxu0 %v14876_v58  ;;  %v14918_v58 = vld [vmem:[#allocation7 + $0x24c] ss:$68 sps:$4 sm:$0xff]  }
 0x7dd   : > { %10156 = vmatmul.mubr.bf16.gmra.mrb[36].mxu0 %v17385_v56 }
 0x7de   : > { %10665 = vmatmul.mubr.bf16.gmra.mrb[252].mxu1 %v17385_v56  ;;  %12635 = vmatprep.mubr.msk.bf16.mxu0 %vm20179_vm9, %v17404_v63  ;;  %vm20195_vm9 = vcmask 261120  }
 0x7df   : > { %10264 = vmatpush1.bf16.msra.mxu0 %v14874_v4  ;;  %12663 = vmatprep.mubr.msk.bf16.mxu1 %vm20180_vm10, %v17404_v63  ;;  %v19422_v4 = vld [vmem:[%s20034_s9] sm:$0xff]  ;;  %vm20196_vm10 = vmmov %vm20195_vm9 }
 0x7e0   : > { %10265 = vmatprep.subr.bf16.mxu0 %v14879_v15  ;;  %v10717_v15 = vsub.s32 5, %v16809_v9 }
 0x7e3   : > { %10266 = vmatpush1.bf16.msra.mxu0 %v14877_v49  ;;  %v14916_v49 = vld [vmem:[#allocation7 + $0x248] ss:$68 sps:$4 sm:$0xff]  }
 0x7e4   : > { %10267 = vmatprep.subr.bf16.mxu0 %v14882_v7  ;;  %v19428_v7 = vrot.slane %v19422_v4, %v10713_v19 }
 0x7e5   : > { %10166 = vmatmul.mubr.bf16.gmra.mrb[40].mxu0 %v17401_v39 }
 0x7e6   : > { %10673 = vmatmul.mubr.bf16.gmra.mrb[0].mxu1 %v17401_v39  ;;  %12636 = vmatprep.mubr.msk.bf16.mxu0 %vm20164_vm0, %v17425_v60  ;;  %v13011_v52 = vpop.f32.mrb[232].mxu1  ;;  %vm20197_vm0 = vmmov %vm20195_vm9 }
 0x7e7   : > { %10268 = vmatpush1.bf16.msra.mxu0 %v14880_v32  ;;  %12664 = vmatprep.mubr.msk.bf16.mxu1 %vm20181_vm12, %v17425_v60  ;;  %v13012_v54 = vpop.f32.mrb[233].mxu1  ;;  %v19433_v32 = vrot.slane %v19422_v4, %v10717_v15  ;;  %vm20198_vm12 = vmmov %vm20197_vm0 }
 0x7e8   : > { %v19392_v55 = vadd.f32 %v13012_v54, %v13011_v52  ;;  %10269 = vmatprep.subr.bf16.mxu0 %v14885_v42  ;;  %v13014_v50 = vpop.f32.mrb[234].mxu1  ;;  %v14921_v42 = vld [vmem:[#allocation7 + $0x2d4] ss:$68 sps:$4 sm:$0xff]  }
 0x7e9   : > { %v13015_v30 = vpop.f32.mrb[235].mxu1 }
 0x7ea   : > { %v19394_v22 = vadd.f32 %v13015_v30, %v13014_v50  ;;  %v14919_v50 = vld [vmem:[#allocation7 + $0x2d0] ss:$68 sps:$4 sm:$0xff]  }
 0x7eb   : > { %10270 = vmatpush1.bf16.msra.mxu0 %v14883_v59 }
 0x7ec   : > { %10271 = vmatprep.subr.bf16.mxu0 %v14888_v57 }
 0x7ed   : > { %10176 = vmatmul.mubr.bf16.gmra.mrb[44].mxu0 %v17423_v20 }
 0x7ee   : > { %10681 = vmatmul.mubr.bf16.gmra.mrb[4].mxu1 %v17423_v20  ;;  %12641 = vmatprep.mubr.msk.bf16.mxu0 %vm20182_vm13, %v17372_v27  ;;  %v13017_v36 = vpop.f32.mrb[236].mxu1  ;;  %vm20199_vm13 = vmmov %vm20197_vm0 }
 0x7ef   : > { %10272 = vmatpush1.bf16.msra.mxu0 %v14886_v0  ;;  %v13018_v34 = vpop.f32.mrb[237].mxu1  ;;  %v14924_v0 = vld [vmem:[#allocation7 + $0x35c] ss:$68 sps:$4 sm:$0xff]  }
 0x7f0   : > { %v19400_v6 = vadd.f32 %v13018_v34, %v13017_v36  ;;  %10273 = vmatprep.subr.bf16.mxu0 %v14891_v3  ;;  %v13020_v41 = vpop.f32.mrb[238].mxu1  ;;  %v14977_v3 = vld [vmem:[%s15520_s24 + $0x20] sm:$0xff] }
 0x7f1   : > { %v13021_v45 = vpop.f32.mrb[239].mxu1 }
 0x7f2   : > { %v19402_v17 = vadd.f32 %v13021_v45, %v13020_v41  ;;  %v14978_v41 = vld [vmem:[%s15520_s24 + $0x28] sm:$0xff] }
 0x7f3   : > { %10274 = vmatpush1.bf16.msra.mxu0 %v14889_v18 }
 0x7f4   : > { %10275 = vmatprep.subr.bf16.mxu0 %v14894_v28 }
 0x7f6   : > { %v13023_v48 = vpop.f32.mrb[240].mxu1 }
 0x7f7   : > { %10276 = vmatpush1.bf16.msra.mxu0 %v14892_v5  ;;  %v13024_v16 = vpop.f32.mrb[241].mxu1 }
 0x7f8   : > { %v19404_v10 = vadd.f32 %v13024_v16, %v13023_v48  ;;  %10277 = vmatprep.subr.bf16.mxu0 %v14897_v1  ;;  %v13026_v23 = vpop.f32.mrb[242].mxu1  ;;  %v14979_v1 = vld [vmem:[%s15520_s24 + $0xa8] sm:$0xff]  ;;  %v14922_v16 = vld [vmem:[#allocation7 + $0x358] ss:$68 sps:$4 sm:$0xff]  }
 0x7f9   : > { %v13027_v62 = vpop.f32.mrb[243].mxu1 }
 0x7fa   : > { %v19406_v40 = vadd.f32 %v13027_v62, %v13026_v23  ;;  %v14980_v23 = vld [vmem:[%s15520_s24 + $0xb0] sm:$0xff]  ;;  %v14927_v62 = vld [vmem:[#allocation7 + $0x3e4] ss:$68 sps:$4 sm:$0xff]  }
 0x7fb   : > { %10278 = vmatpush1.bf16.msra.mxu0 %v14895_v37 }
 0x7fc   : > { %10279 = vmatprep.subr.bf16.mxu0 %v14900_v33 }
 0x7fe   : > { %v13029_v8 = vpop.f32.mrb[244].mxu1 }
 0x7ff   : > { %10280 = vmatpush1.bf16.msra.mxu0 %v14898_v61  ;;  %v13030_v47 = vpop.f32.mrb[245].mxu1 }
 0x800   : > { %v19408_v11 = vadd.f32 %v13030_v47, %v13029_v8  ;;  %10281 = vmatprep.subr.bf16.mxu0 %v14903_v24  ;;  %v13032_v26 = vpop.f32.mrb[246].mxu1 }
 0x801   : > { %v13033_v53 = vpop.f32.mrb[247].mxu1 }
 0x802   : > { %v19410_v29 = vadd.f32 %v13033_v53, %v13032_v26  ;;  %v14925_v26 = vld [vmem:[#allocation7 + $0x3e0] ss:$68 sps:$4 sm:$0xff]  }
 0x803   : > { %10282 = vmatpush1.bf16.msra.mxu0 %v14901_v21 }
 0x804   : > { %10405 = vmatprep.subr.bf16.mxu0 %v14906_v46 }
 0x806   : > { %10292 = vmatmul.mubr.bf16.vlgmr.msra.gmra.mrb[48].mxu0 %v17367_v2 }
 0x807   : > { %12642 = vmatprep.mubr.msk.bf16.mxu0 %vm20183_vm1, %v17388_v12  ;;  %10406 = vmatpush1.bf16.msra.mxu0 %v14904_v43  ;;  %v14930_v43 = vld [vmem:[#allocation7 + $0x46c] ss:$68 sps:$4 sm:$0xff]   ;;  %vm20200_vm1 = vmmov %vm20197_vm0 }
 0x808   : > { %10407 = vmatprep.subr.bf16.mxu0 %v14909_v44  ;;  %v14981_v44 = vld [vmem:[%s15520_s24 + $0x130] sm:$0xff] }
 0x80b   : > { %10408 = vmatpush1.bf16.msra.mxu0 %v14907_v38 }
 0x80c   : > { %10409 = vmatprep.subr.bf16.mxu0 %v14912_v13 }
 0x80e   : > { %10302 = vmatmul.mubr.bf16.gmra.mrb[52].mxu0 %v17385_v56 }
 0x80f   : > { %12643 = vmatprep.mubr.msk.bf16.mxu0 %vm20184_vm8, %v17404_v63  ;;  %10410 = vmatpush1.bf16.msra.mxu0 %v14910_v35  ;;  %vm20201_vm8 = vmmov %vm20197_vm0 }
 0x810   : > { %10411 = vmatprep.subr.bf16.mxu0 %v14915_v25  ;;  %v14982_v25 = vld [vmem:[%s15520_s24 + $0x138] sm:$0xff] }
 0x813   : > { %10412 = vmatpush1.bf16.msra.mxu0 %v14913_v31 }
 0x814   : > { %10413 = vmatprep.subr.bf16.mxu0 %v14918_v58 }
 0x816   : > { %10312 = vmatmul.mubr.bf16.gmra.mrb[56].mxu0 %v17401_v39  ;;  %v10220_v52 = vpop.f32.mrb[184].mxu1 }
 0x817   : > { %12644 = vmatprep.mubr.msk.bf16.mxu0 %vm20185_vm11, %v17425_v60  ;;  %10414 = vmatpush1.bf16.msra.mxu0 %v14916_v49  ;;  %v10784_v54 = vadd.f32 %v19428_v7, %v10220_v52  ;;  %v10222_v59 = vpop.f32.mrb[185].mxu1  ;;  %vm20202_vm11 = vmmov %vm20197_vm0 }
 0x818   : > { %v10785_v57 = vadd.f32 %v19433_v32, %v10222_v59  ;;  %10415 = vmatprep.subr.bf16.mxu0 %v14921_v42  ;;  %v10224_v30 = vpop.f32.mrb[186].mxu1  ;;  %v14983_v42 = vld [vmem:[%s15520_s24 + $0x1b8] sm:$0xff] }
 0x819   : > { %v10920_v36 = vadd.f32 %v14977_v3, %v10784_v54  ;;  %v10801_v34 = vadd.f32 %v19428_v7, %v10224_v30  ;;  %v10226_v18 = vpop.f32.mrb[187].mxu1  ;;  %v14928_v54 = vld [vmem:[#allocation7 + $0x468] ss:$68 sps:$4 sm:$0xff]   ;;  %v14933_v30 = vld [vmem:[#allocation7 + $0x4f4] ss:$68 sps:$4 sm:$0xff]  }
 0x81a   : > { %v10921_v28 = vadd.f32 %v14978_v41, %v10785_v57  ;;  %v10802_v45 = vadd.f32 %v19433_v32, %v10226_v18  ;;  %v14931_v41 = vld [vmem:[#allocation7 + $0x4f0] ss:$68 sps:$4 sm:$0xff]  }
 0x81b   : > { %v11056_v5 = vmax.f32 %v10920_v36, 0.0  ;;  %v10937_v48 = vadd.f32 %v14979_v1, %v10801_v34  ;;  %10416 = vmatpush1.bf16.msra.mxu0 %v14919_v50  ;;  %v14984_v50 = vld [vmem:[%s15520_s24 + $0x1c0] sm:$0xff] }
 0x81c   : > { %v11057_v37 = vmax.f32 %v10921_v28, 0.0  ;;  %v10938_v33 = vadd.f32 %v14980_v23, %v10802_v45  ;;  %10417 = vmatprep.subr.bf16.mxu0 %v14924_v0  ;;  %v14985_v1 = vld [vmem:[%s15520_s24 + $0x240] sm:$0xff]  ;;  %v14986_v23 = vld [vmem:[%s15520_s24 + $0x248] sm:$0xff] }
 0x81d   : > { %11192 = vst [vmem:[%s19448_s27 + $0x20] sm:$0xff] %v11056_v5  ;;  %v11073_v61 = vmax.f32 %v10937_v48, 0.0  ;;  %v14936_v5 = vld [vmem:[#allocation7 + $0x57c] ss:$68 sps:$4 sm:$0xff]  }
 0x81e   : > { %11193 = vst [vmem:[%s19448_s27 + $0x28] sm:$0xff] %v11057_v37  ;;  %v11074_v24 = vmax.f32 %v10938_v33, 0.0  ;;  %10322 = vmatmul.mubr.bf16.gmra.mrb[60].mxu0 %v17423_v20  ;;  %v10230_v8 = vpop.f32.mrb[188].mxu1 }
 0x81f   : > { %11209 = vst [vmem:[%s19448_s27 + $0xa8] sm:$0xff] %v11073_v61  ;;  %10418 = vmatpush1.bf16.msra.mxu0 %v14922_v16  ;;  %12649 = vmatprep.mubr.msk.bf16.mxu0 %vm20186_vm14, %v17372_v27  ;;  %v10818_v47 = vadd.f32 %v19428_v7, %v10230_v8  ;;  %v10232_v21 = vpop.f32.mrb[189].mxu1 }
 0x820   : > { %11210 = vst [vmem:[%s19448_s27 + $0xb0] sm:$0xff] %v11074_v24  ;;  %v10819_v46 = vadd.f32 %v19433_v32, %v10232_v21  ;;  %10419 = vmatprep.subr.bf16.mxu0 %v14927_v62  ;;  %v10234_v53 = vpop.f32.mrb[190].mxu1  ;;  %v14987_v24 = vld [vmem:[%s15520_s24 + $0x2c8] sm:$0xff] }
 0x821   : > { %v10954_v38 = vadd.f32 %v14981_v44, %v10818_v47  ;;  %v10835_v13 = vadd.f32 %v19428_v7, %v10234_v53  ;;  %v10236_v35 = vpop.f32.mrb[191].mxu1  ;;  %v14934_v47 = vld [vmem:[#allocation7 + $0x578] ss:$68 sps:$4 sm:$0xff]   ;;  %v14939_v53 = vld [vmem:[#allocation7 + $0x604] ss:$68 sps:$4 sm:$0xff]  }
 0x822   : > { %v10955_v31 = vadd.f32 %v14982_v25, %v10819_v46  ;;  %v10836_v58 = vadd.f32 %v19433_v32, %v10236_v35  ;;  %v14937_v25 = vld [vmem:[#allocation7 + $0x600] ss:$68 sps:$4 sm:$0xff]  }
 0x823   : > { %v11090_v49 = vmax.f32 %v10954_v38, 0.0  ;;  %v10971_v52 = vadd.f32 %v14983_v42, %v10835_v13  ;;  %10420 = vmatpush1.bf16.msra.mxu0 %v14925_v26  ;;  %v14988_v26 = vld [vmem:[%s15520_s24 + $0x2d0] sm:$0xff] }
 0x824   : > { %v11091_v59 = vmax.f32 %v10955_v31, 0.0  ;;  %v10972_v57 = vadd.f32 %v14984_v50, %v10836_v58  ;;  %10421 = vmatprep.subr.bf16.mxu0 %v14930_v43  ;;  %v14989_v42 = vld [vmem:[%s15520_s24 + $0x350] sm:$0xff]  ;;  %v14990_v50 = vld [vmem:[%s15520_s24 + $0x358] sm:$0xff] }
 0x825   : > { %11226 = vst [vmem:[%s19448_s27 + $0x130] sm:$0xff] %v11090_v49  ;;  %v11107_v0 = vmax.f32 %v10971_v52, 0.0  ;;  %v14942_v49 = vld [vmem:[#allocation7 + $0x3c] ss:$68 sps:$4 sm:$0xff]  }
 0x826   : > { %11227 = vst [vmem:[%s19448_s27 + $0x138] sm:$0xff] %v11091_v59  ;;  %v11108_v3 = vmax.f32 %v10972_v57, 0.0  ;;  %v10240_v36 = vpop.f32.mrb[192].mxu1 }
 0x827   : > { %11243 = vst [vmem:[%s19448_s27 + $0x1b8] sm:$0xff] %v11107_v0  ;;  %10422 = vmatpush1.bf16.msra.mxu0 %v14928_v54  ;;  %v10852_v34 = vadd.f32 %v19428_v7, %v10240_v36  ;;  %v10242_v18 = vpop.f32.mrb[193].mxu1 }
 0x828   : > { %11244 = vst [vmem:[%s19448_s27 + $0x1c0] sm:$0xff] %v11108_v3  ;;  %v10853_v28 = vadd.f32 %v19433_v32, %v10242_v18  ;;  %10423 = vmatprep.subr.bf16.mxu0 %v14933_v30  ;;  %v10244_v45 = vpop.f32.mrb[194].mxu1  ;;  %v14991_v3 = vld [vmem:[%s15520_s24 + $0x3d8] sm:$0xff] }
 0x829   : > { %v10988_v48 = vadd.f32 %v14985_v1, %v10852_v34  ;;  %v10869_v16 = vadd.f32 %v19428_v7, %v10244_v45  ;;  %v10246_v37 = vpop.f32.mrb[195].mxu1  ;;  %v14940_v34 = vld [vmem:[#allocation7 + $0x38] ss:$68 sps:$4 sm:$0xff]   ;;  %v14945_v45 = vld [vmem:[#allocation7 + $0xc4] ss:$68 sps:$4 sm:$0xff]  }
 0x82a   : > { %v10989_v33 = vadd.f32 %v14986_v23, %v10853_v28  ;;  %v10870_v62 = vadd.f32 %v19433_v32, %v10246_v37  ;;  %v14948_v1 = vld [vmem:[#allocation7 + $0x14c] ss:$68 sps:$4 sm:$0xff]   ;;  %v14954_v23 = vld [vmem:[#allocation7 + $0x25c] ss:$68 sps:$4 sm:$0xff]  }
 0x82b   : > { %v11124_v61 = vmax.f32 %v10988_v48, 0.0  ;;  %v11005_v8 = vadd.f32 %v14987_v24, %v10869_v16  ;;  %10424 = vmatpush1.bf16.msra.mxu0 %v14931_v41  ;;  %v14992_v41 = vld [vmem:[%s15520_s24 + $0x3e0] sm:$0xff]  ;;  %v14946_v48 = vld [vmem:[#allocation7 + $0x148] ss:$68 sps:$4 sm:$0xff]   ;;  %v14951_v16 = vld [vmem:[#allocation7 + $0x1d4] ss:$68 sps:$4 sm:$0xff]  }
 0x82c   : > { %v11125_v21 = vmax.f32 %v10989_v33, 0.0  ;;  %v11006_v46 = vadd.f32 %v14988_v26, %v10870_v62  ;;  %10425 = vmatprep.subr.bf16.mxu0 %v14936_v5  ;;  %v14949_v37 = vld [vmem:[#allocation7 + $0x1d0] ss:$68 sps:$4 sm:$0xff]   ;;  %v19502_v33 = vld [vmem:[%s20034_s9 + $0x8] sm:$0xff]  ;;  %v14952_v62 = vld [vmem:[#allocation7 + $0x258] ss:$68 sps:$4 sm:$0xff]  }
 0x82d   : > { %11260 = vst [vmem:[%s19448_s27 + $0x240] sm:$0xff] %v11124_v61  ;;  %v11141_v43 = vmax.f32 %v11005_v8, 0.0  ;;  %v19506_v61 = vrot.slane %v19502_v33, %v17338_v51  ;;  %v14957_v24 = vld [vmem:[#allocation7 + $0x2e4] ss:$68 sps:$4 sm:$0xff]   ;;  %v19510_v8 = vrot.slane %v19502_v33, %v17341_v14 }
 0x82e   : > { %11261 = vst [vmem:[%s19448_s27 + $0x248] sm:$0xff] %v11125_v21  ;;  %v11142_v44 = vmax.f32 %v11006_v46, 0.0  ;;  %v10250_v38 = vpop.f32.mrb[196].mxu1  ;;  %v14955_v21 = vld [vmem:[#allocation7 + $0x2e0] ss:$68 sps:$4 sm:$0xff]  }
 0x82f   : > { %11277 = vst [vmem:[%s19448_s27 + $0x2c8] sm:$0xff] %v11141_v43  ;;  %10426 = vmatpush1.bf16.msra.mxu0 %v14934_v47  ;;  %v10886_v13 = vadd.f32 %v19428_v7, %v10250_v38  ;;  %v10252_v35 = vpop.f32.mrb[197].mxu1  ;;  %v14993_v38 = vld [vmem:[%s15520_s24 + $0x40] sm:$0xff] }
 0x830   : > { %11278 = vst [vmem:[%s19448_s27 + $0x2d0] sm:$0xff] %v11142_v44  ;;  %v10887_v31 = vadd.f32 %v19433_v32, %v10252_v35  ;;  %10427 = vmatprep.subr.bf16.mxu0 %v14939_v53  ;;  %v10254_v58 = vpop.f32.mrb[198].mxu1  ;;  %v14960_v53 = vld [vmem:[#allocation7 + $0x36c] ss:$68 sps:$4 sm:$0xff]  }
 0x831   : > { %v11022_v52 = vadd.f32 %v14989_v42, %v10886_v13  ;;  %v10903_v54 = vadd.f32 %v19428_v7, %v10254_v58  ;;  %v10256_v59 = vpop.f32.mrb[199].mxu1  ;;  %v14958_v42 = vld [vmem:[#allocation7 + $0x368] ss:$68 sps:$4 sm:$0xff]  }
 0x832   : > { %v11023_v57 = vadd.f32 %v14990_v50, %v10887_v31  ;;  %v10904_v30 = vadd.f32 %v19433_v32, %v10256_v59  ;;  %v14943_v32 = vld [vmem:[#allocation7 + $0xc0] ss:$68 sps:$4 sm:$0xff]   ;;  %v14994_v31 = vld [vmem:[%s15520_s24 + $0x48] sm:$0xff]  ;;  %v14963_v50 = vld [vmem:[#allocation7 + $0x3f4] ss:$68 sps:$4 sm:$0xff]  }
 0x833   : > { %v11158_v0 = vmax.f32 %v11022_v52, 0.0  ;;  %v11039_v36 = vadd.f32 %v14991_v3, %v10903_v54  ;;  %10428 = vmatpush1.bf16.msra.mxu0 %v14937_v25  ;;  %v14995_v54 = vld [vmem:[%s15520_s24 + $0xc8] sm:$0xff] }
 0x834   : > { %v11159_v18 = vmax.f32 %v11023_v57, 0.0  ;;  %v11040_v28 = vadd.f32 %v14992_v41, %v10904_v30  ;;  %10551 = vmatprep.subr.bf16.mxu0 %v14942_v49  ;;  %v14996_v30 = vld [vmem:[%s15520_s24 + $0xd0] sm:$0xff] }
 0x835   : > { %11294 = vst [vmem:[%s19448_s27 + $0x350] sm:$0xff] %v11158_v0  ;;  %v11175_v7 = vmax.f32 %v11039_v36, 0.0 }
 0x836   : > { %11295 = vst [vmem:[%s19448_s27 + $0x358] sm:$0xff] %v11159_v18  ;;  %v11176_v5 = vmax.f32 %v11040_v28, 0.0  ;;  %10438 = vmatmul.mubr.bf16.vlgmr.msra.gmra.mrb[64].mxu0 %v17367_v2  ;;  %v14961_v18 = vld [vmem:[#allocation7 + $0x3f0] ss:$68 sps:$4 sm:$0xff]  }
 0x837   : > { %11311 = vst [vmem:[%s19448_s27 + $0x3d8] sm:$0xff] %v11175_v7  ;;  %12650 = vmatprep.mubr.msk.bf16.mxu0 %vm20187_vm15, %v17388_v12  ;;  %10552 = vmatpush1.bf16.msra.mxu0 %v14940_v34 }
 0x838   : > { %11312 = vst [vmem:[%s19448_s27 + $0x3e0] sm:$0xff] %v11176_v5  ;;  %10553 = vmatprep.subr.bf16.mxu0 %v14945_v45  ;;  %v14966_v45 = vld [vmem:[#allocation7 + $0x47c] ss:$68 sps:$4 sm:$0xff]  }
 0x83b   : > { %10554 = vmatpush1.bf16.msra.mxu0 %v14943_v32  ;;  %v14997_v32 = vld [vmem:[%s15520_s24 + $0x150] sm:$0xff] }
 0x83c   : > { %10555 = vmatprep.subr.bf16.mxu0 %v14948_v1 }
 0x83e   : > { %10448 = vmatmul.mubr.bf16.gmra.mrb[68].mxu0 %v17385_v56 }
 0x83f   : > { %12651 = vmatprep.mubr.msk.bf16.mxu0 %vm20188_vm3, %v17404_v63  ;;  %10556 = vmatpush1.bf16.msra.mxu0 %v14946_v48 }
 0x840   : > { %10557 = vmatprep.subr.bf16.mxu0 %v14951_v16  ;;  %v14998_v16 = vld [vmem:[%s15520_s24 + $0x158] sm:$0xff] }
 0x843   : > { %10558 = vmatpush1.bf16.msra.mxu0 %v14949_v37 }
 0x844   : > { %10559 = vmatprep.subr.bf16.mxu0 %v14954_v23 }
 0x846   : > { %10458 = vmatmul.mubr.bf16.gmra.mrb[72].mxu0 %v17401_v39 }
 0x847   : > { %12652 = vmatprep.mubr.msk.bf16.mxu0 %vm20189_vm2, %v17425_v60  ;;  %10560 = vmatpush1.bf16.msra.mxu0 %v14952_v62  ;;  %v10366_v47 = vpop.f32.mrb[200].mxu1  ;;  %v14964_v62 = vld [vmem:[#allocation7 + $0x478] ss:$68 sps:$4 sm:$0xff]  }
 0x848   : > { %v10788_v26 = vadd.f32 %v19506_v61, %v10366_v47  ;;  %v10368_v46 = vpop.f32.mrb[201].mxu1  ;;  %10561 = vmatprep.subr.bf16.mxu0 %v14957_v24  ;;  %v14999_v47 = vld [vmem:[%s15520_s24 + $0x1d8] sm:$0xff] }
 0x849   : > { %v10789_v43 = vadd.f32 %v19510_v8, %v10368_v46  ;;  %v10370_v44 = vpop.f32.mrb[202].mxu1 }
 0x84a   : > { %v10924_v13 = vadd.f32 %v14993_v38, %v10788_v26  ;;  %v10805_v35 = vadd.f32 %v19506_v61, %v10370_v44  ;;  %v10372_v25 = vpop.f32.mrb[203].mxu1  ;;  %v14969_v26 = vld [vmem:[#allocation7 + $0x504] ss:$68 sps:$4 sm:$0xff]  }
 0x84b   : > { %v10925_v58 = vadd.f32 %v14994_v31, %v10789_v43  ;;  %10562 = vmatpush1.bf16.msra.mxu0 %v14955_v21  ;;  %v10806_v49 = vadd.f32 %v19510_v8, %v10372_v25 }
 0x84c   : > { %v11060_v52 = vmax.f32 %v10924_v13, 0.0  ;;  %v10941_v59 = vadd.f32 %v14995_v54, %v10805_v35  ;;  %10563 = vmatprep.subr.bf16.mxu0 %v14960_v53  ;;  %v15000_v53 = vld [vmem:[%s15520_s24 + $0x1e0] sm:$0xff] }
 0x84d   : > { %v11061_v57 = vmax.f32 %v10925_v58, 0.0  ;;  %v10942_v0 = vadd.f32 %v14996_v30, %v10806_v49  ;;  %v14967_v35 = vld [vmem:[#allocation7 + $0x500] ss:$68 sps:$4 sm:$0xff]   ;;  %v14972_v58 = vld [vmem:[#allocation7 + $0x58c] ss:$68 sps:$4 sm:$0xff]  }
 0x84e   : > { %11196 = vst [vmem:[%s19448_s27 + $0x40] sm:$0xff] %v11060_v52  ;;  %v11077_v3 = vmax.f32 %v10941_v59, 0.0  ;;  %10468 = vmatmul.mubr.bf16.gmra.mrb[76].mxu0 %v17423_v20  ;;  %v15001_v52 = vld [vmem:[%s15520_s24 + $0x260] sm:$0xff] }
 0x84f   : > { %11197 = vst [vmem:[%s19448_s27 + $0x48] sm:$0xff] %v11061_v57  ;;  %v11078_v36 = vmax.f32 %v10942_v0, 0.0  ;;  %10564 = vmatpush1.bf16.msra.mxu0 %v14958_v42  ;;  %12657 = vmatprep.mubr.msk.bf16.mxu0 %vm20190_vm4, %v17372_v27  ;;  %v10376_v34 = vpop.f32.mrb[204].mxu1  ;;  %v15002_v57 = vld [vmem:[%s15520_s24 + $0x268] sm:$0xff] }
 0x850   : > { %11213 = vst [vmem:[%s19448_s27 + $0xc8] sm:$0xff] %v11077_v3  ;;  %v10822_v41 = vadd.f32 %v19506_v61, %v10376_v34  ;;  %v10378_v28 = vpop.f32.mrb[205].mxu1  ;;  %10565 = vmatprep.subr.bf16.mxu0 %v14963_v50  ;;  %v14970_v3 = vld [vmem:[#allocation7 + $0x588] ss:$68 sps:$4 sm:$0xff]  }
 0x851   : > { %11214 = vst [vmem:[%s19448_s27 + $0xd0] sm:$0xff] %v11078_v36  ;;  %v10823_v7 = vadd.f32 %v19510_v8, %v10378_v28  ;;  %v10380_v5 = vpop.f32.mrb[206].mxu1  ;;  %v15003_v34 = vld [vmem:[%s15520_s24 + $0x2e8] sm:$0xff] }
 0x852   : > { %v10958_v1 = vadd.f32 %v14997_v32, %v10822_v41  ;;  %v10839_v48 = vadd.f32 %v19506_v61, %v10380_v5  ;;  %v10382_v27 = vpop.f32.mrb[207].mxu1  ;;  %v14975_v41 = vld [vmem:[#allocation7 + $0x614] ss:$68 sps:$4 sm:$0xff]  }
 0x853   : > { %v10959_v37 = vadd.f32 %v14998_v16, %v10823_v7  ;;  %10566 = vmatpush1.bf16.msra.mxu0 %v14961_v18  ;;  %v10840_v23 = vadd.f32 %v19510_v8, %v10382_v27 }
 0x854   : > { %v11094_v24 = vmax.f32 %v10958_v1, 0.0  ;;  %v10975_v21 = vadd.f32 %v14999_v47, %v10839_v48  ;;  %10567 = vmatprep.subr.bf16.mxu0 %v14966_v45  ;;  %v15004_v45 = vld [vmem:[%s15520_s24 + $0x2f0] sm:$0xff] }
 0x855   : > { %v11095_v46 = vmax.f32 %v10959_v37, 0.0  ;;  %v10976_v43 = vadd.f32 %v15000_v53, %v10840_v23  ;;  %v14973_v48 = vld [vmem:[#allocation7 + $0x610] ss:$68 sps:$4 sm:$0xff]  }
 0x856   : > { %11230 = vst [vmem:[%s19448_s27 + $0x150] sm:$0xff] %v11094_v24  ;;  %v11111_v44 = vmax.f32 %v10975_v21, 0.0 }
 0x857   : > { %11231 = vst [vmem:[%s19448_s27 + $0x158] sm:$0xff] %v11095_v46  ;;  %v11112_v38 = vmax.f32 %v10976_v43, 0.0  ;;  %10568 = vmatpush1.bf16.msra.mxu0 %v14964_v62  ;;  %v10386_v13 = vpop.f32.mrb[208].mxu1  ;;  %v15005_v62 = vld [vmem:[%s15520_s24 + $0x370] sm:$0xff] }
 0x858   : > { %11247 = vst [vmem:[%s19448_s27 + $0x1d8] sm:$0xff] %v11111_v44  ;;  %v10856_v25 = vadd.f32 %v19506_v61, %v10386_v13  ;;  %v10388_v31 = vpop.f32.mrb[209].mxu1  ;;  %10569 = vmatprep.subr.bf16.mxu0 %v14969_v26  ;;  %v15006_v26 = vld [vmem:[%s15520_s24 + $0x378] sm:$0xff] }
 0x859   : > { %11248 = vst [vmem:[%s19448_s27 + $0x1e0] sm:$0xff] %v11112_v38  ;;  %v10857_v49 = vadd.f32 %v19510_v8, %v10388_v31  ;;  %v10390_v42 = vpop.f32.mrb[210].mxu1  ;;  %v15007_v44 = vld [vmem:[%s15520_s24 + $0x3f8] sm:$0xff] }
 0x85a   : > { %v10992_v54 = vadd.f32 %v15001_v52, %v10856_v25  ;;  %v10873_v59 = vadd.f32 %v19506_v61, %v10390_v42  ;;  %v10392_v50 = vpop.f32.mrb[211].mxu1  ;;  %v15009_v52 = vld [vmem:[%s15520_s24] sm:$0xff] }
 0x85b   : > { %v10993_v30 = vadd.f32 %v15002_v57, %v10857_v49  ;;  %10570 = vmatpush1.bf16.msra.mxu0 %v14967_v35  ;;  %v10874_v0 = vadd.f32 %v19510_v8, %v10392_v50  ;;  %v15008_v35 = vld [vmem:[%s15520_s24 + $0x400] sm:$0xff] }
 0x85c   : > { %v11128_v36 = vmax.f32 %v10992_v54, 0.0  ;;  %v11009_v18 = vadd.f32 %v15003_v34, %v10873_v59  ;;  %10571 = vmatprep.subr.bf16.mxu0 %v14972_v58  ;;  %v15010_v50 = vld [vmem:[%s15520_s24 + $0x60] sm:$0xff] }
 0x85d   : > { %v11129_v28 = vmax.f32 %v10993_v30, 0.0  ;;  %v11010_v7 = vadd.f32 %v15004_v45, %v10874_v0  ;;  %v15011_v30 = vld [vmem:[%s15520_s24 + $0x8] sm:$0xff] }
 0x85e   : > { %11264 = vst [vmem:[%s19448_s27 + $0x260] sm:$0xff] %v11128_v36  ;;  %v11145_v5 = vmax.f32 %v11009_v18, 0.0  ;;  %v15013_v45 = vld [vmem:[%s15520_s24 + $0x88] sm:$0xff] }
 0x85f   : > { %11265 = vst [vmem:[%s19448_s27 + $0x268] sm:$0xff] %v11129_v28  ;;  %v11146_v32 = vmax.f32 %v11010_v7, 0.0  ;;  %10572 = vmatpush1.bf16.msra.mxu0 %v14970_v3  ;;  %v10396_v1 = vpop.f32.mrb[212].mxu1 }
 0x860   : > { %11281 = vst [vmem:[%s19448_s27 + $0x2e8] sm:$0xff] %v11145_v5  ;;  %v10890_v27 = vadd.f32 %v19506_v61, %v10396_v1  ;;  %v10398_v16 = vpop.f32.mrb[213].mxu1  ;;  %10573 = vmatprep.subr.bf16.mxu0 %v14975_v41  ;;  %v15012_v41 = vld [vmem:[%s15520_s24 + $0x68] sm:$0xff] }
 0x861   : > { %11282 = vst [vmem:[%s19448_s27 + $0x2f0] sm:$0xff] %v11146_v32  ;;  %v10891_v37 = vadd.f32 %v19510_v8, %v10398_v16  ;;  %v10400_v23 = vpop.f32.mrb[214].mxu1  ;;  %v15015_v16 = vld [vmem:[%s15520_s24 + $0x90] sm:$0xff] }
 0x862   : > { %v11026_v24 = vadd.f32 %v15005_v62, %v10890_v27  ;;  %v10907_v47 = vadd.f32 %v19506_v61, %v10400_v23  ;;  %v10402_v21 = vpop.f32.mrb[215].mxu1 }
 0x863   : > { %v11027_v46 = vadd.f32 %v15006_v26, %v10891_v37  ;;  %10574 = vmatpush1.bf16.msra.mxu0 %v14973_v48  ;;  %v10908_v53 = vadd.f32 %v19510_v8, %v10402_v21  ;;  %v19574_v8 = vrot.slane %v19422_v4, %v17338_v51  ;;  %v15014_v48 = vld [vmem:[%s15520_s24 + $0xe8] sm:$0xff] }
 0x864   : > { %v11162_v43 = vmax.f32 %v11026_v24, 0.0  ;;  %v11043_v38 = vadd.f32 %v15007_v44, %v10907_v47  ;;  %v15016_v24 = vld [vmem:[%s15520_s24 + $0xf0] sm:$0xff] }
 0x865   : > { %v11163_v13 = vmax.f32 %v11027_v46, 0.0  ;;  %v11044_v25 = vadd.f32 %v15008_v35, %v10908_v53 }
 0x866   : > { %11298 = vst [vmem:[%s19448_s27 + $0x370] sm:$0xff] %v11162_v43  ;;  %v11179_v31 = vmax.f32 %v11043_v38, 0.0  ;;  %10584 = vmatmul.mubr.bf16.vlgmr.msra.gmra.mrb[80].mxu0 %v17367_v2  ;;  %v19579_v2 = vrot.slane %v19502_v33, %v10713_v19 }
 0x867   : > { %11299 = vst [vmem:[%s19448_s27 + $0x378] sm:$0xff] %v11163_v13  ;;  %v11180_v61 = vmax.f32 %v11044_v25, 0.0  ;;  %12658 = vmatprep.mubr.msk.bf16.mxu0 %vm20191_vm5, %v17388_v12  ;;  %v19583_v12 = vrot.slane %v19422_v4, %v17341_v14 }
 0x868   : > { %11315 = vst [vmem:[%s19448_s27 + $0x3f8] sm:$0xff] %v11179_v31  ;;  %v15017_v31 = vld [vmem:[%s15520_s24 + $0x110] sm:$0xff] }
 0x869   : > { %11316 = vst [vmem:[%s19448_s27 + $0x400] sm:$0xff] %v11180_v61 }
 0x86e   : > { %10594 = vmatmul.mubr.bf16.gmra.mrb[84].mxu0 %v17385_v56  ;;  %v19589_v56 = vrot.slane %v19502_v33, %v10717_v15 }
 0x86f   : > { %12659 = vmatprep.mubr.msk.bf16.mxu0 %vm20192_vm6, %v17404_v63 }
 0x876   : > { %10604 = vmatmul.mubr.bf16.gmra.mrb[88].mxu0 %v17401_v39 }
 0x877   : > { %12660 = vmatprep.mubr.msk.bf16.mxu0 %vm20193_vm7, %v17425_v60  ;;  %v10074_v51 = vpop.f32.mrb[16].mxu0 }
 0x878   : > { %v10780_v63 = vadd.f32 %v19574_v8, %v10074_v51  ;;  %v10512_v19 = vpop.f32.mrb[216].mxu1  ;;  %v10076_v58 = vpop.f32.mrb[17].mxu0 }
 0x879   : > { %v10792_v14 = vadd.f32 %v19579_v2, %v10512_v19  ;;  %v10781_v49 = vadd.f32 %v19583_v12, %v10076_v58  ;;  %v10514_v39 = vpop.f32.mrb[217].mxu1  ;;  %v10078_v42 = vpop.f32.mrb[18].mxu0 }
 0x87a   : > { %v10916_v15 = vadd.f32 %v15009_v52, %v10780_v63  ;;  %v10793_v33 = vadd.f32 %v19589_v56, %v10514_v39  ;;  %v10797_v60 = vadd.f32 %v19574_v8, %v10078_v42  ;;  %v10516_v54 = vpop.f32.mrb[218].mxu1  ;;  %v10080_v59 = vpop.f32.mrb[19].mxu0  ;;  %v15019_v39 = vld [vmem:[%s15520_s24 + $0x118] sm:$0xff] }
 0x87b   : > { %v10928_v57 = vadd.f32 %v15010_v50, %v10792_v14  ;;  %v10917_v0 = vadd.f32 %v15011_v30, %v10781_v49  ;;  %v10809_v3 = vadd.f32 %v19579_v2, %v10516_v54  ;;  %v10798_v36 = vadd.f32 %v19583_v12, %v10080_v59  ;;  %v10518_v34 = vpop.f32.mrb[219].mxu1  ;;  %v15018_v14 = vld [vmem:[%s15520_s24 + $0x170] sm:$0xff]  ;;  %v15020_v54 = vld [vmem:[%s15520_s24 + $0x178] sm:$0xff] }
 0x87c   : > { %v11052_v18 = vmax.f32 %v10916_v15, 0.0  ;;  %v10929_v28 = vadd.f32 %v15012_v41, %v10793_v33  ;;  %v10933_v7 = vadd.f32 %v15013_v45, %v10797_v60  ;;  %v10810_v5 = vadd.f32 %v19589_v56, %v10518_v34  ;;  %v15021_v50 = vld [vmem:[%s15520_s24 + $0x198] sm:$0xff] }
 0x87d   : > { %v11064_v32 = vmax.f32 %v10928_v57, 0.0  ;;  %v11053_v1 = vmax.f32 %v10917_v0, 0.0  ;;  %v10945_v27 = vadd.f32 %v15014_v48, %v10809_v3  ;;  %v10934_v37 = vadd.f32 %v15015_v16, %v10798_v36  ;;  %v15022_v36 = vld [vmem:[%s15520_s24 + $0x1f8] sm:$0xff] }
 0x87e   : > { %11188 = vst [vmem:[%s19448_s27] sm:$0xff] %v11052_v18  ;;  %v11065_v23 = vmax.f32 %v10929_v28, 0.0  ;;  %v11069_v62 = vmax.f32 %v10933_v7, 0.0  ;;  %v10946_v47 = vadd.f32 %v15016_v24, %v10810_v5  ;;  %10614 = vmatmul.mubr.bf16.gmra.mrb[92].mxu0 %v17423_v20  ;;  %v15023_v18 = vld [vmem:[%s15520_s24 + $0x1a0] sm:$0xff] }
 0x87f   : > { %11200 = vst [vmem:[%s19448_s27 + $0x60] sm:$0xff] %v11064_v32  ;;  %11189 = vst [vmem:[%s19448_s27 + $0x8] sm:$0xff] %v11053_v1  ;;  %v11081_v21 = vmax.f32 %v10945_v27, 0.0  ;;  %v11070_v26 = vmax.f32 %v10934_v37, 0.0  ;;  %v10084_v46 = vpop.f32.mrb[20].mxu0  ;;  %v15024_v7 = vld [vmem:[%s15520_s24 + $0x200] sm:$0xff] }
 0x880   : > { %11201 = vst [vmem:[%s19448_s27 + $0x68] sm:$0xff] %v11065_v23  ;;  %11205 = vst [vmem:[%s19448_s27 + $0x88] sm:$0xff] %v11069_v62  ;;  %v11082_v53 = vmax.f32 %v10946_v47, 0.0  ;;  %v10814_v43 = vadd.f32 %v19574_v8, %v10084_v46  ;;  %v10522_v44 = vpop.f32.mrb[220].mxu1  ;;  %v10086_v38 = vpop.f32.mrb[21].mxu0 }
 0x881   : > { %11217 = vst [vmem:[%s19448_s27 + $0xe8] sm:$0xff] %v11081_v21  ;;  %11206 = vst [vmem:[%s19448_s27 + $0x90] sm:$0xff] %v11070_v26  ;;  %v10826_v20 = vadd.f32 %v19579_v2, %v10522_v44  ;;  %v10815_v13 = vadd.f32 %v19583_v12, %v10086_v38  ;;  %v10524_v35 = vpop.f32.mrb[221].mxu1  ;;  %v10088_v25 = vpop.f32.mrb[22].mxu0  ;;  %v15025_v26 = vld [vmem:[%s15520_s24 + $0x220] sm:$0xff] }
 0x882   : > { %11218 = vst [vmem:[%s19448_s27 + $0xf0] sm:$0xff] %v11082_v53  ;;  %v10950_v61 = vadd.f32 %v15017_v31, %v10814_v43  ;;  %v10827_v51 = vadd.f32 %v19589_v56, %v10524_v35  ;;  %v10831_v63 = vadd.f32 %v19574_v8, %v10088_v25  ;;  %v10526_v19 = vpop.f32.mrb[222].mxu1  ;;  %v10090_v58 = vpop.f32.mrb[23].mxu0  ;;  %v15027_v35 = vld [vmem:[%s15520_s24 + $0x228] sm:$0xff] }
 0x883   : > { %v10962_v49 = vadd.f32 %v15018_v14, %v10826_v20  ;;  %v10951_v42 = vadd.f32 %v15019_v39, %v10815_v13  ;;  %v10843_v52 = vadd.f32 %v19579_v2, %v10526_v19  ;;  %v10832_v15 = vadd.f32 %v19583_v12, %v10090_v58  ;;  %v10528_v33 = vpop.f32.mrb[223].mxu1  ;;  %v15026_v20 = vld [vmem:[%s15520_s24 + $0x280] sm:$0xff]  ;;  %v15028_v19 = vld [vmem:[%s15520_s24 + $0x288] sm:$0xff] }
 0x884   : > { %v11086_v60 = vmax.f32 %v10950_v61, 0.0  ;;  %v10963_v59 = vadd.f32 %v15020_v54, %v10827_v51  ;;  %v10967_v57 = vadd.f32 %v15021_v50, %v10831_v63  ;;  %v10844_v30 = vadd.f32 %v19589_v56, %v10528_v33  ;;  %v15029_v14 = vld [vmem:[%s15520_s24 + $0x2a8] sm:$0xff] }
 0x885   : > { %v11098_v0 = vmax.f32 %v10962_v49, 0.0  ;;  %v11087_v3 = vmax.f32 %v10951_v42, 0.0  ;;  %v10979_v34 = vadd.f32 %v15022_v36, %v10843_v52  ;;  %v10968_v41 = vadd.f32 %v15023_v18, %v10832_v15  ;;  %v15030_v15 = vld [vmem:[%s15520_s24 + $0x308] sm:$0xff] }
 0x886   : > { %11222 = vst [vmem:[%s19448_s27 + $0x110] sm:$0xff] %v11086_v60  ;;  %v11099_v28 = vmax.f32 %v10963_v59, 0.0  ;;  %v11103_v45 = vmax.f32 %v10967_v57, 0.0  ;;  %v10980_v5 = vadd.f32 %v15024_v7, %v10844_v30  ;;  %v15031_v60 = vld [vmem:[%s15520_s24 + $0x2b0] sm:$0xff] }
 0x887   : > { %11234 = vst [vmem:[%s19448_s27 + $0x170] sm:$0xff] %v11098_v0  ;;  %11223 = vst [vmem:[%s19448_s27 + $0x118] sm:$0xff] %v11087_v3  ;;  %v11115_v32 = vmax.f32 %v10979_v34, 0.0  ;;  %v11104_v1 = vmax.f32 %v10968_v41, 0.0  ;;  %v10094_v48 = vpop.f32.mrb[24].mxu0  ;;  %v15032_v57 = vld [vmem:[%s15520_s24 + $0x310] sm:$0xff] }
 0x888   : > { %11235 = vst [vmem:[%s19448_s27 + $0x178] sm:$0xff] %v11099_v28  ;;  %11239 = vst [vmem:[%s19448_s27 + $0x198] sm:$0xff] %v11103_v45  ;;  %v11116_v27 = vmax.f32 %v10980_v5, 0.0  ;;  %v10848_v16 = vadd.f32 %v19574_v8, %v10094_v48  ;;  %v10532_v37 = vpop.f32.mrb[224].mxu1  ;;  %v10096_v23 = vpop.f32.mrb[25].mxu0 }
 0x889   : > { %11251 = vst [vmem:[%s19448_s27 + $0x1f8] sm:$0xff] %v11115_v32  ;;  %11240 = vst [vmem:[%s19448_s27 + $0x1a0] sm:$0xff] %v11104_v1  ;;  %v10860_v62 = vadd.f32 %v19579_v2, %v10532_v37  ;;  %v10849_v24 = vadd.f32 %v19583_v12, %v10096_v23  ;;  %v10534_v47 = vpop.f32.mrb[225].mxu1  ;;  %v10098_v21 = vpop.f32.mrb[26].mxu0  ;;  %v15033_v1 = vld [vmem:[%s15520_s24 + $0x330] sm:$0xff] }
 0x88a   : > { %11252 = vst [vmem:[%s19448_s27 + $0x200] sm:$0xff] %v11116_v27  ;;  %v10984_v46 = vadd.f32 %v15025_v26, %v10848_v16  ;;  %v10861_v53 = vadd.f32 %v19589_v56, %v10534_v47  ;;  %v10865_v43 = vadd.f32 %v19574_v8, %v10098_v21  ;;  %v10536_v44 = vpop.f32.mrb[226].mxu1  ;;  %v10100_v38 = vpop.f32.mrb[27].mxu0  ;;  %v15035_v47 = vld [vmem:[%s15520_s24 + $0x338] sm:$0xff] }
 0x88b   : > { %v10996_v13 = vadd.f32 %v15026_v20, %v10860_v62  ;;  %v10985_v25 = vadd.f32 %v15027_v35, %v10849_v24  ;;  %v10877_v31 = vadd.f32 %v19579_v2, %v10536_v44  ;;  %v10866_v61 = vadd.f32 %v19583_v12, %v10100_v38  ;;  %v10538_v51 = vpop.f32.mrb[227].mxu1  ;;  %v15034_v62 = vld [vmem:[%s15520_s24 + $0x390] sm:$0xff]  ;;  %v15036_v44 = vld [vmem:[%s15520_s24 + $0x398] sm:$0xff] }
 0x88c   : > { %v11120_v63 = vmax.f32 %v10984_v46, 0.0  ;;  %v10997_v58 = vadd.f32 %v15028_v19, %v10861_v53  ;;  %v11001_v49 = vadd.f32 %v15029_v14, %v10865_v43  ;;  %v10878_v39 = vadd.f32 %v19589_v56, %v10538_v51  ;;  %v15040_v19 = vld [vmem:[%s15520_s24 + $0x420] sm:$0xff] }
 0x88d   : > { %v11132_v42 = vmax.f32 %v10996_v13, 0.0  ;;  %v11121_v52 = vmax.f32 %v10985_v25, 0.0  ;;  %v11013_v33 = vadd.f32 %v15030_v15, %v10877_v31  ;;  %v11002_v54 = vadd.f32 %v15031_v60, %v10866_v61  ;;  %v15038_v31 = vld [vmem:[%s15520_s24 + $0x418] sm:$0xff] }
 0x88e   : > { %11256 = vst [vmem:[%s19448_s27 + $0x220] sm:$0xff] %v11120_v63  ;;  %v11133_v59 = vmax.f32 %v10997_v58, 0.0  ;;  %v11137_v50 = vmax.f32 %v11001_v49, 0.0  ;;  %v11014_v30 = vadd.f32 %v15032_v57, %v10878_v39  ;;  %v10709_v39 = vsub.s32 3, %v16809_v9 }
 0x88f   : > { %11268 = vst [vmem:[%s19448_s27 + $0x280] sm:$0xff] %v11132_v42  ;;  %11257 = vst [vmem:[%s19448_s27 + $0x228] sm:$0xff] %v11121_v52  ;;  %v11149_v0 = vmax.f32 %v11013_v33, 0.0  ;;  %v11138_v3 = vmax.f32 %v11002_v54, 0.0  ;;  %v10104_v36 = vpop.f32.mrb[28].mxu0  ;;  %v20194_v42 = vld [vmem:[#allocation27_spill] sm:$0xff] }
 0x890   : > { %11269 = vst [vmem:[%s19448_s27 + $0x288] sm:$0xff] %v11133_v59  ;;  %11273 = vst [vmem:[%s19448_s27 + $0x2a8] sm:$0xff] %v11137_v50  ;;  %v11150_v34 = vmax.f32 %v11014_v30, 0.0  ;;  %v10882_v18 = vadd.f32 %v19574_v8, %v10104_v36  ;;  %v10542_v41 = vpop.f32.mrb[228].mxu1  ;;  %v10106_v28 = vpop.f32.mrb[29].mxu0  ;;  %v19693_v52 = vrot.slane %v19422_v4, %v20194_v42  ;;  %v19698_v15 = vrot.slane %v19422_v4, %v10709_v39 }
 0x891   : > { %11285 = vst [vmem:[%s19448_s27 + $0x308] sm:$0xff] %v11149_v0  ;;  %11274 = vst [vmem:[%s19448_s27 + $0x2b0] sm:$0xff] %v11138_v3  ;;  %v10894_v45 = vadd.f32 %v19579_v2, %v10542_v41  ;;  %v10883_v7 = vadd.f32 %v19583_v12, %v10106_v28  ;;  %v10544_v5 = vpop.f32.mrb[229].mxu1  ;;  %v10108_v32 = vpop.f32.mrb[30].mxu0  ;;  %v19704_v59 = vld [vmem:[%s20034_s9 + $0x10] ss:$0 sm:$0xff] }
 0x892   : > { %11286 = vst [vmem:[%s19448_s27 + $0x310] sm:$0xff] %v11150_v34  ;;  %v11018_v48 = vadd.f32 %v15033_v1, %v10882_v18  ;;  %v10895_v27 = vadd.f32 %v19589_v56, %v10544_v5  ;;  %v10899_v16 = vadd.f32 %v19574_v8, %v10108_v32  ;;  %v10546_v37 = vpop.f32.mrb[230].mxu1  ;;  %v10110_v23 = vpop.f32.mrb[31].mxu0  ;;  %v15037_v8 = vld [vmem:[%s15520_s24 + $0x3b8] sm:$0xff]  ;;  %v15041_v3 = vld [vmem:[%s15520_s24 + $0x10] sm:$0xff] }
 0x893   : > { %v11030_v24 = vadd.f32 %v15034_v62, %v10894_v45  ;;  %v11019_v21 = vadd.f32 %v15035_v47, %v10883_v7  ;;  %v10911_v26 = vadd.f32 %v19579_v2, %v10546_v37  ;;  %v10900_v46 = vadd.f32 %v19583_v12, %v10110_v23  ;;  %v10548_v53 = vpop.f32.mrb[231].mxu1  ;;  %v15039_v12 = vld [vmem:[%s15520_s24 + $0x3c0] sm:$0xff]  ;;  %v15042_v45 = vld [vmem:[%s15520_s24 + $0x18] sm:$0xff] }
 0x894   : > { %v11154_v43 = vmax.f32 %v11018_v48, 0.0  ;;  %v11031_v38 = vadd.f32 %v15036_v44, %v10895_v27  ;;  %v11035_v20 = vadd.f32 %v15037_v8, %v10899_v16  ;;  %v10912_v13 = vadd.f32 %v19589_v56, %v10548_v53  ;;  %v15043_v48 = vld [vmem:[%s15520_s24 + $0x98] sm:$0xff]  ;;  %v15044_v16 = vld [vmem:[%s15520_s24 + $0x80] sm:$0xff] }
 0x895   : > { %v11166_v35 = vmax.f32 %v11030_v24, 0.0  ;;  %v11155_v25 = vmax.f32 %v11019_v21, 0.0  ;;  %v11047_v2 = vadd.f32 %v15038_v31, %v10911_v26  ;;  %v11036_v61 = vadd.f32 %v15039_v12, %v10900_v46  ;;  %v15045_v24 = vld [vmem:[%s15520_s24 + $0xa0] sm:$0xff]  ;;  %v15046_v26 = vld [vmem:[%s15520_s24 + $0x108] sm:$0xff] }
 0x896   : > { %11290 = vst [vmem:[%s19448_s27 + $0x330] sm:$0xff] %v11154_v43  ;;  %v11167_v51 = vmax.f32 %v11031_v38, 0.0  ;;  %v11171_v63 = vmax.f32 %v11035_v20, 0.0  ;;  %v11048_v58 = vadd.f32 %v15040_v19, %v10912_v13 }
 0x897   : > { %11302 = vst [vmem:[%s19448_s27 + $0x390] sm:$0xff] %v11166_v35  ;;  %11291 = vst [vmem:[%s19448_s27 + $0x338] sm:$0xff] %v11155_v25  ;;  %v11183_v14 = vmax.f32 %v11047_v2, 0.0  ;;  %v11172_v56 = vmax.f32 %v11036_v61, 0.0  ;;  %v15047_v2 = vld [vmem:[%s15520_s24 + $0x120] sm:$0xff] }
 0x898   : > { %11303 = vst [vmem:[%s19448_s27 + $0x398] sm:$0xff] %v11167_v51  ;;  %11307 = vst [vmem:[%s19448_s27 + $0x3b8] sm:$0xff] %v11171_v63  ;;  %v11184_v49 = vmax.f32 %v11048_v58, 0.0  ;;  %v15048_v58 = vld [vmem:[%s15520_s24 + $0x128] sm:$0xff] }
 0x899   : > { %11319 = vst [vmem:[%s19448_s27 + $0x418] sm:$0xff] %v11183_v14  ;;  %11308 = vst [vmem:[%s19448_s27 + $0x3c0] sm:$0xff] %v11172_v56 }
 0x89a   : > { %11320 = vst [vmem:[%s19448_s27 + $0x420] sm:$0xff] %v11184_v49 }
 0x8a8   : > { %v10147_v33 = vpop.f32.mrb[32].mxu0 }
 0x8a9   : > { %v10782_v60 = vadd.f32 %v19693_v52, %v10147_v33  ;;  %v10658_v54 = vpop.f32.mrb[248].mxu1  ;;  %v10149_v50 = vpop.f32.mrb[33].mxu0 }
 0x8aa   : > { %v10659_v57 = vadd.f32 %v19392_v55, %v10658_v54  ;;  %v10783_v30 = vadd.f32 %v19698_v15, %v10149_v50  ;;  %v10660_v0 = vpop.f32.mrb[249].mxu1  ;;  %v10151_v4 = vpop.f32.mrb[34].mxu0  ;;  %v15050_v50 = vld [vmem:[%s15520_s24 + $0x190] sm:$0xff] }
 0x8ab   : > { %v10918_v36 = vadd.f32 %v15041_v3, %v10782_v60  ;;  %v10799_v34 = vadd.f32 %v19693_v52, %v10151_v4  ;;  %v10661_v18 = vpop.f32.mrb[250].mxu1  ;;  %v10153_v41 = vpop.f32.mrb[35].mxu0  ;;  %v15049_v60 = vld [vmem:[%s15520_s24 + $0x1a8] sm:$0xff]  ;;  %v15051_v4 = vld [vmem:[%s15520_s24 + $0x1b0] sm:$0xff] }
 0x8ac   : > { %v10796_v28 = vadd.f32 %v19704_v59, %v10659_v57  ;;  %v10919_v7 = vadd.f32 %v15042_v45, %v10783_v30  ;;  %v10662_v55 = vadd.f32 %v19394_v22, %v10661_v18  ;;  %v10800_v5 = vadd.f32 %v19698_v15, %v10153_v41  ;;  %v10663_v32 = vpop.f32.mrb[251].mxu1 }
 0x8ad   : > { %v11054_v1 = vmax.f32 %v10918_v36, 0.0  ;;  %v10935_v27 = vadd.f32 %v15043_v48, %v10799_v34  ;;  %v15052_v34 = vld [vmem:[%s15520_s24 + $0x218] sm:$0xff] }
 0x8ae   : > { %v10932_v37 = vadd.f32 %v15044_v16, %v10796_v28  ;;  %v11055_v23 = vmax.f32 %v10919_v7, 0.0  ;;  %v10813_v62 = vadd.f32 %v19704_v59, %v10662_v55  ;;  %v10936_v47 = vadd.f32 %v15045_v24, %v10800_v5  ;;  %v15053_v16 = vld [vmem:[%s15520_s24 + $0x230] sm:$0xff] }
 0x8af   : > { %11190 = vst [vmem:[%s19448_s27 + $0x10] sm:$0xff] %v11054_v1  ;;  %v11071_v21 = vmax.f32 %v10935_v27, 0.0 }
 0x8b0   : > { %v11068_v22 = vmax.f32 %v10932_v37, 0.0  ;;  %11191 = vst [vmem:[%s19448_s27 + $0x18] sm:$0xff] %v11055_v23  ;;  %v10949_v46 = vadd.f32 %v15046_v26, %v10813_v62  ;;  %v11072_v53 = vmax.f32 %v10936_v47, 0.0  ;;  %v10157_v43 = vpop.f32.mrb[36].mxu0 }
 0x8b1   : > { %11207 = vst [vmem:[%s19448_s27 + $0x98] sm:$0xff] %v11071_v21  ;;  %v10816_v44 = vadd.f32 %v19693_v52, %v10157_v43  ;;  %v10666_v38 = vpop.f32.mrb[252].mxu1  ;;  %v10159_v8 = vpop.f32.mrb[37].mxu0  ;;  %v15054_v21 = vld [vmem:[%s15520_s24 + $0x238] sm:$0xff] }
 0x8b2   : > { %11204 = vst.msk [vmem:[%s19448_s27 + $0x80] sm:$0xff] %vm20195_vm9, %v11068_v22  ;;  %v11085_v20 = vmax.f32 %v10949_v46, 0.0  ;;  %11208 = vst [vmem:[%s19448_s27 + $0xa0] sm:$0xff] %v11072_v53  ;;  %v10667_v13 = vadd.f32 %v19400_v6, %v10666_v38  ;;  %v10817_v35 = vadd.f32 %v19698_v15, %v10159_v8  ;;  %v10668_v25 = vpop.f32.mrb[253].mxu1  ;;  %v10161_v31 = vpop.f32.mrb[38].mxu0  ;;  %v15055_v43 = vld [vmem:[%s15520_s24 + $0x2b8] sm:$0xff] }
 0x8b3   : > { %v10952_v12 = vadd.f32 %v15047_v2, %v10816_v44  ;;  %v10833_v61 = vadd.f32 %v19693_v52, %v10161_v31  ;;  %v10669_v51 = vpop.f32.mrb[254].mxu1  ;;  %v10163_v63 = vpop.f32.mrb[39].mxu0  ;;  %v15056_v38 = vld [vmem:[%s15520_s24 + $0x2a0] sm:$0xff]  ;;  %v15058_v2 = vld [vmem:[%s15520_s24 + $0x328] sm:$0xff] }
 0x8b4   : > { %11221 = vst.msk [vmem:[%s19448_s27 + $0x108] sm:$0xff] %vm20196_vm10, %v11085_v20  ;;  %v10830_v19 = vadd.f32 %v19704_v59, %v10667_v13  ;;  %v10953_v6 = vadd.f32 %v15048_v58, %v10817_v35  ;;  %v10670_v14 = vadd.f32 %v19402_v17, %v10669_v51  ;;  %v10834_v56 = vadd.f32 %v19698_v15, %v10163_v63  ;;  %v10671_v49 = vpop.f32.mrb[255].mxu1  ;;  %v15057_v35 = vld [vmem:[%s15520_s24 + $0x2c0] sm:$0xff] }
 0x8b5   : > { %v11088_v33 = vmax.f32 %v10952_v12, 0.0  ;;  %v10969_v54 = vadd.f32 %v15049_v60, %v10833_v61  ;;  %v15059_v60 = vld [vmem:[%s15520_s24 + $0x340] sm:$0xff] }
 0x8b6   : > { %v10966_v57 = vadd.f32 %v15050_v50, %v10830_v19  ;;  %v11089_v30 = vmax.f32 %v10953_v6, 0.0  ;;  %v10847_v0 = vadd.f32 %v19704_v59, %v10670_v14  ;;  %v10970_v3 = vadd.f32 %v15051_v4, %v10834_v56  ;;  %v15060_v4 = vld [vmem:[%s15520_s24 + $0x348] sm:$0xff] }
 0x8b7   : > { %11224 = vst [vmem:[%s19448_s27 + $0x120] sm:$0xff] %v11088_v33  ;;  %v11105_v36 = vmax.f32 %v10969_v54, 0.0 }
 0x8b8   : > { %v11102_v17 = vmax.f32 %v10966_v57, 0.0  ;;  %11225 = vst [vmem:[%s19448_s27 + $0x128] sm:$0xff] %v11089_v30  ;;  %v10983_v18 = vadd.f32 %v15052_v34, %v10847_v0  ;;  %v11106_v41 = vmax.f32 %v10970_v3, 0.0  ;;  %v10167_v28 = vpop.f32.mrb[40].mxu0 }
 0x8b9   : > { %11241 = vst [vmem:[%s19448_s27 + $0x1a8] sm:$0xff] %v11105_v36  ;;  %v10850_v45 = vadd.f32 %v19693_v52, %v10167_v28  ;;  %v10674_v7 = vpop.f32.mrb[0].mxu1  ;;  %v10169_v55 = vpop.f32.mrb[41].mxu0 }
 0x8ba   : > { %11238 = vst.msk [vmem:[%s19448_s27 + $0x190] sm:$0xff] %vm20197_vm0, %v11102_v17  ;;  %v11119_v5 = vmax.f32 %v10983_v18, 0.0  ;;  %11242 = vst [vmem:[%s19448_s27 + $0x1b0] sm:$0xff] %v11106_v41  ;;  %v10675_v32 = vadd.f32 %v19404_v10, %v10674_v7  ;;  %v10851_v1 = vadd.f32 %v19698_v15, %v10169_v55  ;;  %v10676_v48 = vpop.f32.mrb[1].mxu1  ;;  %v10171_v27 = vpop.f32.mrb[42].mxu0  ;;  %v15062_v41 = vld [vmem:[%s15520_s24 + $0x3b0] sm:$0xff] }
 0x8bb   : > { %v10986_v37 = vadd.f32 %v15053_v16, %v10850_v45  ;;  %v10867_v23 = vadd.f32 %v19693_v52, %v10171_v27  ;;  %v10677_v62 = vpop.f32.mrb[2].mxu1  ;;  %v10173_v24 = vpop.f32.mrb[43].mxu0  ;;  %v15063_v55 = vld [vmem:[%s15520_s24 + $0x3d0] sm:$0xff]  ;;  %v10725_v16 = vsub.s32 7, %v16809_v9 }
 0x8bc   : > { %11255 = vst.msk [vmem:[%s19448_s27 + $0x218] sm:$0xff] %vm20198_vm12, %v11119_v5  ;;  %v10864_v47 = vadd.f32 %v19704_v59, %v10675_v32  ;;  %v10987_v10 = vadd.f32 %v15054_v21, %v10851_v1  ;;  %v10678_v22 = vadd.f32 %v19406_v40, %v10677_v62  ;;  %v10868_v26 = vadd.f32 %v19698_v15, %v10173_v24  ;;  %v10679_v46 = vpop.f32.mrb[3].mxu1 }
 0x8bd   : > { %v11122_v53 = vmax.f32 %v10986_v37, 0.0  ;;  %v11003_v44 = vadd.f32 %v15055_v43, %v10867_v23  ;;  %v15065_v37 = vld [vmem:[%s20034_s9] sm:$0xff] }
 0x8be   : > { %v11000_v8 = vadd.f32 %v15056_v38, %v10864_v47  ;;  %v11123_v20 = vmax.f32 %v10987_v10, 0.0  ;;  %v10881_v13 = vadd.f32 %v19704_v59, %v10678_v22  ;;  %v11004_v25 = vadd.f32 %v15057_v35, %v10868_v26  ;;  %v15066_v26 = vld [vmem:[%s15520_s24 + $0x30] sm:$0xff] }
 0x8bf   : > { %11258 = vst [vmem:[%s19448_s27 + $0x230] sm:$0xff] %v11122_v53  ;;  %v11139_v31 = vmax.f32 %v11003_v44, 0.0  ;;  %v19804_v62 = vrot.slane %v15065_v37, %v10725_v16  ;;  %v15067_v44 = vld [vmem:[%s15520_s24 + $0x38] sm:$0xff] }
 0x8c0   : > { %v11136_v40 = vmax.f32 %v11000_v8, 0.0  ;;  %11259 = vst [vmem:[%s19448_s27 + $0x238] sm:$0xff] %v11123_v20  ;;  %v11017_v12 = vadd.f32 %v15058_v2, %v10881_v13  ;;  %v11140_v61 = vmax.f32 %v11004_v25, 0.0  ;;  %v10177_v51 = vpop.f32.mrb[44].mxu0  ;;  %v15068_v13 = vld [vmem:[%s15520_s24 + $0xb8] sm:$0xff] }
 0x8c1   : > { %11275 = vst [vmem:[%s19448_s27 + $0x2b8] sm:$0xff] %v11139_v31  ;;  %v10884_v63 = vadd.f32 %v19693_v52, %v10177_v51  ;;  %v10682_v19 = vpop.f32.mrb[4].mxu1  ;;  %v10179_v58 = vpop.f32.mrb[45].mxu0  ;;  %v15069_v31 = vld [vmem:[%s15520_s24 + $0xc0] sm:$0xff] }
 0x8c2   : > { %11272 = vst.msk [vmem:[%s19448_s27 + $0x2a0] sm:$0xff] %vm20199_vm13, %v11136_v40  ;;  %v11153_v6 = vmax.f32 %v11017_v12, 0.0  ;;  %11276 = vst [vmem:[%s19448_s27 + $0x2c0] sm:$0xff] %v11140_v61  ;;  %v10683_v14 = vadd.f32 %v19408_v11, %v10682_v19  ;;  %v10885_v56 = vadd.f32 %v19698_v15, %v10179_v58  ;;  %v10684_v49 = vpop.f32.mrb[5].mxu1  ;;  %v10181_v33 = vpop.f32.mrb[46].mxu0 }
 0x8c3   : > { %v11020_v54 = vadd.f32 %v15059_v60, %v10884_v63  ;;  %v10901_v50 = vadd.f32 %v19693_v52, %v10181_v33  ;;  %v10685_v57 = vpop.f32.mrb[6].mxu1  ;;  %v10183_v30 = vpop.f32.mrb[47].mxu0  ;;  %v15061_v52 = vld [vmem:[%s15520_s24 + $0x3c8] sm:$0xff] }
 0x8c4   : > { %11289 = vst.msk [vmem:[%s19448_s27 + $0x328] sm:$0xff] %vm20200_vm1, %v11153_v6  ;;  %v10898_v0 = vadd.f32 %v19704_v59, %v10683_v14  ;;  %v11021_v11 = vadd.f32 %v15060_v4, %v10885_v56  ;;  %v10686_v3 = vadd.f32 %v19410_v29, %v10685_v57  ;;  %v10902_v36 = vadd.f32 %v19698_v15, %v10183_v30  ;;  %v10687_v17 = vpop.f32.mrb[7].mxu1  ;;  %v15064_v15 = vld [vmem:[%s15520_s24 + $0x438] sm:$0xff]  ;;  %v15070_v6 = vld [vmem:[%s15520_s24 + $0x140] sm:$0xff]  ;;  %v15071_v33 = vld [vmem:[%s15520_s24 + $0x148] sm:$0xff] }
 0x8c5   : > { %v11156_v34 = vmax.f32 %v11020_v54, 0.0  ;;  %v11037_v18 = vadd.f32 %v15061_v52, %v10901_v50  ;;  %v15072_v57 = vld [vmem:[%s15520_s24 + $0x1c8] sm:$0xff]  ;;  %v15073_v4 = vld [vmem:[%s15520_s24 + $0x1d0] sm:$0xff] }
 0x8c6   : > { %v11034_v28 = vadd.f32 %v15062_v41, %v10898_v0  ;;  %v11157_v45 = vmax.f32 %v11021_v11, 0.0  ;;  %v10915_v7 = vadd.f32 %v19704_v59, %v10686_v3  ;;  %v11038_v5 = vadd.f32 %v15063_v55, %v10902_v36 }
 0x8c7   : > { %11292 = vst [vmem:[%s19448_s27 + $0x340] sm:$0xff] %v11156_v34  ;;  %v11173_v29 = vmax.f32 %v11037_v18, 0.0  ;;  %v10721_v59 = vsub.s32 6, %v16809_v9  ;;  %v15100_v9 = vld [vmem:[%s15520_s24 + $0x78] sm:$0xff] }
 0x8c8   : > { %v11170_v32 = vmax.f32 %v11034_v28, 0.0  ;;  %11293 = vst [vmem:[%s19448_s27 + $0x348] sm:$0xff] %v11157_v45  ;;  %v11051_v1 = vadd.f32 %v15064_v15, %v10915_v7  ;;  %v11174_v48 = vmax.f32 %v11038_v5, 0.0  ;;  %v15074_v28 = vld [vmem:[%s15520_s24 + $0x250] sm:$0xff]  ;;  %v15075_v5 = vld [vmem:[%s15520_s24 + $0x258] sm:$0xff] }
 0x8c9   : > { %11309 = vst [vmem:[%s19448_s27 + $0x3c8] sm:$0xff] %v11173_v29  ;;  %v19800_v23 = vrot.slane %v15065_v37, %v10721_v59  ;;  %v15077_v37 = vld [vmem:[%s15520_s24 + $0x2e0] sm:$0xff] }
 0x8ca   : > { %11306 = vst.msk [vmem:[%s19448_s27 + $0x3b0] sm:$0xff] %vm20201_vm8, %v11170_v32  ;;  %v11187_v27 = vmax.f32 %v11051_v1, 0.0  ;;  %11310 = vst [vmem:[%s19448_s27 + $0x3d0] sm:$0xff] %v11174_v48  ;;  %v15076_v1 = vld [vmem:[%s15520_s24 + $0x2d8] sm:$0xff] }
 0x8cc   : > { %11323 = vst.msk [vmem:[%s19448_s27 + $0x438] sm:$0xff] %vm20202_vm11, %v11187_v27 }
 0x8d9   : > { %v10293_v24 = vpop.f32.mrb[48].mxu0 }
 0x8da   : > { %v10786_v47 = vadd.f32 %v19800_v23, %v10293_v24  ;;  %v10295_v21 = vpop.f32.mrb[49].mxu0 }
 0x8db   : > { %v10787_v10 = vadd.f32 %v19804_v62, %v10295_v21  ;;  %v10297_v22 = vpop.f32.mrb[50].mxu0 }
 0x8dc   : > { %v10922_v46 = vadd.f32 %v15066_v26, %v10786_v47  ;;  %v10803_v53 = vadd.f32 %v19800_v23, %v10297_v22  ;;  %v10299_v43 = vpop.f32.mrb[51].mxu0 }
 0x8dd   : > { %v10923_v38 = vadd.f32 %v15067_v44, %v10787_v10  ;;  %v10804_v8 = vadd.f32 %v19804_v62, %v10299_v43  ;;  %v15078_v43 = vld [vmem:[%s15520_s24 + $0x360] sm:$0xff] }
 0x8de   : > { %v11058_v20 = vmax.f32 %v10922_v46, 0.0  ;;  %v10939_v35 = vadd.f32 %v15068_v13, %v10803_v53 }
 0x8df   : > { %v11059_v25 = vmax.f32 %v10923_v38, 0.0  ;;  %v10940_v40 = vadd.f32 %v15069_v31, %v10804_v8  ;;  %v15080_v31 = vld [vmem:[%s15520_s24 + $0x3e8] sm:$0xff] }
 0x8e0   : > { %11194 = vst [vmem:[%s19448_s27 + $0x30] sm:$0xff] %v11058_v20  ;;  %v11075_v2 = vmax.f32 %v10939_v35, 0.0  ;;  %v15079_v20 = vld [vmem:[%s15520_s24 + $0x368] sm:$0xff] }
 0x8e1   : > { %11195 = vst [vmem:[%s19448_s27 + $0x38] sm:$0xff] %v11059_v25  ;;  %v11076_v12 = vmax.f32 %v10940_v40, 0.0  ;;  %v10303_v61 = vpop.f32.mrb[52].mxu0 }
 0x8e2   : > { %11211 = vst [vmem:[%s19448_s27 + $0xb8] sm:$0xff] %v11075_v2  ;;  %v10820_v51 = vadd.f32 %v19800_v23, %v10303_v61  ;;  %v10305_v63 = vpop.f32.mrb[53].mxu0 }
 0x8e3   : > { %11212 = vst [vmem:[%s19448_s27 + $0xc0] sm:$0xff] %v11076_v12  ;;  %v10821_v19 = vadd.f32 %v19804_v62, %v10305_v63  ;;  %v10307_v58 = vpop.f32.mrb[54].mxu0  ;;  %v15081_v12 = vld [vmem:[%s15520_s24 + $0x3f0] sm:$0xff] }
 0x8e4   : > { %v10956_v14 = vadd.f32 %v15070_v6, %v10820_v51  ;;  %v10837_v56 = vadd.f32 %v19800_v23, %v10307_v58  ;;  %v10309_v49 = vpop.f32.mrb[55].mxu0 }
 0x8e5   : > { %v10957_v60 = vadd.f32 %v15071_v33, %v10821_v19  ;;  %v10838_v54 = vadd.f32 %v19804_v62, %v10309_v49  ;;  %v15083_v33 = vld [vmem:[%s15520_s24 + $0x50] sm:$0xff] }
 0x8e6   : > { %v11092_v50 = vmax.f32 %v10956_v14, 0.0  ;;  %v10973_v30 = vadd.f32 %v15072_v57, %v10837_v56 }
 0x8e7   : > { %v11093_v0 = vmax.f32 %v10957_v60, 0.0  ;;  %v10974_v11 = vadd.f32 %v15073_v4, %v10838_v54 }
 0x8e8   : > { %11228 = vst [vmem:[%s19448_s27 + $0x140] sm:$0xff] %v11092_v50  ;;  %v11109_v3 = vmax.f32 %v10973_v30, 0.0  ;;  %v15084_v50 = vld [vmem:[%s15520_s24 + $0x58] sm:$0xff] }
 0x8e9   : > { %11229 = vst [vmem:[%s19448_s27 + $0x148] sm:$0xff] %v11093_v0  ;;  %v11110_v36 = vmax.f32 %v10974_v11, 0.0  ;;  %v10313_v17 = vpop.f32.mrb[56].mxu0  ;;  %v15085_v0 = vld [vmem:[%s15520_s24 + $0xd8] sm:$0xff] }
 0x8ea   : > { %11245 = vst [vmem:[%s19448_s27 + $0x1c8] sm:$0xff] %v11109_v3  ;;  %v10854_v34 = vadd.f32 %v19800_v23, %v10313_v17  ;;  %v10315_v52 = vpop.f32.mrb[57].mxu0  ;;  %v15086_v3 = vld [vmem:[%s15520_s24 + $0xe0] sm:$0xff] }
 0x8eb   : > { %11246 = vst [vmem:[%s19448_s27 + $0x1d0] sm:$0xff] %v11110_v36  ;;  %v10855_v18 = vadd.f32 %v19804_v62, %v10315_v52  ;;  %v10317_v41 = vpop.f32.mrb[58].mxu0 }
 0x8ec   : > { %v10990_v45 = vadd.f32 %v15074_v28, %v10854_v34  ;;  %v10871_v7 = vadd.f32 %v19800_v23, %v10317_v41  ;;  %v10319_v55 = vpop.f32.mrb[59].mxu0 }
 0x8ed   : > { %v10991_v29 = vadd.f32 %v15075_v5, %v10855_v18  ;;  %v10872_v32 = vadd.f32 %v19804_v62, %v10319_v55 }
 0x8ee   : > { %v11126_v15 = vmax.f32 %v10990_v45, 0.0  ;;  %v11007_v48 = vadd.f32 %v15076_v1, %v10871_v7  ;;  %v15087_v7 = vld [vmem:[%s15520_s24 + $0x160] sm:$0xff] }
 0x8ef   : > { %v11127_v27 = vmax.f32 %v10991_v29, 0.0  ;;  %v11008_v24 = vadd.f32 %v15077_v37, %v10872_v32  ;;  %v15088_v32 = vld [vmem:[%s15520_s24 + $0x168] sm:$0xff] }
 0x8f0   : > { %11262 = vst [vmem:[%s19448_s27 + $0x250] sm:$0xff] %v11126_v15  ;;  %v11143_v47 = vmax.f32 %v11007_v48, 0.0 }
 0x8f1   : > { %11263 = vst [vmem:[%s19448_s27 + $0x258] sm:$0xff] %v11127_v27  ;;  %v11144_v21 = vmax.f32 %v11008_v24, 0.0  ;;  %v10323_v10 = vpop.f32.mrb[60].mxu0  ;;  %v15089_v27 = vld [vmem:[%s15520_s24 + $0x1e8] sm:$0xff] }
 0x8f2   : > { %11279 = vst [vmem:[%s19448_s27 + $0x2d8] sm:$0xff] %v11143_v47  ;;  %v10888_v22 = vadd.f32 %v19800_v23, %v10323_v10  ;;  %v10325_v26 = vpop.f32.mrb[61].mxu0  ;;  %v15090_v47 = vld [vmem:[%s15520_s24 + $0x1f0] sm:$0xff] }
 0x8f3   : > { %11280 = vst [vmem:[%s19448_s27 + $0x2e0] sm:$0xff] %v11144_v21  ;;  %v10889_v46 = vadd.f32 %v19804_v62, %v10325_v26  ;;  %v10327_v53 = vpop.f32.mrb[62].mxu0 }
 0x8f4   : > { %v11024_v44 = vadd.f32 %v15078_v43, %v10888_v22  ;;  %v10905_v38 = vadd.f32 %v19800_v23, %v10327_v53  ;;  %v10329_v8 = vpop.f32.mrb[63].mxu0  ;;  %v19857_v23 = vld [vmem:[%s20034_s9 + $0x8] sm:$0xff] }
 0x8f5   : > { %v11025_v13 = vadd.f32 %v15079_v20, %v10889_v46  ;;  %v10906_v35 = vadd.f32 %v19804_v62, %v10329_v8  ;;  %v19861_v62 = vrot.slane %v19857_v23, %v20194_v42  ;;  %v19866_v19 = vrot.slane %v19857_v23, %v10709_v39 }
 0x8f6   : > { %v11160_v25 = vmax.f32 %v11024_v44, 0.0  ;;  %v11041_v40 = vadd.f32 %v15080_v31, %v10905_v38  ;;  %v15091_v38 = vld [vmem:[%s15520_s24 + $0x270] sm:$0xff] }
 0x8f7   : > { %v11161_v2 = vmax.f32 %v11025_v13, 0.0  ;;  %v11042_v61 = vadd.f32 %v15081_v12, %v10906_v35  ;;  %v15092_v35 = vld [vmem:[%s15520_s24 + $0x278] sm:$0xff] }
 0x8f8   : > { %11296 = vst [vmem:[%s19448_s27 + $0x360] sm:$0xff] %v11160_v25  ;;  %v11177_v51 = vmax.f32 %v11041_v40, 0.0 }
 0x8f9   : > { %11297 = vst [vmem:[%s19448_s27 + $0x368] sm:$0xff] %v11161_v2  ;;  %v11178_v63 = vmax.f32 %v11042_v61, 0.0  ;;  %v15093_v2 = vld [vmem:[%s15520_s24 + $0x2f8] sm:$0xff] }
 0x8fa   : > { %11313 = vst [vmem:[%s19448_s27 + $0x3e8] sm:$0xff] %v11177_v51  ;;  %v15094_v51 = vld [vmem:[%s15520_s24 + $0x300] sm:$0xff] }
 0x8fb   : > { %11314 = vst [vmem:[%s19448_s27 + $0x3f0] sm:$0xff] %v11178_v63 }
 0x909   : > { %v10439_v58 = vpop.f32.mrb[64].mxu0 }
 0x90a   : > { %v10790_v6 = vadd.f32 %v19861_v62, %v10439_v58  ;;  %v10441_v14 = vpop.f32.mrb[65].mxu0 }
 0x90b   : > { %v10791_v56 = vadd.f32 %v19866_v19, %v10441_v14  ;;  %v10443_v49 = vpop.f32.mrb[66].mxu0 }
 0x90c   : > { %v10926_v60 = vadd.f32 %v15083_v33, %v10790_v6  ;;  %v10807_v42 = vadd.f32 %v19861_v62, %v10443_v49  ;;  %v10445_v54 = vpop.f32.mrb[67].mxu0 }
 0x90d   : > { %v10927_v57 = vadd.f32 %v15084_v50, %v10791_v56  ;;  %v10808_v39 = vadd.f32 %v19866_v19, %v10445_v54 }
 0x90e   : > { %v11062_v30 = vmax.f32 %v10926_v60, 0.0  ;;  %v10943_v4 = vadd.f32 %v15085_v0, %v10807_v42  ;;  %v15095_v42 = vld [vmem:[%s15520_s24 + $0x380] sm:$0xff] }
 0x90f   : > { %v11063_v11 = vmax.f32 %v10927_v57, 0.0  ;;  %v10944_v36 = vadd.f32 %v15086_v3, %v10808_v39  ;;  %v15096_v39 = vld [vmem:[%s15520_s24 + $0x388] sm:$0xff] }
 0x910   : > { %11198 = vst [vmem:[%s19448_s27 + $0x50] sm:$0xff] %v11062_v30  ;;  %v11079_v17 = vmax.f32 %v10943_v4, 0.0 }
 0x911   : > { %11199 = vst [vmem:[%s19448_s27 + $0x58] sm:$0xff] %v11063_v11  ;;  %v11080_v34 = vmax.f32 %v10944_v36, 0.0  ;;  %v10449_v52 = vpop.f32.mrb[68].mxu0  ;;  %v15097_v11 = vld [vmem:[%s15520_s24 + $0x408] sm:$0xff] }
 0x912   : > { %11215 = vst [vmem:[%s19448_s27 + $0xd8] sm:$0xff] %v11079_v17  ;;  %v10824_v18 = vadd.f32 %v19861_v62, %v10449_v52  ;;  %v10451_v41 = vpop.f32.mrb[69].mxu0  ;;  %v15098_v17 = vld [vmem:[%s15520_s24 + $0x410] sm:$0xff] }
 0x913   : > { %11216 = vst [vmem:[%s19448_s27 + $0xe0] sm:$0xff] %v11080_v34  ;;  %v10825_v28 = vadd.f32 %v19866_v19, %v10451_v41  ;;  %v10453_v45 = vpop.f32.mrb[70].mxu0 }
 0x914   : > { %v10960_v55 = vadd.f32 %v15087_v7, %v10824_v18  ;;  %v10841_v5 = vadd.f32 %v19861_v62, %v10453_v45  ;;  %v10455_v29 = vpop.f32.mrb[71].mxu0 }
 0x915   : > { %v10961_v15 = vadd.f32 %v15088_v32, %v10825_v28  ;;  %v10842_v1 = vadd.f32 %v19866_v19, %v10455_v29 }
 0x916   : > { %v11096_v48 = vmax.f32 %v10960_v55, 0.0  ;;  %v10977_v37 = vadd.f32 %v15089_v27, %v10841_v5  ;;  %v15099_v5 = vld [vmem:[%s15520_s24 + $0x70] sm:$0xff] }
 0x917   : > { %v11097_v24 = vmax.f32 %v10961_v15, 0.0  ;;  %v10978_v21 = vadd.f32 %v15090_v47, %v10842_v1  ;;  %v15101_v1 = vld [vmem:[%s15520_s24 + $0xf8] sm:$0xff] }
 0x918   : > { %11232 = vst [vmem:[%s19448_s27 + $0x160] sm:$0xff] %v11096_v48  ;;  %v11113_v10 = vmax.f32 %v10977_v37, 0.0  ;;  %v15102_v37 = vld [vmem:[%s15520_s24 + $0x100] sm:$0xff] }
 0x919   : > { %11233 = vst [vmem:[%s19448_s27 + $0x168] sm:$0xff] %v11097_v24  ;;  %v11114_v22 = vmax.f32 %v10978_v21, 0.0  ;;  %v10459_v26 = vpop.f32.mrb[72].mxu0 }
 0x91a   : > { %11249 = vst [vmem:[%s19448_s27 + $0x1e8] sm:$0xff] %v11113_v10  ;;  %v10858_v46 = vadd.f32 %v19861_v62, %v10459_v26  ;;  %v10461_v53 = vpop.f32.mrb[73].mxu0 }
 0x91b   : > { %11250 = vst [vmem:[%s19448_s27 + $0x1f0] sm:$0xff] %v11114_v22  ;;  %v10859_v43 = vadd.f32 %v19866_v19, %v10461_v53  ;;  %v10463_v44 = vpop.f32.mrb[74].mxu0 }
 0x91c   : > { %v10994_v8 = vadd.f32 %v15091_v38, %v10858_v46  ;;  %v10875_v20 = vadd.f32 %v19861_v62, %v10463_v44  ;;  %v10465_v13 = vpop.f32.mrb[75].mxu0 }
 0x91d   : > { %v10995_v25 = vadd.f32 %v15092_v35, %v10859_v43  ;;  %v10876_v31 = vadd.f32 %v19866_v19, %v10465_v13  ;;  %v15103_v43 = vld [vmem:[%s15520_s24 + $0x180] sm:$0xff] }
 0x91e   : > { %v11130_v40 = vmax.f32 %v10994_v8, 0.0  ;;  %v11011_v12 = vadd.f32 %v15093_v2, %v10875_v20  ;;  %v15104_v20 = vld [vmem:[%s15520_s24 + $0x188] sm:$0xff] }
 0x91f   : > { %v11131_v61 = vmax.f32 %v10995_v25, 0.0  ;;  %v11012_v63 = vadd.f32 %v15094_v51, %v10876_v31  ;;  %v15105_v31 = vld [vmem:[%s15520_s24 + $0x208] sm:$0xff] }
 0x920   : > { %11266 = vst [vmem:[%s19448_s27 + $0x270] sm:$0xff] %v11130_v40  ;;  %v11147_v58 = vmax.f32 %v11011_v12, 0.0  ;;  %v15106_v12 = vld [vmem:[%s15520_s24 + $0x210] sm:$0xff] }
 0x921   : > { %11267 = vst [vmem:[%s19448_s27 + $0x278] sm:$0xff] %v11131_v61  ;;  %v11148_v6 = vmax.f32 %v11012_v63, 0.0  ;;  %v10469_v14 = vpop.f32.mrb[76].mxu0 }
 0x922   : > { %11283 = vst [vmem:[%s19448_s27 + $0x2f8] sm:$0xff] %v11147_v58  ;;  %v10892_v56 = vadd.f32 %v19861_v62, %v10469_v14  ;;  %v10471_v49 = vpop.f32.mrb[77].mxu0 }
 0x923   : > { %11284 = vst [vmem:[%s19448_s27 + $0x300] sm:$0xff] %v11148_v6  ;;  %v10893_v33 = vadd.f32 %v19866_v19, %v10471_v49  ;;  %v10473_v60 = vpop.f32.mrb[78].mxu0 }
 0x924   : > { %v11028_v54 = vadd.f32 %v15095_v42, %v10892_v56  ;;  %v10909_v50 = vadd.f32 %v19861_v62, %v10473_v60  ;;  %v10475_v57 = vpop.f32.mrb[79].mxu0  ;;  %v19919_v62 = vrot.slane %v19857_v23, %v10721_v59 }
 0x925   : > { %v11029_v30 = vadd.f32 %v15096_v39, %v10893_v33  ;;  %v10910_v0 = vadd.f32 %v19866_v19, %v10475_v57  ;;  %v19924_v19 = vrot.slane %v19857_v23, %v10725_v16  ;;  %v15107_v33 = vld [vmem:[%s15520_s24 + $0x290] sm:$0xff] }
 0x926   : > { %v11164_v4 = vmax.f32 %v11028_v54, 0.0  ;;  %v11045_v3 = vadd.f32 %v15097_v11, %v10909_v50  ;;  %v15108_v50 = vld [vmem:[%s15520_s24 + $0x298] sm:$0xff] }
 0x927   : > { %v11165_v36 = vmax.f32 %v11029_v30, 0.0  ;;  %v11046_v34 = vadd.f32 %v15098_v17, %v10910_v0  ;;  %v15109_v0 = vld [vmem:[%s15520_s24 + $0x318] sm:$0xff] }
 0x928   : > { %11300 = vst [vmem:[%s19448_s27 + $0x380] sm:$0xff] %v11164_v4  ;;  %v11181_v52 = vmax.f32 %v11045_v3, 0.0  ;;  %v15110_v3 = vld [vmem:[%s15520_s24 + $0x320] sm:$0xff] }
 0x929   : > { %11301 = vst [vmem:[%s19448_s27 + $0x388] sm:$0xff] %v11165_v36  ;;  %v11182_v18 = vmax.f32 %v11046_v34, 0.0 }
 0x92a   : > { %11317 = vst [vmem:[%s19448_s27 + $0x408] sm:$0xff] %v11181_v52 }
 0x92b   : > { %11318 = vst [vmem:[%s19448_s27 + $0x410] sm:$0xff] %v11182_v18 }
 0x939   : > { %v10585_v41 = vpop.f32.mrb[80].mxu0 }
 0x93a   : > { %v10794_v28 = vadd.f32 %v19919_v62, %v10585_v41  ;;  %v10587_v45 = vpop.f32.mrb[81].mxu0 }
 0x93b   : > { %v10795_v7 = vadd.f32 %v19924_v19, %v10587_v45  ;;  %v10589_v55 = vpop.f32.mrb[82].mxu0 }
 0x93c   : > { %v10930_v29 = vadd.f32 %v15099_v5, %v10794_v28  ;;  %v10811_v59 = vadd.f32 %v19919_v62, %v10589_v55  ;;  %v10591_v32 = vpop.f32.mrb[83].mxu0 }
 0x93d   : > { %v10931_v15 = vadd.f32 %v15100_v9, %v10795_v7  ;;  %v10812_v16 = vadd.f32 %v19924_v19, %v10591_v32  ;;  %v15111_v7 = vld [vmem:[%s15520_s24 + $0x3a0] sm:$0xff] }
 0x93e   : > { %v11066_v23 = vmax.f32 %v10930_v29, 0.0  ;;  %v10947_v48 = vadd.f32 %v15101_v1, %v10811_v59  ;;  %v15112_v59 = vld [vmem:[%s15520_s24 + $0x3a8] sm:$0xff] }
 0x93f   : > { %v11067_v27 = vmax.f32 %v10931_v15, 0.0  ;;  %v10948_v24 = vadd.f32 %v15102_v37, %v10812_v16  ;;  %v15113_v16 = vld [vmem:[%s15520_s24 + $0x428] sm:$0xff] }
 0x940   : > { %11202 = vst [vmem:[%s19448_s27 + $0x70] sm:$0xff] %v11066_v23  ;;  %v11083_v47 = vmax.f32 %v10947_v48, 0.0  ;;  %v15114_v48 = vld [vmem:[%s15520_s24 + $0x430] sm:$0xff]  ;;  %s15284_s24 = smov [#allocation8]  }
 0x941   : > { %11203 = vst [vmem:[%s19448_s27 + $0x78] sm:$0xff] %v11067_v27  ;;  %v11084_v21 = vmax.f32 %v10948_v24, 0.0  ;;  %v10595_v10 = vpop.f32.mrb[84].mxu0  ;;  %s15205_s29 = sshll.u32 %s15284_s24, 4  ;;  %s15206_s29 = int_to_ptr.vmem [resolvable:$false] %s15205_s29 }
 0x942   : > { %11219 = vst [vmem:[%s19448_s27 + $0xf8] sm:$0xff] %v11083_v47  ;;  %v10828_v22 = vadd.f32 %v19919_v62, %v10595_v10  ;;  %v10597_v26 = vpop.f32.mrb[85].mxu0  ;;  %s15207_s18 = scalar_lea.vmem %s15206_s29, 34816  ;;  %p15208_p5 = scmp.lt.s32.totalorder %s19979_s21, %s15206_s29 }
 0x943   : > { %11220 = vst [vmem:[%s19448_s27 + $0x100] sm:$0xff] %v11084_v21  ;;  %v10829_v46 = vadd.f32 %v19924_v19, %v10597_v26  ;;  %v10599_v53 = vpop.f32.mrb[86].mxu0  ;;  %p15209_p9 = scmp.lt.s32.totalorder %s15207_s18, %s15201_s19 }
 0x944   : > { %v10964_v44 = vadd.f32 %v15103_v43, %v10828_v22  ;;  %v10845_v38 = vadd.f32 %v19919_v62, %v10599_v53  ;;  %v10601_v8 = vpop.f32.mrb[87].mxu0 }
 0x945   : > { %v10965_v13 = vadd.f32 %v15104_v20, %v10829_v46  ;;  %v10846_v35 = vadd.f32 %v19924_v19, %v10601_v8  ;;  %p15210_p12 = por %p15209_p9, %p15208_p5 }
 0x946   : > { %v11100_v25 = vmax.f32 %v10964_v44, 0.0  ;;  %v10981_v40 = vadd.f32 %v15105_v31, %v10845_v38 }
 0x947   : > { %v11101_v2 = vmax.f32 %v10965_v13, 0.0  ;;  %v10982_v61 = vadd.f32 %v15106_v12, %v10846_v35  ;;  %p15211_p2 = pnand %p15210_p12, %p15204_p3 }
 0x948   : > { %11236 = vst [vmem:[%s19448_s27 + $0x180] sm:$0xff] %v11100_v25  ;;  %v11117_v51 = vmax.f32 %v10981_v40, 0.0 }
 0x949   : > { %11237 = vst [vmem:[%s19448_s27 + $0x188] sm:$0xff] %v11101_v2  ;;  %v11118_v63 = vmax.f32 %v10982_v61, 0.0  ;;  %v10605_v58 = vpop.f32.mrb[88].mxu0 }
 0x94a   : > { %11253 = vst [vmem:[%s19448_s27 + $0x208] sm:$0xff] %v11117_v51  ;;  %v10862_v6 = vadd.f32 %v19919_v62, %v10605_v58  ;;  %v10607_v14 = vpop.f32.mrb[89].mxu0 }
 0x94b   : > { %11254 = vst [vmem:[%s19448_s27 + $0x210] sm:$0xff] %v11118_v63  ;;  %v10863_v56 = vadd.f32 %v19924_v19, %v10607_v14  ;;  %v10609_v49 = vpop.f32.mrb[90].mxu0 }
 0x94c   : > { %v10998_v60 = vadd.f32 %v15107_v33, %v10862_v6  ;;  %v10879_v42 = vadd.f32 %v19919_v62, %v10609_v49  ;;  %v10611_v54 = vpop.f32.mrb[91].mxu0 }
 0x94d   : > { %v10999_v57 = vadd.f32 %v15108_v50, %v10863_v56  ;;  %v10880_v39 = vadd.f32 %v19924_v19, %v10611_v54 }
 0x94e   : > { %v11134_v30 = vmax.f32 %v10998_v60, 0.0  ;;  %v11015_v4 = vadd.f32 %v15109_v0, %v10879_v42 }
 0x94f   : > { %v11135_v11 = vmax.f32 %v10999_v57, 0.0  ;;  %v11016_v36 = vadd.f32 %v15110_v3, %v10880_v39 }
 0x950   : > { %11270 = vst [vmem:[%s19448_s27 + $0x290] sm:$0xff] %v11134_v30  ;;  %v11151_v17 = vmax.f32 %v11015_v4, 0.0 }
 0x951   : > { %11271 = vst [vmem:[%s19448_s27 + $0x298] sm:$0xff] %v11135_v11  ;;  %v11152_v34 = vmax.f32 %v11016_v36, 0.0  ;;  %v10615_v52 = vpop.f32.mrb[92].mxu0 }
 0x952   : > { %11287 = vst [vmem:[%s19448_s27 + $0x318] sm:$0xff] %v11151_v17  ;;  %v10896_v18 = vadd.f32 %v19919_v62, %v10615_v52  ;;  %v10617_v41 = vpop.f32.mrb[93].mxu0 }
 0x953   : > { %11288 = vst [vmem:[%s19448_s27 + $0x320] sm:$0xff] %v11152_v34  ;;  %v10897_v28 = vadd.f32 %v19924_v19, %v10617_v41  ;;  %v10619_v45 = vpop.f32.mrb[94].mxu0 }
 0x954   : > { %v11032_v55 = vadd.f32 %v15111_v7, %v10896_v18  ;;  %v10913_v5 = vadd.f32 %v19919_v62, %v10619_v45  ;;  %v10621_v29 = vpop.f32.mrb[95].mxu0 }
 0x955   : > { %v11033_v32 = vadd.f32 %v15112_v59, %v10897_v28  ;;  %v10914_v9 = vadd.f32 %v19924_v19, %v10621_v29 }
 0x956   : > { %v11168_v15 = vmax.f32 %v11032_v55, 0.0  ;;  %v11049_v23 = vadd.f32 %v15113_v16, %v10913_v5 }
 0x957   : > { %v11169_v1 = vmax.f32 %v11033_v32, 0.0  ;;  %v11050_v27 = vadd.f32 %v15114_v48, %v10914_v9 }
 0x958   : > { %11304 = vst [vmem:[%s19448_s27 + $0x3a0] sm:$0xff] %v11168_v15  ;;  %v11185_v62 = vmax.f32 %v11049_v23, 0.0 }
 0x959   : > { %11305 = vst [vmem:[%s19448_s27 + $0x3a8] sm:$0xff] %v11169_v1  ;;  %v11186_v37 = vmax.f32 %v11050_v27, 0.0 }
 0x95a   : > { %11321 = vst [vmem:[%s19448_s27 + $0x428] sm:$0xff] %v11185_v62 }
 0x95b   : > { %11322 = vst [vmem:[%s19448_s27 + $0x430] sm:$0xff] %v11186_v37 }
 0x95c   : > { %15214 = shalt.err (!%p15211_p2)
}
 0x95d   : > { %s15215_s27 = scalar_lea.hbm %s19976_s17, 17408  ;;  %s15219_s7 = scalar_lea.hbm %s20035_s10, 34816 }
 0x95e   : > { %p15216_p13 = scmp.ne.s32.totalorder %s19976_s17, %s15215_s27  ;;  %p15220_p4 = scmp.lt.u32.totalorder %s19976_s17, %s20035_s10 }
 0x95f   : > { %p15221_p7 = scmp.lt.u32.totalorder %s15219_s7, %s15215_s27  ;;  %p15223_p11 = scmp.lt.u32.totalorder %s15215_s27, %s19976_s17 }
 0x960   : > { %p15217_p6 = pnand %p15216_p13, %p20203_p0 }
 0x961   : > { %p15222_p8 = por %p15221_p7, %p15220_p4 }
 0x962   : > { %p15218_p10 = pneg %p15217_p6 }
 0x963   : > { %p15224_p1 = por %p15223_p11, %p15222_p8 }
 0x965   : > { %p15225_p3 = pnand %p15224_p1, %p15218_p10 }
 0x967   : > { %15228 = shalt.err (!%p15225_p3)
}
 0x968   : > { %s15285_s22 = smov 2176   ;;  %s15286_s20 = smov 136  }
 0x969   : > { %13397 = dma.vmem_to_hbm [thread:$0]  (%p20203_p0), %s19979_s21, 17408, %s19976_s17, %s11325_s23, %s15285_s22, %s15285_s22, %s15286_s20  }
 0x96a PF: > { %s20204_s19 = sld [smem:[#allocation12_spill]]  ;;  %s20205_s24 = sld [smem:[#allocation13_spill]] }
 0x96b   : > { %p20207_p9 = scmp.ge.s32.totalorder %s15271_s16, 2 }
 0x970   : > { %s11353_s29 = sand.u32 1, %s20204_s19   ;;  %p20206_p5 = scmp.ne.s32.totalorder %s20205_s24, 0 }
 0x971   : > { %s11354_s18 = scalar_lea.sflag [#allocation4], %s11353_s29 }
 0x972   : > { %p13411_p12 = pnand %p20207_p9, %p20206_p5 }
 0x974   : > { %15254 = dma.done.wait (!%p13411_p12), %s11354_s18, 17408  }
 0x975   : > { %15256 = vsyncadd (!%p13411_p12), %s11354_s18, 4294949888  ;;  %p24_p2 = scmp.ge.s32.totalorder %s15452_s28, 4   ;;  %s20208_s13 = smov %s15263_s14 }
 0x976   : > { %s20209_s14 = smov %s15267_s15  ;;  %s20210_s15 = smov %s15461_s11 }
 0x977   : > { %s20211_s16 = smov %s15452_s28  ;;  %26 = sbr.rel (!%p24_p2) target bundleno = 9 (0x9), region = 117 }
 0x97e   :  { %11359 = vsyncpa [#allocation3], 1 }
 0x97f   :  { %11361 = vsyncpa [#allocation3 + $0x1], 1 }
 0x980   :  { %11362 = vsyncpa [#allocation6], 1 }
 0x981   :  { %11363 = vsyncpa [#allocation4], 1 }
 0x982   :  { %11365 = vsyncpa [#allocation4 + $0x1], 1 }

</bundles_post_ra>
